<compile_context>
chip_gen: v5e
topology: v5e:2x2
jax: 0.10.0
libtpu: 0.0.40
codegen_flags: <defaults>
</compile_context>

<pallas_src>
import functools

import jax
import jax.numpy as jnp
import numpy as np
from jax.experimental import pallas as pl
from jax.experimental.pallas import tpu as pltpu

LANE = 128
ROW_TILE = 512                      # 512-row/col tiles for the N x N matmul
_VMEM_LIMIT = 32 * 1024 * 1024      # safe scoped limit on v5e/v6e/v7x


def _round_up(x, m):
    return (x + m - 1) // m * m


# ----------------------------------------------------------------------------
# Pallas kernels
# ----------------------------------------------------------------------------
def _adj_layer_kernel(*refs, epilogue):
    """Tiled  acc = Ahat @ V  (bf16 x bf16 -> f32) with a fused layer epilogue.

    grid = (N/TM, N/TK); K (reduction) axis is last / "arbitrary".
    epilogue (static):
      "mm_bn_relu" : out = relu(scale * (acc @ W) + shift)      (initial branches)
      "bn_relu_mm" : out = relu(scale * acc + shift) @ W        (middle -> next layer)
      "bias"       : out = acc + bias                           (final GCNConv)
    """
    adj_ref, v_ref = refs[0], refs[1]
    if epilogue == "mm_bn_relu":
        w_ref, scale_ref, shift_ref, out_ref, acc_ref = refs[2:]
    elif epilogue == "bn_relu_mm":
        scale_ref, shift_ref, w_ref, out_ref, acc_ref = refs[2:]
    elif epilogue == "bias":
        shift_ref, out_ref, acc_ref = refs[2:]
    else:
        raise ValueError(epilogue)

    k = pl.program_id(1)

    @pl.when(k == 0)
    def _():
        acc_ref[...] = jnp.zeros_like(acc_ref)

    # Native bf16 x bf16 -> f32 accumulation on the MXU (no in-kernel upcast).
    acc_ref[...] += jnp.dot(adj_ref[...], v_ref[...],
                            preferred_element_type=jnp.float32)

    @pl.when(k == pl.num_programs(1) - 1)
    def _():
        acc = acc_ref[...]
        if epilogue == "mm_bn_relu":
            y = jnp.dot(acc.astype(jnp.bfloat16), w_ref[...],
                        preferred_element_type=jnp.float32)
            y = jnp.maximum(y * scale_ref[...] + shift_ref[...], 0.0)
            out_ref[...] = y.astype(out_ref.dtype)
        elif epilogue == "bn_relu_mm":
            y = jnp.maximum(acc * scale_ref[...] + shift_ref[...], 0.0)
            out_ref[...] = jnp.dot(y.astype(jnp.bfloat16), w_ref[...],
                                   preferred_element_type=jnp.float32
                                   ).astype(out_ref.dtype)
        else:  # "bias"
            out_ref[...] = (acc + shift_ref[...]).astype(out_ref.dtype)


def _feat_matmul_kernel(x_ref, w_ref, out_ref):
    """Row-tiled plain matmul: out = X @ W (bf16 operands, f32 accumulate)."""
    out_ref[...] = jnp.dot(x_ref[...], w_ref[...],
                           preferred_element_type=jnp.float32
                           ).astype(out_ref.dtype)


# ----------------------------------------------------------------------------
# pallas_call wrappers
# ----------------------------------------------------------------------------
def adj_layer(adj, v, *, epilogue, w=None, scale=None, shift=None,
              out_dtype=jnp.bfloat16):
    n_pad = adj.shape[0]
    c_in = v.shape[1]
    tm = tk = ROW_TILE
    grid = (n_pad // tm, n_pad // tk)

    const2 = lambda i, k: (0, 0)
    operands = [adj, v]
    in_specs = [
        pl.BlockSpec((tm, tk), lambda i, k: (i, k)),   # Ahat tile (bf16)
        pl.BlockSpec((tk, c_in), lambda i, k: (k, 0)),  # activation tile (bf16)
    ]
    if epilogue == "mm_bn_relu":
        c_out = w.shape[1]
        operands += [w, scale, shift]
        in_specs += [pl.BlockSpec((c_in, c_out), const2),
                     pl.BlockSpec((1, c_out), const2),
                     pl.BlockSpec((1, c_out), const2)]
        epi_flops = 2 * n_pad * c_in * c_out
        epi_bytes = w.size * w.dtype.itemsize + 8 * c_out
    elif epilogue == "bn_relu_mm":
        c_out = w.shape[1]
        operands += [scale, shift, w]
        in_specs += [pl.BlockSpec((1, c_in), const2),
                     pl.BlockSpec((1, c_in), const2),
                     pl.BlockSpec((c_in, c_out), const2)]
        epi_flops = 2 * n_pad * c_in * c_out
        epi_bytes = w.size * w.dtype.itemsize + 8 * c_in
    elif epilogue == "bias":
        c_out = c_in
        operands += [shift]
        in_specs += [pl.BlockSpec((1, c_out), const2)]
        epi_flops = 0
        epi_bytes = 4 * c_out
    else:
        raise ValueError(epilogue)

    out_dtype = jnp.dtype(out_dtype)
    flops = 2 * n_pad * n_pad * c_in + epi_flops
    # Adjacency read once; V re-streamed once per row tile; output written once.
    bytes_accessed = (adj.size * adj.dtype.itemsize
                      + (n_pad // tm) * v.size * v.dtype.itemsize
                      + n_pad * c_out * out_dtype.itemsize
                      + epi_bytes)

    return pl.pallas_call(
        functools.partial(_adj_layer_kernel, epilogue=epilogue),
        out_shape=jax.ShapeDtypeStruct((n_pad, c_out), out_dtype),
        grid_spec=pltpu.PrefetchScalarGridSpec(
            num_scalar_prefetch=0,
            grid=grid,
            in_specs=in_specs,
            out_specs=pl.BlockSpec((tm, c_out), lambda i, k: (i, 0)),
            scratch_shapes=[pltpu.VMEM((tm, c_in), jnp.float32)],
        ),
        compiler_params=pltpu.CompilerParams(
            dimension_semantics=("parallel", "arbitrary"),
            vmem_limit_bytes=_VMEM_LIMIT,
        ),
        cost_estimate=pl.CostEstimate(
            flops=flops, transcendentals=0, bytes_accessed=bytes_accessed),
    )(*operands)


def feat_matmul(x, w, *, out_dtype=jnp.bfloat16):
    n_pad, kdim = x.shape
    c = w.shape[1]
    tm = ROW_TILE
    grid = (n_pad // tm,)
    out_dtype = jnp.dtype(out_dtype)
    flops = 2 * n_pad * kdim * c
    bytes_accessed = (x.size * x.dtype.itemsize + w.size * w.dtype.itemsize
                      + n_pad * c * out_dtype.itemsize)
    return pl.pallas_call(
        _feat_matmul_kernel,
        out_shape=jax.ShapeDtypeStruct((n_pad, c), out_dtype),
        grid_spec=pltpu.PrefetchScalarGridSpec(
            num_scalar_prefetch=0,
            grid=grid,
            in_specs=[pl.BlockSpec((tm, kdim), lambda i: (i, 0)),
                      pl.BlockSpec((kdim, c), lambda i: (0, 0))],
            out_specs=pl.BlockSpec((tm, c), lambda i: (i, 0)),
        ),
        compiler_params=pltpu.CompilerParams(
            dimension_semantics=("parallel",),
            vmem_limit_bytes=_VMEM_LIMIT,
        ),
        cost_estimate=pl.CostEstimate(
            flops=flops, transcendentals=0, bytes_accessed=bytes_accessed),
    )(x, w)


# ----------------------------------------------------------------------------
# Parameter preparation (BN folding, bias folding, branch fusion, padding)
# ----------------------------------------------------------------------------
def fold_bn(gamma, beta, mean, var, eps=1e-5):
    scale = gamma / jnp.sqrt(var + eps)
    shift = beta - mean * scale
    return scale, shift


def _pad2(a, rows, cols):
    return jnp.pad(a, ((0, rows - a.shape[0]), (0, cols - a.shape[1])))


def _pad_row(v, cols):
    v = v.reshape(1, -1)
    return jnp.pad(v, ((0, 0), (0, cols - v.shape[1])))


def prepare_params(params, in_channels, hidden_channels, concat, out_channels):
    in_pad = _round_up(in_channels, LANE)
    ch_pad = _round_up(concat * hidden_channels, LANE)
    out_pad = _round_up(out_channels, LANE)

    # Fuse the `concat` initial branches along the output-channel axis and fold
    # the conv bias into the BN shift:  scale*(y + b) + shift = scale*y + (b*scale+shift)
    w_cat = jnp.concatenate([p["w"] for p in params["initial"]], axis=1)
    scales, shifts = [], []
    for p in params["initial"]:
        s, sh = fold_bn(p["gamma"], p["beta"], p["mean"], p["var"])
        scales.append(s)
        shifts.append(p["b"] * s + sh)
    prepped = {
        "w_init": _pad2(w_cat, in_pad, ch_pad).astype(jnp.bfloat16),
        "scale_init": _pad_row(jnp.concatenate(scales), ch_pad),
        "shift_init": _pad_row(jnp.concatenate(shifts), ch_pad),
        "middle": [],
    }
    for p in params["middle"]:
        s, sh = fold_bn(p["gamma"], p["beta"], p["mean"], p["var"])
        prepped["middle"].append({
            "w": _pad2(p["w"], ch_pad, ch_pad).astype(jnp.bfloat16),
            "scale": _pad_row(s, ch_pad),
            "shift": _pad_row(p["b"] * s + sh, ch_pad),
        })
    pf = params["final"]
    prepped["w_final"] = _pad2(pf["w"], ch_pad, out_pad).astype(jnp.bfloat16)
    prepped["b_final"] = _pad_row(pf["b"], out_pad)
    return prepped


# ----------------------------------------------------------------------------
# LAGCN forward (hot path = Pallas kernels; glue = padding / slicing only)
# ----------------------------------------------------------------------------
def lagcn_forward(prepped, x, adj_norm, n_valid, out_channels):
    n = x.shape[0]
    n_pad = _round_up(n, ROW_TILE)          # 512-aligned so tiles are 512x512
    in_pad = prepped["w_init"].shape[0]

    x_p = _pad2(x, n_pad, in_pad).astype(jnp.bfloat16)
    adj_p = _pad2(adj_norm, n_pad, n_pad).astype(jnp.bfloat16)

    # ---- initial branches (fused): acc = Ahat @ X once (narrow F on the
    #      N x N matmul), then the concatenated feature matmul + BN + ReLU
    #      fused into the finalize epilogue of the same kernel. ----
    h = adj_layer(adj_p, x_p, epilogue="mm_bn_relu",
                  w=prepped["w_init"], scale=prepped["scale_init"],
                  shift=prepped["shift_init"])
    # (dropout == identity in eval mode)

    middles = prepped["middle"]
    if middles:
        # One explicit feature matmul to enter the fused layer chain.
        v = feat_matmul(h, middles[0]["w"])
        for j, p in enumerate(middles):
            w_next = (middles[j + 1]["w"] if j + 1 < len(middles)
                      else prepped["w_final"])
            # relu(bn(Ahat @ v)) @ W_next fused into the adjacency kernel.
            v = adj_layer(adj_p, v, epilogue="bn_relu_mm",
                          scale=p["scale"], shift=p["shift"], w=w_next)
    else:
        v = feat_matmul(h, prepped["w_final"])

    # ---- final layer: plain GCNConv, bias added after Ahat @ (h @ W_f). ----
    out = adj_layer(adj_p, v, epilogue="bias", shift=prepped["b_final"],
                    out_dtype=jnp.float32)
    return out[:n_valid, :out_channels]


def lagcn_forward_ref(params, x, adj_norm):
    # Pure-JAX f32 reference (eval-mode semantics) for correctness checking.
    hidden_list = []
    for p in params["initial"]:
        s, sh = fold_bn(p["gamma"], p["beta"], p["mean"], p["var"])
        h = adj_norm @ (x @ p["w"]) + p["b"]
        hidden_list.append(jnp.maximum(h * s + sh, 0.0))
    h = jnp.concatenate(hidden_list, axis=-1)
    for p in params["middle"]:
        s, sh = fold_bn(p["gamma"], p["beta"], p["mean"], p["var"])
        h = adj_norm @ (h @ p["w"]) + p["b"]
        h = jnp.maximum(h * s + sh, 0.0)
    pf = params["final"]
    return adj_norm @ (h @ pf["w"]) + pf["b"]


# ----------------------------------------------------------------------------
# Deterministic parameter / input construction
# ----------------------------------------------------------------------------
def make_layer_params(key, fan_in, fan_out, with_bn=True):
    k_w, k_b, k_g, k_be, k_m, k_v = jax.random.split(key, 6)
    p = {
        "w": jax.random.normal(k_w, (fan_in, fan_out), jnp.float32) * 0.1,
        "b": jax.random.normal(k_b, (fan_out,), jnp.float32) * 0.01,
    }
    if with_bn:
        p["gamma"] = 1.0 + 0.1 * jax.random.normal(k_g, (fan_out,), jnp.float32)
        p["beta"] = 0.1 * jax.random.normal(k_be, (fan_out,), jnp.float32)
        p["mean"] = 0.1 * jax.random.normal(k_m, (fan_out,), jnp.float32)
        p["var"] = jnp.abs(jax.random.normal(k_v, (fan_out,), jnp.float32)) + 0.5
    return p


def build_params(key, concat, in_channels, hidden_channels, out_channels,
                 num_layers):
    keys = jax.random.split(key, concat + max(num_layers - 2, 0) + 1)
    params = {"initial": [], "middle": [], "final": None}
    k_idx = 0
    for _ in range(concat):
        params["initial"].append(
            make_layer_params(keys[k_idx], in_channels, hidden_channels))
        k_idx += 1
    ch = concat * hidden_channels
    for _ in range(num_layers - 2):
        params["middle"].append(make_layer_params(keys[k_idx], ch, ch))
        k_idx += 1
    params["final"] = make_layer_params(keys[k_idx], ch, out_channels,
                                        with_bn=False)
    return params


def quantize_weights_bf16(params):
    # bf16-quantize the conv weights (what the kernels consume) so the f32
    # reference and the Pallas path share identical weight values; the
    # remaining discrepancy is only in-kernel bf16 activation rounding.
    def q(w):
        return w.astype(jnp.bfloat16).astype(jnp.float32)
    out = {"initial": [], "middle": [], "final": None}
    for p in params["initial"]:
        out["initial"].append({**p, "w": q(p["w"])})
    for p in params["middle"]:
        out["middle"].append({**p, "w": q(p["w"])})
    out["final"] = {**params["final"], "w": q(params["final"]["w"])}
    return out


def gcn_norm_dense(adj):
    # Ahat = D^-1/2 (A + I) D^-1/2
    n = adj.shape[0]
    a = adj + jnp.eye(n, dtype=adj.dtype)
    deg = jnp.sum(a, axis=1)
    dinv = jnp.where(deg > 0, 1.0 / jnp.sqrt(deg), 0.0)
    return a * dinv[:, None] * dinv[None, :]


if __name__ == "__main__":
    # Small config: concat=2, in=16, hidden=32, out=8, num_layers=3
    concat, in_channels, hidden_channels, out_channels, num_layers = 2, 16, 32, 8, 3
    n_nodes = 64

    key = jax.random.PRNGKey(0)
    k_x, k_adj, k_p = jax.random.split(key, 3)

    x = jax.random.normal(k_x, (n_nodes, in_channels), jnp.float32)
    a_raw = (jax.random.uniform(k_adj, (n_nodes, n_nodes)) < 0.1).astype(jnp.float32)
    a_sym = jnp.maximum(a_raw, a_raw.T)
    adj_norm = gcn_norm_dense(a_sym)

    # Quantize shared inputs once; both the kernel path and the pure-JAX
    # reference consume the same values, so the check isolates in-kernel
    # bf16-activation rounding (plus any structural bug).
    adj_q = adj_norm.astype(jnp.bfloat16).astype(jnp.float32)
    x_q = x.astype(jnp.bfloat16).astype(jnp.float32)

    params = build_params(k_p, concat, in_channels, hidden_channels,
                          out_channels, num_layers)
    params_q = quantize_weights_bf16(params)
    prepped = prepare_params(params_q, in_channels, hidden_channels, concat,
                             out_channels)

    fwd = jax.jit(functools.partial(lagcn_forward, n_valid=n_nodes,
                                    out_channels=out_channels))
    out = jax.block_until_ready(fwd(prepped, x_q, adj_q))

    ref = lagcn_forward_ref(params_q, x_q, adj_q)
    assert out.shape == (n_nodes, out_channels)
    # bf16 intermediates between kernels -> looser tolerance than pure f32.
    np.testing.assert_allclose(np.asarray(out), np.asarray(ref),
                               rtol=3e-2, atol=3e-2)
    print("KERNEL_OK")
</pallas_src>

<mosaic_0001>
module attributes {stable_mosaic.version = 11 : i64} {
  func.func @_feat_matmul_kernel(%arg0: i32, %arg1: memref<512x128xbf16, #tpu.memory_space<vmem>>, %arg2: memref<128x128xbf16, #tpu.memory_space<vmem>>, %arg3: memref<512x128xbf16, #tpu.memory_space<vmem>>) attributes {dimension_semantics = [#tpu.dimension_semantics<parallel>], iteration_bounds = array<i64: 1>, scalar_prefetch = 0 : i64, scratch_operands = 0 : i64, tpu.core_type = #tpu.core_type<tc>, window_params = [{transform_indices = @transform_0, window_bounds = array<i64: 512, 128>}, {pipeline_mode = #tpu.pipeline_mode<synchronous>, transform_indices = @transform_1, window_bounds = array<i64: 128, 128>}, {transform_indices = @transform_2, window_bounds = array<i64: 512, 128>}]} {
    %c0 = arith.constant 0 : index
    %c0_0 = arith.constant 0 : index
    %0 = vector.load %arg1[%c0, %c0_0] : memref<512x128xbf16, #tpu.memory_space<vmem>>, vector<512x128xbf16>
    %c0_1 = arith.constant 0 : index
    %c0_2 = arith.constant 0 : index
    %1 = vector.load %arg2[%c0_1, %c0_2] : memref<128x128xbf16, #tpu.memory_space<vmem>>, vector<128x128xbf16>
    %cst = arith.constant dense<0.000000e+00> : vector<512x128xf32>
    %2 = tpu.matmul %0, %1, %cst {dimension_numbers = #tpu.dot_dimension_numbers<[1], [0], [0], [1], [0, 0, 1, 1], [], []>} : vector<512x128xbf16>, vector<128x128xbf16>, vector<512x128xf32> -> vector<512x128xf32>
    %3 = arith.truncf %2 : vector<512x128xf32> to vector<512x128xbf16>
    %c0_3 = arith.constant 0 : index
    %c0_4 = arith.constant 0 : index
    %4 = vector.load %arg3[%c0_3, %c0_4] : memref<512x128xbf16, #tpu.memory_space<vmem>>, vector<512x128xbf16>
    tpu.vector_store %arg3[%c0_3, %c0_4], %3 {strides = array<i32>} : memref<512x128xbf16, #tpu.memory_space<vmem>>, vector<512x128xbf16>,
    return
  }
  func.func @transform_0(%arg0: i32) -> (i32, i32) {
    %c0_i32 = arith.constant 0 : i32
    %c0_i32_0 = arith.constant 0 : i32
    return %arg0, %c0_i32 : i32, i32
  }
  func.func @transform_1(%arg0: i32) -> (i32, i32) {
    %c0_i32 = arith.constant 0 : i32
    %c0_i32_0 = arith.constant 0 : i32
    %c0_i32_1 = arith.constant 0 : i32
    return %c0_i32, %c0_i32_0 : i32, i32
  }
  func.func @transform_2(%arg0: i32) -> (i32, i32) {
    %c0_i32 = arith.constant 0 : i32
    %c0_i32_0 = arith.constant 0 : i32
    return %arg0, %c0_i32 : i32, i32
  }
}

module attributes {stable_mosaic.version = 11 : i64} {
  func.func @_adj_layer_kernel(%arg0: i32, %arg1: i32, %arg2: memref<512x512xbf16, #tpu.memory_space<vmem>>, %arg3: memref<512x128xbf16, #tpu.memory_space<vmem>>, %arg4: memref<1x128xf32, #tpu.memory_space<vmem>>, %arg5: memref<512x128xf32, #tpu.memory_space<vmem>>, %arg6: memref<512x128xf32, #tpu.memory_space<vmem>>) attributes {dimension_semantics = [#tpu.dimension_semantics<parallel>, #tpu.dimension_semantics<arbitrary>], iteration_bounds = array<i64: 1, 1>, scalar_prefetch = 0 : i64, scratch_operands = 1 : i64, tpu.core_type = #tpu.core_type<tc>, window_params = [{transform_indices = @transform_0, window_bounds = array<i64: 512, 512>}, {transform_indices = @transform_1, window_bounds = array<i64: 512, 128>}, {pipeline_mode = #tpu.pipeline_mode<synchronous>, transform_indices = @transform_2, window_bounds = array<i64: 1, 128>}, {transform_indices = @transform_3, window_bounds = array<i64: 512, 128>}]} {
    %c0_i32 = arith.constant 0 : i32
    %0 = arith.cmpi eq, %arg1, %c0_i32 : i32
    %1 = arith.extui %0 : i1 to i32
    %c0_i32_0 = arith.constant 0 : i32
    %2 = arith.cmpi ne, %1, %c0_i32_0 : i32
    scf.if %2 {
      %cst_10 = arith.constant 0.000000e+00 : f32
      %12 = vector.broadcast %cst_10 : f32 to vector<512x128xf32>
      %c0_11 = arith.constant 0 : index
      %c0_12 = arith.constant 0 : index
      %13 = vector.load %arg6[%c0_11, %c0_12] : memref<512x128xf32, #tpu.memory_space<vmem>>, vector<512x128xf32>
      tpu.vector_store %arg6[%c0_11, %c0_12], %12 {strides = array<i32>} : memref<512x128xf32, #tpu.memory_space<vmem>>, vector<512x128xf32>,
    } else {
    }
    %c0 = arith.constant 0 : index
    %c0_1 = arith.constant 0 : index
    %3 = vector.load %arg6[%c0, %c0_1] : memref<512x128xf32, #tpu.memory_space<vmem>>, vector<512x128xf32>
    %c0_2 = arith.constant 0 : index
    %c0_3 = arith.constant 0 : index
    %4 = vector.load %arg2[%c0_2, %c0_3] : memref<512x512xbf16, #tpu.memory_space<vmem>>, vector<512x512xbf16>
    %c0_4 = arith.constant 0 : index
    %c0_5 = arith.constant 0 : index
    %5 = vector.load %arg3[%c0_4, %c0_5] : memref<512x128xbf16, #tpu.memory_space<vmem>>, vector<512x128xbf16>
    %cst = arith.constant dense<0.000000e+00> : vector<512x128xf32>
    %6 = tpu.matmul %4, %5, %cst {dimension_numbers = #tpu.dot_dimension_numbers<[1], [0], [0], [1], [0, 0, 1, 1], [], []>} : vector<512x512xbf16>, vector<512x128xbf16>, vector<512x128xf32> -> vector<512x128xf32>
    %7 = arith.addf %3, %6 : vector<512x128xf32>
    %c0_6 = arith.constant 0 : index
    %c0_7 = arith.constant 0 : index
    %8 = vector.load %arg6[%c0_6, %c0_7] : memref<512x128xf32, #tpu.memory_space<vmem>>, vector<512x128xf32>
    tpu.vector_store %arg6[%c0_6, %c0_7], %7 {strides = array<i32>} : memref<512x128xf32, #tpu.memory_space<vmem>>, vector<512x128xf32>,
    %c0_i32_8 = arith.constant 0 : i32
    %9 = arith.cmpi eq, %arg1, %c0_i32_8 : i32
    %10 = arith.extui %9 : i1 to i32
    %c0_i32_9 = arith.constant 0 : i32
    %11 = arith.cmpi ne, %10, %c0_i32_9 : i32
    scf.if %11 {
      %c0_10 = arith.constant 0 : index
      %c0_11 = arith.constant 0 : index
      %12 = vector.load %arg6[%c0_10, %c0_11] : memref<512x128xf32, #tpu.memory_space<vmem>>, vector<512x128xf32>
      %c0_12 = arith.constant 0 : index
      %c0_13 = arith.constant 0 : index
      %13 = vector.load %arg4[%c0_12, %c0_13] : memref<1x128xf32, #tpu.memory_space<vmem>>, vector<1x128xf32>
      %14 = vector.broadcast %13 : vector<1x128xf32> to vector<512x128xf32>
      %15 = arith.addf %12, %14 : vector<512x128xf32>
      %c0_14 = arith.constant 0 : index
      %c0_15 = arith.constant 0 : index
      %16 = vector.load %arg5[%c0_14, %c0_15] : memref<512x128xf32, #tpu.memory_space<vmem>>, vector<512x128xf32>
      tpu.vector_store %arg5[%c0_14, %c0_15], %15 {strides = array<i32>} : memref<512x128xf32, #tpu.memory_space<vmem>>, vector<512x128xf32>,
    } else {
    }
    return
  }
  func.func @transform_0(%arg0: i32, %arg1: i32) -> (i32, i32) {
    %c0_i32 = arith.constant 0 : i32
    return %arg0, %arg1 : i32, i32
  }
  func.func @transform_1(%arg0: i32, %arg1: i32) -> (i32, i32) {
    %c0_i32 = arith.constant 0 : i32
    %c0_i32_0 = arith.constant 0 : i32
    return %arg1, %c0_i32 : i32, i32
  }
  func.func @transform_2(%arg0: i32, %arg1: i32) -> (i32, i32) {
    %c0_i32 = arith.constant 0 : i32
    %c0_i32_0 = arith.constant 0 : i32
    %c0_i32_1 = arith.constant 0 : i32
    return %c0_i32, %c0_i32_0 : i32, i32
  }
  func.func @transform_3(%arg0: i32, %arg1: i32) -> (i32, i32) {
    %c0_i32 = arith.constant 0 : i32
    %c0_i32_0 = arith.constant 0 : i32
    return %arg0, %c0_i32 : i32, i32
  }
}

module attributes {stable_mosaic.version = 11 : i64} {
  func.func @_adj_layer_kernel(%arg0: i32, %arg1: i32, %arg2: memref<512x512xbf16, #tpu.memory_space<vmem>>, %arg3: memref<512x128xbf16, #tpu.memory_space<vmem>>, %arg4: memref<128x128xbf16, #tpu.memory_space<vmem>>, %arg5: memref<1x128xf32, #tpu.memory_space<vmem>>, %arg6: memref<1x128xf32, #tpu.memory_space<vmem>>, %arg7: memref<512x128xbf16, #tpu.memory_space<vmem>>, %arg8: memref<512x128xf32, #tpu.memory_space<vmem>>) attributes {dimension_semantics = [#tpu.dimension_semantics<parallel>, #tpu.dimension_semantics<arbitrary>], iteration_bounds = array<i64: 1, 1>, scalar_prefetch = 0 : i64, scratch_operands = 1 : i64, tpu.core_type = #tpu.core_type<tc>, window_params = [{transform_indices = @transform_0, window_bounds = array<i64: 512, 512>}, {transform_indices = @transform_1, window_bounds = array<i64: 512, 128>}, {pipeline_mode = #tpu.pipeline_mode<synchronous>, transform_indices = @transform_2, window_bounds = array<i64: 128, 128>}, {pipeline_mode = #tpu.pipeline_mode<synchronous>, transform_indices = @transform_3, window_bounds = array<i64: 1, 128>}, {pipeline_mode = #tpu.pipeline_mode<synchronous>, transform_indices = @transform_4, window_bounds = array<i64: 1, 128>}, {transform_indices = @transform_5, window_bounds = array<i64: 512, 128>}]} {
    %c0_i32 = arith.constant 0 : i32
    %0 = arith.cmpi eq, %arg1, %c0_i32 : i32
    %1 = arith.extui %0 : i1 to i32
    %c0_i32_0 = arith.constant 0 : i32
    %2 = arith.cmpi ne, %1, %c0_i32_0 : i32
    scf.if %2 {
      %cst_10 = arith.constant 0.000000e+00 : f32
      %12 = vector.broadcast %cst_10 : f32 to vector<512x128xf32>
      %c0_11 = arith.constant 0 : index
      %c0_12 = arith.constant 0 : index
      %13 = vector.load %arg8[%c0_11, %c0_12] : memref<512x128xf32, #tpu.memory_space<vmem>>, vector<512x128xf32>
      tpu.vector_store %arg8[%c0_11, %c0_12], %12 {strides = array<i32>} : memref<512x128xf32, #tpu.memory_space<vmem>>, vector<512x128xf32>,
    } else {
    }
    %c0 = arith.constant 0 : index
    %c0_1 = arith.constant 0 : index
    %3 = vector.load %arg8[%c0, %c0_1] : memref<512x128xf32, #tpu.memory_space<vmem>>, vector<512x128xf32>
    %c0_2 = arith.constant 0 : index
    %c0_3 = arith.constant 0 : index
    %4 = vector.load %arg2[%c0_2, %c0_3] : memref<512x512xbf16, #tpu.memory_space<vmem>>, vector<512x512xbf16>
    %c0_4 = arith.constant 0 : index
    %c0_5 = arith.constant 0 : index
    %5 = vector.load %arg3[%c0_4, %c0_5] : memref<512x128xbf16, #tpu.memory_space<vmem>>, vector<512x128xbf16>
    %cst = arith.constant dense<0.000000e+00> : vector<512x128xf32>
    %6 = tpu.matmul %4, %5, %cst {dimension_numbers = #tpu.dot_dimension_numbers<[1], [0], [0], [1], [0, 0, 1, 1], [], []>} : vector<512x512xbf16>, vector<512x128xbf16>, vector<512x128xf32> -> vector<512x128xf32>
    %7 = arith.addf %3, %6 : vector<512x128xf32>
    %c0_6 = arith.constant 0 : index
    %c0_7 = arith.constant 0 : index
    %8 = vector.load %arg8[%c0_6, %c0_7] : memref<512x128xf32, #tpu.memory_space<vmem>>, vector<512x128xf32>
    tpu.vector_store %arg8[%c0_6, %c0_7], %7 {strides = array<i32>} : memref<512x128xf32, #tpu.memory_space<vmem>>, vector<512x128xf32>,
    %c0_i32_8 = arith.constant 0 : i32
    %9 = arith.cmpi eq, %arg1, %c0_i32_8 : i32
    %10 = arith.extui %9 : i1 to i32
    %c0_i32_9 = arith.constant 0 : i32
    %11 = arith.cmpi ne, %10, %c0_i32_9 : i32
    scf.if %11 {
      %c0_10 = arith.constant 0 : index
      %c0_11 = arith.constant 0 : index
      %12 = vector.load %arg8[%c0_10, %c0_11] : memref<512x128xf32, #tpu.memory_space<vmem>>, vector<512x128xf32>
      %13 = arith.truncf %12 : vector<512x128xf32> to vector<512x128xbf16>
      %c0_12 = arith.constant 0 : index
      %c0_13 = arith.constant 0 : index
      %14 = vector.load %arg4[%c0_12, %c0_13] : memref<128x128xbf16, #tpu.memory_space<vmem>>, vector<128x128xbf16>
      %cst_14 = arith.constant dense<0.000000e+00> : vector<512x128xf32>
      %15 = tpu.matmul %13, %14, %cst_14 {dimension_numbers = #tpu.dot_dimension_numbers<[1], [0], [0], [1], [0, 0, 1, 1], [], []>} : vector<512x128xbf16>, vector<128x128xbf16>, vector<512x128xf32> -> vector<512x128xf32>
      %c0_15 = arith.constant 0 : index
      %c0_16 = arith.constant 0 : index
      %16 = vector.load %arg5[%c0_15, %c0_16] : memref<1x128xf32, #tpu.memory_space<vmem>>, vector<1x128xf32>
      %17 = vector.broadcast %16 : vector<1x128xf32> to vector<512x128xf32>
      %18 = arith.mulf %15, %17 : vector<512x128xf32>
      %c0_17 = arith.constant 0 : index
      %c0_18 = arith.constant 0 : index
      %19 = vector.load %arg6[%c0_17, %c0_18] : memref<1x128xf32, #tpu.memory_space<vmem>>, vector<1x128xf32>
      %20 = vector.broadcast %19 : vector<1x128xf32> to vector<512x128xf32>
      %21 = arith.addf %18, %20 : vector<512x128xf32>
      %cst_19 = arith.constant 0.000000e+00 : f32
      %22 = vector.broadcast %cst_19 : f32 to vector<512x128xf32>
      %23 = arith.maximumf %21, %22 : vector<512x128xf32>
      %24 = arith.truncf %23 : vector<512x128xf32> to vector<512x128xbf16>
      %c0_20 = arith.constant 0 : index
      %c0_21 = arith.constant 0 : index
      %25 = vector.load %arg7[%c0_20, %c0_21] : memref<512x128xbf16, #tpu.memory_space<vmem>>, vector<512x128xbf16>
      tpu.vector_store %arg7[%c0_20, %c0_21], %24 {strides = array<i32>} : memref<512x128xbf16, #tpu.memory_space<vmem>>, vector<512x128xbf16>,
    } else {
    }
    return
  }
  func.func @transform_0(%arg0: i32, %arg1: i32) -> (i32, i32) {
    %c0_i32 = arith.constant 0 : i32
    return %arg0, %arg1 : i32, i32
  }
  func.func @transform_1(%arg0: i32, %arg1: i32) -> (i32, i32) {
    %c0_i32 = arith.constant 0 : i32
    %c0_i32_0 = arith.constant 0 : i32
    return %arg1, %c0_i32 : i32, i32
  }
  func.func @transform_2(%arg0: i32, %arg1: i32) -> (i32, i32) {
    %c0_i32 = arith.constant 0 : i32
    %c0_i32_0 = arith.constant 0 : i32
    %c0_i32_1 = arith.constant 0 : i32
    return %c0_i32, %c0_i32_0 : i32, i32
  }
  func.func @transform_3(%arg0: i32, %arg1: i32) -> (i32, i32) {
    %c0_i32 = arith.constant 0 : i32
    %c0_i32_0 = arith.constant 0 : i32
    %c0_i32_1 = arith.constant 0 : i32
    return %c0_i32, %c0_i32_0 : i32, i32
  }
  func.func @transform_4(%arg0: i32, %arg1: i32) -> (i32, i32) {
    %c0_i32 = arith.constant 0 : i32
    %c0_i32_0 = arith.constant 0 : i32
    %c0_i32_1 = arith.constant 0 : i32
    return %c0_i32, %c0_i32_0 : i32, i32
  }
  func.func @transform_5(%arg0: i32, %arg1: i32) -> (i32, i32) {
    %c0_i32 = arith.constant 0 : i32
    %c0_i32_0 = arith.constant 0 : i32
    return %arg0, %c0_i32 : i32, i32
  }
}

module attributes {stable_mosaic.version = 11 : i64} {
  func.func @_adj_layer_kernel(%arg0: i32, %arg1: i32, %arg2: memref<512x512xbf16, #tpu.memory_space<vmem>>, %arg3: memref<512x128xbf16, #tpu.memory_space<vmem>>, %arg4: memref<1x128xf32, #tpu.memory_space<vmem>>, %arg5: memref<1x128xf32, #tpu.memory_space<vmem>>, %arg6: memref<128x128xbf16, #tpu.memory_space<vmem>>, %arg7: memref<512x128xbf16, #tpu.memory_space<vmem>>, %arg8: memref<512x128xf32, #tpu.memory_space<vmem>>) attributes {dimension_semantics = [#tpu.dimension_semantics<parallel>, #tpu.dimension_semantics<arbitrary>], iteration_bounds = array<i64: 1, 1>, scalar_prefetch = 0 : i64, scratch_operands = 1 : i64, tpu.core_type = #tpu.core_type<tc>, window_params = [{transform_indices = @transform_0, window_bounds = array<i64: 512, 512>}, {transform_indices = @transform_1, window_bounds = array<i64: 512, 128>}, {pipeline_mode = #tpu.pipeline_mode<synchronous>, transform_indices = @transform_2, window_bounds = array<i64: 1, 128>}, {pipeline_mode = #tpu.pipeline_mode<synchronous>, transform_indices = @transform_3, window_bounds = array<i64: 1, 128>}, {pipeline_mode = #tpu.pipeline_mode<synchronous>, transform_indices = @transform_4, window_bounds = array<i64: 128, 128>}, {transform_indices = @transform_5, window_bounds = array<i64: 512, 128>}]} {
    %c0_i32 = arith.constant 0 : i32
    %0 = arith.cmpi eq, %arg1, %c0_i32 : i32
    %1 = arith.extui %0 : i1 to i32
    %c0_i32_0 = arith.constant 0 : i32
    %2 = arith.cmpi ne, %1, %c0_i32_0 : i32
    scf.if %2 {
      %cst_10 = arith.constant 0.000000e+00 : f32
      %12 = vector.broadcast %cst_10 : f32 to vector<512x128xf32>
      %c0_11 = arith.constant 0 : index
      %c0_12 = arith.constant 0 : index
      %13 = vector.load %arg8[%c0_11, %c0_12] : memref<512x128xf32, #tpu.memory_space<vmem>>, vector<512x128xf32>
      tpu.vector_store %arg8[%c0_11, %c0_12], %12 {strides = array<i32>} : memref<512x128xf32, #tpu.memory_space<vmem>>, vector<512x128xf32>,
    } else {
    }
    %c0 = arith.constant 0 : index
    %c0_1 = arith.constant 0 : index
    %3 = vector.load %arg8[%c0, %c0_1] : memref<512x128xf32, #tpu.memory_space<vmem>>, vector<512x128xf32>
    %c0_2 = arith.constant 0 : index
    %c0_3 = arith.constant 0 : index
    %4 = vector.load %arg2[%c0_2, %c0_3] : memref<512x512xbf16, #tpu.memory_space<vmem>>, vector<512x512xbf16>
    %c0_4 = arith.constant 0 : index
    %c0_5 = arith.constant 0 : index
    %5 = vector.load %arg3[%c0_4, %c0_5] : memref<512x128xbf16, #tpu.memory_space<vmem>>, vector<512x128xbf16>
    %cst = arith.constant dense<0.000000e+00> : vector<512x128xf32>
    %6 = tpu.matmul %4, %5, %cst {dimension_numbers = #tpu.dot_dimension_numbers<[1], [0], [0], [1], [0, 0, 1, 1], [], []>} : vector<512x512xbf16>, vector<512x128xbf16>, vector<512x128xf32> -> vector<512x128xf32>
    %7 = arith.addf %3, %6 : vector<512x128xf32>
    %c0_6 = arith.constant 0 : index
    %c0_7 = arith.constant 0 : index
    %8 = vector.load %arg8[%c0_6, %c0_7] : memref<512x128xf32, #tpu.memory_space<vmem>>, vector<512x128xf32>
    tpu.vector_store %arg8[%c0_6, %c0_7], %7 {strides = array<i32>} : memref<512x128xf32, #tpu.memory_space<vmem>>, vector<512x128xf32>,
    %c0_i32_8 = arith.constant 0 : i32
    %9 = arith.cmpi eq, %arg1, %c0_i32_8 : i32
    %10 = arith.extui %9 : i1 to i32
    %c0_i32_9 = arith.constant 0 : i32
    %11 = arith.cmpi ne, %10, %c0_i32_9 : i32
    scf.if %11 {
      %c0_10 = arith.constant 0 : index
      %c0_11 = arith.constant 0 : index
      %12 = vector.load %arg8[%c0_10, %c0_11] : memref<512x128xf32, #tpu.memory_space<vmem>>, vector<512x128xf32>
      %c0_12 = arith.constant 0 : index
      %c0_13 = arith.constant 0 : index
      %13 = vector.load %arg4[%c0_12, %c0_13] : memref<1x128xf32, #tpu.memory_space<vmem>>, vector<1x128xf32>
      %14 = vector.broadcast %13 : vector<1x128xf32> to vector<512x128xf32>
      %15 = arith.mulf %12, %14 : vector<512x128xf32>
      %c0_14 = arith.constant 0 : index
      %c0_15 = arith.constant 0 : index
      %16 = vector.load %arg5[%c0_14, %c0_15] : memref<1x128xf32, #tpu.memory_space<vmem>>, vector<1x128xf32>
      %17 = vector.broadcast %16 : vector<1x128xf32> to vector<512x128xf32>
      %18 = arith.addf %15, %17 : vector<512x128xf32>
      %cst_16 = arith.constant 0.000000e+00 : f32
      %19 = vector.broadcast %cst_16 : f32 to vector<512x128xf32>
      %20 = arith.maximumf %18, %19 : vector<512x128xf32>
      %21 = arith.truncf %20 : vector<512x128xf32> to vector<512x128xbf16>
      %c0_17 = arith.constant 0 : index
      %c0_18 = arith.constant 0 : index
      %22 = vector.load %arg6[%c0_17, %c0_18] : memref<128x128xbf16, #tpu.memory_space<vmem>>, vector<128x128xbf16>
      %cst_19 = arith.constant dense<0.000000e+00> : vector<512x128xf32>
      %23 = tpu.matmul %21, %22, %cst_19 {dimension_numbers = #tpu.dot_dimension_numbers<[1], [0], [0], [1], [0, 0, 1, 1], [], []>} : vector<512x128xbf16>, vector<128x128xbf16>, vector<512x128xf32> -> vector<512x128xf32>
      %24 = arith.truncf %23 : vector<512x128xf32> to vector<512x128xbf16>
      %c0_20 = arith.constant 0 : index
      %c0_21 = arith.constant 0 : index
      %25 = vector.load %arg7[%c0_20, %c0_21] : memref<512x128xbf16, #tpu.memory_space<vmem>>, vector<512x128xbf16>
      tpu.vector_store %arg7[%c0_20, %c0_21], %24 {strides = array<i32>} : memref<512x128xbf16, #tpu.memory_space<vmem>>, vector<512x128xbf16>,
    } else {
    }
    return
  }
  func.func @transform_0(%arg0: i32, %arg1: i32) -> (i32, i32) {
    %c0_i32 = arith.constant 0 : i32
    return %arg0, %arg1 : i32, i32
  }
  func.func @transform_1(%arg0: i32, %arg1: i32) -> (i32, i32) {
    %c0_i32 = arith.constant 0 : i32
    %c0_i32_0 = arith.constant 0 : i32
    return %arg1, %c0_i32 : i32, i32
  }
  func.func @transform_2(%arg0: i32, %arg1: i32) -> (i32, i32) {
    %c0_i32 = arith.constant 0 : i32
    %c0_i32_0 = arith.constant 0 : i32
    %c0_i32_1 = arith.constant 0 : i32
    return %c0_i32, %c0_i32_0 : i32, i32
  }
  func.func @transform_3(%arg0: i32, %arg1: i32) -> (i32, i32) {
    %c0_i32 = arith.constant 0 : i32
    %c0_i32_0 = arith.constant 0 : i32
    %c0_i32_1 = arith.constant 0 : i32
    return %c0_i32, %c0_i32_0 : i32, i32
  }
  func.func @transform_4(%arg0: i32, %arg1: i32) -> (i32, i32) {
    %c0_i32 = arith.constant 0 : i32
    %c0_i32_0 = arith.constant 0 : i32
    %c0_i32_1 = arith.constant 0 : i32
    return %c0_i32, %c0_i32_0 : i32, i32
  }
  func.func @transform_5(%arg0: i32, %arg1: i32) -> (i32, i32) {
    %c0_i32 = arith.constant 0 : i32
    %c0_i32_0 = arith.constant 0 : i32
    return %arg0, %c0_i32 : i32, i32
  }
}

</mosaic_0001>

<bundles_post_ra>
// kernel: lagcn_forward.5
= control target key start
LH: loop header
LB: loop body
LE: loop exit
PB: predicated region body
PF: predicated region fallthrough
CT: control target
= control target key end

     0   :  { %s1278_s1 = inlined_call_operand.vmem [shape: bf16[128,128], index: 1, kind: input, shape index: {}]   ;;  %s1279_s0 = inlined_call_operand.vmem [shape: bf16[512,128], index: 0, kind: input, shape index: {}]   ;;  %s1280_s2 = inlined_call_operand.vmem [shape: bf16[512,128], index: 2, kind: output, shape index: {}]  }
   0x1   :  { %v831_v0 = vld [vmem:[%s1278_s1 + $0x38] sm:$0xff]  ;;  %v830_v1 = vld [vmem:[%s1278_s1 + $0x30] sm:$0xff]  ;;  %v829_v2 = vld [vmem:[%s1278_s1 + $0x28] sm:$0xff] }
   0x2   :  { %331 = vmatpush.bf16.msra.mxu0 %v831_v0  ;;  %1023 = vmatpush.bf16.msra.mxu1 %v831_v0  ;;  %v828_v3 = vld [vmem:[%s1278_s1 + $0x20] sm:$0xff]  ;;  %v827_v4 = vld [vmem:[%s1278_s1 + $0x18] sm:$0xff]  ;;  %v826_v5 = vld [vmem:[%s1278_s1 + $0x10] sm:$0xff] }
   0x3   :  { %1024 = vmatpush.bf16.msra.mxu2 %v831_v0  ;;  %1025 = vmatpush.bf16.msra.mxu3 %v831_v0  ;;  %v825_v6 = vld [vmem:[%s1278_s1 + $0x8] sm:$0xff]  ;;  %v824_v7 = vld [vmem:[%s1278_s1] sm:$0xff]  ;;  %v794_v16 = vld [vmem:[%s1279_s0 + $0x10] sm:$0xff] }
   0x4   :  { %v792_v8 = vld [vmem:[%s1279_s0] sm:$0xff]  ;;  %v793_v12 = vld [vmem:[%s1279_s0 + $0x8] sm:$0xff]  ;;  %v802_v17 = vld [vmem:[%s1279_s0 + $0x50] sm:$0xff] }
   0x5   :  { %v800_v9 = vld [vmem:[%s1279_s0 + $0x40] sm:$0xff]  ;;  %v801_v13 = vld [vmem:[%s1279_s0 + $0x48] sm:$0xff]  ;;  %v810_v18 = vld [vmem:[%s1279_s0 + $0x90] sm:$0xff] }
   0x6   :  { %332 = vmatpush.bf16.msra.mxu0 %v830_v1  ;;  %1026 = vmatpush.bf16.msra.mxu1 %v830_v1  ;;  %v808_v10 = vld [vmem:[%s1279_s0 + $0x80] sm:$0xff]  ;;  %v809_v14 = vld [vmem:[%s1279_s0 + $0x88] sm:$0xff]  ;;  %v818_v19 = vld [vmem:[%s1279_s0 + $0xd0] sm:$0xff] }
   0x7   :  { %1027 = vmatpush.bf16.msra.mxu2 %v830_v1  ;;  %1028 = vmatpush.bf16.msra.mxu3 %v830_v1  ;;  %v816_v11 = vld [vmem:[%s1279_s0 + $0xc0] sm:$0xff]  ;;  %v817_v15 = vld [vmem:[%s1279_s0 + $0xc8] sm:$0xff]  ;;  %v795_v20 = vld [vmem:[%s1279_s0 + $0x18] sm:$0xff] }
   0x8   :  { %v803_v21 = vld [vmem:[%s1279_s0 + $0x58] sm:$0xff]  ;;  %v796_v24 = vld [vmem:[%s1279_s0 + $0x20] sm:$0xff]  ;;  %v797_v28 = vld [vmem:[%s1279_s0 + $0x28] sm:$0xff] }
   0x9   :  { %v811_v22 = vld [vmem:[%s1279_s0 + $0x98] sm:$0xff]  ;;  %v804_v25 = vld [vmem:[%s1279_s0 + $0x60] sm:$0xff]  ;;  %v805_v29 = vld [vmem:[%s1279_s0 + $0x68] sm:$0xff] }
   0xa   :  { %333 = vmatpush.bf16.msra.mxu0 %v829_v2  ;;  %1029 = vmatpush.bf16.msra.mxu1 %v829_v2  ;;  %v819_v23 = vld [vmem:[%s1279_s0 + $0xd8] sm:$0xff]  ;;  %v812_v26 = vld [vmem:[%s1279_s0 + $0xa0] sm:$0xff]  ;;  %v813_v30 = vld [vmem:[%s1279_s0 + $0xa8] sm:$0xff] }
   0xb   :  { %1030 = vmatpush.bf16.msra.mxu2 %v829_v2  ;;  %1031 = vmatpush.bf16.msra.mxu3 %v829_v2  ;;  %v820_v27 = vld [vmem:[%s1279_s0 + $0xe0] sm:$0xff]  ;;  %v821_v31 = vld [vmem:[%s1279_s0 + $0xe8] sm:$0xff]  ;;  %v798_v32 = vld [vmem:[%s1279_s0 + $0x30] sm:$0xff] }
   0xc   :  { %v806_v33 = vld [vmem:[%s1279_s0 + $0x70] sm:$0xff]  ;;  %v799_v36 = vld [vmem:[%s1279_s0 + $0x38] sm:$0xff] }
   0xd   :  { %v814_v34 = vld [vmem:[%s1279_s0 + $0xb0] sm:$0xff]  ;;  %v807_v37 = vld [vmem:[%s1279_s0 + $0x78] sm:$0xff] }
   0xe   :  { %334 = vmatpush.bf16.msra.mxu0 %v828_v3  ;;  %1032 = vmatpush.bf16.msra.mxu1 %v828_v3  ;;  %v822_v35 = vld [vmem:[%s1279_s0 + $0xf0] sm:$0xff]  ;;  %v815_v38 = vld [vmem:[%s1279_s0 + $0xb8] sm:$0xff] }
   0xf   :  { %1033 = vmatpush.bf16.msra.mxu2 %v828_v3  ;;  %1034 = vmatpush.bf16.msra.mxu3 %v828_v3  ;;  %v823_v39 = vld [vmem:[%s1279_s0 + $0xf8] sm:$0xff] }
  0x12   :  { %335 = vmatpush.bf16.msra.mxu0 %v827_v4  ;;  %1035 = vmatpush.bf16.msra.mxu1 %v827_v4 }
  0x13   :  { %1036 = vmatpush.bf16.msra.mxu2 %v827_v4  ;;  %1037 = vmatpush.bf16.msra.mxu3 %v827_v4 }
  0x16   :  { %336 = vmatpush.bf16.msra.mxu0 %v826_v5  ;;  %1038 = vmatpush.bf16.msra.mxu1 %v826_v5 }
  0x17   :  { %1039 = vmatpush.bf16.msra.mxu2 %v826_v5  ;;  %1040 = vmatpush.bf16.msra.mxu3 %v826_v5 }
  0x1a   :  { %337 = vmatpush.bf16.msra.mxu0 %v825_v6  ;;  %1041 = vmatpush.bf16.msra.mxu1 %v825_v6 }
  0x1b   :  { %1042 = vmatpush.bf16.msra.mxu2 %v825_v6  ;;  %1043 = vmatpush.bf16.msra.mxu3 %v825_v6 }
  0x1e   :  { %338 = vmatpush.bf16.msra.mxu0 %v824_v7  ;;  %1044 = vmatpush.bf16.msra.mxu1 %v824_v7 }
  0x1f   :  { %1045 = vmatpush.bf16.msra.mxu2 %v824_v7  ;;  %1046 = vmatpush.bf16.msra.mxu3 %v824_v7 }
  0x21   :  { %339 = vmatmul.bf16.vlgmr.msra.gmra.mxu0 %v792_v8  ;;  %379 = vmatmul.bf16.vlgmr.msra.gmra.mxu1 %v800_v9 }
  0x22   :  { %419 = vmatmul.bf16.vlgmr.msra.gmra.mxu2 %v808_v10  ;;  %459 = vmatmul.bf16.vlgmr.msra.gmra.mxu3 %v816_v11 }
  0x31   :  { %344 = vmatmul.bf16.gmra.mxu0 %v793_v12  ;;  %384 = vmatmul.bf16.gmra.mxu1 %v801_v13 }
  0x32   :  { %424 = vmatmul.bf16.gmra.mxu2 %v809_v14  ;;  %464 = vmatmul.bf16.gmra.mxu3 %v817_v15 }
  0x41   :  { %349 = vmatmul.bf16.gmra.mxu0 %v794_v16  ;;  %389 = vmatmul.bf16.gmra.mxu1 %v802_v17 }
  0x42   :  { %429 = vmatmul.bf16.gmra.mxu2 %v810_v18  ;;  %469 = vmatmul.bf16.gmra.mxu3 %v818_v19 }
  0x51   :  { %354 = vmatmul.bf16.gmra.mxu0 %v795_v20  ;;  %394 = vmatmul.bf16.gmra.mxu1 %v803_v21 }
  0x52   :  { %434 = vmatmul.bf16.gmra.mxu2 %v811_v22  ;;  %474 = vmatmul.bf16.gmra.mxu3 %v819_v23 }
  0x61   :  { %359 = vmatmul.bf16.gmra.mxu0 %v796_v24  ;;  %399 = vmatmul.bf16.gmra.mxu1 %v804_v25 }
  0x62   :  { %439 = vmatmul.bf16.gmra.mxu2 %v812_v26  ;;  %479 = vmatmul.bf16.gmra.mxu3 %v820_v27 }
  0x71   :  { %364 = vmatmul.bf16.gmra.mxu0 %v797_v28  ;;  %404 = vmatmul.bf16.gmra.mxu1 %v805_v29 }
  0x72   :  { %444 = vmatmul.bf16.gmra.mxu2 %v813_v30  ;;  %484 = vmatmul.bf16.gmra.mxu3 %v821_v31 }
  0x81   :  { %369 = vmatmul.bf16.gmra.mxu0 %v798_v32  ;;  %409 = vmatmul.bf16.gmra.mxu1 %v806_v33 }
  0x82   :  { %449 = vmatmul.bf16.gmra.mxu2 %v814_v34  ;;  %489 = vmatmul.bf16.gmra.mxu3 %v822_v35 }
  0x91   :  { %374 = vmatmul.bf16.gmra.mxu0 %v799_v36  ;;  %414 = vmatmul.bf16.gmra.mxu1 %v807_v37 }
  0x92   :  { %454 = vmatmul.bf16.gmra.mxu2 %v815_v38  ;;  %494 = vmatmul.bf16.gmra.mxu3 %v823_v39 }
  0x9e   :  { %v340_v40 = vpop.f32.mrf.mxu0  ;;  %v380_v41 = vpop.f32.mrf.mxu1 }
  0xa5   :  { %v420_v42 = vpop.f32.mrf.mxu2  ;;  %v460_v43 = vpop.f32.mrf.mxu3 }
  0xa6   :  { %v342_v44 = vpop.f32.mrf.mxu0  ;;  %v382_v45 = vpop.f32.mrf.mxu1 }
  0xa7   :  { %v835_v46 = vpack.c.bf16 %v342_v44, %v340_v40  ;;  %v875_v47 = vpack.c.bf16 %v382_v45, %v380_v41 }
  0xa9   :  { %836 = vst [vmem:[%s1280_s2] sm:$0xff] %v835_v46  }
  0xaa   :  { %999 = vst [vmem:[%s1280_s2 + $0x40] sm:$0xff] %v875_v47  }
  0xad   :  { %v422_v48 = vpop.f32.mrf.mxu2  ;;  %v462_v49 = vpop.f32.mrf.mxu3 }
  0xae   :  { %v915_v50 = vpack.c.bf16 %v422_v48, %v420_v42  ;;  %v955_v51 = vpack.c.bf16 %v462_v49, %v460_v43  ;;  %v345_v52 = vpop.f32.mrf.mxu0  ;;  %v385_v53 = vpop.f32.mrf.mxu1 }
  0xb0   :  { %1007 = vst [vmem:[%s1280_s2 + $0x80] sm:$0xff] %v915_v50  }
  0xb1   :  { %1015 = vst [vmem:[%s1280_s2 + $0xc0] sm:$0xff] %v955_v51  }
  0xb5   :  { %v425_v54 = vpop.f32.mrf.mxu2  ;;  %v465_v55 = vpop.f32.mrf.mxu3 }
  0xb6   :  { %v347_v56 = vpop.f32.mrf.mxu0  ;;  %v387_v57 = vpop.f32.mrf.mxu1 }
  0xb7   :  { %v840_v58 = vpack.c.bf16 %v347_v56, %v345_v52  ;;  %v880_v59 = vpack.c.bf16 %v387_v57, %v385_v53 }
  0xb9   :  { %992 = vst [vmem:[%s1280_s2 + $0x8] sm:$0xff] %v840_v58  }
  0xba   :  { %1000 = vst [vmem:[%s1280_s2 + $0x48] sm:$0xff] %v880_v59  }
  0xbd   :  { %v427_v60 = vpop.f32.mrf.mxu2  ;;  %v467_v61 = vpop.f32.mrf.mxu3 }
  0xbe   :  { %v920_v62 = vpack.c.bf16 %v427_v60, %v425_v54  ;;  %v960_v63 = vpack.c.bf16 %v467_v61, %v465_v55  ;;  %v350_v0 = vpop.f32.mrf.mxu0  ;;  %v390_v1 = vpop.f32.mrf.mxu1 }
  0xc0   :  { %1008 = vst [vmem:[%s1280_s2 + $0x88] sm:$0xff] %v920_v62  }
  0xc1   :  { %1016 = vst [vmem:[%s1280_s2 + $0xc8] sm:$0xff] %v960_v63  }
  0xc5   :  { %v430_v2 = vpop.f32.mrf.mxu2  ;;  %v470_v3 = vpop.f32.mrf.mxu3 }
  0xc6   :  { %v352_v4 = vpop.f32.mrf.mxu0  ;;  %v392_v5 = vpop.f32.mrf.mxu1 }
  0xc7   :  { %v845_v6 = vpack.c.bf16 %v352_v4, %v350_v0  ;;  %v885_v7 = vpack.c.bf16 %v392_v5, %v390_v1 }
  0xc9   :  { %993 = vst [vmem:[%s1280_s2 + $0x10] sm:$0xff] %v845_v6  }
  0xca   :  { %1001 = vst [vmem:[%s1280_s2 + $0x50] sm:$0xff] %v885_v7  }
  0xcd   :  { %v432_v8 = vpop.f32.mrf.mxu2  ;;  %v472_v9 = vpop.f32.mrf.mxu3 }
  0xce   :  { %v925_v10 = vpack.c.bf16 %v432_v8, %v430_v2  ;;  %v965_v11 = vpack.c.bf16 %v472_v9, %v470_v3  ;;  %v355_v12 = vpop.f32.mrf.mxu0  ;;  %v395_v13 = vpop.f32.mrf.mxu1 }
  0xd0   :  { %1009 = vst [vmem:[%s1280_s2 + $0x90] sm:$0xff] %v925_v10  }
  0xd1   :  { %1017 = vst [vmem:[%s1280_s2 + $0xd0] sm:$0xff] %v965_v11  }
  0xd5   :  { %v435_v14 = vpop.f32.mrf.mxu2  ;;  %v475_v15 = vpop.f32.mrf.mxu3 }
  0xd6   :  { %v357_v16 = vpop.f32.mrf.mxu0  ;;  %v397_v17 = vpop.f32.mrf.mxu1 }
  0xd7   :  { %v850_v18 = vpack.c.bf16 %v357_v16, %v355_v12  ;;  %v890_v19 = vpack.c.bf16 %v397_v17, %v395_v13 }
  0xd9   :  { %994 = vst [vmem:[%s1280_s2 + $0x18] sm:$0xff] %v850_v18  }
  0xda   :  { %1002 = vst [vmem:[%s1280_s2 + $0x58] sm:$0xff] %v890_v19  }
  0xdd   :  { %v437_v20 = vpop.f32.mrf.mxu2  ;;  %v477_v21 = vpop.f32.mrf.mxu3 }
  0xde   :  { %v930_v22 = vpack.c.bf16 %v437_v20, %v435_v14  ;;  %v970_v23 = vpack.c.bf16 %v477_v21, %v475_v15  ;;  %v360_v24 = vpop.f32.mrf.mxu0  ;;  %v400_v25 = vpop.f32.mrf.mxu1 }
  0xe0   :  { %1010 = vst [vmem:[%s1280_s2 + $0x98] sm:$0xff] %v930_v22  }
  0xe1   :  { %1018 = vst [vmem:[%s1280_s2 + $0xd8] sm:$0xff] %v970_v23  }
  0xe5   :  { %v440_v26 = vpop.f32.mrf.mxu2  ;;  %v480_v27 = vpop.f32.mrf.mxu3 }
  0xe6   :  { %v362_v28 = vpop.f32.mrf.mxu0  ;;  %v402_v29 = vpop.f32.mrf.mxu1 }
  0xe7   :  { %v855_v30 = vpack.c.bf16 %v362_v28, %v360_v24  ;;  %v895_v31 = vpack.c.bf16 %v402_v29, %v400_v25 }
  0xe9   :  { %995 = vst [vmem:[%s1280_s2 + $0x20] sm:$0xff] %v855_v30  }
  0xea   :  { %1003 = vst [vmem:[%s1280_s2 + $0x60] sm:$0xff] %v895_v31  }
  0xed   :  { %v442_v32 = vpop.f32.mrf.mxu2  ;;  %v482_v33 = vpop.f32.mrf.mxu3 }
  0xee   :  { %v935_v34 = vpack.c.bf16 %v442_v32, %v440_v26  ;;  %v975_v35 = vpack.c.bf16 %v482_v33, %v480_v27  ;;  %v365_v36 = vpop.f32.mrf.mxu0  ;;  %v405_v37 = vpop.f32.mrf.mxu1 }
  0xf0   :  { %1011 = vst [vmem:[%s1280_s2 + $0xa0] sm:$0xff] %v935_v34  }
  0xf1   :  { %1019 = vst [vmem:[%s1280_s2 + $0xe0] sm:$0xff] %v975_v35  }
  0xf5   :  { %v445_v38 = vpop.f32.mrf.mxu2  ;;  %v485_v39 = vpop.f32.mrf.mxu3 }
  0xf6   :  { %v367_v40 = vpop.f32.mrf.mxu0  ;;  %v407_v41 = vpop.f32.mrf.mxu1 }
  0xf7   :  { %v860_v42 = vpack.c.bf16 %v367_v40, %v365_v36  ;;  %v900_v43 = vpack.c.bf16 %v407_v41, %v405_v37 }
  0xf9   :  { %996 = vst [vmem:[%s1280_s2 + $0x28] sm:$0xff] %v860_v42  }
  0xfa   :  { %1004 = vst [vmem:[%s1280_s2 + $0x68] sm:$0xff] %v900_v43  }
  0xfd   :  { %v447_v44 = vpop.f32.mrf.mxu2  ;;  %v487_v45 = vpop.f32.mrf.mxu3 }
  0xfe   :  { %v940_v46 = vpack.c.bf16 %v447_v44, %v445_v38  ;;  %v980_v47 = vpack.c.bf16 %v487_v45, %v485_v39  ;;  %v370_v48 = vpop.f32.mrf.mxu0  ;;  %v410_v49 = vpop.f32.mrf.mxu1 }
 0x100   :  { %1012 = vst [vmem:[%s1280_s2 + $0xa8] sm:$0xff] %v940_v46  }
 0x101   :  { %1020 = vst [vmem:[%s1280_s2 + $0xe8] sm:$0xff] %v980_v47  }
 0x105   :  { %v450_v50 = vpop.f32.mrf.mxu2  ;;  %v490_v51 = vpop.f32.mrf.mxu3 }
 0x106   :  { %v372_v52 = vpop.f32.mrf.mxu0  ;;  %v412_v53 = vpop.f32.mrf.mxu1 }
 0x107   :  { %v865_v54 = vpack.c.bf16 %v372_v52, %v370_v48  ;;  %v905_v55 = vpack.c.bf16 %v412_v53, %v410_v49 }
 0x109   :  { %997 = vst [vmem:[%s1280_s2 + $0x30] sm:$0xff] %v865_v54  }
 0x10a   :  { %1005 = vst [vmem:[%s1280_s2 + $0x70] sm:$0xff] %v905_v55  }
 0x10d   :  { %v452_v56 = vpop.f32.mrf.mxu2  ;;  %v492_v57 = vpop.f32.mrf.mxu3 }
 0x10e   :  { %v945_v58 = vpack.c.bf16 %v452_v56, %v450_v50  ;;  %v985_v59 = vpack.c.bf16 %v492_v57, %v490_v51  ;;  %v375_v60 = vpop.f32.mrf.mxu0  ;;  %v415_v61 = vpop.f32.mrf.mxu1 }
 0x110   :  { %1013 = vst [vmem:[%s1280_s2 + $0xb0] sm:$0xff] %v945_v58  }
 0x111   :  { %1021 = vst [vmem:[%s1280_s2 + $0xf0] sm:$0xff] %v985_v59  }
 0x115   :  { %v455_v62 = vpop.f32.mrf.mxu2  ;;  %v495_v63 = vpop.f32.mrf.mxu3 }
 0x116   :  { %v377_v0 = vpop.f32.mrf.mxu0  ;;  %v417_v1 = vpop.f32.mrf.mxu1 }
 0x117   :  { %v870_v2 = vpack.c.bf16 %v377_v0, %v375_v60  ;;  %v910_v3 = vpack.c.bf16 %v417_v1, %v415_v61 }
 0x119   :  { %998 = vst [vmem:[%s1280_s2 + $0x38] sm:$0xff] %v870_v2  }
 0x11a   :  { %1006 = vst [vmem:[%s1280_s2 + $0x78] sm:$0xff] %v910_v3  }
 0x11d   :  { %v457_v4 = vpop.f32.mrf.mxu2  ;;  %v497_v5 = vpop.f32.mrf.mxu3 }
 0x11e   :  { %v950_v6 = vpack.c.bf16 %v457_v4, %v455_v62  ;;  %v990_v7 = vpack.c.bf16 %v497_v5, %v495_v63 }
 0x120   :  { %1014 = vst [vmem:[%s1280_s2 + $0xb8] sm:$0xff] %v950_v6  }
 0x121   :  { %1022 = vst [vmem:[%s1280_s2 + $0xf8] sm:$0xff] %v990_v7  }

// kernel: lagcn_forward.7
= control target key start
LH: loop header
LB: loop body
LE: loop exit
PB: predicated region body
PF: predicated region fallthrough
CT: control target
= control target key end

     0   :  { %s4129_s1 = inlined_call_operand.vmem [shape: bf16[512,128], index: 1, kind: input, shape index: {}]   ;;  %s4130_s0 = inlined_call_operand.vmem [shape: bf16[512,512], index: 0, kind: input, shape index: {}]   ;;  %s4131_s2 = inlined_call_operand.vmem [shape: f32[1,128], index: 2, kind: input, shape index: {}]   ;;  %s4132_s3 = inlined_call_operand.vmem [shape: f32[512,128], index: 3, kind: output, shape index: {}]  }
   0x1   :  { %v2952_v0 = vld [vmem:[%s4129_s1 + $0x38] sm:$0xff]  ;;  %v2951_v4 = vld [vmem:[%s4129_s1 + $0x30] sm:$0xff]  ;;  %v2950_v8 = vld [vmem:[%s4129_s1 + $0x28] sm:$0xff] }
   0x2   :  { %v2960_v1 = vld [vmem:[%s4129_s1 + $0x78] sm:$0xff]  ;;  %1170 = vmatpush.bf16.msra.mxu0 %v2952_v0  ;;  %v2959_v5 = vld [vmem:[%s4129_s1 + $0x70] sm:$0xff]  ;;  %v2958_v9 = vld [vmem:[%s4129_s1 + $0x68] sm:$0xff] }
   0x3   :  { %v2968_v2 = vld [vmem:[%s4129_s1 + $0xb8] sm:$0xff]  ;;  %1339 = vmatpush.bf16.msra.mxu1 %v2960_v1  ;;  %v2967_v6 = vld [vmem:[%s4129_s1 + $0xb0] sm:$0xff]  ;;  %v2966_v10 = vld [vmem:[%s4129_s1 + $0xa8] sm:$0xff] }
   0x4   :  { %v2976_v3 = vld [vmem:[%s4129_s1 + $0xf8] sm:$0xff]  ;;  %1508 = vmatpush.bf16.msra.mxu2 %v2968_v2  ;;  %v2975_v7 = vld [vmem:[%s4129_s1 + $0xf0] sm:$0xff]  ;;  %v2974_v11 = vld [vmem:[%s4129_s1 + $0xe8] sm:$0xff] }
   0x5   :  { %1677 = vmatpush.bf16.msra.mxu3 %v2976_v3  ;;  %v2949_v12 = vld [vmem:[%s4129_s1 + $0x20] sm:$0xff]  ;;  %v2948_v16 = vld [vmem:[%s4129_s1 + $0x18] sm:$0xff]  ;;  %v2947_v20 = vld [vmem:[%s4129_s1 + $0x10] sm:$0xff] }
   0x6   :  { %1171 = vmatpush.bf16.msra.mxu0 %v2951_v4  ;;  %v2957_v13 = vld [vmem:[%s4129_s1 + $0x60] sm:$0xff]  ;;  %v2956_v17 = vld [vmem:[%s4129_s1 + $0x58] sm:$0xff]  ;;  %v2955_v21 = vld [vmem:[%s4129_s1 + $0x50] sm:$0xff] }
   0x7   :  { %1340 = vmatpush.bf16.msra.mxu1 %v2959_v5  ;;  %v2965_v14 = vld [vmem:[%s4129_s1 + $0xa0] sm:$0xff]  ;;  %v2964_v18 = vld [vmem:[%s4129_s1 + $0x98] sm:$0xff]  ;;  %v2963_v22 = vld [vmem:[%s4129_s1 + $0x90] sm:$0xff] }
   0x8   :  { %1509 = vmatpush.bf16.msra.mxu2 %v2967_v6  ;;  %v2973_v15 = vld [vmem:[%s4129_s1 + $0xe0] sm:$0xff]  ;;  %v2972_v19 = vld [vmem:[%s4129_s1 + $0xd8] sm:$0xff]  ;;  %v2971_v23 = vld [vmem:[%s4129_s1 + $0xd0] sm:$0xff] }
   0x9   :  { %1678 = vmatpush.bf16.msra.mxu3 %v2975_v7  ;;  %v2946_v24 = vld [vmem:[%s4129_s1 + $0x8] sm:$0xff]  ;;  %v2945_v28 = vld [vmem:[%s4129_s1] sm:$0xff]  ;;  %v2819_v33 = vld [vmem:[%s4130_s0 + $0xc] sm:$0xf0] }
   0xa   :  { %1172 = vmatpush.bf16.msra.mxu0 %v2950_v8  ;;  %v2954_v25 = vld [vmem:[%s4129_s1 + $0x48] sm:$0xff]  ;;  %v2953_v29 = vld [vmem:[%s4129_s1 + $0x40] sm:$0xff]  ;;  %v2181_v35 = vld [vmem:[%s4130_s0 + $0x10] sm:$0xf0] }
   0xb   :  { %1341 = vmatpush.bf16.msra.mxu1 %v2958_v9  ;;  %v2962_v26 = vld [vmem:[%s4129_s1 + $0x88] sm:$0xff]  ;;  %v2961_v30 = vld [vmem:[%s4129_s1 + $0x80] sm:$0xff]  ;;  %v2820_v37 = vld [vmem:[%s4130_s0 + $0x14] sm:$0xf0] }
   0xc   :  { %1510 = vmatpush.bf16.msra.mxu2 %v2966_v10  ;;  %v2970_v27 = vld [vmem:[%s4129_s1 + $0xc8] sm:$0xff]  ;;  %v2969_v31 = vld [vmem:[%s4129_s1 + $0xc0] sm:$0xff]  ;;  %v2189_v39 = vld [vmem:[%s4130_s0 + $0x18] sm:$0xf0] }
   0xd   :  { %1679 = vmatpush.bf16.msra.mxu3 %v2974_v11  ;;  %v2179_v32 = vld [vmem:[%s4130_s0] sm:$0xf]  ;;  %v2817_v34 = vld [vmem:[%s4130_s0 + $0x4] sm:$0xf]  ;;  %v2187_v36 = vld [vmem:[%s4130_s0 + $0x8] sm:$0xf] }
   0xe   :  { %1173 = vmatpush.bf16.msra.mxu0 %v2949_v12  ;;  %v2818_v38 = vld [vmem:[%s4130_s0 + $0xc] sm:$0xf]  ;;  %v2180_v40 = vor.u32 %v2819_v33, %v2179_v32  ;;  %v2184_v41 = vor.u32 %v2817_v34, %v2181_v35  ;;  %v2188_v42 = vor.u32 %v2820_v37, %v2187_v36  ;;  %v2195_v44 = vld [vmem:[%s4130_s0 + $0x20] sm:$0xf]  ;;  %v2823_v45 = vld [vmem:[%s4130_s0 + $0x2c] sm:$0xf0] }
   0xf   :  { %1342 = vmatpush.bf16.msra.mxu1 %v2957_v13  ;;  %v2192_v43 = vor.u32 %v2818_v38, %v2189_v39  ;;  %v2821_v46 = vld [vmem:[%s4130_s0 + $0x24] sm:$0xf]  ;;  %v2197_v47 = vld [vmem:[%s4130_s0 + $0x30] sm:$0xf0]  ;;  %v2203_v48 = vld [vmem:[%s4130_s0 + $0x28] sm:$0xf]  ;;  %v2196_v52 = vor.u32 %v2823_v45, %v2195_v44 }
  0x10   :  { %1511 = vmatpush.bf16.msra.mxu2 %v2965_v14  ;;  %v2824_v49 = vld [vmem:[%s4130_s0 + $0x34] sm:$0xf0]  ;;  %v2822_v50 = vld [vmem:[%s4130_s0 + $0x2c] sm:$0xf]  ;;  %v2205_v51 = vld [vmem:[%s4130_s0 + $0x38] sm:$0xf0]  ;;  %v2200_v53 = vor.u32 %v2821_v46, %v2197_v47 }
  0x11   :  { %1680 = vmatpush.bf16.msra.mxu3 %v2973_v15  ;;  %v2204_v54 = vor.u32 %v2824_v49, %v2203_v48  ;;  %v2208_v55 = vor.u32 %v2822_v50, %v2205_v51  ;;  %v2211_v56 = vld [vmem:[%s4130_s0 + $0x40] sm:$0xf]  ;;  %v2827_v57 = vld [vmem:[%s4130_s0 + $0x4c] sm:$0xf0]  ;;  %v2825_v58 = vld [vmem:[%s4130_s0 + $0x44] sm:$0xf] }
  0x12   :  { %1174 = vmatpush.bf16.msra.mxu0 %v2948_v16  ;;  %v2213_v59 = vld [vmem:[%s4130_s0 + $0x50] sm:$0xf0]  ;;  %v2219_v60 = vld [vmem:[%s4130_s0 + $0x48] sm:$0xf]  ;;  %v2828_v61 = vld [vmem:[%s4130_s0 + $0x54] sm:$0xf0]  ;;  %v2212_v0 = vor.u32 %v2827_v57, %v2211_v56 }
  0x13   :  { %1343 = vmatpush.bf16.msra.mxu1 %v2956_v17  ;;  %v2826_v62 = vld [vmem:[%s4130_s0 + $0x4c] sm:$0xf]  ;;  %v2221_v63 = vld [vmem:[%s4130_s0 + $0x58] sm:$0xf0]  ;;  %v2216_v1 = vor.u32 %v2825_v58, %v2213_v59  ;;  %v2220_v2 = vor.u32 %v2828_v61, %v2219_v60  ;;  %v2227_v4 = vld [vmem:[%s4130_s0 + $0x60] sm:$0xf] }
  0x14   :  { %1512 = vmatpush.bf16.msra.mxu2 %v2964_v18  ;;  %v2224_v3 = vor.u32 %v2826_v62, %v2221_v63  ;;  %v2831_v5 = vld [vmem:[%s4130_s0 + $0x6c] sm:$0xf0]  ;;  %v2829_v6 = vld [vmem:[%s4130_s0 + $0x64] sm:$0xf]  ;;  %v2229_v7 = vld [vmem:[%s4130_s0 + $0x70] sm:$0xf0] }
  0x15   :  { %1681 = vmatpush.bf16.msra.mxu3 %v2972_v19  ;;  %v2235_v8 = vld [vmem:[%s4130_s0 + $0x68] sm:$0xf]  ;;  %v2832_v9 = vld [vmem:[%s4130_s0 + $0x74] sm:$0xf0]  ;;  %v2830_v10 = vld [vmem:[%s4130_s0 + $0x6c] sm:$0xf]  ;;  %v2228_v12 = vor.u32 %v2831_v5, %v2227_v4  ;;  %v2232_v13 = vor.u32 %v2829_v6, %v2229_v7 }
  0x16   :  { %1175 = vmatpush.bf16.msra.mxu0 %v2947_v20  ;;  %v2237_v11 = vld [vmem:[%s4130_s0 + $0x78] sm:$0xf0]  ;;  %v2236_v14 = vor.u32 %v2832_v9, %v2235_v8  ;;  %v2243_v16 = vld [vmem:[%s4130_s0 + $0x80] sm:$0xf]  ;;  %v2835_v17 = vld [vmem:[%s4130_s0 + $0x8c] sm:$0xf0] }
  0x17   :  { %1344 = vmatpush.bf16.msra.mxu1 %v2955_v21  ;;  %v2240_v15 = vor.u32 %v2830_v10, %v2237_v11  ;;  %v2833_v18 = vld [vmem:[%s4130_s0 + $0x84] sm:$0xf]  ;;  %v2245_v19 = vld [vmem:[%s4130_s0 + $0x90] sm:$0xf0]  ;;  %v2251_v20 = vld [vmem:[%s4130_s0 + $0x88] sm:$0xf] }
  0x18   :  { %1513 = vmatpush.bf16.msra.mxu2 %v2963_v22  ;;  %v2836_v21 = vld [vmem:[%s4130_s0 + $0x94] sm:$0xf0]  ;;  %v2834_v22 = vld [vmem:[%s4130_s0 + $0x8c] sm:$0xf]  ;;  %v2267_v32 = vld [vmem:[%s4130_s0 + $0xa8] sm:$0xf] }
  0x19   :  { %1682 = vmatpush.bf16.msra.mxu3 %v2971_v23  ;;  %v2253_v23 = vld [vmem:[%s4130_s0 + $0x98] sm:$0xf0]  ;;  %v2840_v33 = vld [vmem:[%s4130_s0 + $0xb4] sm:$0xf0]  ;;  %v2838_v34 = vld [vmem:[%s4130_s0 + $0xac] sm:$0xf] }
  0x1a   :  { %1176 = vmatpush.bf16.msra.mxu0 %v2946_v24  ;;  %v2244_v24 = vor.u32 %v2835_v17, %v2243_v16  ;;  %v2269_v35 = vld [vmem:[%s4130_s0 + $0xb8] sm:$0xf0]  ;;  %v2268_v38 = vor.u32 %v2840_v33, %v2267_v32  ;;  %v2283_v44 = vld [vmem:[%s4130_s0 + $0xc8] sm:$0xf]  ;;  %v2844_v45 = vld [vmem:[%s4130_s0 + $0xd4] sm:$0xf0] }
  0x1b   :  { %1345 = vmatpush.bf16.msra.mxu1 %v2954_v25  ;;  %v2248_v25 = vor.u32 %v2833_v18, %v2245_v19  ;;  %v2272_v39 = vor.u32 %v2838_v34, %v2269_v35  ;;  %v2842_v46 = vld [vmem:[%s4130_s0 + $0xcc] sm:$0xf]  ;;  %v2285_v47 = vld [vmem:[%s4130_s0 + $0xd8] sm:$0xf0]  ;;  %v2284_v50 = vor.u32 %v2844_v45, %v2283_v44  ;;  %v2299_v56 = vld [vmem:[%s4130_s0 + $0xe8] sm:$0xf] }
  0x1c   :  { %1514 = vmatpush.bf16.msra.mxu2 %v2962_v26  ;;  %v2252_v26 = vor.u32 %v2836_v21, %v2251_v20  ;;  %v2288_v51 = vor.u32 %v2842_v46, %v2285_v47  ;;  %v2848_v57 = vld [vmem:[%s4130_s0 + $0xf4] sm:$0xf0]  ;;  %v2846_v58 = vld [vmem:[%s4130_s0 + $0xec] sm:$0xf]  ;;  %v2301_v59 = vld [vmem:[%s4130_s0 + $0xf8] sm:$0xf0] }
  0x1d   :  { %1683 = vmatpush.bf16.msra.mxu3 %v2970_v27  ;;  %v2256_v27 = vor.u32 %v2834_v22, %v2253_v23  ;;  %v2300_v62 = vor.u32 %v2848_v57, %v2299_v56  ;;  %v2304_v63 = vor.u32 %v2846_v58, %v2301_v59  ;;  %v2315_v4 = vld [vmem:[%s4130_s0 + $0x108] sm:$0xf]  ;;  %v2852_v5 = vld [vmem:[%s4130_s0 + $0x114] sm:$0xf0]  ;;  %v2850_v6 = vld [vmem:[%s4130_s0 + $0x10c] sm:$0xf] }
  0x1e   :  { %1177 = vmatpush.bf16.msra.mxu0 %v2945_v28  ;;  %v2259_v28 = vld [vmem:[%s4130_s0 + $0xa0] sm:$0xf]  ;;  %v2317_v7 = vld [vmem:[%s4130_s0 + $0x118] sm:$0xf0]  ;;  %v2855_v23 = vld [vmem:[%s4130_s0 + $0x12c] sm:$0xf0] }
  0x1f   :  { %1346 = vmatpush.bf16.msra.mxu1 %v2953_v29  ;;  %v2839_v29 = vld [vmem:[%s4130_s0 + $0xac] sm:$0xf0]  ;;  %v3314_v18 = vld [vmem:[%s4131_s2] ss:$0 sm:$0xff]  ;;  %v2860_v56 = vld [vmem:[%s4130_s0 + $0x154] sm:$0xf0] }
  0x20   :  { %1515 = vmatpush.bf16.msra.mxu2 %v2961_v30  ;;  %v2837_v30 = vld [vmem:[%s4130_s0 + $0xa4] sm:$0xf]  ;;  %v2260_v36 = vor.u32 %v2839_v29, %v2259_v28  ;;  %v2323_v22 = vld [vmem:[%s4130_s0 + $0x120] sm:$0xf]  ;;  %v2856_v28 = vld [vmem:[%s4130_s0 + $0x134] sm:$0xf0] }
  0x21   :  { %1684 = vmatpush.bf16.msra.mxu3 %v2969_v31  ;;  %1178 = vmatmul.bf16.vlgmr.msra.gmra.mxu0 %v2180_v40  ;;  %v2261_v31 = vld [vmem:[%s4130_s0 + $0xb0] sm:$0xf0]  ;;  %v2275_v40 = vld [vmem:[%s4130_s0 + $0xc0] sm:$0xf]  ;;  %v2854_v29 = vld [vmem:[%s4130_s0 + $0x12c] sm:$0xf]  ;;  %v2324_v34 = vor.u32 %v2855_v23, %v2323_v22 }
  0x22   :  { %1347 = vmatmul.bf16.vlgmr.msra.gmra.mxu1 %v2184_v41  ;;  %v2264_v37 = vor.u32 %v2837_v30, %v2261_v31  ;;  %v2843_v41 = vld [vmem:[%s4130_s0 + $0xcc] sm:$0xf0]  ;;  %v2333_v30 = vld [vmem:[%s4130_s0 + $0x138] sm:$0xf0]  ;;  %v2858_v57 = vld [vmem:[%s4130_s0 + $0x14c] sm:$0xf] }
  0x23   :  { %1516 = vmatmul.bf16.vlgmr.msra.gmra.mxu2 %v2188_v42  ;;  %v2841_v42 = vld [vmem:[%s4130_s0 + $0xc4] sm:$0xf]  ;;  %v2276_v48 = vor.u32 %v2843_v41, %v2275_v40  ;;  %v2336_v40 = vor.u32 %v2854_v29, %v2333_v30  ;;  %v2349_v58 = vld [vmem:[%s4130_s0 + $0x158] sm:$0xf0]  ;;  %v2862_v22 = vld [vmem:[%s4130_s0 + $0x16c] sm:$0xf] }
  0x24   :  { %1685 = vmatmul.bf16.vlgmr.msra.gmra.mxu3 %v2192_v43  ;;  %v2277_v43 = vld [vmem:[%s4130_s0 + $0xd0] sm:$0xf0]  ;;  %v2365_v23 = vld [vmem:[%s4130_s0 + $0x178] sm:$0xf0] }
  0x25   :  { %v2280_v49 = vor.u32 %v2841_v42, %v2277_v43 }
  0x31   :  { %1183 = vmatmul.bf16.gmra.mxu0 %v2196_v52  ;;  %v2291_v52 = vld [vmem:[%s4130_s0 + $0xe0] sm:$0xf] }
  0x32   :  { %1352 = vmatmul.bf16.gmra.mxu1 %v2200_v53  ;;  %v2847_v53 = vld [vmem:[%s4130_s0 + $0xec] sm:$0xf0] }
  0x33   :  { %1521 = vmatmul.bf16.gmra.mxu2 %v2204_v54  ;;  %v2845_v54 = vld [vmem:[%s4130_s0 + $0xe4] sm:$0xf]  ;;  %v2292_v60 = vor.u32 %v2847_v53, %v2291_v52 }
  0x34   :  { %1690 = vmatmul.bf16.gmra.mxu3 %v2208_v55  ;;  %v2293_v55 = vld [vmem:[%s4130_s0 + $0xf0] sm:$0xf0]  ;;  %v2857_v53 = vld [vmem:[%s4130_s0 + $0x144] sm:$0xf] }
  0x35   :  { %v2296_v61 = vor.u32 %v2845_v54, %v2293_v55  ;;  %v2341_v54 = vld [vmem:[%s4130_s0 + $0x150] sm:$0xf0]  ;;  %v2347_v55 = vld [vmem:[%s4130_s0 + $0x148] sm:$0xf] }
  0x41   :  { %1188 = vmatmul.bf16.gmra.mxu0 %v2212_v0  ;;  %v2307_v0 = vld [vmem:[%s4130_s0 + $0x100] sm:$0xf] }
  0x42   :  { %1357 = vmatmul.bf16.gmra.mxu1 %v2216_v1  ;;  %v2851_v1 = vld [vmem:[%s4130_s0 + $0x10c] sm:$0xf0] }
  0x43   :  { %1526 = vmatmul.bf16.gmra.mxu2 %v2220_v2  ;;  %v2849_v2 = vld [vmem:[%s4130_s0 + $0x104] sm:$0xf]  ;;  %v2308_v8 = vor.u32 %v2851_v1, %v2307_v0 }
  0x44   :  { %1695 = vmatmul.bf16.gmra.mxu3 %v2224_v3  ;;  %v2309_v3 = vld [vmem:[%s4130_s0 + $0x110] sm:$0xf0] }
  0x45   :  { %v2312_v9 = vor.u32 %v2849_v2, %v2309_v3  ;;  %v2348_v3 = vor.u32 %v2860_v56, %v2347_v55 }
  0x51   :  { %1193 = vmatmul.bf16.gmra.mxu0 %v2228_v12  ;;  %v2316_v12 = vor.u32 %v2852_v5, %v2315_v4  ;;  %v2352_v4 = vor.u32 %v2858_v57, %v2349_v58 }
  0x52   :  { %1362 = vmatmul.bf16.gmra.mxu1 %v2232_v13  ;;  %v2320_v13 = vor.u32 %v2850_v6, %v2317_v7 }
  0x53   :  { %1531 = vmatmul.bf16.gmra.mxu2 %v2236_v14 }
  0x54   :  { %1700 = vmatmul.bf16.gmra.mxu3 %v2240_v15 }
  0x61   :  { %1198 = vmatmul.bf16.gmra.mxu0 %v2244_v24 }
  0x62   :  { %1367 = vmatmul.bf16.gmra.mxu1 %v2248_v25  ;;  %v2853_v25 = vld [vmem:[%s4130_s0 + $0x124] sm:$0xf] }
  0x63   :  { %1536 = vmatmul.bf16.gmra.mxu2 %v2252_v26  ;;  %v2325_v26 = vld [vmem:[%s4130_s0 + $0x130] sm:$0xf0] }
  0x64   :  { %1705 = vmatmul.bf16.gmra.mxu3 %v2256_v27  ;;  %v2331_v27 = vld [vmem:[%s4130_s0 + $0x128] sm:$0xf]  ;;  %v2328_v35 = vor.u32 %v2853_v25, %v2325_v26 }
  0x71   :  { %1203 = vmatmul.bf16.gmra.mxu0 %v2260_v36 }
  0x72   :  { %1372 = vmatmul.bf16.gmra.mxu1 %v2264_v37 }
  0x73   :  { %1541 = vmatmul.bf16.gmra.mxu2 %v2268_v38 }
  0x74   :  { %1710 = vmatmul.bf16.gmra.mxu3 %v2272_v39  ;;  %v2332_v39 = vor.u32 %v2856_v28, %v2331_v27 }
  0x81   :  { %1208 = vmatmul.bf16.gmra.mxu0 %v2276_v48 }
  0x82   :  { %1377 = vmatmul.bf16.gmra.mxu1 %v2280_v49 }
  0x83   :  { %1546 = vmatmul.bf16.gmra.mxu2 %v2284_v50  ;;  %v2339_v50 = vld [vmem:[%s4130_s0 + $0x140] sm:$0xf] }
  0x84   :  { %1715 = vmatmul.bf16.gmra.mxu3 %v2288_v51  ;;  %v2859_v51 = vld [vmem:[%s4130_s0 + $0x14c] sm:$0xf0] }
  0x91   :  { %1213 = vmatmul.bf16.gmra.mxu0 %v2292_v60 }
  0x92   :  { %1382 = vmatmul.bf16.gmra.mxu1 %v2296_v61 }
  0x93   :  { %1551 = vmatmul.bf16.gmra.mxu2 %v2300_v62  ;;  %v2340_v62 = vor.u32 %v2859_v51, %v2339_v50  ;;  %v2866_v50 = vld [vmem:[%s4130_s0 + $0x18c] sm:$0xf]  ;;  %v2381_v51 = vld [vmem:[%s4130_s0 + $0x198] sm:$0xf0] }
  0x94   :  { %1720 = vmatmul.bf16.gmra.mxu3 %v2304_v63  ;;  %v2344_v63 = vor.u32 %v2857_v53, %v2341_v54 }
  0x9e   :  { %v1179_v10 = vpop.f32.mrf.mxu0 }
  0x9f   :  { %v1348_v11 = vpop.f32.mrf.mxu1 }
  0xa0   :  { %v1349_v14 = vadd.f32 %v1348_v11, %v1179_v10 }
  0xa1   :  { %1218 = vmatmul.bf16.gmra.mxu0 %v2308_v8 }
  0xa2   :  { %1387 = vmatmul.bf16.gmra.mxu1 %v2312_v9 }
  0xa3   :  { %1556 = vmatmul.bf16.gmra.mxu2 %v2316_v12 }
  0xa4   :  { %1725 = vmatmul.bf16.gmra.mxu3 %v2320_v13 }
  0xa6   :  { %v1517_v15 = vpop.f32.mrf.mxu2  ;;  %v1181_v19 = vpop.f32.mrf.mxu0 }
  0xa7   :  { %v1686_v16 = vpop.f32.mrf.mxu3  ;;  %v1518_v17 = vadd.f32 %v1517_v15, %v1349_v14  ;;  %v1350_v20 = vpop.f32.mrf.mxu1  ;;  %v2355_v14 = vld [vmem:[%s4130_s0 + $0x160] sm:$0xf]  ;;  %v2863_v15 = vld [vmem:[%s4130_s0 + $0x16c] sm:$0xf0] }
  0xa8   :  { %v1351_v31 = vadd.f32 %v1350_v20, %v1181_v19  ;;  %v2357_v19 = vld [vmem:[%s4130_s0 + $0x170] sm:$0xf0]  ;;  %v2363_v20 = vld [vmem:[%s4130_s0 + $0x168] sm:$0xf]  ;;  %v2356_v27 = vor.u32 %v2863_v15, %v2355_v14  ;;  %v2870_v14 = vld [vmem:[%s4130_s0 + $0x1ac] sm:$0xf] }
  0xa9   :  { %v1687_v21 = vadd.f32 %v1686_v16, %v1518_v17  ;;  %v2861_v17 = vld [vmem:[%s4130_s0 + $0x164] sm:$0xf]  ;;  %v2397_v15 = vld [vmem:[%s4130_s0 + $0x1b8] sm:$0xf0] }
  0xaa   :  { %v2360_v28 = vor.u32 %v2861_v17, %v2357_v19 }
  0xab   :  { %v2045_v24 = vadd.f32 %v3314_v18, %v1687_v21  ;;  %v2864_v21 = vld [vmem:[%s4130_s0 + $0x174] sm:$0xf0] }
  0xad   :  { %2109 = vst [vmem:[%s4132_s3] sm:$0xff] %v2045_v24 }
  0xae   :  { %v1519_v32 = vpop.f32.mrf.mxu2  ;;  %v1184_v37 = vpop.f32.mrf.mxu0 }
  0xaf   :  { %v1688_v33 = vpop.f32.mrf.mxu3  ;;  %v1520_v36 = vadd.f32 %v1519_v32, %v1351_v31  ;;  %v1353_v38 = vpop.f32.mrf.mxu1  ;;  %v2364_v32 = vor.u32 %v2864_v21, %v2363_v20 }
  0xb0   :  { %v1354_v43 = vadd.f32 %v1353_v38, %v1184_v37 }
  0xb1   :  { %v1689_v41 = vadd.f32 %v1688_v33, %v1520_v36  ;;  %1223 = vmatmul.bf16.gmra.mxu0 %v2324_v34  ;;  %v2368_v33 = vor.u32 %v2862_v22, %v2365_v23 }
  0xb2   :  { %1392 = vmatmul.bf16.gmra.mxu1 %v2328_v35 }
  0xb3   :  { %v2046_v42 = vadd.f32 %v3314_v18, %v1689_v41  ;;  %1561 = vmatmul.bf16.gmra.mxu2 %v2332_v39 }
  0xb4   :  { %1730 = vmatmul.bf16.gmra.mxu3 %v2336_v40 }
  0xb5   :  { %2110 = vst [vmem:[%s4132_s3 + $0x8] sm:$0xff] %v2046_v42 }
  0xb6   :  { %v1522_v44 = vpop.f32.mrf.mxu2  ;;  %v1186_v47 = vpop.f32.mrf.mxu0 }
  0xb7   :  { %v1691_v45 = vpop.f32.mrf.mxu3  ;;  %v1523_v46 = vadd.f32 %v1522_v44, %v1354_v43  ;;  %v1355_v48 = vpop.f32.mrf.mxu1  ;;  %v2371_v43 = vld [vmem:[%s4130_s0 + $0x180] sm:$0xf]  ;;  %v2867_v44 = vld [vmem:[%s4130_s0 + $0x18c] sm:$0xf0] }
  0xb8   :  { %v1356_v59 = vadd.f32 %v1355_v48, %v1186_v47  ;;  %v2373_v47 = vld [vmem:[%s4130_s0 + $0x190] sm:$0xf0]  ;;  %v2379_v48 = vld [vmem:[%s4130_s0 + $0x188] sm:$0xf]  ;;  %v2372_v55 = vor.u32 %v2867_v44, %v2371_v43  ;;  %v2874_v43 = vld [vmem:[%s4130_s0 + $0x1cc] sm:$0xf] }
  0xb9   :  { %v1692_v49 = vadd.f32 %v1691_v45, %v1523_v46  ;;  %v2865_v46 = vld [vmem:[%s4130_s0 + $0x184] sm:$0xf]  ;;  %v2413_v44 = vld [vmem:[%s4130_s0 + $0x1d8] sm:$0xf0] }
  0xba   :  { %v2376_v56 = vor.u32 %v2865_v46, %v2373_v47 }
  0xbb   :  { %v2047_v52 = vadd.f32 %v3314_v18, %v1692_v49  ;;  %v2868_v49 = vld [vmem:[%s4130_s0 + $0x194] sm:$0xf0] }
  0xbd   :  { %2111 = vst [vmem:[%s4132_s3 + $0x10] sm:$0xff] %v2047_v52 }
  0xbe   :  { %v1524_v60 = vpop.f32.mrf.mxu2  ;;  %v1189_v1 = vpop.f32.mrf.mxu0 }
  0xbf   :  { %v1693_v61 = vpop.f32.mrf.mxu3  ;;  %v1525_v0 = vadd.f32 %v1524_v60, %v1356_v59  ;;  %v1358_v2 = vpop.f32.mrf.mxu1  ;;  %v2380_v60 = vor.u32 %v2868_v49, %v2379_v48 }
  0xc0   :  { %v1359_v7 = vadd.f32 %v1358_v2, %v1189_v1 }
  0xc1   :  { %v1694_v5 = vadd.f32 %v1693_v61, %v1525_v0  ;;  %1228 = vmatmul.bf16.gmra.mxu0 %v2340_v62  ;;  %v2384_v61 = vor.u32 %v2866_v50, %v2381_v51 }
  0xc2   :  { %1397 = vmatmul.bf16.gmra.mxu1 %v2344_v63 }
  0xc3   :  { %v2048_v6 = vadd.f32 %v3314_v18, %v1694_v5  ;;  %1566 = vmatmul.bf16.gmra.mxu2 %v2348_v3 }
  0xc4   :  { %1735 = vmatmul.bf16.gmra.mxu3 %v2352_v4 }
  0xc5   :  { %2112 = vst [vmem:[%s4132_s3 + $0x18] sm:$0xff] %v2048_v6 }
  0xc6   :  { %v1527_v8 = vpop.f32.mrf.mxu2  ;;  %v1191_v11 = vpop.f32.mrf.mxu0 }
  0xc7   :  { %v1696_v9 = vpop.f32.mrf.mxu3  ;;  %v1528_v10 = vadd.f32 %v1527_v8, %v1359_v7  ;;  %v1360_v12 = vpop.f32.mrf.mxu1  ;;  %v2387_v7 = vld [vmem:[%s4130_s0 + $0x1a0] sm:$0xf]  ;;  %v2871_v8 = vld [vmem:[%s4130_s0 + $0x1ac] sm:$0xf0] }
  0xc8   :  { %v1361_v24 = vadd.f32 %v1360_v12, %v1191_v11  ;;  %v2389_v11 = vld [vmem:[%s4130_s0 + $0x1b0] sm:$0xf0]  ;;  %v2395_v12 = vld [vmem:[%s4130_s0 + $0x1a8] sm:$0xf]  ;;  %v2388_v20 = vor.u32 %v2871_v8, %v2387_v7  ;;  %v2878_v7 = vld [vmem:[%s4130_s0 + $0x1ec] sm:$0xf] }
  0xc9   :  { %v1697_v13 = vadd.f32 %v1696_v9, %v1528_v10  ;;  %v2869_v10 = vld [vmem:[%s4130_s0 + $0x1a4] sm:$0xf]  ;;  %v2429_v8 = vld [vmem:[%s4130_s0 + $0x1f8] sm:$0xf0] }
  0xca   :  { %v2392_v21 = vor.u32 %v2869_v10, %v2389_v11 }
  0xcb   :  { %v2049_v16 = vadd.f32 %v3314_v18, %v1697_v13  ;;  %v2872_v13 = vld [vmem:[%s4130_s0 + $0x1b4] sm:$0xf0] }
  0xcd   :  { %2113 = vst [vmem:[%s4132_s3 + $0x20] sm:$0xff] %v2049_v16 }
  0xce   :  { %v1529_v25 = vpop.f32.mrf.mxu2  ;;  %v1194_v30 = vpop.f32.mrf.mxu0 }
  0xcf   :  { %v1698_v26 = vpop.f32.mrf.mxu3  ;;  %v1530_v29 = vadd.f32 %v1529_v25, %v1361_v24  ;;  %v1363_v31 = vpop.f32.mrf.mxu1  ;;  %v2396_v25 = vor.u32 %v2872_v13, %v2395_v12 }
  0xd0   :  { %v1364_v36 = vadd.f32 %v1363_v31, %v1194_v30 }
  0xd1   :  { %v1699_v34 = vadd.f32 %v1698_v26, %v1530_v29  ;;  %1233 = vmatmul.bf16.gmra.mxu0 %v2356_v27  ;;  %v2400_v26 = vor.u32 %v2870_v14, %v2397_v15 }
  0xd2   :  { %1402 = vmatmul.bf16.gmra.mxu1 %v2360_v28 }
  0xd3   :  { %v2050_v35 = vadd.f32 %v3314_v18, %v1699_v34  ;;  %1571 = vmatmul.bf16.gmra.mxu2 %v2364_v32 }
  0xd4   :  { %1740 = vmatmul.bf16.gmra.mxu3 %v2368_v33 }
  0xd5   :  { %2114 = vst [vmem:[%s4132_s3 + $0x28] sm:$0xff] %v2050_v35 }
  0xd6   :  { %v1532_v37 = vpop.f32.mrf.mxu2  ;;  %v1196_v40 = vpop.f32.mrf.mxu0 }
  0xd7   :  { %v1701_v38 = vpop.f32.mrf.mxu3  ;;  %v1533_v39 = vadd.f32 %v1532_v37, %v1364_v36  ;;  %v1365_v41 = vpop.f32.mrf.mxu1  ;;  %v2403_v36 = vld [vmem:[%s4130_s0 + $0x1c0] sm:$0xf]  ;;  %v2875_v37 = vld [vmem:[%s4130_s0 + $0x1cc] sm:$0xf0] }
  0xd8   :  { %v1366_v52 = vadd.f32 %v1365_v41, %v1196_v40  ;;  %v2405_v40 = vld [vmem:[%s4130_s0 + $0x1d0] sm:$0xf0]  ;;  %v2411_v41 = vld [vmem:[%s4130_s0 + $0x1c8] sm:$0xf]  ;;  %v2404_v48 = vor.u32 %v2875_v37, %v2403_v36  ;;  %v2882_v36 = vld [vmem:[%s4130_s0 + $0x20c] sm:$0xf] }
  0xd9   :  { %v1702_v42 = vadd.f32 %v1701_v38, %v1533_v39  ;;  %v2873_v39 = vld [vmem:[%s4130_s0 + $0x1c4] sm:$0xf]  ;;  %v2445_v37 = vld [vmem:[%s4130_s0 + $0x218] sm:$0xf0] }
  0xda   :  { %v2408_v49 = vor.u32 %v2873_v39, %v2405_v40 }
  0xdb   :  { %v2051_v45 = vadd.f32 %v3314_v18, %v1702_v42  ;;  %v2876_v42 = vld [vmem:[%s4130_s0 + $0x1d4] sm:$0xf0] }
  0xdd   :  { %2115 = vst [vmem:[%s4132_s3 + $0x30] sm:$0xff] %v2051_v45 }
  0xde   :  { %v1534_v53 = vpop.f32.mrf.mxu2  ;;  %v1199_v58 = vpop.f32.mrf.mxu0 }
  0xdf   :  { %v1703_v54 = vpop.f32.mrf.mxu3  ;;  %v1535_v57 = vadd.f32 %v1534_v53, %v1366_v52  ;;  %v1368_v59 = vpop.f32.mrf.mxu1  ;;  %v2412_v53 = vor.u32 %v2876_v42, %v2411_v41 }
  0xe0   :  { %v1369_v0 = vadd.f32 %v1368_v59, %v1199_v58 }
  0xe1   :  { %v1704_v62 = vadd.f32 %v1703_v54, %v1535_v57  ;;  %1238 = vmatmul.bf16.gmra.mxu0 %v2372_v55  ;;  %v2416_v54 = vor.u32 %v2874_v43, %v2413_v44 }
  0xe2   :  { %1407 = vmatmul.bf16.gmra.mxu1 %v2376_v56 }
  0xe3   :  { %v2052_v63 = vadd.f32 %v3314_v18, %v1704_v62  ;;  %1576 = vmatmul.bf16.gmra.mxu2 %v2380_v60 }
  0xe4   :  { %1745 = vmatmul.bf16.gmra.mxu3 %v2384_v61 }
  0xe5   :  { %2116 = vst [vmem:[%s4132_s3 + $0x38] sm:$0xff] %v2052_v63 }
  0xe6   :  { %v1537_v1 = vpop.f32.mrf.mxu2  ;;  %v1201_v4 = vpop.f32.mrf.mxu0 }
  0xe7   :  { %v1706_v2 = vpop.f32.mrf.mxu3  ;;  %v1538_v3 = vadd.f32 %v1537_v1, %v1369_v0  ;;  %v1370_v5 = vpop.f32.mrf.mxu1  ;;  %v2419_v0 = vld [vmem:[%s4130_s0 + $0x1e0] sm:$0xf]  ;;  %v2879_v1 = vld [vmem:[%s4130_s0 + $0x1ec] sm:$0xf0] }
  0xe8   :  { %v1371_v16 = vadd.f32 %v1370_v5, %v1201_v4  ;;  %v2421_v4 = vld [vmem:[%s4130_s0 + $0x1f0] sm:$0xf0]  ;;  %v2427_v5 = vld [vmem:[%s4130_s0 + $0x1e8] sm:$0xf]  ;;  %v2420_v12 = vor.u32 %v2879_v1, %v2419_v0  ;;  %v2886_v0 = vld [vmem:[%s4130_s0 + $0x22c] sm:$0xf] }
  0xe9   :  { %v1707_v6 = vadd.f32 %v1706_v2, %v1538_v3  ;;  %v2877_v3 = vld [vmem:[%s4130_s0 + $0x1e4] sm:$0xf]  ;;  %v2461_v1 = vld [vmem:[%s4130_s0 + $0x238] sm:$0xf0] }
  0xea   :  { %v2424_v13 = vor.u32 %v2877_v3, %v2421_v4 }
  0xeb   :  { %v2053_v9 = vadd.f32 %v3314_v18, %v1707_v6  ;;  %v2880_v6 = vld [vmem:[%s4130_s0 + $0x1f4] sm:$0xf0] }
  0xed   :  { %2117 = vst [vmem:[%s4132_s3 + $0x40] sm:$0xff] %v2053_v9 }
  0xee   :  { %v1539_v17 = vpop.f32.mrf.mxu2  ;;  %v1204_v23 = vpop.f32.mrf.mxu0 }
  0xef   :  { %v1708_v19 = vpop.f32.mrf.mxu3  ;;  %v1540_v22 = vadd.f32 %v1539_v17, %v1371_v16  ;;  %v1373_v24 = vpop.f32.mrf.mxu1  ;;  %v2428_v17 = vor.u32 %v2880_v6, %v2427_v5 }
  0xf0   :  { %v1374_v29 = vadd.f32 %v1373_v24, %v1204_v23 }
  0xf1   :  { %v1709_v27 = vadd.f32 %v1708_v19, %v1540_v22  ;;  %1243 = vmatmul.bf16.gmra.mxu0 %v2388_v20  ;;  %v2432_v19 = vor.u32 %v2878_v7, %v2429_v8 }
  0xf2   :  { %1412 = vmatmul.bf16.gmra.mxu1 %v2392_v21 }
  0xf3   :  { %v2054_v28 = vadd.f32 %v3314_v18, %v1709_v27  ;;  %1581 = vmatmul.bf16.gmra.mxu2 %v2396_v25 }
  0xf4   :  { %1750 = vmatmul.bf16.gmra.mxu3 %v2400_v26 }
  0xf5   :  { %2118 = vst [vmem:[%s4132_s3 + $0x48] sm:$0xff] %v2054_v28 }
  0xf6   :  { %v1542_v30 = vpop.f32.mrf.mxu2  ;;  %v1206_v33 = vpop.f32.mrf.mxu0 }
  0xf7   :  { %v1711_v31 = vpop.f32.mrf.mxu3  ;;  %v1543_v32 = vadd.f32 %v1542_v30, %v1374_v29  ;;  %v1375_v34 = vpop.f32.mrf.mxu1  ;;  %v2435_v29 = vld [vmem:[%s4130_s0 + $0x200] sm:$0xf]  ;;  %v2883_v30 = vld [vmem:[%s4130_s0 + $0x20c] sm:$0xf0] }
  0xf8   :  { %v1376_v45 = vadd.f32 %v1375_v34, %v1206_v33  ;;  %v2437_v33 = vld [vmem:[%s4130_s0 + $0x210] sm:$0xf0]  ;;  %v2443_v34 = vld [vmem:[%s4130_s0 + $0x208] sm:$0xf]  ;;  %v2436_v41 = vor.u32 %v2883_v30, %v2435_v29  ;;  %v2890_v29 = vld [vmem:[%s4130_s0 + $0x24c] sm:$0xf] }
  0xf9   :  { %v1712_v35 = vadd.f32 %v1711_v31, %v1543_v32  ;;  %v2881_v32 = vld [vmem:[%s4130_s0 + $0x204] sm:$0xf]  ;;  %v2477_v30 = vld [vmem:[%s4130_s0 + $0x258] sm:$0xf0] }
  0xfa   :  { %v2440_v42 = vor.u32 %v2881_v32, %v2437_v33 }
  0xfb   :  { %v2055_v38 = vadd.f32 %v3314_v18, %v1712_v35  ;;  %v2884_v35 = vld [vmem:[%s4130_s0 + $0x214] sm:$0xf0] }
  0xfd   :  { %2119 = vst [vmem:[%s4132_s3 + $0x50] sm:$0xff] %v2055_v38 }
  0xfe   :  { %v1544_v46 = vpop.f32.mrf.mxu2  ;;  %v1209_v51 = vpop.f32.mrf.mxu0 }
  0xff   :  { %v1713_v47 = vpop.f32.mrf.mxu3  ;;  %v1545_v50 = vadd.f32 %v1544_v46, %v1376_v45  ;;  %v1378_v52 = vpop.f32.mrf.mxu1  ;;  %v2444_v46 = vor.u32 %v2884_v35, %v2443_v34 }
 0x100   :  { %v1379_v57 = vadd.f32 %v1378_v52, %v1209_v51 }
 0x101   :  { %v1714_v55 = vadd.f32 %v1713_v47, %v1545_v50  ;;  %1248 = vmatmul.bf16.gmra.mxu0 %v2404_v48  ;;  %v2448_v47 = vor.u32 %v2882_v36, %v2445_v37 }
 0x102   :  { %1417 = vmatmul.bf16.gmra.mxu1 %v2408_v49 }
 0x103   :  { %v2056_v56 = vadd.f32 %v3314_v18, %v1714_v55  ;;  %1586 = vmatmul.bf16.gmra.mxu2 %v2412_v53 }
 0x104   :  { %1755 = vmatmul.bf16.gmra.mxu3 %v2416_v54 }
 0x105   :  { %2120 = vst [vmem:[%s4132_s3 + $0x58] sm:$0xff] %v2056_v56 }
 0x106   :  { %v1547_v58 = vpop.f32.mrf.mxu2  ;;  %v1211_v61 = vpop.f32.mrf.mxu0 }
 0x107   :  { %v1716_v59 = vpop.f32.mrf.mxu3  ;;  %v1548_v60 = vadd.f32 %v1547_v58, %v1379_v57  ;;  %v1380_v62 = vpop.f32.mrf.mxu1  ;;  %v2451_v57 = vld [vmem:[%s4130_s0 + $0x220] sm:$0xf]  ;;  %v2887_v58 = vld [vmem:[%s4130_s0 + $0x22c] sm:$0xf0] }
 0x108   :  { %v1381_v9 = vadd.f32 %v1380_v62, %v1211_v61  ;;  %v2453_v61 = vld [vmem:[%s4130_s0 + $0x230] sm:$0xf0]  ;;  %v2459_v62 = vld [vmem:[%s4130_s0 + $0x228] sm:$0xf]  ;;  %v2452_v5 = vor.u32 %v2887_v58, %v2451_v57  ;;  %v2894_v57 = vld [vmem:[%s4130_s0 + $0x26c] sm:$0xf] }
 0x109   :  { %v1717_v63 = vadd.f32 %v1716_v59, %v1548_v60  ;;  %v2885_v60 = vld [vmem:[%s4130_s0 + $0x224] sm:$0xf]  ;;  %v2493_v58 = vld [vmem:[%s4130_s0 + $0x278] sm:$0xf0] }
 0x10a   :  { %v2456_v6 = vor.u32 %v2885_v60, %v2453_v61 }
 0x10b   :  { %v2057_v2 = vadd.f32 %v3314_v18, %v1717_v63  ;;  %v2888_v63 = vld [vmem:[%s4130_s0 + $0x234] sm:$0xf0] }
 0x10d   :  { %2121 = vst [vmem:[%s4132_s3 + $0x60] sm:$0xff] %v2057_v2 }
 0x10e   :  { %v1549_v10 = vpop.f32.mrf.mxu2  ;;  %v1214_v15 = vpop.f32.mrf.mxu0 }
 0x10f   :  { %v1718_v11 = vpop.f32.mrf.mxu3  ;;  %v1550_v14 = vadd.f32 %v1549_v10, %v1381_v9  ;;  %v1383_v16 = vpop.f32.mrf.mxu1  ;;  %v2460_v10 = vor.u32 %v2888_v63, %v2459_v62 }
 0x110   :  { %v1384_v22 = vadd.f32 %v1383_v16, %v1214_v15 }
 0x111   :  { %v1719_v20 = vadd.f32 %v1718_v11, %v1550_v14  ;;  %1253 = vmatmul.bf16.gmra.mxu0 %v2420_v12  ;;  %v2464_v11 = vor.u32 %v2886_v0, %v2461_v1 }
 0x112   :  { %1422 = vmatmul.bf16.gmra.mxu1 %v2424_v13 }
 0x113   :  { %v2058_v21 = vadd.f32 %v3314_v18, %v1719_v20  ;;  %1591 = vmatmul.bf16.gmra.mxu2 %v2428_v17 }
 0x114   :  { %1760 = vmatmul.bf16.gmra.mxu3 %v2432_v19 }
 0x115   :  { %2122 = vst [vmem:[%s4132_s3 + $0x68] sm:$0xff] %v2058_v21 }
 0x116   :  { %v1552_v23 = vpop.f32.mrf.mxu2  ;;  %v1216_v26 = vpop.f32.mrf.mxu0 }
 0x117   :  { %v1721_v24 = vpop.f32.mrf.mxu3  ;;  %v1553_v25 = vadd.f32 %v1552_v23, %v1384_v22  ;;  %v1385_v27 = vpop.f32.mrf.mxu1  ;;  %v2467_v22 = vld [vmem:[%s4130_s0 + $0x240] sm:$0xf]  ;;  %v2891_v23 = vld [vmem:[%s4130_s0 + $0x24c] sm:$0xf0] }
 0x118   :  { %v1386_v38 = vadd.f32 %v1385_v27, %v1216_v26  ;;  %v2469_v26 = vld [vmem:[%s4130_s0 + $0x250] sm:$0xf0]  ;;  %v2475_v27 = vld [vmem:[%s4130_s0 + $0x248] sm:$0xf]  ;;  %v2468_v34 = vor.u32 %v2891_v23, %v2467_v22  ;;  %v2898_v22 = vld [vmem:[%s4130_s0 + $0x28c] sm:$0xf] }
 0x119   :  { %v1722_v28 = vadd.f32 %v1721_v24, %v1553_v25  ;;  %v2889_v25 = vld [vmem:[%s4130_s0 + $0x244] sm:$0xf]  ;;  %v2509_v23 = vld [vmem:[%s4130_s0 + $0x298] sm:$0xf0] }
 0x11a   :  { %v2472_v35 = vor.u32 %v2889_v25, %v2469_v26 }
 0x11b   :  { %v2059_v31 = vadd.f32 %v3314_v18, %v1722_v28  ;;  %v2892_v28 = vld [vmem:[%s4130_s0 + $0x254] sm:$0xf0] }
 0x11d   :  { %2123 = vst [vmem:[%s4132_s3 + $0x70] sm:$0xff] %v2059_v31 }
 0x11e   :  { %v1554_v39 = vpop.f32.mrf.mxu2  ;;  %v1219_v44 = vpop.f32.mrf.mxu0 }
 0x11f   :  { %v1723_v40 = vpop.f32.mrf.mxu3  ;;  %v1555_v43 = vadd.f32 %v1554_v39, %v1386_v38  ;;  %v1388_v45 = vpop.f32.mrf.mxu1  ;;  %v2476_v39 = vor.u32 %v2892_v28, %v2475_v27 }
 0x120   :  { %v1389_v50 = vadd.f32 %v1388_v45, %v1219_v44 }
 0x121   :  { %v1724_v48 = vadd.f32 %v1723_v40, %v1555_v43  ;;  %1258 = vmatmul.bf16.gmra.mxu0 %v2436_v41  ;;  %v2480_v40 = vor.u32 %v2890_v29, %v2477_v30 }
 0x122   :  { %1427 = vmatmul.bf16.gmra.mxu1 %v2440_v42 }
 0x123   :  { %v2060_v49 = vadd.f32 %v3314_v18, %v1724_v48  ;;  %1596 = vmatmul.bf16.gmra.mxu2 %v2444_v46 }
 0x124   :  { %1765 = vmatmul.bf16.gmra.mxu3 %v2448_v47 }
 0x125   :  { %2124 = vst [vmem:[%s4132_s3 + $0x78] sm:$0xff] %v2060_v49 }
 0x126   :  { %v1557_v51 = vpop.f32.mrf.mxu2  ;;  %v1221_v54 = vpop.f32.mrf.mxu0 }
 0x127   :  { %v1726_v52 = vpop.f32.mrf.mxu3  ;;  %v1558_v53 = vadd.f32 %v1557_v51, %v1389_v50  ;;  %v1390_v55 = vpop.f32.mrf.mxu1  ;;  %v2483_v50 = vld [vmem:[%s4130_s0 + $0x260] sm:$0xf]  ;;  %v2895_v51 = vld [vmem:[%s4130_s0 + $0x26c] sm:$0xf0] }
 0x128   :  { %v1391_v2 = vadd.f32 %v1390_v55, %v1221_v54  ;;  %v2485_v54 = vld [vmem:[%s4130_s0 + $0x270] sm:$0xf0]  ;;  %v2491_v55 = vld [vmem:[%s4130_s0 + $0x268] sm:$0xf]  ;;  %v2484_v62 = vor.u32 %v2895_v51, %v2483_v50  ;;  %v2902_v50 = vld [vmem:[%s4130_s0 + $0x2ac] sm:$0xf] }
 0x129   :  { %v1727_v56 = vadd.f32 %v1726_v52, %v1558_v53  ;;  %v2893_v53 = vld [vmem:[%s4130_s0 + $0x264] sm:$0xf]  ;;  %v2525_v51 = vld [vmem:[%s4130_s0 + $0x2b8] sm:$0xf0] }
 0x12a   :  { %v2488_v63 = vor.u32 %v2893_v53, %v2485_v54 }
 0x12b   :  { %v2061_v59 = vadd.f32 %v3314_v18, %v1727_v56  ;;  %v2896_v56 = vld [vmem:[%s4130_s0 + $0x274] sm:$0xf0] }
 0x12d   :  { %2125 = vst [vmem:[%s4132_s3 + $0x80] sm:$0xff] %v2061_v59 }
 0x12e   :  { %v1559_v3 = vpop.f32.mrf.mxu2  ;;  %v1224_v8 = vpop.f32.mrf.mxu0 }
 0x12f   :  { %v1728_v4 = vpop.f32.mrf.mxu3  ;;  %v1560_v7 = vadd.f32 %v1559_v3, %v1391_v2  ;;  %v1393_v9 = vpop.f32.mrf.mxu1  ;;  %v2492_v3 = vor.u32 %v2896_v56, %v2491_v55 }
 0x130   :  { %v1394_v14 = vadd.f32 %v1393_v9, %v1224_v8 }
 0x131   :  { %v1729_v12 = vadd.f32 %v1728_v4, %v1560_v7  ;;  %1263 = vmatmul.bf16.gmra.mxu0 %v2452_v5  ;;  %v2496_v4 = vor.u32 %v2894_v57, %v2493_v58 }
 0x132   :  { %1432 = vmatmul.bf16.gmra.mxu1 %v2456_v6 }
 0x133   :  { %v2062_v13 = vadd.f32 %v3314_v18, %v1729_v12  ;;  %1601 = vmatmul.bf16.gmra.mxu2 %v2460_v10 }
 0x134   :  { %1770 = vmatmul.bf16.gmra.mxu3 %v2464_v11 }
 0x135   :  { %2126 = vst [vmem:[%s4132_s3 + $0x88] sm:$0xff] %v2062_v13 }
 0x136   :  { %v1562_v15 = vpop.f32.mrf.mxu2  ;;  %v1226_v19 = vpop.f32.mrf.mxu0 }
 0x137   :  { %v1731_v16 = vpop.f32.mrf.mxu3  ;;  %v1563_v17 = vadd.f32 %v1562_v15, %v1394_v14  ;;  %v1395_v20 = vpop.f32.mrf.mxu1  ;;  %v2499_v14 = vld [vmem:[%s4130_s0 + $0x280] sm:$0xf]  ;;  %v2899_v15 = vld [vmem:[%s4130_s0 + $0x28c] sm:$0xf0] }
 0x138   :  { %v1396_v31 = vadd.f32 %v1395_v20, %v1226_v19  ;;  %v2501_v19 = vld [vmem:[%s4130_s0 + $0x290] sm:$0xf0]  ;;  %v2507_v20 = vld [vmem:[%s4130_s0 + $0x288] sm:$0xf]  ;;  %v2500_v27 = vor.u32 %v2899_v15, %v2499_v14  ;;  %v2906_v14 = vld [vmem:[%s4130_s0 + $0x2cc] sm:$0xf] }
 0x139   :  { %v1732_v21 = vadd.f32 %v1731_v16, %v1563_v17  ;;  %v2897_v17 = vld [vmem:[%s4130_s0 + $0x284] sm:$0xf]  ;;  %v2541_v15 = vld [vmem:[%s4130_s0 + $0x2d8] sm:$0xf0] }
 0x13a   :  { %v2504_v28 = vor.u32 %v2897_v17, %v2501_v19 }
 0x13b   :  { %v2063_v24 = vadd.f32 %v3314_v18, %v1732_v21  ;;  %v2900_v21 = vld [vmem:[%s4130_s0 + $0x294] sm:$0xf0] }
 0x13d   :  { %2127 = vst [vmem:[%s4132_s3 + $0x90] sm:$0xff] %v2063_v24 }
 0x13e   :  { %v1564_v32 = vpop.f32.mrf.mxu2  ;;  %v1229_v37 = vpop.f32.mrf.mxu0 }
 0x13f   :  { %v1733_v33 = vpop.f32.mrf.mxu3  ;;  %v1565_v36 = vadd.f32 %v1564_v32, %v1396_v31  ;;  %v1398_v38 = vpop.f32.mrf.mxu1  ;;  %v2508_v32 = vor.u32 %v2900_v21, %v2507_v20 }
 0x140   :  { %v1399_v43 = vadd.f32 %v1398_v38, %v1229_v37 }
 0x141   :  { %v1734_v41 = vadd.f32 %v1733_v33, %v1565_v36  ;;  %1268 = vmatmul.bf16.gmra.mxu0 %v2468_v34  ;;  %v2512_v33 = vor.u32 %v2898_v22, %v2509_v23 }
 0x142   :  { %1437 = vmatmul.bf16.gmra.mxu1 %v2472_v35 }
 0x143   :  { %v2064_v42 = vadd.f32 %v3314_v18, %v1734_v41  ;;  %1606 = vmatmul.bf16.gmra.mxu2 %v2476_v39 }
 0x144   :  { %1775 = vmatmul.bf16.gmra.mxu3 %v2480_v40 }
 0x145   :  { %2128 = vst [vmem:[%s4132_s3 + $0x98] sm:$0xff] %v2064_v42 }
 0x146   :  { %v1567_v44 = vpop.f32.mrf.mxu2  ;;  %v1231_v47 = vpop.f32.mrf.mxu0 }
 0x147   :  { %v1736_v45 = vpop.f32.mrf.mxu3  ;;  %v1568_v46 = vadd.f32 %v1567_v44, %v1399_v43  ;;  %v1400_v48 = vpop.f32.mrf.mxu1  ;;  %v2515_v43 = vld [vmem:[%s4130_s0 + $0x2a0] sm:$0xf]  ;;  %v2903_v44 = vld [vmem:[%s4130_s0 + $0x2ac] sm:$0xf0] }
 0x148   :  { %v1401_v59 = vadd.f32 %v1400_v48, %v1231_v47  ;;  %v2517_v47 = vld [vmem:[%s4130_s0 + $0x2b0] sm:$0xf0]  ;;  %v2523_v48 = vld [vmem:[%s4130_s0 + $0x2a8] sm:$0xf]  ;;  %v2516_v55 = vor.u32 %v2903_v44, %v2515_v43  ;;  %v2910_v43 = vld [vmem:[%s4130_s0 + $0x2ec] sm:$0xf] }
 0x149   :  { %v1737_v49 = vadd.f32 %v1736_v45, %v1568_v46  ;;  %v2901_v46 = vld [vmem:[%s4130_s0 + $0x2a4] sm:$0xf]  ;;  %v2557_v44 = vld [vmem:[%s4130_s0 + $0x2f8] sm:$0xf0] }
 0x14a   :  { %v2520_v56 = vor.u32 %v2901_v46, %v2517_v47 }
 0x14b   :  { %v2065_v52 = vadd.f32 %v3314_v18, %v1737_v49  ;;  %v2904_v49 = vld [vmem:[%s4130_s0 + $0x2b4] sm:$0xf0] }
 0x14d   :  { %2129 = vst [vmem:[%s4132_s3 + $0xa0] sm:$0xff] %v2065_v52 }
 0x14e   :  { %v1569_v60 = vpop.f32.mrf.mxu2  ;;  %v1234_v1 = vpop.f32.mrf.mxu0 }
 0x14f   :  { %v1738_v61 = vpop.f32.mrf.mxu3  ;;  %v1570_v0 = vadd.f32 %v1569_v60, %v1401_v59  ;;  %v1403_v2 = vpop.f32.mrf.mxu1  ;;  %v2524_v60 = vor.u32 %v2904_v49, %v2523_v48 }
 0x150   :  { %v1404_v7 = vadd.f32 %v1403_v2, %v1234_v1 }
 0x151   :  { %v1739_v5 = vadd.f32 %v1738_v61, %v1570_v0  ;;  %1273 = vmatmul.bf16.gmra.mxu0 %v2484_v62  ;;  %v2528_v61 = vor.u32 %v2902_v50, %v2525_v51 }
 0x152   :  { %1442 = vmatmul.bf16.gmra.mxu1 %v2488_v63 }
 0x153   :  { %v2066_v6 = vadd.f32 %v3314_v18, %v1739_v5  ;;  %1611 = vmatmul.bf16.gmra.mxu2 %v2492_v3 }
 0x154   :  { %1780 = vmatmul.bf16.gmra.mxu3 %v2496_v4 }
 0x155   :  { %2130 = vst [vmem:[%s4132_s3 + $0xa8] sm:$0xff] %v2066_v6 }
 0x156   :  { %v1572_v8 = vpop.f32.mrf.mxu2  ;;  %v1236_v11 = vpop.f32.mrf.mxu0 }
 0x157   :  { %v1741_v9 = vpop.f32.mrf.mxu3  ;;  %v1573_v10 = vadd.f32 %v1572_v8, %v1404_v7  ;;  %v1405_v12 = vpop.f32.mrf.mxu1  ;;  %v2531_v7 = vld [vmem:[%s4130_s0 + $0x2c0] sm:$0xf]  ;;  %v2907_v8 = vld [vmem:[%s4130_s0 + $0x2cc] sm:$0xf0] }
 0x158   :  { %v1406_v24 = vadd.f32 %v1405_v12, %v1236_v11  ;;  %v2533_v11 = vld [vmem:[%s4130_s0 + $0x2d0] sm:$0xf0]  ;;  %v2539_v12 = vld [vmem:[%s4130_s0 + $0x2c8] sm:$0xf]  ;;  %v2532_v20 = vor.u32 %v2907_v8, %v2531_v7  ;;  %v2914_v7 = vld [vmem:[%s4130_s0 + $0x30c] sm:$0xf] }
 0x159   :  { %v1742_v13 = vadd.f32 %v1741_v9, %v1573_v10  ;;  %v2905_v10 = vld [vmem:[%s4130_s0 + $0x2c4] sm:$0xf]  ;;  %v2573_v8 = vld [vmem:[%s4130_s0 + $0x318] sm:$0xf0] }
 0x15a   :  { %v2536_v21 = vor.u32 %v2905_v10, %v2533_v11 }
 0x15b   :  { %v2067_v16 = vadd.f32 %v3314_v18, %v1742_v13  ;;  %v2908_v13 = vld [vmem:[%s4130_s0 + $0x2d4] sm:$0xf0] }
 0x15d   :  { %2131 = vst [vmem:[%s4132_s3 + $0xb0] sm:$0xff] %v2067_v16 }
 0x15e   :  { %v1574_v25 = vpop.f32.mrf.mxu2  ;;  %v1239_v30 = vpop.f32.mrf.mxu0 }
 0x15f   :  { %v1743_v26 = vpop.f32.mrf.mxu3  ;;  %v1575_v29 = vadd.f32 %v1574_v25, %v1406_v24  ;;  %v1408_v31 = vpop.f32.mrf.mxu1  ;;  %v2540_v25 = vor.u32 %v2908_v13, %v2539_v12 }
 0x160   :  { %v1409_v36 = vadd.f32 %v1408_v31, %v1239_v30 }
 0x161   :  { %v1744_v34 = vadd.f32 %v1743_v26, %v1575_v29  ;;  %1278 = vmatmul.bf16.gmra.mxu0 %v2500_v27  ;;  %v2544_v26 = vor.u32 %v2906_v14, %v2541_v15 }
 0x162   :  { %1447 = vmatmul.bf16.gmra.mxu1 %v2504_v28 }
 0x163   :  { %v2068_v35 = vadd.f32 %v3314_v18, %v1744_v34  ;;  %1616 = vmatmul.bf16.gmra.mxu2 %v2508_v32 }
 0x164   :  { %1785 = vmatmul.bf16.gmra.mxu3 %v2512_v33 }
 0x165   :  { %2132 = vst [vmem:[%s4132_s3 + $0xb8] sm:$0xff] %v2068_v35 }
 0x166   :  { %v1577_v37 = vpop.f32.mrf.mxu2  ;;  %v1241_v40 = vpop.f32.mrf.mxu0 }
 0x167   :  { %v1746_v38 = vpop.f32.mrf.mxu3  ;;  %v1578_v39 = vadd.f32 %v1577_v37, %v1409_v36  ;;  %v1410_v41 = vpop.f32.mrf.mxu1  ;;  %v2547_v36 = vld [vmem:[%s4130_s0 + $0x2e0] sm:$0xf]  ;;  %v2911_v37 = vld [vmem:[%s4130_s0 + $0x2ec] sm:$0xf0] }
 0x168   :  { %v1411_v52 = vadd.f32 %v1410_v41, %v1241_v40  ;;  %v2549_v40 = vld [vmem:[%s4130_s0 + $0x2f0] sm:$0xf0]  ;;  %v2555_v41 = vld [vmem:[%s4130_s0 + $0x2e8] sm:$0xf]  ;;  %v2548_v48 = vor.u32 %v2911_v37, %v2547_v36  ;;  %v2918_v36 = vld [vmem:[%s4130_s0 + $0x32c] sm:$0xf] }
 0x169   :  { %v1747_v42 = vadd.f32 %v1746_v38, %v1578_v39  ;;  %v2909_v39 = vld [vmem:[%s4130_s0 + $0x2e4] sm:$0xf]  ;;  %v2589_v37 = vld [vmem:[%s4130_s0 + $0x338] sm:$0xf0] }
 0x16a   :  { %v2552_v49 = vor.u32 %v2909_v39, %v2549_v40 }
 0x16b   :  { %v2069_v45 = vadd.f32 %v3314_v18, %v1747_v42  ;;  %v2912_v42 = vld [vmem:[%s4130_s0 + $0x2f4] sm:$0xf0] }
 0x16d   :  { %2133 = vst [vmem:[%s4132_s3 + $0xc0] sm:$0xff] %v2069_v45 }
 0x16e   :  { %v1579_v53 = vpop.f32.mrf.mxu2  ;;  %v1244_v58 = vpop.f32.mrf.mxu0 }
 0x16f   :  { %v1748_v54 = vpop.f32.mrf.mxu3  ;;  %v1580_v57 = vadd.f32 %v1579_v53, %v1411_v52  ;;  %v1413_v59 = vpop.f32.mrf.mxu1  ;;  %v2556_v53 = vor.u32 %v2912_v42, %v2555_v41 }
 0x170   :  { %v1414_v0 = vadd.f32 %v1413_v59, %v1244_v58 }
 0x171   :  { %v1749_v62 = vadd.f32 %v1748_v54, %v1580_v57  ;;  %1283 = vmatmul.bf16.gmra.mxu0 %v2516_v55  ;;  %v2560_v54 = vor.u32 %v2910_v43, %v2557_v44 }
 0x172   :  { %1452 = vmatmul.bf16.gmra.mxu1 %v2520_v56 }
 0x173   :  { %v2070_v63 = vadd.f32 %v3314_v18, %v1749_v62  ;;  %1621 = vmatmul.bf16.gmra.mxu2 %v2524_v60 }
 0x174   :  { %1790 = vmatmul.bf16.gmra.mxu3 %v2528_v61 }
 0x175   :  { %2134 = vst [vmem:[%s4132_s3 + $0xc8] sm:$0xff] %v2070_v63 }
 0x176   :  { %v1582_v1 = vpop.f32.mrf.mxu2  ;;  %v1246_v4 = vpop.f32.mrf.mxu0 }
 0x177   :  { %v1751_v2 = vpop.f32.mrf.mxu3  ;;  %v1583_v3 = vadd.f32 %v1582_v1, %v1414_v0  ;;  %v1415_v5 = vpop.f32.mrf.mxu1  ;;  %v2563_v0 = vld [vmem:[%s4130_s0 + $0x300] sm:$0xf] }
 0x178   :  { %v1416_v16 = vadd.f32 %v1415_v5, %v1246_v4  ;;  %v3805_v1 = vld [vmem:[%s4131_s2] ss:$0 sm:$0xff]  ;;  %v2565_v4 = vld [vmem:[%s4130_s0 + $0x310] sm:$0xf0]  ;;  %v2571_v5 = vld [vmem:[%s4130_s0 + $0x308] sm:$0xf] }
 0x179   :  { %v1752_v6 = vadd.f32 %v1751_v2, %v1583_v3  ;;  %v2913_v3 = vld [vmem:[%s4130_s0 + $0x304] sm:$0xf] }
 0x17a   :  { %v2568_v13 = vor.u32 %v2913_v3, %v2565_v4 }
 0x17b   :  { %v2071_v9 = vadd.f32 %v3314_v18, %v1752_v6  ;;  %v2916_v6 = vld [vmem:[%s4130_s0 + $0x314] sm:$0xf0] }
 0x17d   :  { %2135 = vst [vmem:[%s4132_s3 + $0xd0] sm:$0xff] %v2071_v9 }
 0x17e   :  { %v1584_v17 = vpop.f32.mrf.mxu2  ;;  %v1249_v23 = vpop.f32.mrf.mxu0 }
 0x17f   :  { %v1753_v19 = vpop.f32.mrf.mxu3  ;;  %v1585_v22 = vadd.f32 %v1584_v17, %v1416_v16  ;;  %v1418_v24 = vpop.f32.mrf.mxu1  ;;  %v2572_v17 = vor.u32 %v2916_v6, %v2571_v5 }
 0x180   :  { %v1419_v29 = vadd.f32 %v1418_v24, %v1249_v23 }
 0x181   :  { %v1754_v27 = vadd.f32 %v1753_v19, %v1585_v22  ;;  %1288 = vmatmul.bf16.gmra.mxu0 %v2532_v20  ;;  %v2576_v19 = vor.u32 %v2914_v7, %v2573_v8 }
 0x182   :  { %1457 = vmatmul.bf16.gmra.mxu1 %v2536_v21 }
 0x183   :  { %v2072_v28 = vadd.f32 %v3314_v18, %v1754_v27  ;;  %1626 = vmatmul.bf16.gmra.mxu2 %v2540_v25 }
 0x184   :  { %1795 = vmatmul.bf16.gmra.mxu3 %v2544_v26 }
 0x185   :  { %2136 = vst [vmem:[%s4132_s3 + $0xd8] sm:$0xff] %v2072_v28 }
 0x186   :  { %v1587_v30 = vpop.f32.mrf.mxu2  ;;  %v1251_v33 = vpop.f32.mrf.mxu0 }
 0x187   :  { %v1756_v31 = vpop.f32.mrf.mxu3  ;;  %v1588_v32 = vadd.f32 %v1587_v30, %v1419_v29  ;;  %v1420_v34 = vpop.f32.mrf.mxu1  ;;  %v2579_v29 = vld [vmem:[%s4130_s0 + $0x320] sm:$0xf]  ;;  %v2919_v30 = vld [vmem:[%s4130_s0 + $0x32c] sm:$0xf0] }
 0x188   :  { %v1421_v45 = vadd.f32 %v1420_v34, %v1251_v33  ;;  %v2581_v33 = vld [vmem:[%s4130_s0 + $0x330] sm:$0xf0]  ;;  %v2587_v34 = vld [vmem:[%s4130_s0 + $0x328] sm:$0xf]  ;;  %v2580_v41 = vor.u32 %v2919_v30, %v2579_v29  ;;  %v2926_v29 = vld [vmem:[%s4130_s0 + $0x36c] sm:$0xf] }
 0x189   :  { %v1757_v35 = vadd.f32 %v1756_v31, %v1588_v32  ;;  %v2917_v32 = vld [vmem:[%s4130_s0 + $0x324] sm:$0xf]  ;;  %v2621_v30 = vld [vmem:[%s4130_s0 + $0x378] sm:$0xf0] }
 0x18a   :  { %v2584_v42 = vor.u32 %v2917_v32, %v2581_v33 }
 0x18b   :  { %v2073_v38 = vadd.f32 %v3314_v18, %v1757_v35  ;;  %v2920_v35 = vld [vmem:[%s4130_s0 + $0x334] sm:$0xf0] }
 0x18d   :  { %2137 = vst [vmem:[%s4132_s3 + $0xe0] sm:$0xff] %v2073_v38 }
 0x18e   :  { %v1589_v46 = vpop.f32.mrf.mxu2  ;;  %v1254_v51 = vpop.f32.mrf.mxu0 }
 0x18f   :  { %v1758_v47 = vpop.f32.mrf.mxu3  ;;  %v1590_v50 = vadd.f32 %v1589_v46, %v1421_v45  ;;  %v1423_v52 = vpop.f32.mrf.mxu1  ;;  %v2588_v46 = vor.u32 %v2920_v35, %v2587_v34 }
 0x190   :  { %v1424_v57 = vadd.f32 %v1423_v52, %v1254_v51 }
 0x191   :  { %v1759_v55 = vadd.f32 %v1758_v47, %v1590_v50  ;;  %1293 = vmatmul.bf16.gmra.mxu0 %v2548_v48  ;;  %v2592_v47 = vor.u32 %v2918_v36, %v2589_v37 }
 0x192   :  { %1462 = vmatmul.bf16.gmra.mxu1 %v2552_v49 }
 0x193   :  { %v2074_v56 = vadd.f32 %v3314_v18, %v1759_v55  ;;  %1631 = vmatmul.bf16.gmra.mxu2 %v2556_v53  ;;  %v2915_v18 = vld [vmem:[%s4130_s0 + $0x30c] sm:$0xf0] }
 0x194   :  { %1800 = vmatmul.bf16.gmra.mxu3 %v2560_v54  ;;  %v2564_v12 = vor.u32 %v2915_v18, %v2563_v0  ;;  %v2922_v0 = vld [vmem:[%s4130_s0 + $0x34c] sm:$0xf]  ;;  %v2605_v18 = vld [vmem:[%s4130_s0 + $0x358] sm:$0xf0] }
 0x195   :  { %2138 = vst [vmem:[%s4132_s3 + $0xe8] sm:$0xff] %v2074_v56 }
 0x196   :  { %v1592_v58 = vpop.f32.mrf.mxu2  ;;  %v1256_v61 = vpop.f32.mrf.mxu0 }
 0x197   :  { %v1761_v59 = vpop.f32.mrf.mxu3  ;;  %v1593_v60 = vadd.f32 %v1592_v58, %v1424_v57  ;;  %v1425_v62 = vpop.f32.mrf.mxu1  ;;  %v2595_v57 = vld [vmem:[%s4130_s0 + $0x340] sm:$0xf]  ;;  %v2923_v58 = vld [vmem:[%s4130_s0 + $0x34c] sm:$0xf0] }
 0x198   :  { %v1426_v9 = vadd.f32 %v1425_v62, %v1256_v61  ;;  %v2597_v61 = vld [vmem:[%s4130_s0 + $0x350] sm:$0xf0]  ;;  %v2603_v62 = vld [vmem:[%s4130_s0 + $0x348] sm:$0xf]  ;;  %v2596_v5 = vor.u32 %v2923_v58, %v2595_v57  ;;  %v2930_v57 = vld [vmem:[%s4130_s0 + $0x38c] sm:$0xf] }
 0x199   :  { %v1762_v63 = vadd.f32 %v1761_v59, %v1593_v60  ;;  %v2921_v60 = vld [vmem:[%s4130_s0 + $0x344] sm:$0xf]  ;;  %v2637_v58 = vld [vmem:[%s4130_s0 + $0x398] sm:$0xf0] }
 0x19a   :  { %v2600_v6 = vor.u32 %v2921_v60, %v2597_v61 }
 0x19b   :  { %v2075_v2 = vadd.f32 %v3805_v1, %v1762_v63  ;;  %v2924_v63 = vld [vmem:[%s4130_s0 + $0x354] sm:$0xf0] }
 0x19d   :  { %2139 = vst [vmem:[%s4132_s3 + $0xf0] sm:$0xff] %v2075_v2 }
 0x19e   :  { %v1594_v10 = vpop.f32.mrf.mxu2  ;;  %v1259_v15 = vpop.f32.mrf.mxu0 }
 0x19f   :  { %v1763_v11 = vpop.f32.mrf.mxu3  ;;  %v1595_v14 = vadd.f32 %v1594_v10, %v1426_v9  ;;  %v1428_v16 = vpop.f32.mrf.mxu1  ;;  %v2604_v10 = vor.u32 %v2924_v63, %v2603_v62 }
 0x1a0   :  { %v1429_v22 = vadd.f32 %v1428_v16, %v1259_v15 }
 0x1a1   :  { %v1764_v20 = vadd.f32 %v1763_v11, %v1595_v14  ;;  %1298 = vmatmul.bf16.gmra.mxu0 %v2564_v12  ;;  %v2608_v11 = vor.u32 %v2922_v0, %v2605_v18 }
 0x1a2   :  { %1467 = vmatmul.bf16.gmra.mxu1 %v2568_v13 }
 0x1a3   :  { %v2076_v21 = vadd.f32 %v3805_v1, %v1764_v20  ;;  %1636 = vmatmul.bf16.gmra.mxu2 %v2572_v17 }
 0x1a4   :  { %1805 = vmatmul.bf16.gmra.mxu3 %v2576_v19 }
 0x1a5   :  { %2140 = vst [vmem:[%s4132_s3 + $0xf8] sm:$0xff] %v2076_v21 }
 0x1a6   :  { %v1597_v23 = vpop.f32.mrf.mxu2  ;;  %v1261_v26 = vpop.f32.mrf.mxu0 }
 0x1a7   :  { %v1766_v24 = vpop.f32.mrf.mxu3  ;;  %v1598_v25 = vadd.f32 %v1597_v23, %v1429_v22  ;;  %v1430_v27 = vpop.f32.mrf.mxu1  ;;  %v2611_v22 = vld [vmem:[%s4130_s0 + $0x360] sm:$0xf]  ;;  %v2927_v23 = vld [vmem:[%s4130_s0 + $0x36c] sm:$0xf0] }
 0x1a8   :  { %v1431_v38 = vadd.f32 %v1430_v27, %v1261_v26  ;;  %v2613_v26 = vld [vmem:[%s4130_s0 + $0x370] sm:$0xf0]  ;;  %v2619_v27 = vld [vmem:[%s4130_s0 + $0x368] sm:$0xf]  ;;  %v2612_v34 = vor.u32 %v2927_v23, %v2611_v22  ;;  %v2934_v22 = vld [vmem:[%s4130_s0 + $0x3ac] sm:$0xf] }
 0x1a9   :  { %v1767_v28 = vadd.f32 %v1766_v24, %v1598_v25  ;;  %v2925_v25 = vld [vmem:[%s4130_s0 + $0x364] sm:$0xf]  ;;  %v2653_v23 = vld [vmem:[%s4130_s0 + $0x3b8] sm:$0xf0] }
 0x1aa   :  { %v2616_v35 = vor.u32 %v2925_v25, %v2613_v26 }
 0x1ab   :  { %v2077_v31 = vadd.f32 %v3805_v1, %v1767_v28  ;;  %v2928_v28 = vld [vmem:[%s4130_s0 + $0x374] sm:$0xf0] }
 0x1ad   :  { %2141 = vst [vmem:[%s4132_s3 + $0x100] sm:$0xff] %v2077_v31 }
 0x1ae   :  { %v1599_v39 = vpop.f32.mrf.mxu2  ;;  %v1264_v44 = vpop.f32.mrf.mxu0 }
 0x1af   :  { %v1768_v40 = vpop.f32.mrf.mxu3  ;;  %v1600_v43 = vadd.f32 %v1599_v39, %v1431_v38  ;;  %v1433_v45 = vpop.f32.mrf.mxu1  ;;  %v2620_v39 = vor.u32 %v2928_v28, %v2619_v27 }
 0x1b0   :  { %v1434_v50 = vadd.f32 %v1433_v45, %v1264_v44 }
 0x1b1   :  { %v1769_v48 = vadd.f32 %v1768_v40, %v1600_v43  ;;  %1303 = vmatmul.bf16.gmra.mxu0 %v2580_v41  ;;  %v2624_v40 = vor.u32 %v2926_v29, %v2621_v30 }
 0x1b2   :  { %1472 = vmatmul.bf16.gmra.mxu1 %v2584_v42 }
 0x1b3   :  { %v2078_v49 = vadd.f32 %v3805_v1, %v1769_v48  ;;  %1641 = vmatmul.bf16.gmra.mxu2 %v2588_v46 }
 0x1b4   :  { %1810 = vmatmul.bf16.gmra.mxu3 %v2592_v47 }
 0x1b5   :  { %2142 = vst [vmem:[%s4132_s3 + $0x108] sm:$0xff] %v2078_v49 }
 0x1b6   :  { %v1602_v51 = vpop.f32.mrf.mxu2  ;;  %v1266_v54 = vpop.f32.mrf.mxu0 }
 0x1b7   :  { %v1771_v52 = vpop.f32.mrf.mxu3  ;;  %v1603_v53 = vadd.f32 %v1602_v51, %v1434_v50  ;;  %v1435_v55 = vpop.f32.mrf.mxu1  ;;  %v2627_v50 = vld [vmem:[%s4130_s0 + $0x380] sm:$0xf]  ;;  %v2931_v51 = vld [vmem:[%s4130_s0 + $0x38c] sm:$0xf0] }
 0x1b8   :  { %v1436_v2 = vadd.f32 %v1435_v55, %v1266_v54  ;;  %v2629_v54 = vld [vmem:[%s4130_s0 + $0x390] sm:$0xf0]  ;;  %v2635_v55 = vld [vmem:[%s4130_s0 + $0x388] sm:$0xf]  ;;  %v2628_v62 = vor.u32 %v2931_v51, %v2627_v50  ;;  %v2938_v50 = vld [vmem:[%s4130_s0 + $0x3cc] sm:$0xf] }
 0x1b9   :  { %v1772_v56 = vadd.f32 %v1771_v52, %v1603_v53  ;;  %v2929_v53 = vld [vmem:[%s4130_s0 + $0x384] sm:$0xf]  ;;  %v2669_v51 = vld [vmem:[%s4130_s0 + $0x3d8] sm:$0xf0] }
 0x1ba   :  { %v2632_v63 = vor.u32 %v2929_v53, %v2629_v54 }
 0x1bb   :  { %v2079_v59 = vadd.f32 %v3805_v1, %v1772_v56  ;;  %v2932_v56 = vld [vmem:[%s4130_s0 + $0x394] sm:$0xf0] }
 0x1bd   :  { %2143 = vst [vmem:[%s4132_s3 + $0x110] sm:$0xff] %v2079_v59 }
 0x1be   :  { %v1604_v3 = vpop.f32.mrf.mxu2  ;;  %v1269_v8 = vpop.f32.mrf.mxu0 }
 0x1bf   :  { %v1773_v4 = vpop.f32.mrf.mxu3  ;;  %v1605_v7 = vadd.f32 %v1604_v3, %v1436_v2  ;;  %v1438_v9 = vpop.f32.mrf.mxu1  ;;  %v2636_v3 = vor.u32 %v2932_v56, %v2635_v55 }
 0x1c0   :  { %v1439_v14 = vadd.f32 %v1438_v9, %v1269_v8 }
 0x1c1   :  { %v1774_v12 = vadd.f32 %v1773_v4, %v1605_v7  ;;  %1308 = vmatmul.bf16.gmra.mxu0 %v2596_v5  ;;  %v2640_v4 = vor.u32 %v2930_v57, %v2637_v58 }
 0x1c2   :  { %1477 = vmatmul.bf16.gmra.mxu1 %v2600_v6 }
 0x1c3   :  { %v2080_v13 = vadd.f32 %v3805_v1, %v1774_v12  ;;  %1646 = vmatmul.bf16.gmra.mxu2 %v2604_v10 }
 0x1c4   :  { %1815 = vmatmul.bf16.gmra.mxu3 %v2608_v11 }
 0x1c5   :  { %2144 = vst [vmem:[%s4132_s3 + $0x118] sm:$0xff] %v2080_v13 }
 0x1c6   :  { %v1607_v15 = vpop.f32.mrf.mxu2  ;;  %v1271_v19 = vpop.f32.mrf.mxu0 }
 0x1c7   :  { %v1776_v16 = vpop.f32.mrf.mxu3  ;;  %v1608_v17 = vadd.f32 %v1607_v15, %v1439_v14  ;;  %v1440_v20 = vpop.f32.mrf.mxu1  ;;  %v2643_v14 = vld [vmem:[%s4130_s0 + $0x3a0] sm:$0xf]  ;;  %v2935_v15 = vld [vmem:[%s4130_s0 + $0x3ac] sm:$0xf0] }
 0x1c8   :  { %v1441_v31 = vadd.f32 %v1440_v20, %v1271_v19  ;;  %v2645_v19 = vld [vmem:[%s4130_s0 + $0x3b0] sm:$0xf0]  ;;  %v2651_v20 = vld [vmem:[%s4130_s0 + $0x3a8] sm:$0xf]  ;;  %v2644_v27 = vor.u32 %v2935_v15, %v2643_v14  ;;  %v2942_v14 = vld [vmem:[%s4130_s0 + $0x3ec] sm:$0xf] }
 0x1c9   :  { %v1777_v21 = vadd.f32 %v1776_v16, %v1608_v17  ;;  %v2933_v17 = vld [vmem:[%s4130_s0 + $0x3a4] sm:$0xf]  ;;  %v2685_v15 = vld [vmem:[%s4130_s0 + $0x3f8] sm:$0xf0] }
 0x1ca   :  { %v2648_v28 = vor.u32 %v2933_v17, %v2645_v19 }
 0x1cb   :  { %v2081_v24 = vadd.f32 %v3805_v1, %v1777_v21  ;;  %v2936_v21 = vld [vmem:[%s4130_s0 + $0x3b4] sm:$0xf0] }
 0x1cd   :  { %2145 = vst [vmem:[%s4132_s3 + $0x120] sm:$0xff] %v2081_v24 }
 0x1ce   :  { %v1609_v32 = vpop.f32.mrf.mxu2  ;;  %v1274_v37 = vpop.f32.mrf.mxu0 }
 0x1cf   :  { %v1778_v33 = vpop.f32.mrf.mxu3  ;;  %v1610_v36 = vadd.f32 %v1609_v32, %v1441_v31  ;;  %v1443_v38 = vpop.f32.mrf.mxu1  ;;  %v2652_v32 = vor.u32 %v2936_v21, %v2651_v20 }
 0x1d0   :  { %v1444_v43 = vadd.f32 %v1443_v38, %v1274_v37 }
 0x1d1   :  { %v1779_v41 = vadd.f32 %v1778_v33, %v1610_v36  ;;  %1313 = vmatmul.bf16.gmra.mxu0 %v2612_v34  ;;  %v2656_v33 = vor.u32 %v2934_v22, %v2653_v23 }
 0x1d2   :  { %1482 = vmatmul.bf16.gmra.mxu1 %v2616_v35 }
 0x1d3   :  { %v2082_v42 = vadd.f32 %v3805_v1, %v1779_v41  ;;  %1651 = vmatmul.bf16.gmra.mxu2 %v2620_v39 }
 0x1d4   :  { %1820 = vmatmul.bf16.gmra.mxu3 %v2624_v40 }
 0x1d5   :  { %2146 = vst [vmem:[%s4132_s3 + $0x128] sm:$0xff] %v2082_v42 }
 0x1d6   :  { %v1612_v44 = vpop.f32.mrf.mxu2  ;;  %v1276_v47 = vpop.f32.mrf.mxu0 }
 0x1d7   :  { %v1781_v45 = vpop.f32.mrf.mxu3  ;;  %v1613_v46 = vadd.f32 %v1612_v44, %v1444_v43  ;;  %v1445_v48 = vpop.f32.mrf.mxu1  ;;  %v2659_v43 = vld [vmem:[%s4130_s0 + $0x3c0] sm:$0xf]  ;;  %v2939_v44 = vld [vmem:[%s4130_s0 + $0x3cc] sm:$0xf0] }
 0x1d8   :  { %v1446_v59 = vadd.f32 %v1445_v48, %v1276_v47  ;;  %v2661_v47 = vld [vmem:[%s4130_s0 + $0x3d0] sm:$0xf0]  ;;  %v2667_v48 = vld [vmem:[%s4130_s0 + $0x3c8] sm:$0xf]  ;;  %v2660_v55 = vor.u32 %v2939_v44, %v2659_v43 }
 0x1d9   :  { %v1782_v49 = vadd.f32 %v1781_v45, %v1613_v46  ;;  %v2937_v46 = vld [vmem:[%s4130_s0 + $0x3c4] sm:$0xf] }
 0x1da   :  { %v2664_v56 = vor.u32 %v2937_v46, %v2661_v47 }
 0x1db   :  { %v2083_v52 = vadd.f32 %v3805_v1, %v1782_v49  ;;  %v2940_v49 = vld [vmem:[%s4130_s0 + $0x3d4] sm:$0xf0] }
 0x1dd   :  { %2147 = vst [vmem:[%s4132_s3 + $0x130] sm:$0xff] %v2083_v52 }
 0x1de   :  { %v1614_v60 = vpop.f32.mrf.mxu2  ;;  %v1279_v18 = vpop.f32.mrf.mxu0 }
 0x1df   :  { %v1783_v61 = vpop.f32.mrf.mxu3  ;;  %v1615_v0 = vadd.f32 %v1614_v60, %v1446_v59  ;;  %v1448_v2 = vpop.f32.mrf.mxu1  ;;  %v2668_v60 = vor.u32 %v2940_v49, %v2667_v48 }
 0x1e0   :  { %v1449_v7 = vadd.f32 %v1448_v2, %v1279_v18 }
 0x1e1   :  { %v1784_v5 = vadd.f32 %v1783_v61, %v1615_v0  ;;  %1318 = vmatmul.bf16.gmra.mxu0 %v2628_v62  ;;  %v2672_v61 = vor.u32 %v2938_v50, %v2669_v51 }
 0x1e2   :  { %1487 = vmatmul.bf16.gmra.mxu1 %v2632_v63 }
 0x1e3   :  { %v2084_v6 = vadd.f32 %v3805_v1, %v1784_v5  ;;  %1656 = vmatmul.bf16.gmra.mxu2 %v2636_v3 }
 0x1e4   :  { %1825 = vmatmul.bf16.gmra.mxu3 %v2640_v4 }
 0x1e5   :  { %2148 = vst [vmem:[%s4132_s3 + $0x138] sm:$0xff] %v2084_v6 }
 0x1e6   :  { %v1617_v8 = vpop.f32.mrf.mxu2  ;;  %v1281_v11 = vpop.f32.mrf.mxu0 }
 0x1e7   :  { %v1786_v9 = vpop.f32.mrf.mxu3  ;;  %v1618_v10 = vadd.f32 %v1617_v8, %v1449_v7  ;;  %v1450_v12 = vpop.f32.mrf.mxu1  ;;  %v2675_v7 = vld [vmem:[%s4130_s0 + $0x3e0] sm:$0xf]  ;;  %v2943_v8 = vld [vmem:[%s4130_s0 + $0x3ec] sm:$0xf0] }
 0x1e8   :  { %v1451_v24 = vadd.f32 %v1450_v12, %v1281_v11  ;;  %v2677_v11 = vld [vmem:[%s4130_s0 + $0x3f0] sm:$0xf0]  ;;  %v2683_v12 = vld [vmem:[%s4130_s0 + $0x3e8] sm:$0xf]  ;;  %v2676_v20 = vor.u32 %v2943_v8, %v2675_v7 }
 0x1e9   :  { %v1787_v13 = vadd.f32 %v1786_v9, %v1618_v10  ;;  %v2941_v10 = vld [vmem:[%s4130_s0 + $0x3e4] sm:$0xf] }
 0x1ea   :  { %v2680_v21 = vor.u32 %v2941_v10, %v2677_v11 }
 0x1eb   :  { %v2085_v16 = vadd.f32 %v3805_v1, %v1787_v13  ;;  %v2944_v13 = vld [vmem:[%s4130_s0 + $0x3f4] sm:$0xf0] }
 0x1ed   :  { %2149 = vst [vmem:[%s4132_s3 + $0x140] sm:$0xff] %v2085_v16 }
 0x1ee   :  { %v1619_v25 = vpop.f32.mrf.mxu2  ;;  %v1284_v30 = vpop.f32.mrf.mxu0 }
 0x1ef   :  { %v1788_v26 = vpop.f32.mrf.mxu3  ;;  %v1620_v29 = vadd.f32 %v1619_v25, %v1451_v24  ;;  %v1453_v31 = vpop.f32.mrf.mxu1  ;;  %v2684_v25 = vor.u32 %v2944_v13, %v2683_v12 }
 0x1f0   :  { %v1454_v36 = vadd.f32 %v1453_v31, %v1284_v30 }
 0x1f1   :  { %v1789_v34 = vadd.f32 %v1788_v26, %v1620_v29  ;;  %1323 = vmatmul.bf16.gmra.mxu0 %v2644_v27  ;;  %v2688_v26 = vor.u32 %v2942_v14, %v2685_v15 }
 0x1f2   :  { %1492 = vmatmul.bf16.gmra.mxu1 %v2648_v28 }
 0x1f3   :  { %v2086_v35 = vadd.f32 %v3805_v1, %v1789_v34  ;;  %1661 = vmatmul.bf16.gmra.mxu2 %v2652_v32 }
 0x1f4   :  { %1830 = vmatmul.bf16.gmra.mxu3 %v2656_v33 }
 0x1f5   :  { %2150 = vst [vmem:[%s4132_s3 + $0x148] sm:$0xff] %v2086_v35 }
 0x1f6   :  { %v1622_v37 = vpop.f32.mrf.mxu2  ;;  %v1286_v40 = vpop.f32.mrf.mxu0 }
 0x1f7   :  { %v1791_v38 = vpop.f32.mrf.mxu3  ;;  %v1623_v39 = vadd.f32 %v1622_v37, %v1454_v36  ;;  %v1455_v41 = vpop.f32.mrf.mxu1 }
 0x1f8   :  { %v1456_v52 = vadd.f32 %v1455_v41, %v1286_v40 }
 0x1f9   :  { %v1792_v42 = vadd.f32 %v1791_v38, %v1623_v39 }
 0x1fb   :  { %v2087_v45 = vadd.f32 %v3805_v1, %v1792_v42 }
 0x1fd   :  { %2151 = vst [vmem:[%s4132_s3 + $0x150] sm:$0xff] %v2087_v45 }
 0x1fe   :  { %v1624_v53 = vpop.f32.mrf.mxu2  ;;  %v1289_v58 = vpop.f32.mrf.mxu0 }
 0x1ff   :  { %v1793_v54 = vpop.f32.mrf.mxu3  ;;  %v1625_v57 = vadd.f32 %v1624_v53, %v1456_v52  ;;  %v1458_v59 = vpop.f32.mrf.mxu1 }
 0x200   :  { %v1459_v0 = vadd.f32 %v1458_v59, %v1289_v58 }
 0x201   :  { %v1794_v62 = vadd.f32 %v1793_v54, %v1625_v57  ;;  %1328 = vmatmul.bf16.gmra.mxu0 %v2660_v55 }
 0x202   :  { %1497 = vmatmul.bf16.gmra.mxu1 %v2664_v56 }
 0x203   :  { %v2088_v63 = vadd.f32 %v3805_v1, %v1794_v62  ;;  %1666 = vmatmul.bf16.gmra.mxu2 %v2668_v60 }
 0x204   :  { %1835 = vmatmul.bf16.gmra.mxu3 %v2672_v61 }
 0x205   :  { %2152 = vst [vmem:[%s4132_s3 + $0x158] sm:$0xff] %v2088_v63 }
 0x206   :  { %v1627_v18 = vpop.f32.mrf.mxu2  ;;  %v1291_v4 = vpop.f32.mrf.mxu0 }
 0x207   :  { %v1796_v2 = vpop.f32.mrf.mxu3  ;;  %v1628_v3 = vadd.f32 %v1627_v18, %v1459_v0  ;;  %v1460_v5 = vpop.f32.mrf.mxu1 }
 0x208   :  { %v1461_v16 = vadd.f32 %v1460_v5, %v1291_v4 }
 0x209   :  { %v1797_v6 = vadd.f32 %v1796_v2, %v1628_v3 }
 0x20b   :  { %v2089_v9 = vadd.f32 %v3805_v1, %v1797_v6 }
 0x20d   :  { %2153 = vst [vmem:[%s4132_s3 + $0x160] sm:$0xff] %v2089_v9 }
 0x20e   :  { %v1629_v17 = vpop.f32.mrf.mxu2  ;;  %v1294_v23 = vpop.f32.mrf.mxu0 }
 0x20f   :  { %v1798_v19 = vpop.f32.mrf.mxu3  ;;  %v1630_v22 = vadd.f32 %v1629_v17, %v1461_v16  ;;  %v1463_v24 = vpop.f32.mrf.mxu1 }
 0x210   :  { %v1464_v29 = vadd.f32 %v1463_v24, %v1294_v23 }
 0x211   :  { %v1799_v27 = vadd.f32 %v1798_v19, %v1630_v22  ;;  %1333 = vmatmul.bf16.gmra.mxu0 %v2676_v20 }
 0x212   :  { %1502 = vmatmul.bf16.gmra.mxu1 %v2680_v21 }
 0x213   :  { %v2090_v28 = vadd.f32 %v3805_v1, %v1799_v27  ;;  %1671 = vmatmul.bf16.gmra.mxu2 %v2684_v25 }
 0x214   :  { %1840 = vmatmul.bf16.gmra.mxu3 %v2688_v26 }
 0x215   :  { %2154 = vst [vmem:[%s4132_s3 + $0x168] sm:$0xff] %v2090_v28 }
 0x216   :  { %v1632_v30 = vpop.f32.mrf.mxu2  ;;  %v1296_v33 = vpop.f32.mrf.mxu0 }
 0x217   :  { %v1801_v31 = vpop.f32.mrf.mxu3  ;;  %v1633_v32 = vadd.f32 %v1632_v30, %v1464_v29  ;;  %v1465_v34 = vpop.f32.mrf.mxu1 }
 0x218   :  { %v1466_v37 = vadd.f32 %v1465_v34, %v1296_v33 }
 0x219   :  { %v1802_v35 = vadd.f32 %v1801_v31, %v1633_v32 }
 0x21b   :  { %v2091_v36 = vadd.f32 %v3805_v1, %v1802_v35 }
 0x21d   :  { %2155 = vst [vmem:[%s4132_s3 + $0x170] sm:$0xff] %v2091_v36 }
 0x21e   :  { %v1634_v38 = vpop.f32.mrf.mxu2  ;;  %v1299_v41 = vpop.f32.mrf.mxu0 }
 0x21f   :  { %v1803_v39 = vpop.f32.mrf.mxu3  ;;  %v1635_v40 = vadd.f32 %v1634_v38, %v1466_v37  ;;  %v1468_v42 = vpop.f32.mrf.mxu1 }
 0x220   :  { %v1469_v45 = vadd.f32 %v1468_v42, %v1299_v41 }
 0x221   :  { %v1804_v43 = vadd.f32 %v1803_v39, %v1635_v40 }
 0x223   :  { %v2092_v44 = vadd.f32 %v3805_v1, %v1804_v43 }
 0x225   :  { %2156 = vst [vmem:[%s4132_s3 + $0x178] sm:$0xff] %v2092_v44 }
 0x226   :  { %v1637_v46 = vpop.f32.mrf.mxu2  ;;  %v1301_v49 = vpop.f32.mrf.mxu0 }
 0x227   :  { %v1806_v47 = vpop.f32.mrf.mxu3  ;;  %v1638_v48 = vadd.f32 %v1637_v46, %v1469_v45  ;;  %v1470_v50 = vpop.f32.mrf.mxu1 }
 0x228   :  { %v1471_v53 = vadd.f32 %v1470_v50, %v1301_v49 }
 0x229   :  { %v1807_v51 = vadd.f32 %v1806_v47, %v1638_v48 }
 0x22b   :  { %v2093_v52 = vadd.f32 %v3805_v1, %v1807_v51 }
 0x22d   :  { %2157 = vst [vmem:[%s4132_s3 + $0x180] sm:$0xff] %v2093_v52 }
 0x22e   :  { %v1639_v54 = vpop.f32.mrf.mxu2  ;;  %v1304_v57 = vpop.f32.mrf.mxu0 }
 0x22f   :  { %v1808_v55 = vpop.f32.mrf.mxu3  ;;  %v1640_v56 = vadd.f32 %v1639_v54, %v1471_v53  ;;  %v1473_v58 = vpop.f32.mrf.mxu1 }
 0x230   :  { %v1474_v61 = vadd.f32 %v1473_v58, %v1304_v57 }
 0x231   :  { %v1809_v59 = vadd.f32 %v1808_v55, %v1640_v56 }
 0x233   :  { %v2094_v60 = vadd.f32 %v3805_v1, %v1809_v59 }
 0x235   :  { %2158 = vst [vmem:[%s4132_s3 + $0x188] sm:$0xff] %v2094_v60 }
 0x236   :  { %v1642_v62 = vpop.f32.mrf.mxu2  ;;  %v1306_v18 = vpop.f32.mrf.mxu0 }
 0x237   :  { %v1811_v63 = vpop.f32.mrf.mxu3  ;;  %v1643_v0 = vadd.f32 %v1642_v62, %v1474_v61  ;;  %v1475_v2 = vpop.f32.mrf.mxu1 }
 0x238   :  { %v1476_v5 = vadd.f32 %v1475_v2, %v1306_v18 }
 0x239   :  { %v1812_v3 = vadd.f32 %v1811_v63, %v1643_v0 }
 0x23b   :  { %v2095_v4 = vadd.f32 %v3805_v1, %v1812_v3 }
 0x23d   :  { %2159 = vst [vmem:[%s4132_s3 + $0x190] sm:$0xff] %v2095_v4 }
 0x23e   :  { %v1644_v6 = vpop.f32.mrf.mxu2  ;;  %v1309_v9 = vpop.f32.mrf.mxu0 }
 0x23f   :  { %v1813_v7 = vpop.f32.mrf.mxu3  ;;  %v1645_v8 = vadd.f32 %v1644_v6, %v1476_v5  ;;  %v1478_v10 = vpop.f32.mrf.mxu1 }
 0x240   :  { %v1479_v13 = vadd.f32 %v1478_v10, %v1309_v9 }
 0x241   :  { %v1814_v11 = vadd.f32 %v1813_v7, %v1645_v8 }
 0x243   :  { %v2096_v12 = vadd.f32 %v3805_v1, %v1814_v11 }
 0x245   :  { %2160 = vst [vmem:[%s4132_s3 + $0x198] sm:$0xff] %v2096_v12 }
 0x246   :  { %v1647_v14 = vpop.f32.mrf.mxu2  ;;  %v1311_v17 = vpop.f32.mrf.mxu0 }
 0x247   :  { %v1816_v15 = vpop.f32.mrf.mxu3  ;;  %v1648_v16 = vadd.f32 %v1647_v14, %v1479_v13  ;;  %v1480_v19 = vpop.f32.mrf.mxu1 }
 0x248   :  { %v1481_v22 = vadd.f32 %v1480_v19, %v1311_v17 }
 0x249   :  { %v1817_v20 = vadd.f32 %v1816_v15, %v1648_v16 }
 0x24b   :  { %v2097_v21 = vadd.f32 %v3805_v1, %v1817_v20 }
 0x24d   :  { %2161 = vst [vmem:[%s4132_s3 + $0x1a0] sm:$0xff] %v2097_v21 }
 0x24e   :  { %v1649_v23 = vpop.f32.mrf.mxu2  ;;  %v1314_v26 = vpop.f32.mrf.mxu0 }
 0x24f   :  { %v1818_v24 = vpop.f32.mrf.mxu3  ;;  %v1650_v25 = vadd.f32 %v1649_v23, %v1481_v22  ;;  %v1483_v27 = vpop.f32.mrf.mxu1 }
 0x250   :  { %v1484_v30 = vadd.f32 %v1483_v27, %v1314_v26 }
 0x251   :  { %v1819_v28 = vadd.f32 %v1818_v24, %v1650_v25 }
 0x253   :  { %v2098_v29 = vadd.f32 %v3805_v1, %v1819_v28 }
 0x255   :  { %2162 = vst [vmem:[%s4132_s3 + $0x1a8] sm:$0xff] %v2098_v29 }
 0x256   :  { %v1652_v31 = vpop.f32.mrf.mxu2  ;;  %v1316_v34 = vpop.f32.mrf.mxu0 }
 0x257   :  { %v1821_v32 = vpop.f32.mrf.mxu3  ;;  %v1653_v33 = vadd.f32 %v1652_v31, %v1484_v30  ;;  %v1485_v35 = vpop.f32.mrf.mxu1 }
 0x258   :  { %v1486_v38 = vadd.f32 %v1485_v35, %v1316_v34 }
 0x259   :  { %v1822_v36 = vadd.f32 %v1821_v32, %v1653_v33 }
 0x25b   :  { %v2099_v37 = vadd.f32 %v3805_v1, %v1822_v36 }
 0x25d   :  { %2163 = vst [vmem:[%s4132_s3 + $0x1b0] sm:$0xff] %v2099_v37 }
 0x25e   :  { %v1654_v39 = vpop.f32.mrf.mxu2  ;;  %v1319_v42 = vpop.f32.mrf.mxu0 }
 0x25f   :  { %v1823_v40 = vpop.f32.mrf.mxu3  ;;  %v1655_v41 = vadd.f32 %v1654_v39, %v1486_v38  ;;  %v1488_v43 = vpop.f32.mrf.mxu1 }
 0x260   :  { %v1489_v46 = vadd.f32 %v1488_v43, %v1319_v42 }
 0x261   :  { %v1824_v44 = vadd.f32 %v1823_v40, %v1655_v41 }
 0x263   :  { %v2100_v45 = vadd.f32 %v3805_v1, %v1824_v44 }
 0x265   :  { %2164 = vst [vmem:[%s4132_s3 + $0x1b8] sm:$0xff] %v2100_v45 }
 0x266   :  { %v1657_v47 = vpop.f32.mrf.mxu2  ;;  %v1321_v50 = vpop.f32.mrf.mxu0 }
 0x267   :  { %v1826_v48 = vpop.f32.mrf.mxu3  ;;  %v1658_v49 = vadd.f32 %v1657_v47, %v1489_v46  ;;  %v1490_v51 = vpop.f32.mrf.mxu1 }
 0x268   :  { %v1491_v54 = vadd.f32 %v1490_v51, %v1321_v50 }
 0x269   :  { %v1827_v52 = vadd.f32 %v1826_v48, %v1658_v49 }
 0x26b   :  { %v2101_v53 = vadd.f32 %v3805_v1, %v1827_v52 }
 0x26d   :  { %2165 = vst [vmem:[%s4132_s3 + $0x1c0] sm:$0xff] %v2101_v53 }
 0x26e   :  { %v1659_v55 = vpop.f32.mrf.mxu2  ;;  %v1324_v58 = vpop.f32.mrf.mxu0 }
 0x26f   :  { %v1828_v56 = vpop.f32.mrf.mxu3  ;;  %v1660_v57 = vadd.f32 %v1659_v55, %v1491_v54  ;;  %v1493_v59 = vpop.f32.mrf.mxu1 }
 0x270   :  { %v1494_v62 = vadd.f32 %v1493_v59, %v1324_v58 }
 0x271   :  { %v1829_v60 = vadd.f32 %v1828_v56, %v1660_v57 }
 0x273   :  { %v2102_v61 = vadd.f32 %v3805_v1, %v1829_v60 }
 0x275   :  { %2166 = vst [vmem:[%s4132_s3 + $0x1c8] sm:$0xff] %v2102_v61 }
 0x276   :  { %v1662_v63 = vpop.f32.mrf.mxu2  ;;  %v1326_v2 = vpop.f32.mrf.mxu0 }
 0x277   :  { %v1831_v0 = vpop.f32.mrf.mxu3  ;;  %v1663_v18 = vadd.f32 %v1662_v63, %v1494_v62  ;;  %v1495_v3 = vpop.f32.mrf.mxu1 }
 0x278   :  { %v1496_v6 = vadd.f32 %v1495_v3, %v1326_v2 }
 0x279   :  { %v1832_v4 = vadd.f32 %v1831_v0, %v1663_v18 }
 0x27b   :  { %v2103_v5 = vadd.f32 %v3805_v1, %v1832_v4 }
 0x27d   :  { %2167 = vst [vmem:[%s4132_s3 + $0x1d0] sm:$0xff] %v2103_v5 }
 0x27e   :  { %v1664_v7 = vpop.f32.mrf.mxu2  ;;  %v1329_v10 = vpop.f32.mrf.mxu0 }
 0x27f   :  { %v1833_v8 = vpop.f32.mrf.mxu3  ;;  %v1665_v9 = vadd.f32 %v1664_v7, %v1496_v6  ;;  %v1498_v11 = vpop.f32.mrf.mxu1 }
 0x280   :  { %v1499_v14 = vadd.f32 %v1498_v11, %v1329_v10 }
 0x281   :  { %v1834_v12 = vadd.f32 %v1833_v8, %v1665_v9 }
 0x283   :  { %v2104_v13 = vadd.f32 %v3805_v1, %v1834_v12 }
 0x285   :  { %2168 = vst [vmem:[%s4132_s3 + $0x1d8] sm:$0xff] %v2104_v13 }
 0x286   :  { %v1667_v15 = vpop.f32.mrf.mxu2  ;;  %v1331_v19 = vpop.f32.mrf.mxu0 }
 0x287   :  { %v1836_v16 = vpop.f32.mrf.mxu3  ;;  %v1668_v17 = vadd.f32 %v1667_v15, %v1499_v14  ;;  %v1500_v20 = vpop.f32.mrf.mxu1 }
 0x288   :  { %v1501_v23 = vadd.f32 %v1500_v20, %v1331_v19 }
 0x289   :  { %v1837_v21 = vadd.f32 %v1836_v16, %v1668_v17 }
 0x28b   :  { %v2105_v22 = vadd.f32 %v3805_v1, %v1837_v21 }
 0x28d   :  { %2169 = vst [vmem:[%s4132_s3 + $0x1e0] sm:$0xff] %v2105_v22 }
 0x28e   :  { %v1669_v24 = vpop.f32.mrf.mxu2  ;;  %v1334_v27 = vpop.f32.mrf.mxu0 }
 0x28f   :  { %v1838_v25 = vpop.f32.mrf.mxu3  ;;  %v1670_v26 = vadd.f32 %v1669_v24, %v1501_v23  ;;  %v1503_v28 = vpop.f32.mrf.mxu1 }
 0x290   :  { %v1504_v31 = vadd.f32 %v1503_v28, %v1334_v27 }
 0x291   :  { %v1839_v29 = vadd.f32 %v1838_v25, %v1670_v26 }
 0x293   :  { %v2106_v30 = vadd.f32 %v3805_v1, %v1839_v29 }
 0x295   :  { %2170 = vst [vmem:[%s4132_s3 + $0x1e8] sm:$0xff] %v2106_v30 }
 0x296   :  { %v1672_v32 = vpop.f32.mrf.mxu2  ;;  %v1336_v36 = vpop.f32.mrf.mxu0 }
 0x297   :  { %v1841_v33 = vpop.f32.mrf.mxu3  ;;  %v1673_v34 = vadd.f32 %v1672_v32, %v1504_v31  ;;  %v1505_v37 = vpop.f32.mrf.mxu1 }
 0x298   :  { %v1506_v39 = vadd.f32 %v1505_v37, %v1336_v36 }
 0x299   :  { %v1842_v35 = vadd.f32 %v1841_v33, %v1673_v34 }
 0x29b   :  { %v2107_v38 = vadd.f32 %v3805_v1, %v1842_v35 }
 0x29d   :  { %2171 = vst [vmem:[%s4132_s3 + $0x1f0] sm:$0xff] %v2107_v38 }
 0x29e   :  { %v1674_v40 = vpop.f32.mrf.mxu2 }
 0x29f   :  { %v1675_v41 = vadd.f32 %v1674_v40, %v1506_v39  ;;  %v1843_v42 = vpop.f32.mrf.mxu3 }
 0x2a1   :  { %v1844_v43 = vadd.f32 %v1843_v42, %v1675_v41 }
 0x2a3   :  { %v2108_v44 = vadd.f32 %v3805_v1, %v1844_v43 }
 0x2a5   :  { %2172 = vst [vmem:[%s4132_s3 + $0x1f8] sm:$0xff] %v2108_v44 }

// kernel: lagcn_forward.6
= control target key start
LH: loop header
LB: loop body
LE: loop exit
PB: predicated region body
PF: predicated region fallthrough
CT: control target
= control target key end

     0   :  { %s5009_s1 = inlined_call_operand.vmem [shape: bf16[512,128], index: 1, kind: input, shape index: {}]   ;;  %s5010_s0 = inlined_call_operand.vmem [shape: bf16[512,512], index: 0, kind: input, shape index: {}]   ;;  %s5011_s4 = inlined_call_operand.vmem [shape: bf16[128,128], index: 4, kind: input, shape index: {}]   ;;  %s5012_s2 = inlined_call_operand.vmem [shape: f32[1,128], index: 2, kind: input, shape index: {}]   ;;  %s5013_s3 = inlined_call_operand.vmem [shape: f32[1,128], index: 3, kind: input, shape index: {}]   ;;  %s5014_s5 = inlined_call_operand.vmem [shape: bf16[512,128], index: 5, kind: output, shape index: {}]  }
   0x1   :  { %v3451_v0 = vld [vmem:[%s5009_s1 + $0x38] sm:$0xff]  ;;  %v3450_v1 = vld [vmem:[%s5009_s1 + $0x30] sm:$0xff]  ;;  %v3449_v2 = vld [vmem:[%s5009_s1 + $0x28] sm:$0xff] }
   0x2   :  { %3675 = vmatpush.bf16.msra.mxu1 %v3451_v0  ;;  %3676 = vmatpush.bf16.msra.mxu2 %v3451_v0  ;;  %v3448_v3 = vld [vmem:[%s5009_s1 + $0x20] sm:$0xff]  ;;  %v3447_v4 = vld [vmem:[%s5009_s1 + $0x18] sm:$0xff]  ;;  %v3446_v5 = vld [vmem:[%s5009_s1 + $0x10] sm:$0xff] }
   0x3   :  { %3677 = vmatpush.bf16.msra.mxu3 %v3451_v0  ;;  %1176 = vmatpush.bf16.msra.mxu0 %v3451_v0  ;;  %v3445_v6 = vld [vmem:[%s5009_s1 + $0x8] sm:$0xff]  ;;  %v3444_v7 = vld [vmem:[%s5009_s1] sm:$0xff]  ;;  %v3350_v9 = vld [vmem:[%s5010_s0 + $0x10c] sm:$0xf0] }
   0x4   :  { %v2774_v8 = vld [vmem:[%s5010_s0 + $0x100] sm:$0xf]  ;;  %v3382_v11 = vld [vmem:[%s5010_s0 + $0x20c] sm:$0xf0]  ;;  %v3467_v14 = vld [vmem:[%s5009_s1 + $0xb8] sm:$0xff] }
   0x5   :  { %v2902_v10 = vld [vmem:[%s5010_s0 + $0x200] sm:$0xf]  ;;  %v3414_v13 = vld [vmem:[%s5010_s0 + $0x30c] sm:$0xf0]  ;;  %v3475_v15 = vld [vmem:[%s5009_s1 + $0xf8] sm:$0xff]  ;;  %v2775_v17 = vor.u32 %v3350_v9, %v2774_v8 }
   0x6   :  { %3678 = vmatpush.bf16.msra.mxu1 %v3450_v1  ;;  %3679 = vmatpush.bf16.msra.mxu2 %v3450_v1  ;;  %v3030_v12 = vld [vmem:[%s5010_s0 + $0x300] sm:$0xf]  ;;  %v3459_v16 = vld [vmem:[%s5009_s1 + $0x78] sm:$0xff]  ;;  %v2903_v18 = vor.u32 %v3382_v11, %v2902_v10  ;;  %v3466_v20 = vld [vmem:[%s5009_s1 + $0xb0] sm:$0xff] }
   0x7   :  { %3680 = vmatpush.bf16.msra.mxu3 %v3450_v1  ;;  %1177 = vmatpush.bf16.msra.mxu0 %v3450_v1  ;;  %v3031_v19 = vor.u32 %v3414_v13, %v3030_v12  ;;  %v3474_v21 = vld [vmem:[%s5009_s1 + $0xf0] sm:$0xff]  ;;  %v3465_v23 = vld [vmem:[%s5009_s1 + $0xa8] sm:$0xff]  ;;  %v2790_v26 = vld [vmem:[%s5010_s0 + $0x120] sm:$0xf] }
   0x8   :  { %v3458_v22 = vld [vmem:[%s5009_s1 + $0x70] sm:$0xff]  ;;  %v3473_v24 = vld [vmem:[%s5009_s1 + $0xe8] sm:$0xff]  ;;  %v2918_v28 = vld [vmem:[%s5010_s0 + $0x220] sm:$0xf] }
   0x9   :  { %v3457_v25 = vld [vmem:[%s5009_s1 + $0x68] sm:$0xff]  ;;  %v3354_v27 = vld [vmem:[%s5010_s0 + $0x12c] sm:$0xf0]  ;;  %v3046_v30 = vld [vmem:[%s5010_s0 + $0x320] sm:$0xf] }
   0xa   :  { %3681 = vmatpush.bf16.msra.mxu1 %v3449_v2  ;;  %3682 = vmatpush.bf16.msra.mxu2 %v3449_v2  ;;  %v3386_v29 = vld [vmem:[%s5010_s0 + $0x22c] sm:$0xf0]  ;;  %v2791_v32 = vor.u32 %v3354_v27, %v2790_v26  ;;  %v3464_v35 = vld [vmem:[%s5009_s1 + $0xa0] sm:$0xff]  ;;  %v3463_v47 = vld [vmem:[%s5009_s1 + $0x98] sm:$0xff] }
   0xb   :  { %3683 = vmatpush.bf16.msra.mxu3 %v3449_v2  ;;  %1178 = vmatpush.bf16.msra.mxu0 %v3449_v2  ;;  %v3418_v31 = vld [vmem:[%s5010_s0 + $0x32c] sm:$0xf0]  ;;  %v2919_v33 = vor.u32 %v3386_v29, %v2918_v28  ;;  %v3472_v36 = vld [vmem:[%s5009_s1 + $0xe0] sm:$0xff]  ;;  %v3471_v48 = vld [vmem:[%s5009_s1 + $0xd8] sm:$0xff] }
   0xc   :  { %v3047_v34 = vor.u32 %v3418_v31, %v3046_v30  ;;  %v3456_v37 = vld [vmem:[%s5009_s1 + $0x60] sm:$0xff]  ;;  %v3358_v39 = vld [vmem:[%s5010_s0 + $0x14c] sm:$0xf0]  ;;  %v3455_v49 = vld [vmem:[%s5009_s1 + $0x58] sm:$0xff] }
   0xd   :  { %v2806_v38 = vld [vmem:[%s5010_s0 + $0x140] sm:$0xf]  ;;  %v3390_v41 = vld [vmem:[%s5010_s0 + $0x24c] sm:$0xf0]  ;;  %v3469_v8 = vld [vmem:[%s5009_s1 + $0xc8] sm:$0xff] }
   0xe   :  { %3684 = vmatpush.bf16.msra.mxu1 %v3448_v3  ;;  %3685 = vmatpush.bf16.msra.mxu2 %v3448_v3  ;;  %v2934_v40 = vld [vmem:[%s5010_s0 + $0x240] sm:$0xf]  ;;  %v3422_v43 = vld [vmem:[%s5010_s0 + $0x34c] sm:$0xf0]  ;;  %v2807_v44 = vor.u32 %v3358_v39, %v2806_v38  ;;  %v3453_v9 = vld [vmem:[%s5009_s1 + $0x48] sm:$0xff] }
   0xf   :  { %3686 = vmatpush.bf16.msra.mxu3 %v3448_v3  ;;  %1179 = vmatpush.bf16.msra.mxu0 %v3448_v3  ;;  %v3062_v42 = vld [vmem:[%s5010_s0 + $0x340] sm:$0xf]  ;;  %v2935_v45 = vor.u32 %v3390_v41, %v2934_v40  ;;  %v3362_v51 = vld [vmem:[%s5010_s0 + $0x16c] sm:$0xf0] }
  0x10   :  { %v3063_v46 = vor.u32 %v3422_v43, %v3062_v42  ;;  %v2822_v50 = vld [vmem:[%s5010_s0 + $0x160] sm:$0xf]  ;;  %v3394_v53 = vld [vmem:[%s5010_s0 + $0x26c] sm:$0xf0] }
  0x11   :  { %v2950_v52 = vld [vmem:[%s5010_s0 + $0x260] sm:$0xf]  ;;  %v3426_v55 = vld [vmem:[%s5010_s0 + $0x36c] sm:$0xf0]  ;;  %v2823_v56 = vor.u32 %v3362_v51, %v2822_v50  ;;  %v3319_v50 = vld [vmem:[%s5010_s0 + $0x14] sm:$0xf0] }
  0x12   :  { %3687 = vmatpush.bf16.msra.mxu1 %v3447_v4  ;;  %3688 = vmatpush.bf16.msra.mxu2 %v3447_v4  ;;  %v3078_v54 = vld [vmem:[%s5010_s0 + $0x360] sm:$0xf]  ;;  %v2951_v57 = vor.u32 %v3394_v53, %v2950_v52  ;;  %v3462_v59 = vld [vmem:[%s5009_s1 + $0x90] sm:$0xff]  ;;  %v3317_v51 = vld [vmem:[%s5010_s0 + $0xc] sm:$0xf] }
  0x13   :  { %3689 = vmatpush.bf16.msra.mxu3 %v3447_v4  ;;  %1180 = vmatpush.bf16.msra.mxu0 %v3447_v4  ;;  %v3079_v58 = vor.u32 %v3426_v55, %v3078_v54  ;;  %v3470_v60 = vld [vmem:[%s5009_s1 + $0xd0] sm:$0xff]  ;;  %v2838_v62 = vld [vmem:[%s5010_s0 + $0x180] sm:$0xf]  ;;  %v2656_v52 = vld [vmem:[%s5010_s0 + $0x18] sm:$0xf0] }
  0x14   :  { %v3454_v61 = vld [vmem:[%s5009_s1 + $0x50] sm:$0xff]  ;;  %v2966_v0 = vld [vmem:[%s5010_s0 + $0x280] sm:$0xf] }
  0x15   :  { %v3366_v63 = vld [vmem:[%s5010_s0 + $0x18c] sm:$0xf0]  ;;  %v3094_v2 = vld [vmem:[%s5010_s0 + $0x380] sm:$0xf] }
  0x16   :  { %3690 = vmatpush.bf16.msra.mxu1 %v3446_v5  ;;  %3691 = vmatpush.bf16.msra.mxu2 %v3446_v5  ;;  %v3398_v1 = vld [vmem:[%s5010_s0 + $0x28c] sm:$0xf0]  ;;  %v2839_v4 = vor.u32 %v3366_v63, %v2838_v62  ;;  %v2854_v10 = vld [vmem:[%s5010_s0 + $0x1a0] sm:$0xf] }
  0x17   :  { %3692 = vmatpush.bf16.msra.mxu3 %v3446_v5  ;;  %1181 = vmatpush.bf16.msra.mxu0 %v3446_v5  ;;  %v3430_v3 = vld [vmem:[%s5010_s0 + $0x38c] sm:$0xf0]  ;;  %v2967_v5 = vor.u32 %v3398_v1, %v2966_v0  ;;  %v2982_v12 = vld [vmem:[%s5010_s0 + $0x2a0] sm:$0xf]  ;;  %v3320_v0 = vld [vmem:[%s5010_s0 + $0x24] sm:$0xf] }
  0x18   :  { %v3370_v11 = vld [vmem:[%s5010_s0 + $0x1ac] sm:$0xf0]  ;;  %v2998_v27 = vld [vmem:[%s5010_s0 + $0x2c0] sm:$0xf]  ;;  %v2664_v1 = vld [vmem:[%s5010_s0 + $0x30] sm:$0xf0] }
  0x19   :  { %v3402_v13 = vld [vmem:[%s5010_s0 + $0x2ac] sm:$0xf0]  ;;  %v3126_v29 = vld [vmem:[%s5010_s0 + $0x3c0] sm:$0xf] }
  0x1a   :  { %3693 = vmatpush.bf16.msra.mxu1 %v3445_v6  ;;  %3694 = vmatpush.bf16.msra.mxu2 %v3445_v6  ;;  %v3374_v26 = vld [vmem:[%s5010_s0 + $0x1cc] sm:$0xf0]  ;;  %v3142_v38 = vld [vmem:[%s5010_s0 + $0x3e0] sm:$0xf] }
  0x1b   :  { %3695 = vmatpush.bf16.msra.mxu3 %v3445_v6  ;;  %1182 = vmatpush.bf16.msra.mxu0 %v3445_v6  ;;  %v3095_v6 = vor.u32 %v3430_v3, %v3094_v2  ;;  %v3406_v28 = vld [vmem:[%s5010_s0 + $0x2cc] sm:$0xf0]  ;;  %v2662_v40 = vld [vmem:[%s5010_s0 + $0x20] sm:$0xf]  ;;  %v2670_v2 = vld [vmem:[%s5010_s0 + $0x28] sm:$0xf] }
  0x1c   :  { %v3438_v30 = vld [vmem:[%s5010_s0 + $0x3cc] sm:$0xf0]  ;;  %v2678_v53 = vld [vmem:[%s5010_s0 + $0x40] sm:$0xf]  ;;  %v3323_v3 = vld [vmem:[%s5010_s0 + $0x34] sm:$0xf0] }
  0x1d   :  { %v3442_v39 = vld [vmem:[%s5010_s0 + $0x3ec] sm:$0xf0] }
  0x1e   :  { %3696 = vmatpush.bf16.msra.mxu1 %v3444_v7  ;;  %3697 = vmatpush.bf16.msra.mxu2 %v3444_v7  ;;  %v3322_v41 = vld [vmem:[%s5010_s0 + $0x2c] sm:$0xf0] }
  0x1f   :  { %3698 = vmatpush.bf16.msra.mxu3 %v3444_v7  ;;  %1183 = vmatpush.bf16.msra.mxu0 %v3444_v7  ;;  %v3461_v7 = vld [vmem:[%s5009_s1 + $0x88] sm:$0xff]  ;;  %v2663_v42 = vor.u32 %v3322_v41, %v2662_v40  ;;  %v3326_v54 = vld [vmem:[%s5010_s0 + $0x4c] sm:$0xf0]  ;;  %v3331_v41 = vld [vmem:[%s5010_s0 + $0x74] sm:$0xf0] }
  0x20   :  { %v2679_v55 = vor.u32 %v3326_v54, %v2678_v53  ;;  %v3482_v63 = vld [vmem:[%s5011_s4 + $0x30] sm:$0xff]  ;;  %v2702_v40 = vld [vmem:[%s5010_s0 + $0x68] sm:$0xf] }
  0x21   :  { %1224 = vmatmul.bf16.vlgmr.msra.gmra.mxu1 %v2775_v17  ;;  %1264 = vmatmul.bf16.vlgmr.msra.gmra.mxu2 %v2903_v18  ;;  %v2983_v17 = vor.u32 %v3402_v13, %v2982_v12  ;;  %v2671_v12 = vor.u32 %v3323_v3, %v2670_v2  ;;  %v2720_v2 = vld [vmem:[%s5010_s0 + $0x98] sm:$0xf0]  ;;  %v2742_v3 = vld [vmem:[%s5010_s0 + $0xc0] sm:$0xf] }
  0x22   :  { %1514 = vmatpush.bf16.msrb.mxu2 %v3467_v14  ;;  %1345 = vmatpush.bf16.msrb.mxu1 %v3459_v16  ;;  %v3110_v14 = vld [vmem:[%s5010_s0 + $0x3a0] sm:$0xf]  ;;  %v2855_v16 = vor.u32 %v3370_v11, %v2854_v10  ;;  %v2667_v11 = vor.u32 %v3320_v0, %v2664_v1  ;;  %v3335_v0 = vld [vmem:[%s5010_s0 + $0x94] sm:$0xf0]  ;;  %v3333_v1 = vld [vmem:[%s5010_s0 + $0x8c] sm:$0xf] }
  0x23   :  { %1683 = vmatpush.bf16.msrb.mxu3 %v3475_v15  ;;  %v3434_v15 = vld [vmem:[%s5010_s0 + $0x3ac] sm:$0xf0] }
  0x24   :  { %1304 = vmatmul.bf16.vlgmr.msra.gmra.mxu3 %v3031_v19  ;;  %v3111_v18 = vor.u32 %v3434_v15, %v3110_v14  ;;  %v3460_v19 = vld [vmem:[%s5009_s1 + $0x80] sm:$0xff] }
  0x26   :  { %1515 = vmatpush.bf16.msrb.mxu2 %v3466_v20  ;;  %1346 = vmatpush.bf16.msrb.mxu1 %v3458_v22  ;;  %v3468_v20 = vld [vmem:[%s5009_s1 + $0xc0] sm:$0xff] }
  0x27   :  { %1684 = vmatpush.bf16.msrb.mxu3 %v3474_v21  ;;  %v3452_v21 = vld [vmem:[%s5009_s1 + $0x40] sm:$0xff] }
  0x28   :  { %v2646_v22 = vld [vmem:[%s5010_s0] sm:$0xf] }
  0x2a   :  { %1516 = vmatpush.bf16.msrb.mxu2 %v3465_v23  ;;  %1347 = vmatpush.bf16.msrb.mxu1 %v3457_v25  ;;  %v3318_v23 = vld [vmem:[%s5010_s0 + $0xc] sm:$0xf0]  ;;  %v2870_v25 = vld [vmem:[%s5010_s0 + $0x1c0] sm:$0xf] }
  0x2b   :  { %1685 = vmatpush.bf16.msrb.mxu3 %v3473_v24  ;;  %v2647_v24 = vor.u32 %v3318_v23, %v2646_v22  ;;  %v2871_v31 = vor.u32 %v3374_v26, %v2870_v25  ;;  %v3327_v22 = vld [vmem:[%s5010_s0 + $0x54] sm:$0xf0]  ;;  %v3325_v23 = vld [vmem:[%s5010_s0 + $0x4c] sm:$0xf]  ;;  %v2710_v25 = vld [vmem:[%s5010_s0 + $0x80] sm:$0xf] }
  0x2c   :  { %v3334_v26 = vld [vmem:[%s5010_s0 + $0x8c] sm:$0xf0] }
  0x2d   :  { %1184 = vmatmul.bf16.vlgmr.msra.gmra.mxu0 %v2647_v24  ;;  %v2688_v24 = vld [vmem:[%s5010_s0 + $0x58] sm:$0xf0] }
  0x2e   :  { %1517 = vmatpush.bf16.msrb.mxu2 %v3464_v35  ;;  %1348 = vmatpush.bf16.msrb.mxu1 %v3456_v37  ;;  %v3378_v35 = vld [vmem:[%s5010_s0 + $0x1ec] sm:$0xf0] }
  0x2f   :  { %1686 = vmatpush.bf16.msrb.mxu3 %v3472_v36  ;;  %v3014_v36 = vld [vmem:[%s5010_s0 + $0x2e0] sm:$0xf]  ;;  %v3410_v37 = vld [vmem:[%s5010_s0 + $0x2ec] sm:$0xf0] }
  0x31   :  { %1229 = vmatmul.bf16.gmra.mxu1 %v2791_v32  ;;  %1269 = vmatmul.bf16.gmra.mxu2 %v2919_v33  ;;  %v2999_v32 = vor.u32 %v3406_v28, %v2998_v27  ;;  %v3127_v33 = vor.u32 %v3438_v30, %v3126_v29  ;;  %v2711_v28 = vor.u32 %v3334_v26, %v2710_v25  ;;  %v3339_v25 = vld [vmem:[%s5010_s0 + $0xb4] sm:$0xf0]  ;;  %v3337_v26 = vld [vmem:[%s5010_s0 + $0xac] sm:$0xf] }
  0x32   :  { %1518 = vmatpush.bf16.msrb.mxu2 %v3463_v47  ;;  %1349 = vmatpush.bf16.msrb.mxu1 %v3455_v49  ;;  %v3316_v47 = vld [vmem:[%s5010_s0 + $0x4] sm:$0xf]  ;;  %v2654_v49 = vld [vmem:[%s5010_s0 + $0x8] sm:$0xf] }
  0x33   :  { %1687 = vmatpush.bf16.msrb.mxu3 %v3471_v48  ;;  %v2648_v48 = vld [vmem:[%s5010_s0 + $0x10] sm:$0xf0] }
  0x34   :  { %1309 = vmatmul.bf16.gmra.mxu3 %v3047_v34  ;;  %v2886_v34 = vld [vmem:[%s5010_s0 + $0x1e0] sm:$0xf] }
  0x35   :  { %v2887_v43 = vor.u32 %v3378_v35, %v2886_v34 }
  0x36   :  { %1519 = vmatpush.bf16.msrb.mxu2 %v3462_v59  ;;  %1350 = vmatpush.bf16.msrb.mxu1 %v3454_v61  ;;  %v2659_v59 = vor.u32 %v3317_v51, %v2656_v52 }
  0x37   :  { %1688 = vmatpush.bf16.msrb.mxu3 %v3470_v60 }
  0x3a   :  { %1520 = vmatpush.bf16.msrb.mxu2 %v3461_v7  ;;  %1351 = vmatpush.bf16.msrb.mxu1 %v3453_v9  ;;  %v3330_v7 = vld [vmem:[%s5010_s0 + $0x6c] sm:$0xf0] }
  0x3b   :  { %1689 = vmatpush.bf16.msrb.mxu3 %v3469_v8 }
  0x3d   :  { %1189 = vmatmul.bf16.gmra.mxu0 %v2663_v42  ;;  %v3329_v42 = vld [vmem:[%s5010_s0 + $0x6c] sm:$0xf] }
  0x3e   :  { %1521 = vmatpush.bf16.msrb.mxu2 %v3460_v19  ;;  %1352 = vmatpush.bf16.msrb.mxu1 %v3452_v21  ;;  %v3324_v19 = vld [vmem:[%s5010_s0 + $0x44] sm:$0xf]  ;;  %v2686_v21 = vld [vmem:[%s5010_s0 + $0x48] sm:$0xf] }
  0x3f   :  { %1690 = vmatpush.bf16.msrb.mxu3 %v3468_v20  ;;  %v2680_v20 = vld [vmem:[%s5010_s0 + $0x50] sm:$0xf0] }
  0x40   :  { %v2683_v30 = vor.u32 %v3324_v19, %v2680_v20 }
  0x41   :  { %1234 = vmatmul.bf16.gmra.mxu1 %v2807_v44  ;;  %1274 = vmatmul.bf16.gmra.mxu2 %v2935_v45  ;;  %v3015_v44 = vor.u32 %v3410_v37, %v3014_v36  ;;  %v3143_v45 = vor.u32 %v3442_v39, %v3142_v38  ;;  %v3480_v37 = vld [vmem:[%s5011_s4 + $0x20] sm:$0xff]  ;;  %v2696_v39 = vld [vmem:[%s5010_s0 + $0x70] sm:$0xf0] }
  0x42   :  { %v3328_v38 = vld [vmem:[%s5010_s0 + $0x64] sm:$0xf] }
  0x44   :  { %1314 = vmatmul.bf16.gmra.mxu3 %v3063_v46  ;;  %v3483_v46 = vld [vmem:[%s5011_s4 + $0x38] sm:$0xff] }
  0x45   :  { %2343 = vmatpush.bf16.msrb.mxu0 %v3483_v46 }
  0x49   :  { %2344 = vmatpush.bf16.msrb.mxu0 %v3482_v63  ;;  %v2718_v63 = vld [vmem:[%s5010_s0 + $0x88] sm:$0xf] }
  0x4d   :  { %1194 = vmatmul.bf16.gmra.mxu0 %v2679_v55 }
  0x51   :  { %1239 = vmatmul.bf16.gmra.mxu1 %v2823_v56  ;;  %1279 = vmatmul.bf16.gmra.mxu2 %v2951_v57  ;;  %v2651_v56 = vor.u32 %v3316_v47, %v2648_v48  ;;  %v2655_v57 = vor.u32 %v3319_v50, %v2654_v49  ;;  %v2699_v49 = vor.u32 %v3328_v38, %v2696_v39 }
  0x52   :  { %v2703_v50 = vor.u32 %v3331_v41, %v2702_v40 }
  0x54   :  { %1319 = vmatmul.bf16.gmra.mxu3 %v3079_v58 }
  0x61   :  { %1244 = vmatmul.bf16.gmra.mxu1 %v2839_v4  ;;  %1284 = vmatmul.bf16.gmra.mxu2 %v2967_v5  ;;  %v3321_v4 = vld [vmem:[%s5010_s0 + $0x2c] sm:$0xf]  ;;  %v2672_v5 = vld [vmem:[%s5010_s0 + $0x38] sm:$0xf0] }
  0x62   :  { %v2675_v14 = vor.u32 %v3321_v4, %v2672_v5  ;;  %v3342_v4 = vld [vmem:[%s5010_s0 + $0xcc] sm:$0xf0] }
  0x64   :  { %1324 = vmatmul.bf16.gmra.mxu3 %v3095_v6  ;;  %v2694_v6 = vld [vmem:[%s5010_s0 + $0x60] sm:$0xf] }
  0x65   :  { %v2695_v9 = vor.u32 %v3330_v7, %v2694_v6  ;;  %v2743_v6 = vor.u32 %v3342_v4, %v2742_v3 }
  0x67   :  { %1199 = vmatmul.bf16.gmra.mxu0 %v2695_v9 }
  0x71   :  { %1249 = vmatmul.bf16.gmra.mxu1 %v2855_v16  ;;  %1289 = vmatmul.bf16.gmra.mxu2 %v2983_v17 }
  0x74   :  { %1329 = vmatmul.bf16.gmra.mxu3 %v3111_v18  ;;  %v3481_v18 = vld [vmem:[%s5011_s4 + $0x28] sm:$0xff] }
  0x75   :  { %2345 = vmatpush.bf16.msrb.mxu0 %v3481_v18 }
  0x77   :  { %1204 = vmatmul.bf16.gmra.mxu0 %v2711_v28  ;;  %v2736_v28 = vld [vmem:[%s5010_s0 + $0xb8] sm:$0xf0] }
  0x79   :  { %2346 = vmatpush.bf16.msrb.mxu0 %v3480_v37 }
  0x81   :  { %1254 = vmatmul.bf16.gmra.mxu1 %v2871_v31  ;;  %1294 = vmatmul.bf16.gmra.mxu2 %v2999_v32  ;;  %v2687_v31 = vor.u32 %v3327_v22, %v2686_v21  ;;  %v3478_v21 = vld [vmem:[%s5011_s4 + $0x10] sm:$0xff]  ;;  %v3336_v22 = vld [vmem:[%s5010_s0 + $0xa4] sm:$0xf] }
  0x84   :  { %1334 = vmatmul.bf16.gmra.mxu3 %v3127_v33  ;;  %v2691_v33 = vor.u32 %v3325_v23, %v2688_v24  ;;  %v2728_v23 = vld [vmem:[%s5010_s0 + $0xb0] sm:$0xf0]  ;;  %v2734_v24 = vld [vmem:[%s5010_s0 + $0xa8] sm:$0xf] }
  0x85   :  { %v2731_v39 = vor.u32 %v3336_v22, %v2728_v23  ;;  %v2735_v40 = vor.u32 %v3339_v25, %v2734_v24  ;;  %v2760_v22 = vld [vmem:[%s5010_s0 + $0xf0] sm:$0xf0]  ;;  %v2766_v23 = vld [vmem:[%s5010_s0 + $0xe8] sm:$0xf]  ;;  %v3347_v24 = vld [vmem:[%s5010_s0 + $0xf4] sm:$0xf0] }
  0x86   :  { %v3345_v25 = vld [vmem:[%s5010_s0 + $0xec] sm:$0xf] }
  0x91   :  { %1259 = vmatmul.bf16.gmra.mxu1 %v2887_v43  ;;  %1299 = vmatmul.bf16.gmra.mxu2 %v3015_v44  ;;  %v2704_v43 = vld [vmem:[%s5010_s0 + $0x78] sm:$0xf0]  ;;  %v2726_v44 = vld [vmem:[%s5010_s0 + $0xa0] sm:$0xf] }
  0x92   :  { %v2707_v52 = vor.u32 %v3329_v42, %v2704_v43  ;;  %v2739_v42 = vor.u32 %v3337_v26, %v2736_v28  ;;  %v2768_v26 = vld [vmem:[%s5010_s0 + $0xf8] sm:$0xf0] }
  0x94   :  { %1339 = vmatmul.bf16.gmra.mxu3 %v3143_v45  ;;  %v3338_v45 = vld [vmem:[%s5010_s0 + $0xac] sm:$0xf0] }
  0x95   :  { %v2727_v47 = vor.u32 %v3338_v45, %v2726_v44 }
  0x97   :  { %1209 = vmatmul.bf16.gmra.mxu0 %v2727_v47  ;;  %v3477_v47 = vld [vmem:[%s5011_s4 + $0x8] sm:$0xff] }
  0x9e   :  { %v4012_v58 = vpop.f32.mrf.mxu1 }
  0xa1   :  { %1353 = vmatmul.bf16.vlgmr.msrb.gmra.mxu1 %v2651_v56  ;;  %1522 = vmatmul.bf16.vlgmr.msrb.gmra.mxu2 %v2655_v57  ;;  %v3479_v56 = vld [vmem:[%s5011_s4 + $0x18] sm:$0xff]  ;;  %v3332_v57 = vld [vmem:[%s5010_s0 + $0x84] sm:$0xf] }
  0xa2   :  { %2347 = vmatpush.bf16.msrb.mxu0 %v3479_v56  ;;  %v3343_v56 = vld [vmem:[%s5010_s0 + $0xd4] sm:$0xf0] }
  0xa4   :  { %1691 = vmatmul.bf16.vlgmr.msrb.gmra.mxu3 %v2659_v59  ;;  %v4014_v60 = vpop.f32.mrf.mxu2  ;;  %v2712_v59 = vld [vmem:[%s5010_s0 + $0x90] sm:$0xf0] }
  0xa5   :  { %v2715_v9 = vor.u32 %v3332_v57, %v2712_v59  ;;  %v3341_v57 = vld [vmem:[%s5010_s0 + $0xcc] sm:$0xf]  ;;  %v2752_v59 = vld [vmem:[%s5010_s0 + $0xd8] sm:$0xf0] }
  0xa6   :  { %v4018_v62 = vpop.f32.mrf.mxu1  ;;  %2348 = vmatpush.bf16.msrb.mxu0 %v3478_v21  ;;  %v2755_v4 = vor.u32 %v3341_v57, %v2752_v59  ;;  %v3344_v21 = vld [vmem:[%s5010_s0 + $0xe4] sm:$0xf]  ;;  %v2776_v59 = vld [vmem:[%s5010_s0 + $0x110] sm:$0xf0] }
  0xa7   :  { %v4016_v61 = vpop.f32.mrf.mxu3  ;;  %1214 = vmatmul.bf16.gmra.mxu0 %v2743_v6  ;;  %v3348_v57 = vld [vmem:[%s5010_s0 + $0x104] sm:$0xf] }
  0xaa   :  { %2349 = vmatpush.bf16.msrb.mxu0 %v3477_v47 }
  0xac   :  { %v4047_v8 = vpop.f32.mrf.mxu2 }
  0xae   :  { %v4051_v13 = vpop.f32.mrf.mxu1 }
  0xaf   :  { %v4049_v10 = vpop.f32.mrf.mxu3 }
  0xb1   :  { %1358 = vmatmul.bf16.gmra.mxu1 %v2667_v11  ;;  %1527 = vmatmul.bf16.gmra.mxu2 %v2671_v12  ;;  %v2719_v11 = vor.u32 %v3335_v0, %v2718_v63 }
  0xb4   :  { %1696 = vmatmul.bf16.gmra.mxu3 %v2675_v14  ;;  %v4053_v15 = vpop.f32.mrf.mxu2  ;;  %v2723_v14 = vor.u32 %v3333_v1, %v2720_v2 }
  0xb6   :  { %v4057_v17 = vpop.f32.mrf.mxu1 }
  0xb7   :  { %v4055_v16 = vpop.f32.mrf.mxu3 }
  0xbc   :  { %v4086_v27 = vpop.f32.mrf.mxu2 }
  0xbe   :  { %v4090_v32 = vpop.f32.mrf.mxu1 }
  0xbf   :  { %v4088_v29 = vpop.f32.mrf.mxu3 }
  0xc1   :  { %1363 = vmatmul.bf16.gmra.mxu1 %v2683_v30  ;;  %1532 = vmatmul.bf16.gmra.mxu2 %v2687_v31  ;;  %v2758_v30 = vld [vmem:[%s5010_s0 + $0xe0] sm:$0xf]  ;;  %v3346_v31 = vld [vmem:[%s5010_s0 + $0xec] sm:$0xf0] }
  0xc2   :  { %v2759_v37 = vor.u32 %v3346_v31, %v2758_v30  ;;  %v2763_v31 = vor.u32 %v3344_v21, %v2760_v22  ;;  %v2784_v21 = vld [vmem:[%s5010_s0 + $0x118] sm:$0xf0] }
  0xc4   :  { %1701 = vmatmul.bf16.gmra.mxu3 %v2691_v33  ;;  %v4092_v34 = vpop.f32.mrf.mxu2  ;;  %1219 = vmatmul.bf16.gmra.mxu0 %v2759_v37  ;;  %v2767_v37 = vor.u32 %v3347_v24, %v2766_v23  ;;  %v2779_v24 = vor.u32 %v3348_v57, %v2776_v59  ;;  %v3352_v57 = vld [vmem:[%s5010_s0 + $0x124] sm:$0xf]  ;;  %v2798_v59 = vld [vmem:[%s5010_s0 + $0x128] sm:$0xf] }
  0xc6   :  { %v4096_v36 = vpop.f32.mrf.mxu1 }
  0xc7   :  { %v4094_v35 = vpop.f32.mrf.mxu3 }
  0xc8   :  { %5015 = vst [vmem:[#allocation3_spill] sm:$0xff] %v4094_v35 }
  0xcc   :  { %v4125_v46 = vpop.f32.mrf.mxu2 }
  0xce   :  { %v4129_v51 = vpop.f32.mrf.mxu1 }
  0xcf   :  { %v4127_v48 = vpop.f32.mrf.mxu3 }
  0xd0   :  { %5016 = vst [vmem:[#allocation4_spill] sm:$0xff] %v4127_v48 }
  0xd1   :  { %1368 = vmatmul.bf16.gmra.mxu1 %v2699_v49  ;;  %1537 = vmatmul.bf16.gmra.mxu2 %v2703_v50  ;;  %v3340_v49 = vld [vmem:[%s5010_s0 + $0xc4] sm:$0xf]  ;;  %v2744_v50 = vld [vmem:[%s5010_s0 + $0xd0] sm:$0xf0] }
  0xd2   :  { %v2747_v1 = vor.u32 %v3340_v49, %v2744_v50 }
  0xd4   :  { %1706 = vmatmul.bf16.gmra.mxu3 %v2707_v52  ;;  %v4131_v53 = vpop.f32.mrf.mxu2  ;;  %v2750_v52 = vld [vmem:[%s5010_s0 + $0xc8] sm:$0xf] }
  0xd5   :  { %v2751_v2 = vor.u32 %v3343_v56, %v2750_v52 }
  0xd6   :  { %v4135_v55 = vpop.f32.mrf.mxu1 }
  0xd7   :  { %v4133_v54 = vpop.f32.mrf.mxu3 }
  0xd8   :  { %5017 = vst [vmem:[#allocation5_spill] sm:$0xff] %v4133_v54 }
  0xdc   :  { %v4164_v5 = vpop.f32.mrf.mxu2 }
  0xde   :  { %v4168_v12 = vpop.f32.mrf.mxu1 }
  0xdf   :  { %v4166_v7 = vpop.f32.mrf.mxu3 }
  0xe0   :  { %5018 = vst [vmem:[#allocation6_spill] sm:$0xff] %v4166_v7 }
  0xe1   :  { %1373 = vmatmul.bf16.gmra.mxu1 %v2715_v9  ;;  %1542 = vmatmul.bf16.gmra.mxu2 %v2719_v11  ;;  %v1185_v9 = vpop.f32.mrf.mxu0 }
  0xe4   :  { %1711 = vmatmul.bf16.gmra.mxu3 %v2723_v14  ;;  %v4170_v18 = vpop.f32.mrf.mxu2 }
  0xe6   :  { %v4174_v20 = vpop.f32.mrf.mxu1 }
  0xe7   :  { %v4172_v19 = vpop.f32.mrf.mxu3 }
  0xe8   :  { %5019 = vst [vmem:[#allocation7_spill] sm:$0xff] %v4172_v19 }
  0xe9   :  { %v1187_v47 = vpop.f32.mrf.mxu0 }
  0xec   :  { %v4203_v33 = vpop.f32.mrf.mxu2 }
  0xee   :  { %v4207_v41 = vpop.f32.mrf.mxu1 }
  0xef   :  { %v4205_v38 = vpop.f32.mrf.mxu3 }
  0xf0   :  { %5020 = vst [vmem:[#allocation8_spill] sm:$0xff] %v4205_v38 }
  0xf1   :  { %1378 = vmatmul.bf16.gmra.mxu1 %v2731_v39  ;;  %1547 = vmatmul.bf16.gmra.mxu2 %v2735_v40  ;;  %v3476_v39 = vld [vmem:[%s5011_s4] sm:$0xff]  ;;  %v1190_v56 = vpop.f32.mrf.mxu0 }
  0xf2   :  { %2350 = vmatpush.bf16.msrb.mxu0 %v3476_v39 }
  0xf4   :  { %1716 = vmatmul.bf16.gmra.mxu3 %v2739_v42  ;;  %v4209_v43 = vpop.f32.mrf.mxu2  ;;  %v2771_v42 = vor.u32 %v3345_v25, %v2768_v26 }
  0xf6   :  { %v4213_v45 = vpop.f32.mrf.mxu1 }
  0xf7   :  { %v4211_v44 = vpop.f32.mrf.mxu3 }
  0xf8   :  { %5021 = vst [vmem:[#allocation9_spill] sm:$0xff] %v4211_v44  ;;  %v4306_v44 = vld [vmem:[%s5012_s2] ss:$0 sm:$0xff] }
  0xf9   :  { %v1192_v39 = vpop.f32.mrf.mxu0 }
  0xfc   :  { %v4236_v63 = vpop.f32.mrf.mxu2 }
  0xfe   :  { %v4240_v3 = vpop.f32.mrf.mxu1 }
  0xff   :  { %v4238_v0 = vpop.f32.mrf.mxu3 }
 0x100   :  { %5022 = vst [vmem:[#allocation10_spill] sm:$0xff] %v4238_v0 }
 0x101   :  { %1383 = vmatmul.bf16.gmra.mxu1 %v2747_v1  ;;  %1552 = vmatmul.bf16.gmra.mxu2 %v2751_v2  ;;  %v2782_v1 = vld [vmem:[%s5010_s0 + $0x108] sm:$0xf]  ;;  %v3351_v2 = vld [vmem:[%s5010_s0 + $0x114] sm:$0xf0] }
 0x102   :  { %v2783_v25 = vor.u32 %v3351_v2, %v2782_v1  ;;  %v3353_v1 = vld [vmem:[%s5010_s0 + $0x12c] sm:$0xf]  ;;  %v2800_v2 = vld [vmem:[%s5010_s0 + $0x138] sm:$0xf0] }
 0x104   :  { %1721 = vmatmul.bf16.gmra.mxu3 %v2755_v4  ;;  %v4242_v6 = vpop.f32.mrf.mxu2  ;;  %v3349_v4 = vld [vmem:[%s5010_s0 + $0x10c] sm:$0xf] }
 0x106   :  { %v4246_v14 = vpop.f32.mrf.mxu1 }
 0x107   :  { %v4244_v11 = vpop.f32.mrf.mxu3 }
 0x108   :  { %5023 = vst [vmem:[#allocation11_spill] sm:$0xff] %v4244_v11 }
 0x10c   :  { %v4266_v28 = vpop.f32.mrf.mxu2 }
 0x10e   :  { %v4273_v40 = vpop.f32.mrf.mxu1 }
 0x10f   :  { %v4268_v30 = vpop.f32.mrf.mxu3 }
 0x110   :  { %5024 = vst [vmem:[#allocation12_spill] sm:$0xff] %v4268_v30 }
 0x111   :  { %1388 = vmatmul.bf16.gmra.mxu1 %v2763_v31  ;;  %1557 = vmatmul.bf16.gmra.mxu2 %v2767_v37  ;;  %v2787_v31 = vor.u32 %v3349_v4, %v2784_v21  ;;  %v1195_v21 = vpop.f32.mrf.mxu0 }
 0x114   :  { %1726 = vmatmul.bf16.gmra.mxu3 %v2771_v42  ;;  %v4275_v49 = vpop.f32.mrf.mxu2 }
 0x116   :  { %v4279_v52 = vpop.f32.mrf.mxu1 }
 0x117   :  { %v4277_v50 = vpop.f32.mrf.mxu3 }
 0x118   :  { %5025 = vst [vmem:[#allocation13_spill] sm:$0xff] %v4277_v50 }
 0x11c   :  { %v4299_v22 = vpop.f32.mrf.mxu2 }
 0x11e   :  { %v1354_v26 = vpop.f32.mrf.mxu1 }
 0x11f   :  { %v4301_v23 = vpop.f32.mrf.mxu3  ;;  %v1355_v37 = vadd.f32 %v1354_v26, %v1185_v9  ;;  %v2792_v9 = vld [vmem:[%s5010_s0 + $0x130] sm:$0xf0] }
 0x120   :  { %5026 = vst [vmem:[#allocation14_spill] sm:$0xff] %v4301_v23 }
 0x121   :  { %1393 = vmatmul.bf16.gmra.mxu1 %v2779_v24  ;;  %1562 = vmatmul.bf16.gmra.mxu2 %v2783_v25  ;;  %v4330_v25 = vld [vmem:[%s5013_s3] ss:$0 sm:$0xff] }
 0x124   :  { %1731 = vmatmul.bf16.gmra.mxu3 %v2787_v31  ;;  %v1523_v42 = vpop.f32.mrf.mxu2 }
 0x125   :  { %v1524_v50 = vadd.f32 %v1523_v42, %v1355_v37  ;;  %v2803_v42 = vor.u32 %v3353_v1, %v2800_v2 }
 0x126   :  { %v1356_v11 = vpop.f32.mrf.mxu1 }
 0x127   :  { %v1692_v30 = vpop.f32.mrf.mxu3 }
 0x128   :  { %v1693_v0 = vadd.f32 %v1692_v30, %v1524_v50  ;;  %v3355_v30 = vld [vmem:[%s5010_s0 + $0x134] sm:$0xf0]  ;;  %v1357_v50 = vadd.f32 %v1356_v11, %v1187_v47  ;;  %v2795_v11 = vor.u32 %v3352_v57, %v2792_v9  ;;  %v1197_v9 = vpop.f32.mrf.mxu0 }
 0x129   :  { %v2799_v47 = vor.u32 %v3355_v30, %v2798_v59 }
 0x12a   :  { %v2051_v24 = vmul.f32 %v4306_v44, %v1693_v0 }
 0x12c   :  { %v1525_v4 = vpop.f32.mrf.mxu2  ;;  %v2119_v38 = vadd.f32 %v4330_v25, %v2051_v24 }
 0x12d   :  { %v1526_v26 = vadd.f32 %v1525_v4, %v1357_v50 }
 0x12e   :  { %v1359_v37 = vpop.f32.mrf.mxu1  ;;  %v2183_v48 = vmax.f32 %v2119_v38, 0.0 }
 0x12f   :  { %v1694_v31 = vpop.f32.mrf.mxu3  ;;  %v1360_v7 = vadd.f32 %v1359_v37, %v1190_v56  ;;  %v2808_v56 = vld [vmem:[%s5010_s0 + $0x150] sm:$0xf0] }
 0x130   :  { %v1695_v23 = vadd.f32 %v1694_v31, %v1526_v26 }
 0x131   :  { %1398 = vmatmul.bf16.gmra.mxu1 %v2795_v11  ;;  %1567 = vmatmul.bf16.gmra.mxu2 %v2799_v47 }
 0x132   :  { %v2052_v19 = vmul.f32 %v4306_v44, %v1695_v23  ;;  %v3356_v23 = vld [vmem:[%s5010_s0 + $0x144] sm:$0xf] }
 0x133   :  { %v2811_v26 = vor.u32 %v3356_v23, %v2808_v56 }
 0x134   :  { %1736 = vmatmul.bf16.gmra.mxu3 %v2803_v42  ;;  %v2120_v0 = vadd.f32 %v4330_v25, %v2052_v19  ;;  %v1528_v54 = vpop.f32.mrf.mxu2  ;;  %v2814_v19 = vld [vmem:[%s5010_s0 + $0x148] sm:$0xf]  ;;  %v1200_v42 = vpop.f32.mrf.mxu0 }
 0x135   :  { %v1529_v35 = vadd.f32 %v1528_v54, %v1360_v7  ;;  %v3359_v54 = vld [vmem:[%s5010_s0 + $0x154] sm:$0xf0] }
 0x136   :  { %v2184_v4 = vmax.f32 %v2120_v0, 0.0  ;;  %v1361_v57 = vpop.f32.mrf.mxu1  ;;  %v2815_v31 = vor.u32 %v3359_v54, %v2814_v19 }
 0x137   :  { %v1697_v50 = vpop.f32.mrf.mxu3  ;;  %v1362_v7 = vadd.f32 %v1361_v57, %v1192_v39 }
 0x138   :  { %v2247_v59 = vpack.c.bf16 %v2184_v4, %v2183_v48  ;;  %v1698_v30 = vadd.f32 %v1697_v50, %v1529_v35  ;;  %v3357_v35 = vld [vmem:[%s5010_s0 + $0x14c] sm:$0xf]  ;;  %v2816_v48 = vld [vmem:[%s5010_s0 + $0x158] sm:$0xf0] }
 0x139   :  { %v2819_v47 = vor.u32 %v3357_v35, %v2816_v48  ;;  %v2824_v35 = vld [vmem:[%s5010_s0 + $0x170] sm:$0xf0]  ;;  %v2830_v48 = vld [vmem:[%s5010_s0 + $0x168] sm:$0xf] }
 0x13a   :  { %2351 = vmatmul.bf16.vlgmr.msrb.gmra.mxu0 %v2247_v59  ;;  %v2053_v1 = vmul.f32 %v4306_v44, %v1698_v30 }
 0x13c   :  { %v1530_v38 = vpop.f32.mrf.mxu2  ;;  %v2121_v50 = vadd.f32 %v4330_v25, %v2053_v1  ;;  %v1202_v1 = vpop.f32.mrf.mxu0 }
 0x13d   :  { %v1531_v2 = vadd.f32 %v1530_v38, %v1362_v7  ;;  %v3363_v38 = vld [vmem:[%s5010_s0 + $0x174] sm:$0xf0] }
 0x13e   :  { %v1364_v11 = vpop.f32.mrf.mxu1  ;;  %v2185_v7 = vmax.f32 %v2121_v50, 0.0 }
 0x13f   :  { %v1699_v24 = vpop.f32.mrf.mxu3  ;;  %v1365_v0 = vadd.f32 %v1364_v11, %v1195_v21  ;;  %v3360_v21 = vld [vmem:[%s5010_s0 + $0x164] sm:$0xf] }
 0x140   :  { %v1700_v37 = vadd.f32 %v1699_v24, %v1531_v2  ;;  %v3361_v24 = vld [vmem:[%s5010_s0 + $0x16c] sm:$0xf] }
 0x141   :  { %1403 = vmatmul.bf16.gmra.mxu1 %v2811_v26  ;;  %1572 = vmatmul.bf16.gmra.mxu2 %v2815_v31  ;;  %v2832_v26 = vld [vmem:[%s5010_s0 + $0x178] sm:$0xf0] }
 0x142   :  { %v2054_v39 = vmul.f32 %v4306_v44, %v1700_v37 }
 0x144   :  { %1741 = vmatmul.bf16.gmra.mxu3 %v2819_v47  ;;  %v2122_v4 = vadd.f32 %v4330_v25, %v2054_v39  ;;  %v1533_v57 = vpop.f32.mrf.mxu2  ;;  %v2827_v39 = vor.u32 %v3360_v21, %v2824_v35 }
 0x145   :  { %v1534_v59 = vadd.f32 %v1533_v57, %v1365_v0  ;;  %v2831_v0 = vor.u32 %v3363_v38, %v2830_v48 }
 0x146   :  { %v2186_v23 = vmax.f32 %v2122_v4, 0.0  ;;  %v1366_v56 = vpop.f32.mrf.mxu1  ;;  %v2835_v4 = vor.u32 %v3361_v24, %v2832_v26  ;;  %v2840_v24 = vld [vmem:[%s5010_s0 + $0x190] sm:$0xf0]  ;;  %v2846_v26 = vld [vmem:[%s5010_s0 + $0x188] sm:$0xf] }
 0x147   :  { %v1702_v30 = vpop.f32.mrf.mxu3  ;;  %v1367_v2 = vadd.f32 %v1366_v56, %v1197_v9  ;;  %v1205_v56 = vpop.f32.mrf.mxu0 }
 0x148   :  { %v2248_v19 = vpack.c.bf16 %v2186_v23, %v2185_v7  ;;  %v1703_v54 = vadd.f32 %v1702_v30, %v1534_v59 }
 0x14a   :  { %2356 = vmatmul.bf16.gmra.mxu0 %v2248_v19  ;;  %v2055_v11 = vmul.f32 %v4306_v44, %v1703_v54 }
 0x14c   :  { %v1535_v31 = vpop.f32.mrf.mxu2  ;;  %v2123_v30 = vadd.f32 %v4330_v25, %v2055_v11 }
 0x14d   :  { %v1536_v47 = vadd.f32 %v1535_v31, %v1367_v2  ;;  %v3367_v31 = vld [vmem:[%s5010_s0 + $0x194] sm:$0xf0] }
 0x14e   :  { %v1369_v50 = vpop.f32.mrf.mxu1  ;;  %v2187_v2 = vmax.f32 %v2123_v30, 0.0 }
 0x14f   :  { %v1704_v37 = vpop.f32.mrf.mxu3  ;;  %v1370_v59 = vadd.f32 %v1369_v50, %v1200_v42  ;;  %v3364_v42 = vld [vmem:[%s5010_s0 + $0x184] sm:$0xf] }
 0x150   :  { %v1705_v57 = vadd.f32 %v1704_v37, %v1536_v47  ;;  %v3365_v47 = vld [vmem:[%s5010_s0 + $0x18c] sm:$0xf]  ;;  %v2848_v37 = vld [vmem:[%s5010_s0 + $0x198] sm:$0xf0] }
 0x151   :  { %1408 = vmatmul.bf16.gmra.mxu1 %v2827_v39  ;;  %1577 = vmatmul.bf16.gmra.mxu2 %v2831_v0  ;;  %v2851_v30 = vor.u32 %v3365_v47, %v2848_v37  ;;  %v2856_v47 = vld [vmem:[%s5010_s0 + $0x1b0] sm:$0xf0]  ;;  %v2862_v37 = vld [vmem:[%s5010_s0 + $0x1a8] sm:$0xf] }
 0x152   :  { %v2056_v9 = vmul.f32 %v4306_v44, %v1705_v57  ;;  %v2843_v57 = vor.u32 %v3364_v42, %v2840_v24 }
 0x154   :  { %1746 = vmatmul.bf16.gmra.mxu3 %v2835_v4  ;;  %v2124_v7 = vadd.f32 %v4330_v25, %v2056_v9  ;;  %v1538_v23 = vpop.f32.mrf.mxu2  ;;  %v2847_v9 = vor.u32 %v3367_v31, %v2846_v26 }
 0x155   :  { %v1539_v19 = vadd.f32 %v1538_v23, %v1370_v59 }
 0x156   :  { %v2188_v21 = vmax.f32 %v2124_v7, 0.0  ;;  %v1371_v35 = vpop.f32.mrf.mxu1  ;;  %v1207_v7 = vpop.f32.mrf.mxu0 }
 0x157   :  { %v1707_v54 = vpop.f32.mrf.mxu3  ;;  %v1372_v11 = vadd.f32 %v1371_v35, %v1202_v1 }
 0x158   :  { %v2249_v48 = vpack.c.bf16 %v2188_v21, %v2187_v2  ;;  %v1708_v38 = vadd.f32 %v1707_v54, %v1539_v19 }
 0x15a   :  { %2361 = vmatmul.bf16.gmra.mxu0 %v2249_v48  ;;  %v2057_v0 = vmul.f32 %v4306_v44, %v1708_v38 }
 0x15c   :  { %v1540_v39 = vpop.f32.mrf.mxu2  ;;  %v2125_v54 = vadd.f32 %v4330_v25, %v2057_v0 }
 0x15d   :  { %v1541_v50 = vadd.f32 %v1540_v39, %v1372_v11  ;;  %v3371_v39 = vld [vmem:[%s5010_s0 + $0x1b4] sm:$0xf0] }
 0x15e   :  { %v1374_v59 = vpop.f32.mrf.mxu1  ;;  %v2189_v38 = vmax.f32 %v2125_v54, 0.0  ;;  %v1210_v31 = vpop.f32.mrf.mxu0 }
 0x15f   :  { %v1709_v4 = vpop.f32.mrf.mxu3  ;;  %v1375_v19 = vadd.f32 %v1374_v59, %v1205_v56  ;;  %v3368_v56 = vld [vmem:[%s5010_s0 + $0x1a4] sm:$0xf] }
 0x160   :  { %v1710_v23 = vadd.f32 %v1709_v4, %v1541_v50  ;;  %v3369_v50 = vld [vmem:[%s5010_s0 + $0x1ac] sm:$0xf]  ;;  %v2864_v4 = vld [vmem:[%s5010_s0 + $0x1b8] sm:$0xf0] }
 0x161   :  { %1413 = vmatmul.bf16.gmra.mxu1 %v2843_v57  ;;  %1582 = vmatmul.bf16.gmra.mxu2 %v2847_v9  ;;  %v2867_v54 = vor.u32 %v3369_v50, %v2864_v4  ;;  %v2878_v50 = vld [vmem:[%s5010_s0 + $0x1c8] sm:$0xf]  ;;  %v3375_v4 = vld [vmem:[%s5010_s0 + $0x1d4] sm:$0xf0] }
 0x162   :  { %v2058_v1 = vmul.f32 %v4306_v44, %v1710_v23  ;;  %v2859_v23 = vor.u32 %v3368_v56, %v2856_v47 }
 0x164   :  { %1751 = vmatmul.bf16.gmra.mxu3 %v2851_v30  ;;  %v2126_v2 = vadd.f32 %v4330_v25, %v2058_v1  ;;  %v1543_v21 = vpop.f32.mrf.mxu2  ;;  %v2863_v1 = vor.u32 %v3371_v39, %v2862_v37 }
 0x165   :  { %v1544_v35 = vadd.f32 %v1543_v21, %v1375_v19 }
 0x166   :  { %v2190_v42 = vmax.f32 %v2126_v2, 0.0  ;;  %v1376_v24 = vpop.f32.mrf.mxu1 }
 0x167   :  { %v1712_v48 = vpop.f32.mrf.mxu3  ;;  %v1377_v0 = vadd.f32 %v1376_v24, %v1207_v7 }
 0x168   :  { %v2250_v26 = vpack.c.bf16 %v2190_v42, %v2189_v38  ;;  %v1713_v11 = vadd.f32 %v1712_v48, %v1544_v35  ;;  %v1212_v48 = vpop.f32.mrf.mxu0 }
 0x16a   :  { %2366 = vmatmul.bf16.gmra.mxu0 %v2250_v26  ;;  %v2059_v9 = vmul.f32 %v4306_v44, %v1713_v11 }
 0x16c   :  { %v1545_v57 = vpop.f32.mrf.mxu2  ;;  %v2127_v7 = vadd.f32 %v4330_v25, %v2059_v9  ;;  %v3373_v9 = vld [vmem:[%s5010_s0 + $0x1cc] sm:$0xf] }
 0x16d   :  { %v1546_v59 = vadd.f32 %v1545_v57, %v1377_v0  ;;  %v3372_v0 = vld [vmem:[%s5010_s0 + $0x1c4] sm:$0xf] }
 0x16e   :  { %v1379_v19 = vpop.f32.mrf.mxu1  ;;  %v2191_v24 = vmax.f32 %v2127_v7, 0.0  ;;  %v2879_v7 = vor.u32 %v3375_v4, %v2878_v50 }
 0x16f   :  { %v1714_v30 = vpop.f32.mrf.mxu3  ;;  %v1380_v35 = vadd.f32 %v1379_v19, %v1210_v31  ;;  %v2872_v31 = vld [vmem:[%s5010_s0 + $0x1d0] sm:$0xf0] }
 0x170   :  { %v1715_v2 = vadd.f32 %v1714_v30, %v1546_v59  ;;  %v2880_v59 = vld [vmem:[%s5010_s0 + $0x1d8] sm:$0xf0]  ;;  %v1215_v30 = vpop.f32.mrf.mxu0 }
 0x171   :  { %1418 = vmatmul.bf16.gmra.mxu1 %v2859_v23  ;;  %1587 = vmatmul.bf16.gmra.mxu2 %v2863_v1 }
 0x172   :  { %v2060_v21 = vmul.f32 %v4306_v44, %v1715_v2  ;;  %v2875_v2 = vor.u32 %v3372_v0, %v2872_v31 }
 0x174   :  { %1756 = vmatmul.bf16.gmra.mxu3 %v2867_v54  ;;  %v2128_v38 = vadd.f32 %v4330_v25, %v2060_v21  ;;  %v1548_v42 = vpop.f32.mrf.mxu2 }
 0x175   :  { %v1549_v26 = vadd.f32 %v1548_v42, %v1380_v35  ;;  %v2883_v35 = vor.u32 %v3373_v9, %v2880_v59  ;;  %v2888_v9 = vld [vmem:[%s5010_s0 + $0x1f0] sm:$0xf0]  ;;  %v2894_v59 = vld [vmem:[%s5010_s0 + $0x1e8] sm:$0xf] }
 0x176   :  { %v2192_v56 = vmax.f32 %v2128_v38, 0.0  ;;  %v1381_v47 = vpop.f32.mrf.mxu1 }
 0x177   :  { %v1717_v11 = vpop.f32.mrf.mxu3  ;;  %v1382_v57 = vadd.f32 %v1381_v47, %v1212_v48 }
 0x178   :  { %v2251_v37 = vpack.c.bf16 %v2192_v56, %v2191_v24  ;;  %v1718_v39 = vadd.f32 %v1717_v11, %v1549_v26  ;;  %v1217_v0 = vpop.f32.mrf.mxu0 }
 0x17a   :  { %2371 = vmatmul.bf16.gmra.mxu0 %v2251_v37  ;;  %v2061_v1 = vmul.f32 %v4306_v44, %v1718_v39 }
 0x17c   :  { %v1550_v23 = vpop.f32.mrf.mxu2  ;;  %v2129_v48 = vadd.f32 %v4330_v25, %v2061_v1  ;;  %v3377_v1 = vld [vmem:[%s5010_s0 + $0x1ec] sm:$0xf] }
 0x17d   :  { %v1551_v19 = vadd.f32 %v1550_v23, %v1382_v57  ;;  %v3376_v57 = vld [vmem:[%s5010_s0 + $0x1e4] sm:$0xf] }
 0x17e   :  { %v1384_v21 = vpop.f32.mrf.mxu1  ;;  %v2193_v56 = vmax.f32 %v2129_v48, 0.0 }
 0x17f   :  { %v1719_v54 = vpop.f32.mrf.mxu3  ;;  %v1385_v24 = vadd.f32 %v1384_v21, %v1215_v30  ;;  %v3379_v30 = vld [vmem:[%s5010_s0 + $0x1f4] sm:$0xf0] }
 0x180   :  { %v1720_v38 = vadd.f32 %v1719_v54, %v1551_v19  ;;  %v2896_v19 = vld [vmem:[%s5010_s0 + $0x1f8] sm:$0xf0] }
 0x181   :  { %1423 = vmatmul.bf16.gmra.mxu1 %v2875_v2  ;;  %1592 = vmatmul.bf16.gmra.mxu2 %v2879_v7 }
 0x182   :  { %v2062_v42 = vmul.f32 %v4306_v44, %v1720_v38  ;;  %v2895_v38 = vor.u32 %v3379_v30, %v2894_v59  ;;  %v3380_v30 = vld [vmem:[%s5010_s0 + $0x204] sm:$0xf] }
 0x184   :  { %1761 = vmatmul.bf16.gmra.mxu3 %v2883_v35  ;;  %v2130_v26 = vadd.f32 %v4330_v25, %v2062_v42  ;;  %v1553_v11 = vpop.f32.mrf.mxu2  ;;  %v2891_v35 = vor.u32 %v3376_v57, %v2888_v9  ;;  %v2899_v42 = vor.u32 %v3377_v1, %v2896_v19  ;;  %v2904_v1 = vld [vmem:[%s5010_s0 + $0x210] sm:$0xf0]  ;;  %v2910_v19 = vld [vmem:[%s5010_s0 + $0x208] sm:$0xf] }
 0x185   :  { %v1554_v47 = vadd.f32 %v1553_v11, %v1385_v24 }
 0x186   :  { %v2194_v39 = vmax.f32 %v2130_v26, 0.0  ;;  %v1386_v31 = vpop.f32.mrf.mxu1  ;;  %v1220_v26 = vpop.f32.mrf.mxu0 }
 0x187   :  { %v1722_v37 = vpop.f32.mrf.mxu3  ;;  %v1387_v23 = vadd.f32 %v1386_v31, %v1217_v0 }
 0x188   :  { %v2252_v50 = vpack.c.bf16 %v2194_v39, %v2193_v56  ;;  %v1723_v4 = vadd.f32 %v1722_v37, %v1554_v47 }
 0x18a   :  { %2376 = vmatmul.bf16.gmra.mxu0 %v2252_v50  ;;  %v2063_v2 = vmul.f32 %v4306_v44, %v1723_v4 }
 0x18c   :  { %v1555_v54 = vpop.f32.mrf.mxu2  ;;  %v2131_v11 = vadd.f32 %v4330_v25, %v2063_v2 }
 0x18d   :  { %v1556_v7 = vadd.f32 %v1555_v54, %v1387_v23  ;;  %v3383_v54 = vld [vmem:[%s5010_s0 + $0x214] sm:$0xf0] }
 0x18e   :  { %v1389_v48 = vpop.f32.mrf.mxu1  ;;  %v2195_v0 = vmax.f32 %v2131_v11, 0.0  ;;  %v1222_v23 = vpop.f32.mrf.mxu0 }
 0x18f   :  { %v1724_v21 = vpop.f32.mrf.mxu3  ;;  %v1390_v47 = vadd.f32 %v1389_v48, %v1220_v26  ;;  %v2911_v26 = vor.u32 %v3383_v54, %v2910_v19  ;;  %v3384_v19 = vld [vmem:[%s5010_s0 + $0x224] sm:$0xf]  ;;  %v2920_v54 = vld [vmem:[%s5010_s0 + $0x230] sm:$0xf0] }
 0x190   :  { %v1725_v24 = vadd.f32 %v1724_v21, %v1556_v7  ;;  %v3381_v7 = vld [vmem:[%s5010_s0 + $0x20c] sm:$0xf]  ;;  %v2912_v21 = vld [vmem:[%s5010_s0 + $0x218] sm:$0xf0] }
 0x191   :  { %1428 = vmatmul.bf16.gmra.mxu1 %v2891_v35  ;;  %1597 = vmatmul.bf16.gmra.mxu2 %v2895_v38 }
 0x192   :  { %v2064_v56 = vmul.f32 %v4306_v44, %v1725_v24  ;;  %v2907_v24 = vor.u32 %v3380_v30, %v2904_v1 }
 0x194   :  { %1766 = vmatmul.bf16.gmra.mxu3 %v2899_v42  ;;  %v2132_v37 = vadd.f32 %v4330_v25, %v2064_v56  ;;  %v1558_v39 = vpop.f32.mrf.mxu2  ;;  %v2915_v56 = vor.u32 %v3381_v7, %v2912_v21  ;;  %v3385_v21 = vld [vmem:[%s5010_s0 + $0x22c] sm:$0xf] }
 0x195   :  { %v1559_v31 = vadd.f32 %v1558_v39, %v1390_v47 }
 0x196   :  { %v2196_v4 = vmax.f32 %v2132_v37, 0.0  ;;  %v1391_v57 = vpop.f32.mrf.mxu1 }
 0x197   :  { %v1727_v50 = vpop.f32.mrf.mxu3  ;;  %v1392_v2 = vadd.f32 %v1391_v57, %v1222_v23 }
 0x198   :  { %v2253_v9 = vpack.c.bf16 %v2196_v4, %v2195_v0  ;;  %v1728_v59 = vadd.f32 %v1727_v50, %v1559_v31 }
 0x19a   :  { %2381 = vmatmul.bf16.gmra.mxu0 %v2253_v9  ;;  %v2065_v38 = vmul.f32 %v4306_v44, %v1728_v59 }
 0x19c   :  { %v1560_v35 = vpop.f32.mrf.mxu2  ;;  %v2133_v37 = vadd.f32 %v4330_v25, %v2065_v38 }
 0x19d   :  { %v1561_v48 = vadd.f32 %v1560_v35, %v1392_v2  ;;  %v3387_v2 = vld [vmem:[%s5010_s0 + $0x234] sm:$0xf0]  ;;  %v2928_v35 = vld [vmem:[%s5010_s0 + $0x238] sm:$0xf0] }
 0x19e   :  { %v1394_v11 = vpop.f32.mrf.mxu1  ;;  %v2197_v4 = vmax.f32 %v2133_v37, 0.0 }
 0x19f   :  { %v1729_v42 = vpop.f32.mrf.mxu3  ;;  %v1395_v31 = vadd.f32 %v1394_v11, %v4012_v58  ;;  %v2926_v58 = vld [vmem:[%s5010_s0 + $0x228] sm:$0xf] }
 0x1a0   :  { %v1730_v47 = vadd.f32 %v1729_v42, %v1561_v48  ;;  %v2927_v11 = vor.u32 %v3387_v2, %v2926_v58  ;;  %v2936_v58 = vld [vmem:[%s5010_s0 + $0x250] sm:$0xf0]  ;;  %v3391_v2 = vld [vmem:[%s5010_s0 + $0x254] sm:$0xf0] }
 0x1a1   :  { %1433 = vmatmul.bf16.gmra.mxu1 %v2907_v24  ;;  %1602 = vmatmul.bf16.gmra.mxu2 %v2911_v26  ;;  %v2923_v26 = vor.u32 %v3384_v19, %v2920_v54  ;;  %v3388_v54 = vld [vmem:[%s5010_s0 + $0x244] sm:$0xf] }
 0x1a2   :  { %v2066_v39 = vmul.f32 %v4306_v44, %v1730_v47  ;;  %v2931_v47 = vor.u32 %v3385_v21, %v2928_v35  ;;  %v3389_v21 = vld [vmem:[%s5010_s0 + $0x24c] sm:$0xf]  ;;  %v2944_v35 = vld [vmem:[%s5010_s0 + $0x258] sm:$0xf0] }
 0x1a4   :  { %1771 = vmatmul.bf16.gmra.mxu3 %v2915_v56  ;;  %v2134_v0 = vadd.f32 %v4330_v25, %v2066_v39  ;;  %v1563_v50 = vpop.f32.mrf.mxu2 }
 0x1a5   :  { %v1564_v57 = vadd.f32 %v1563_v50, %v1395_v31 }
 0x1a6   :  { %v2198_v59 = vmax.f32 %v2134_v0, 0.0  ;;  %v1396_v30 = vpop.f32.mrf.mxu1 }
 0x1a7   :  { %v1732_v9 = vpop.f32.mrf.mxu3  ;;  %v1397_v7 = vadd.f32 %v1396_v30, %v4018_v62 }
 0x1a8   :  { %v2254_v23 = vpack.c.bf16 %v2198_v59, %v2197_v4  ;;  %v1733_v1 = vadd.f32 %v1732_v9, %v1564_v57 }
 0x1aa   :  { %2386 = vmatmul.bf16.gmra.mxu0 %v2254_v23  ;;  %v2067_v48 = vmul.f32 %v4306_v44, %v1733_v1 }
 0x1ac   :  { %v1565_v38 = vpop.f32.mrf.mxu2  ;;  %v2135_v62 = vadd.f32 %v4330_v25, %v2067_v48 }
 0x1ad   :  { %v1566_v42 = vadd.f32 %v1565_v38, %v1397_v7 }
 0x1ae   :  { %v1399_v56 = vpop.f32.mrf.mxu1  ;;  %v2199_v4 = vmax.f32 %v2135_v62, 0.0 }
 0x1af   :  { %v1734_v24 = vpop.f32.mrf.mxu3  ;;  %v1400_v31 = vadd.f32 %v1399_v56, %v4051_v13  ;;  %v2942_v13 = vld [vmem:[%s5010_s0 + $0x248] sm:$0xf] }
 0x1b0   :  { %v1735_v37 = vadd.f32 %v1734_v24, %v1566_v42 }
 0x1b1   :  { %1438 = vmatmul.bf16.gmra.mxu1 %v2923_v26  ;;  %1607 = vmatmul.bf16.gmra.mxu2 %v2927_v11  ;;  %v2939_v26 = vor.u32 %v3388_v54, %v2936_v58  ;;  %v2943_v11 = vor.u32 %v3391_v2, %v2942_v13  ;;  %v3392_v58 = vld [vmem:[%s5010_s0 + $0x264] sm:$0xf]  ;;  %v2952_v13 = vld [vmem:[%s5010_s0 + $0x270] sm:$0xf0]  ;;  %v3395_v2 = vld [vmem:[%s5010_s0 + $0x274] sm:$0xf0] }
 0x1b2   :  { %v2068_v39 = vmul.f32 %v4306_v44, %v1735_v37  ;;  %v2947_v37 = vor.u32 %v3389_v21, %v2944_v35  ;;  %v3393_v21 = vld [vmem:[%s5010_s0 + $0x26c] sm:$0xf]  ;;  %v2960_v35 = vld [vmem:[%s5010_s0 + $0x278] sm:$0xf0] }
 0x1b4   :  { %1776 = vmatmul.bf16.gmra.mxu3 %v2931_v47  ;;  %v2136_v0 = vadd.f32 %v4330_v25, %v2068_v39  ;;  %v1568_v50 = vpop.f32.mrf.mxu2 }
 0x1b5   :  { %v1569_v57 = vadd.f32 %v1568_v50, %v1400_v31 }
 0x1b6   :  { %v2200_v59 = vmax.f32 %v2136_v0, 0.0  ;;  %v1401_v30 = vpop.f32.mrf.mxu1 }
 0x1b7   :  { %v1737_v9 = vpop.f32.mrf.mxu3  ;;  %v2352_v23 = vpop.f32.mrf.mxu0  ;;  %v1402_v7 = vadd.f32 %v1401_v30, %v4057_v17 }
 0x1b8   :  { %v2255_v1 = vpack.c.bf16 %v2200_v59, %v2199_v4  ;;  %v1738_v19 = vadd.f32 %v1737_v9, %v1569_v57 }
 0x1ba   :  { %2391 = vmatmul.bf16.gmra.mxu0 %v2255_v1  ;;  %v2069_v48 = vmul.f32 %v4306_v44, %v1738_v19 }
 0x1bc   :  { %v1570_v38 = vpop.f32.mrf.mxu2  ;;  %v2137_v39 = vadd.f32 %v4330_v25, %v2069_v48 }
 0x1bd   :  { %v1571_v42 = vadd.f32 %v1570_v38, %v1402_v7 }
 0x1be   :  { %v1404_v56 = vpop.f32.mrf.mxu1  ;;  %v2201_v57 = vmax.f32 %v2137_v39, 0.0 }
 0x1bf   :  { %v1739_v24 = vpop.f32.mrf.mxu3  ;;  %v2354_v47 = vpop.f32.mrf.mxu0  ;;  %v1405_v50 = vadd.f32 %v1404_v56, %v4090_v32  ;;  %v2958_v32 = vld [vmem:[%s5010_s0 + $0x268] sm:$0xf] }
 0x1c0   :  { %v1740_v62 = vadd.f32 %v1739_v24, %v1571_v42  ;;  %v3487_v17 = vpack.c.bf16 %v2354_v47, %v2352_v23 }
 0x1c1   :  { %1443 = vmatmul.bf16.gmra.mxu1 %v2939_v26  ;;  %1612 = vmatmul.bf16.gmra.mxu2 %v2943_v11  ;;  %v2955_v26 = vor.u32 %v3392_v58, %v2952_v13  ;;  %v2959_v11 = vor.u32 %v3395_v2, %v2958_v32  ;;  %v2968_v58 = vld [vmem:[%s5010_s0 + $0x290] sm:$0xf0]  ;;  %v3399_v13 = vld [vmem:[%s5010_s0 + $0x294] sm:$0xf0]  ;;  %v3397_v2 = vld [vmem:[%s5010_s0 + $0x28c] sm:$0xf] }
 0x1c2   :  { %v2070_v0 = vmul.f32 %v4306_v44, %v1740_v62  ;;  %3488 = vst [vmem:[%s5014_s5] sm:$0xff] %v3487_v17  }
 0x1c4   :  { %1781 = vmatmul.bf16.gmra.mxu3 %v2947_v37  ;;  %v2138_v31 = vadd.f32 %v4330_v25, %v2070_v0  ;;  %v1573_v4 = vpop.f32.mrf.mxu2  ;;  %v2963_v37 = vor.u32 %v3393_v21, %v2960_v35 }
 0x1c5   :  { %v1574_v9 = vadd.f32 %v1573_v4, %v1405_v50 }
 0x1c6   :  { %v2202_v30 = vmax.f32 %v2138_v31, 0.0  ;;  %v1406_v23 = vpop.f32.mrf.mxu1 }
 0x1c7   :  { %v1742_v59 = vpop.f32.mrf.mxu3  ;;  %v2357_v1 = vpop.f32.mrf.mxu0  ;;  %v1407_v7 = vadd.f32 %v1406_v23, %v4096_v36 }
 0x1c8   :  { %v2256_v19 = vpack.c.bf16 %v2202_v30, %v2201_v57  ;;  %v1743_v54 = vadd.f32 %v1742_v59, %v1574_v9 }
 0x1ca   :  { %2396 = vmatmul.bf16.gmra.mxu0 %v2256_v19  ;;  %v2071_v48 = vmul.f32 %v4306_v44, %v1743_v54  ;;  %v3396_v54 = vld [vmem:[%s5010_s0 + $0x284] sm:$0xf] }
 0x1cc   :  { %v1575_v38 = vpop.f32.mrf.mxu2  ;;  %v2139_v17 = vadd.f32 %v4330_v25, %v2071_v48 }
 0x1cd   :  { %v1576_v42 = vadd.f32 %v1575_v38, %v1407_v7  ;;  %v2976_v7 = vld [vmem:[%s5010_s0 + $0x298] sm:$0xf0] }
 0x1ce   :  { %v1409_v56 = vpop.f32.mrf.mxu1  ;;  %v2203_v4 = vmax.f32 %v2139_v17, 0.0 }
 0x1cf   :  { %v1744_v24 = vpop.f32.mrf.mxu3  ;;  %v2359_v47 = vpop.f32.mrf.mxu0  ;;  %v1410_v31 = vadd.f32 %v1409_v56, %v4129_v51  ;;  %v2974_v51 = vld [vmem:[%s5010_s0 + $0x288] sm:$0xf]  ;;  %v2979_v56 = vor.u32 %v3397_v2, %v2976_v7 }
 0x1d0   :  { %v1745_v62 = vadd.f32 %v1744_v24, %v1576_v42  ;;  %v3492_v36 = vpack.c.bf16 %v2359_v47, %v2357_v1  ;;  %v2971_v42 = vor.u32 %v3396_v54, %v2968_v58  ;;  %v2975_v24 = vor.u32 %v3399_v13, %v2974_v51  ;;  %v3401_v58 = vld [vmem:[%s5010_s0 + $0x2ac] sm:$0xf]  ;;  %v2992_v51 = vld [vmem:[%s5010_s0 + $0x2b8] sm:$0xf0] }
 0x1d1   :  { %1448 = vmatmul.bf16.gmra.mxu1 %v2955_v26  ;;  %1617 = vmatmul.bf16.gmra.mxu2 %v2959_v11 }
 0x1d2   :  { %v2072_v39 = vmul.f32 %v4306_v44, %v1745_v62  ;;  %3644 = vst [vmem:[%s5014_s5 + $0x8] sm:$0xff] %v3492_v36  }
 0x1d4   :  { %1786 = vmatmul.bf16.gmra.mxu3 %v2963_v37  ;;  %v2140_v0 = vadd.f32 %v4330_v25, %v2072_v39  ;;  %v1578_v50 = vpop.f32.mrf.mxu2 }
 0x1d5   :  { %v1579_v57 = vadd.f32 %v1578_v50, %v1410_v31 }
 0x1d6   :  { %v2204_v59 = vmax.f32 %v2140_v0, 0.0  ;;  %v1411_v30 = vpop.f32.mrf.mxu1 }
 0x1d7   :  { %v1747_v9 = vpop.f32.mrf.mxu3  ;;  %v2362_v23 = vpop.f32.mrf.mxu0  ;;  %v1412_v32 = vadd.f32 %v1411_v30, %v4135_v55 }
 0x1d8   :  { %v2257_v1 = vpack.c.bf16 %v2204_v59, %v2203_v4  ;;  %v1748_v19 = vadd.f32 %v1747_v9, %v1579_v57 }
 0x1da   :  { %2401 = vmatmul.bf16.gmra.mxu0 %v2257_v1  ;;  %v2073_v35 = vmul.f32 %v4306_v44, %v1748_v19  ;;  %v2984_v1 = vld [vmem:[%s5010_s0 + $0x2b0] sm:$0xf0]  ;;  %v3403_v19 = vld [vmem:[%s5010_s0 + $0x2b4] sm:$0xf0] }
 0x1dc   :  { %v1580_v21 = vpop.f32.mrf.mxu2  ;;  %v2141_v37 = vadd.f32 %v4330_v25, %v2073_v35 }
 0x1dd   :  { %v1581_v38 = vadd.f32 %v1580_v21, %v1412_v32 }
 0x1de   :  { %v1414_v26 = vpop.f32.mrf.mxu1  ;;  %v2205_v0 = vmax.f32 %v2141_v37, 0.0 }
 0x1df   :  { %v1749_v48 = vpop.f32.mrf.mxu3  ;;  %v2364_v11 = vpop.f32.mrf.mxu0  ;;  %v1415_v17 = vadd.f32 %v1414_v26, %v4168_v12  ;;  %v2990_v12 = vld [vmem:[%s5010_s0 + $0x2a8] sm:$0xf] }
 0x1e0   :  { %v1750_v47 = vadd.f32 %v1749_v48, %v1581_v38  ;;  %v3497_v55 = vpack.c.bf16 %v2364_v11, %v2362_v23  ;;  %v3400_v23 = vld [vmem:[%s5010_s0 + $0x2a4] sm:$0xf]  ;;  %v2991_v35 = vor.u32 %v3403_v19, %v2990_v12 }
 0x1e1   :  { %1453 = vmatmul.bf16.gmra.mxu1 %v2971_v42  ;;  %1622 = vmatmul.bf16.gmra.mxu2 %v2975_v24  ;;  %v2987_v21 = vor.u32 %v3400_v23, %v2984_v1  ;;  %v2995_v42 = vor.u32 %v3401_v58, %v2992_v51  ;;  %v3008_v23 = vld [vmem:[%s5010_s0 + $0x2d8] sm:$0xf0] }
 0x1e2   :  { %v2074_v62 = vmul.f32 %v4306_v44, %v1750_v47  ;;  %3645 = vst [vmem:[%s5014_s5 + $0x10] sm:$0xff] %v3497_v55  }
 0x1e4   :  { %1791 = vmatmul.bf16.gmra.mxu3 %v2979_v56  ;;  %v2142_v36 = vadd.f32 %v4330_v25, %v2074_v62  ;;  %v1583_v39 = vpop.f32.mrf.mxu2 }
 0x1e5   :  { %v1584_v31 = vadd.f32 %v1583_v39, %v1415_v17 }
 0x1e6   :  { %v2206_v4 = vmax.f32 %v2142_v36, 0.0  ;;  %v1416_v57 = vpop.f32.mrf.mxu1 }
 0x1e7   :  { %v1752_v50 = vpop.f32.mrf.mxu3  ;;  %v2367_v9 = vpop.f32.mrf.mxu0  ;;  %v1417_v54 = vadd.f32 %v1416_v57, %v4174_v20  ;;  %v3000_v57 = vld [vmem:[%s5010_s0 + $0x2d0] sm:$0xf0] }
 0x1e8   :  { %v2258_v59 = vpack.c.bf16 %v2206_v4, %v2205_v0  ;;  %v1753_v30 = vadd.f32 %v1752_v50, %v1584_v31  ;;  %v3404_v4 = vld [vmem:[%s5010_s0 + $0x2c4] sm:$0xf] }
 0x1e9   :  { %v3003_v58 = vor.u32 %v3404_v4, %v3000_v57 }
 0x1ea   :  { %2406 = vmatmul.bf16.gmra.mxu0 %v2258_v59  ;;  %v2075_v32 = vmul.f32 %v4306_v44, %v1753_v30  ;;  %v3405_v30 = vld [vmem:[%s5010_s0 + $0x2cc] sm:$0xf] }
 0x1ec   :  { %v1585_v13 = vpop.f32.mrf.mxu2  ;;  %v2143_v26 = vadd.f32 %v4330_v25, %v2075_v32 }
 0x1ed   :  { %v1586_v2 = vadd.f32 %v1585_v13, %v1417_v54 }
 0x1ee   :  { %v1419_v38 = vpop.f32.mrf.mxu1  ;;  %v2207_v37 = vmax.f32 %v2143_v26, 0.0 }
 0x1ef   :  { %v1754_v7 = vpop.f32.mrf.mxu3  ;;  %v2369_v48 = vpop.f32.mrf.mxu0  ;;  %v1420_v47 = vadd.f32 %v1419_v38, %v4207_v41  ;;  %v3006_v41 = vld [vmem:[%s5010_s0 + $0x2c8] sm:$0xf] }
 0x1f0   :  { %v1755_v24 = vadd.f32 %v1754_v7, %v1586_v2  ;;  %v3502_v20 = vpack.c.bf16 %v2369_v48, %v2367_v9  ;;  %v3407_v9 = vld [vmem:[%s5010_s0 + $0x2d4] sm:$0xf0]  ;;  %v3011_v2 = vor.u32 %v3405_v30, %v3008_v23 }
 0x1f1   :  { %1458 = vmatmul.bf16.gmra.mxu1 %v2987_v21  ;;  %1627 = vmatmul.bf16.gmra.mxu2 %v2991_v35  ;;  %v3007_v51 = vor.u32 %v3407_v9, %v3006_v41 }
 0x1f2   :  { %v2076_v11 = vmul.f32 %v4306_v44, %v1755_v24  ;;  %3646 = vst [vmem:[%s5014_s5 + $0x18] sm:$0xff] %v3502_v20  }
 0x1f4   :  { %1796 = vmatmul.bf16.gmra.mxu3 %v2995_v42  ;;  %v2144_v56 = vadd.f32 %v4330_v25, %v2076_v11  ;;  %v1588_v55 = vpop.f32.mrf.mxu2 }
 0x1f5   :  { %v1589_v62 = vadd.f32 %v1588_v55, %v1420_v47 }
 0x1f6   :  { %v2208_v17 = vmax.f32 %v2144_v56, 0.0  ;;  %v1421_v39 = vpop.f32.mrf.mxu1 }
 0x1f7   :  { %v1757_v36 = vpop.f32.mrf.mxu3  ;;  %v2372_v0 = vpop.f32.mrf.mxu0  ;;  %v1422_v59 = vadd.f32 %v1421_v39, %v4213_v45 }
 0x1f8   :  { %v2259_v31 = vpack.c.bf16 %v2208_v17, %v2207_v37  ;;  %v1758_v50 = vadd.f32 %v1757_v36, %v1589_v62  ;;  %v3408_v62 = vld [vmem:[%s5010_s0 + $0x2e4] sm:$0xf]  ;;  %v3016_v36 = vld [vmem:[%s5010_s0 + $0x2f0] sm:$0xf0]  ;;  %v3411_v17 = vld [vmem:[%s5010_s0 + $0x2f4] sm:$0xf0] }
 0x1f9   :  { %v3019_v9 = vor.u32 %v3408_v62, %v3016_v36 }
 0x1fa   :  { %2411 = vmatmul.bf16.gmra.mxu0 %v2259_v31  ;;  %v2077_v12 = vmul.f32 %v4306_v44, %v1758_v50  ;;  %v3024_v31 = vld [vmem:[%s5010_s0 + $0x2f8] sm:$0xf0] }
 0x1fc   :  { %v1590_v1 = vpop.f32.mrf.mxu2  ;;  %v2145_v21 = vadd.f32 %v4330_v25, %v2077_v12 }
 0x1fd   :  { %v1591_v19 = vadd.f32 %v1590_v1, %v1422_v59 }
 0x1fe   :  { %v1424_v13 = vpop.f32.mrf.mxu1  ;;  %v2209_v24 = vmax.f32 %v2145_v21, 0.0 }
 0x1ff   :  { %v1759_v54 = vpop.f32.mrf.mxu3  ;;  %v2374_v32 = vpop.f32.mrf.mxu0  ;;  %v1425_v48 = vadd.f32 %v1424_v13, %v4240_v3  ;;  %v3022_v3 = vld [vmem:[%s5010_s0 + $0x2e8] sm:$0xf] }
 0x200   :  { %v1760_v7 = vadd.f32 %v1759_v54, %v1591_v19  ;;  %v3507_v45 = vpack.c.bf16 %v2374_v32, %v2372_v0  ;;  %v3409_v0 = vld [vmem:[%s5010_s0 + $0x2ec] sm:$0xf]  ;;  %v3023_v59 = vor.u32 %v3411_v17, %v3022_v3 }
 0x201   :  { %1463 = vmatmul.bf16.gmra.mxu1 %v3003_v58  ;;  %1632 = vmatmul.bf16.gmra.mxu2 %v3007_v51  ;;  %v3027_v1 = vor.u32 %v3409_v0, %v3024_v31  ;;  %v4704_v31 = vld [vmem:[%s5013_s3] ss:$0 sm:$0xff] }
 0x202   :  { %v2078_v35 = vmul.f32 %v4306_v44, %v1760_v7  ;;  %3647 = vst [vmem:[%s5014_s5 + $0x20] sm:$0xff] %v3507_v45  }
 0x204   :  { %1801 = vmatmul.bf16.gmra.mxu3 %v3011_v2  ;;  %v2146_v38 = vadd.f32 %v4330_v25, %v2078_v35  ;;  %v1593_v42 = vpop.f32.mrf.mxu2 }
 0x205   :  { %v1594_v20 = vadd.f32 %v1593_v42, %v1425_v48  ;;  %v3412_v48 = vld [vmem:[%s5010_s0 + $0x304] sm:$0xf]  ;;  %v3415_v42 = vld [vmem:[%s5010_s0 + $0x314] sm:$0xf0] }
 0x206   :  { %v2210_v11 = vmax.f32 %v2146_v38, 0.0  ;;  %v1426_v56 = vpop.f32.mrf.mxu1 }
 0x207   :  { %v1762_v26 = vpop.f32.mrf.mxu3  ;;  %v2377_v47 = vpop.f32.mrf.mxu0  ;;  %v1427_v39 = vadd.f32 %v1426_v56, %v4246_v14  ;;  %v4698_v56 = vld [vmem:[%s5012_s2] ss:$0 sm:$0xff] }
 0x208   :  { %v2260_v55 = vpack.c.bf16 %v2210_v11, %v2209_v24  ;;  %v1763_v37 = vadd.f32 %v1762_v26, %v1594_v20  ;;  %v3413_v20 = vld [vmem:[%s5010_s0 + $0x30c] sm:$0xf]  ;;  %v3040_v26 = vld [vmem:[%s5010_s0 + $0x318] sm:$0xf0] }
 0x209   :  { %v3043_v17 = vor.u32 %v3413_v20, %v3040_v26 }
 0x20a   :  { %2416 = vmatmul.bf16.gmra.mxu0 %v2260_v55  ;;  %v2079_v4 = vmul.f32 %v4306_v44, %v1763_v37 }
 0x20c   :  { %v1595_v50 = vpop.f32.mrf.mxu2  ;;  %v2147_v19 = vadd.f32 %v4330_v25, %v2079_v4 }
 0x20d   :  { %v1596_v57 = vadd.f32 %v1595_v50, %v1427_v39 }
 0x20e   :  { %v1429_v30 = vpop.f32.mrf.mxu1  ;;  %v2211_v32 = vmax.f32 %v2147_v19, 0.0 }
 0x20f   :  { %v1764_v41 = vpop.f32.mrf.mxu3  ;;  %v2379_v23 = vpop.f32.mrf.mxu0  ;;  %v1430_v51 = vadd.f32 %v1429_v30, %v4273_v40  ;;  %v3038_v40 = vld [vmem:[%s5010_s0 + $0x308] sm:$0xf] }
 0x210   :  { %v1765_v12 = vadd.f32 %v1764_v41, %v1596_v57  ;;  %v3512_v14 = vpack.c.bf16 %v2379_v23, %v2377_v47 }
 0x211   :  { %1468 = vmatmul.bf16.gmra.mxu1 %v3019_v9  ;;  %1637 = vmatmul.bf16.gmra.mxu2 %v3023_v59 }
 0x212   :  { %v2080_v54 = vmul.f32 %v4306_v44, %v1765_v12  ;;  %3648 = vst [vmem:[%s5014_s5 + $0x28] sm:$0xff] %v3512_v14  }
 0x214   :  { %1806 = vmatmul.bf16.gmra.mxu3 %v3027_v1  ;;  %v2148_v58 = vadd.f32 %v4330_v25, %v2080_v54  ;;  %v1598_v13 = vpop.f32.mrf.mxu2  ;;  %v3032_v25 = vld [vmem:[%s5010_s0 + $0x310] sm:$0xf0] }
 0x215   :  { %v1599_v2 = vadd.f32 %v1598_v13, %v1430_v51  ;;  %v3035_v62 = vor.u32 %v3412_v48, %v3032_v25  ;;  %v3048_v51 = vld [vmem:[%s5010_s0 + $0x330] sm:$0xf0]  ;;  %v3419_v13 = vld [vmem:[%s5010_s0 + $0x334] sm:$0xf0] }
 0x216   :  { %v2212_v45 = vmax.f32 %v2148_v58, 0.0  ;;  %v1431_v21 = vpop.f32.mrf.mxu1  ;;  %v3416_v58 = vld [vmem:[%s5010_s0 + $0x324] sm:$0xf] }
 0x217   :  { %v1767_v7 = vpop.f32.mrf.mxu3  ;;  %v2382_v35 = vpop.f32.mrf.mxu0  ;;  %v1432_v24 = vadd.f32 %v1431_v21, %v4279_v52  ;;  %v3039_v52 = vor.u32 %v3415_v42, %v3038_v40 }
 0x218   :  { %v2261_v38 = vpack.c.bf16 %v2212_v45, %v2211_v32  ;;  %v1768_v44 = vadd.f32 %v1767_v7, %v1599_v2  ;;  %v3417_v2 = vld [vmem:[%s5010_s0 + $0x32c] sm:$0xf]  ;;  %v3056_v7 = vld [vmem:[%s5010_s0 + $0x338] sm:$0xf0] }
 0x219   :  { %v3059_v42 = vor.u32 %v3417_v2, %v3056_v7 }
 0x21a   :  { %2421 = vmatmul.bf16.gmra.mxu0 %v2261_v38  ;;  %v2081_v47 = vmul.f32 %v4698_v56, %v1768_v44  ;;  %v3051_v44 = vor.u32 %v3416_v58, %v3048_v51 }
 0x21c   :  { %v1600_v11 = vpop.f32.mrf.mxu2  ;;  %v2149_v50 = vadd.f32 %v4704_v31, %v2081_v47 }
 0x21d   :  { %v1601_v55 = vadd.f32 %v1600_v11, %v1432_v24 }
 0x21e   :  { %v1434_v36 = vpop.f32.mrf.mxu1  ;;  %v2213_v59 = vmax.f32 %v2149_v50, 0.0  ;;  %v3420_v50 = vld [vmem:[%s5010_s0 + $0x344] sm:$0xf] }
 0x21f   :  { %v1769_v37 = vpop.f32.mrf.mxu3  ;;  %v2384_v3 = vpop.f32.mrf.mxu0  ;;  %v1435_v41 = vadd.f32 %v1434_v36, %v4014_v60  ;;  %v3054_v60 = vld [vmem:[%s5010_s0 + $0x328] sm:$0xf] }
 0x220   :  { %v1770_v39 = vadd.f32 %v1769_v37, %v1601_v55  ;;  %v3517_v0 = vpack.c.bf16 %v2384_v3, %v2382_v35  ;;  %v3055_v48 = vor.u32 %v3419_v13, %v3054_v60 }
 0x221   :  { %1473 = vmatmul.bf16.gmra.mxu1 %v3035_v62  ;;  %1642 = vmatmul.bf16.gmra.mxu2 %v3039_v52 }
 0x222   :  { %v2082_v4 = vmul.f32 %v4698_v56, %v1770_v39  ;;  %3649 = vst [vmem:[%s5014_s5 + $0x30] sm:$0xff] %v3517_v0  }
 0x224   :  { %1811 = vmatmul.bf16.gmra.mxu3 %v3043_v17  ;;  %v2150_v57 = vadd.f32 %v4704_v31, %v2082_v4  ;;  %v1603_v9 = vpop.f32.mrf.mxu2  ;;  %v3064_v4 = vld [vmem:[%s5010_s0 + $0x350] sm:$0xf0] }
 0x225   :  { %v1604_v30 = vadd.f32 %v1603_v9, %v1435_v41  ;;  %v3421_v9 = vld [vmem:[%s5010_s0 + $0x34c] sm:$0xf] }
 0x226   :  { %v2214_v1 = vmax.f32 %v2150_v57, 0.0  ;;  %v1436_v12 = vpop.f32.mrf.mxu1  ;;  %v3423_v57 = vld [vmem:[%s5010_s0 + $0x354] sm:$0xf0] }
 0x227   :  { %v1772_v23 = vpop.f32.mrf.mxu3  ;;  %v2387_v14 = vpop.f32.mrf.mxu0  ;;  %v1437_v32 = vadd.f32 %v1436_v12, %v4047_v8 }
 0x228   :  { %v2262_v19 = vpack.c.bf16 %v2214_v1, %v2213_v59  ;;  %v1773_v54 = vadd.f32 %v1772_v23, %v1604_v30  ;;  %v3072_v59 = vld [vmem:[%s5010_s0 + $0x358] sm:$0xf0] }
 0x229   :  { %v3075_v51 = vor.u32 %v3421_v9, %v3072_v59 }
 0x22a   :  { %2426 = vmatmul.bf16.gmra.mxu0 %v2262_v19  ;;  %v2083_v21 = vmul.f32 %v4698_v56, %v1773_v54 }
 0x22c   :  { %v1605_v45 = vpop.f32.mrf.mxu2  ;;  %v2151_v20 = vadd.f32 %v4704_v31, %v2083_v21 }
 0x22d   :  { %v1606_v35 = vadd.f32 %v1605_v45, %v1437_v32 }
 0x22e   :  { %v1439_v25 = vpop.f32.mrf.mxu1  ;;  %v2215_v37 = vmax.f32 %v2151_v20, 0.0  ;;  %v3427_v20 = vld [vmem:[%s5010_s0 + $0x374] sm:$0xf0] }
 0x22f   :  { %v1774_v38 = vpop.f32.mrf.mxu3  ;;  %v2389_v40 = vpop.f32.mrf.mxu0  ;;  %v1440_v47 = vadd.f32 %v1439_v25, %v4053_v15  ;;  %v3070_v15 = vld [vmem:[%s5010_s0 + $0x348] sm:$0xf] }
 0x230   :  { %v1775_v24 = vadd.f32 %v1774_v38, %v1606_v35  ;;  %v3522_v8 = vpack.c.bf16 %v2389_v40, %v2387_v14  ;;  %v3067_v14 = vor.u32 %v3420_v50, %v3064_v4  ;;  %v3071_v19 = vor.u32 %v3423_v57, %v3070_v15 }
 0x231   :  { %1478 = vmatmul.bf16.gmra.mxu1 %v3051_v44  ;;  %1647 = vmatmul.bf16.gmra.mxu2 %v3055_v48 }
 0x232   :  { %v2084_v26 = vmul.f32 %v4698_v56, %v1775_v24  ;;  %3650 = vst [vmem:[%s5014_s5 + $0x38] sm:$0xff] %v3522_v8   ;;  %v3424_v24 = vld [vmem:[%s5010_s0 + $0x364] sm:$0xf]  ;;  %v3080_v8 = vld [vmem:[%s5010_s0 + $0x370] sm:$0xf0] }
 0x234   :  { %1816 = vmatmul.bf16.gmra.mxu3 %v3059_v42  ;;  %v2152_v11 = vadd.f32 %v4704_v31, %v2084_v26  ;;  %v1608_v55 = vpop.f32.mrf.mxu2 }
 0x235   :  { %v1609_v62 = vadd.f32 %v1608_v55, %v1440_v47  ;;  %v3088_v47 = vld [vmem:[%s5010_s0 + $0x378] sm:$0xf0] }
 0x236   :  { %v2216_v36 = vmax.f32 %v2152_v11, 0.0  ;;  %v1441_v3 = vpop.f32.mrf.mxu1  ;;  %v3425_v11 = vld [vmem:[%s5010_s0 + $0x36c] sm:$0xf] }
 0x237   :  { %v1777_v52 = vpop.f32.mrf.mxu3  ;;  %v2392_v17 = vpop.f32.mrf.mxu0  ;;  %v1442_v41 = vadd.f32 %v1441_v3, %v4086_v27 }
 0x238   :  { %v2263_v39 = vpack.c.bf16 %v2216_v36, %v2215_v37  ;;  %v1778_v0 = vadd.f32 %v1777_v52, %v1609_v62  ;;  %v3083_v36 = vor.u32 %v3424_v24, %v3080_v8 }
 0x23a   :  { %2431 = vmatmul.bf16.gmra.mxu0 %v2263_v39  ;;  %v2085_v23 = vmul.f32 %v4698_v56, %v1778_v0  ;;  %v3091_v0 = vor.u32 %v3425_v11, %v3088_v47 }
 0x23c   :  { %v1610_v30 = vpop.f32.mrf.mxu2  ;;  %v2153_v13 = vadd.f32 %v4704_v31, %v2085_v23 }
 0x23d   :  { %v1611_v1 = vadd.f32 %v1610_v30, %v1442_v41 }
 0x23e   :  { %v1444_v54 = vpop.f32.mrf.mxu1  ;;  %v2217_v21 = vmax.f32 %v2153_v13, 0.0  ;;  %v3429_v13 = vld [vmem:[%s5010_s0 + $0x38c] sm:$0xf] }
 0x23f   :  { %v1779_v12 = vpop.f32.mrf.mxu3  ;;  %v2394_v58 = vpop.f32.mrf.mxu0  ;;  %v1445_v7 = vadd.f32 %v1444_v54, %v4092_v34  ;;  %v3086_v34 = vld [vmem:[%s5010_s0 + $0x368] sm:$0xf] }
 0x240   :  { %v1780_v60 = vadd.f32 %v1779_v12, %v1611_v1  ;;  %v3527_v27 = vpack.c.bf16 %v2394_v58, %v2392_v17  ;;  %v3087_v3 = vor.u32 %v3427_v20, %v3086_v34  ;;  %v3428_v58 = vld [vmem:[%s5010_s0 + $0x384] sm:$0xf] }
 0x241   :  { %1483 = vmatmul.bf16.gmra.mxu1 %v3067_v14  ;;  %1652 = vmatmul.bf16.gmra.mxu2 %v3071_v19 }
 0x242   :  { %v2086_v32 = vmul.f32 %v4698_v56, %v1780_v60  ;;  %3651 = vst [vmem:[%s5014_s5 + $0x40] sm:$0xff] %v3527_v27   ;;  %v3431_v60 = vld [vmem:[%s5010_s0 + $0x394] sm:$0xf0] }
 0x244   :  { %1821 = vmatmul.bf16.gmra.mxu3 %v3075_v51  ;;  %v2154_v2 = vadd.f32 %v4704_v31, %v2086_v32  ;;  %v1613_v45 = vpop.f32.mrf.mxu2  ;;  %v3096_v51 = vld [vmem:[%s5010_s0 + $0x390] sm:$0xf0]  ;;  %v3104_v32 = vld [vmem:[%s5010_s0 + $0x398] sm:$0xf0] }
 0x245   :  { %v1614_v35 = vadd.f32 %v1613_v45, %v1445_v7 }
 0x246   :  { %v2218_v44 = vmax.f32 %v2154_v2, 0.0  ;;  %v1446_v48 = vpop.f32.mrf.mxu1 }
 0x247   :  { %v1782_v38 = vpop.f32.mrf.mxu3  ;;  %v2397_v25 = vpop.f32.mrf.mxu0  ;;  %v1447_v26 = vadd.f32 %v1446_v48, %v4125_v46 }
 0x248   :  { %v2264_v40 = vpack.c.bf16 %v2218_v44, %v2217_v21  ;;  %v1783_v42 = vadd.f32 %v1782_v38, %v1614_v35  ;;  %v3099_v35 = vor.u32 %v3428_v58, %v3096_v51 }
 0x24a   :  { %2436 = vmatmul.bf16.gmra.mxu0 %v2264_v40  ;;  %v2087_v37 = vmul.f32 %v4698_v56, %v1783_v42 }
 0x24c   :  { %v1615_v55 = vpop.f32.mrf.mxu2  ;;  %v2155_v4 = vadd.f32 %v4704_v31, %v2087_v37 }
 0x24d   :  { %v1616_v62 = vadd.f32 %v1615_v55, %v1447_v26 }
 0x24e   :  { %v1449_v17 = vpop.f32.mrf.mxu1  ;;  %v2219_v59 = vmax.f32 %v2155_v4, 0.0 }
 0x24f   :  { %v1784_v52 = vpop.f32.mrf.mxu3  ;;  %v2399_v39 = vpop.f32.mrf.mxu0  ;;  %v1450_v41 = vadd.f32 %v1449_v17, %v4131_v53  ;;  %v3102_v53 = vld [vmem:[%s5010_s0 + $0x388] sm:$0xf]  ;;  %v3112_v17 = vld [vmem:[%s5010_s0 + $0x3b0] sm:$0xf0] }
 0x250   :  { %v1785_v50 = vadd.f32 %v1784_v52, %v1616_v62  ;;  %v3532_v46 = vpack.c.bf16 %v2399_v39, %v2397_v25  ;;  %v3103_v38 = vor.u32 %v3431_v60, %v3102_v53  ;;  %v3107_v25 = vor.u32 %v3429_v13, %v3104_v32  ;;  %v3435_v39 = vld [vmem:[%s5010_s0 + $0x3b4] sm:$0xf0] }
 0x251   :  { %1488 = vmatmul.bf16.gmra.mxu1 %v3083_v36  ;;  %1657 = vmatmul.bf16.gmra.mxu2 %v3087_v3  ;;  %v3432_v3 = vld [vmem:[%s5010_s0 + $0x3a4] sm:$0xf] }
 0x252   :  { %v2088_v15 = vmul.f32 %v4698_v56, %v1785_v50  ;;  %3652 = vst [vmem:[%s5014_s5 + $0x48] sm:$0xff] %v3532_v46   ;;  %v3433_v50 = vld [vmem:[%s5010_s0 + $0x3ac] sm:$0xf]  ;;  %v3120_v46 = vld [vmem:[%s5010_s0 + $0x3b8] sm:$0xf0] }
 0x254   :  { %1826 = vmatmul.bf16.gmra.mxu3 %v3091_v0  ;;  %v2156_v57 = vadd.f32 %v4704_v31, %v2088_v15  ;;  %v1618_v9 = vpop.f32.mrf.mxu2 }
 0x255   :  { %v1619_v30 = vadd.f32 %v1618_v9, %v1450_v41  ;;  %v3115_v9 = vor.u32 %v3432_v3, %v3112_v17 }
 0x256   :  { %v2220_v1 = vmax.f32 %v2156_v57, 0.0  ;;  %v1451_v12 = vpop.f32.mrf.mxu1 }
 0x257   :  { %v1787_v23 = vpop.f32.mrf.mxu3  ;;  %v2402_v14 = vpop.f32.mrf.mxu0  ;;  %v1452_v27 = vadd.f32 %v1451_v12, %v4164_v5 }
 0x258   :  { %v2265_v19 = vpack.c.bf16 %v2220_v1, %v2219_v59  ;;  %v1788_v54 = vadd.f32 %v1787_v23, %v1619_v30  ;;  %v3123_v1 = vor.u32 %v3433_v50, %v3120_v46 }
 0x25a   :  { %2441 = vmatmul.bf16.gmra.mxu0 %v2265_v19  ;;  %v2089_v7 = vmul.f32 %v4698_v56, %v1788_v54 }
 0x25c   :  { %v1620_v2 = vpop.f32.mrf.mxu2  ;;  %v2157_v42 = vadd.f32 %v4704_v31, %v2089_v7 }
 0x25d   :  { %v1621_v45 = vadd.f32 %v1620_v2, %v1452_v27 }
 0x25e   :  { %v1454_v44 = vpop.f32.mrf.mxu1  ;;  %v2221_v26 = vmax.f32 %v2157_v42, 0.0 }
 0x25f   :  { %v1789_v21 = vpop.f32.mrf.mxu3  ;;  %v2404_v48 = vpop.f32.mrf.mxu0  ;;  %v1455_v34 = vadd.f32 %v1454_v44, %v4170_v18  ;;  %v3118_v18 = vld [vmem:[%s5010_s0 + $0x3a8] sm:$0xf] }
 0x260   :  { %v1790_v40 = vadd.f32 %v1789_v21, %v1621_v45  ;;  %v3537_v5 = vpack.c.bf16 %v2404_v48, %v2402_v14  ;;  %v3119_v59 = vor.u32 %v3435_v39, %v3118_v18  ;;  %v3436_v21 = vld [vmem:[%s5010_s0 + $0x3c4] sm:$0xf]  ;;  %v3437_v48 = vld [vmem:[%s5010_s0 + $0x3cc] sm:$0xf] }
 0x261   :  { %1493 = vmatmul.bf16.gmra.mxu1 %v3099_v35  ;;  %1662 = vmatmul.bf16.gmra.mxu2 %v3103_v38  ;;  %v3128_v35 = vld [vmem:[%s5010_s0 + $0x3d0] sm:$0xf0]  ;;  %v3439_v38 = vld [vmem:[%s5010_s0 + $0x3d4] sm:$0xf0] }
 0x262   :  { %v2090_v24 = vmul.f32 %v4698_v56, %v1790_v40  ;;  %3653 = vst [vmem:[%s5014_s5 + $0x50] sm:$0xff] %v3537_v5  }
 0x264   :  { %1831 = vmatmul.bf16.gmra.mxu3 %v3107_v25  ;;  %v2158_v8 = vadd.f32 %v4704_v31, %v2090_v24  ;;  %v1623_v20 = vpop.f32.mrf.mxu2  ;;  %v3136_v25 = vld [vmem:[%s5010_s0 + $0x3d8] sm:$0xf0] }
 0x265   :  { %v1624_v11 = vadd.f32 %v1623_v20, %v1455_v34 }
 0x266   :  { %v2222_v55 = vmax.f32 %v2158_v8, 0.0  ;;  %v1456_v37 = vpop.f32.mrf.mxu1  ;;  %v3131_v8 = vor.u32 %v3436_v21, %v3128_v35 }
 0x267   :  { %v1792_v47 = vpop.f32.mrf.mxu3  ;;  %v2407_v62 = vpop.f32.mrf.mxu0  ;;  %v1457_v0 = vadd.f32 %v1456_v37, %v4203_v33 }
 0x268   :  { %v2266_v52 = vpack.c.bf16 %v2222_v55, %v2221_v26  ;;  %v1793_v36 = vadd.f32 %v1792_v47, %v1624_v11  ;;  %v3139_v11 = vor.u32 %v3437_v48, %v3136_v25 }
 0x26a   :  { %2446 = vmatmul.bf16.gmra.mxu0 %v2266_v52  ;;  %v2091_v15 = vmul.f32 %v4698_v56, %v1793_v36 }
 0x26c   :  { %v1625_v4 = vpop.f32.mrf.mxu2  ;;  %v2159_v14 = vadd.f32 %v4704_v31, %v2091_v15  ;;  %v3440_v15 = vld [vmem:[%s5010_s0 + $0x3e4] sm:$0xf] }
 0x26d   :  { %v1626_v57 = vadd.f32 %v1625_v4, %v1457_v0 }
 0x26e   :  { %v1459_v30 = vpop.f32.mrf.mxu1  ;;  %v2223_v53 = vmax.f32 %v2159_v14, 0.0 }
 0x26f   :  { %v1794_v41 = vpop.f32.mrf.mxu3  ;;  %v2409_v23 = vpop.f32.mrf.mxu0  ;;  %v1460_v58 = vadd.f32 %v1459_v30, %v4209_v43  ;;  %v3134_v43 = vld [vmem:[%s5010_s0 + $0x3c8] sm:$0xf]  ;;  %v3152_v30 = vld [vmem:[%s5010_s0 + $0x3f8] sm:$0xf0] }
 0x270   :  { %v1795_v12 = vadd.f32 %v1794_v41, %v1626_v57  ;;  %v3542_v33 = vpack.c.bf16 %v2409_v23, %v2407_v62  ;;  %v3135_v34 = vor.u32 %v3439_v38, %v3134_v43  ;;  %v3144_v57 = vld [vmem:[%s5010_s0 + $0x3f0] sm:$0xf0]  ;;  %v3443_v41 = vld [vmem:[%s5010_s0 + $0x3f4] sm:$0xf0] }
 0x271   :  { %1498 = vmatmul.bf16.gmra.mxu1 %v3115_v9  ;;  %1667 = vmatmul.bf16.gmra.mxu2 %v3119_v59  ;;  %v3441_v59 = vld [vmem:[%s5010_s0 + $0x3ec] sm:$0xf]  ;;  %v3147_v14 = vor.u32 %v3440_v15, %v3144_v57 }
 0x272   :  { %v2092_v19 = vmul.f32 %v4698_v56, %v1795_v12  ;;  %3654 = vst [vmem:[%s5014_s5 + $0x58] sm:$0xff] %v3542_v33  }
 0x274   :  { %1836 = vmatmul.bf16.gmra.mxu3 %v3123_v1  ;;  %v2160_v54 = vadd.f32 %v4704_v31, %v2092_v19  ;;  %v1628_v51 = vpop.f32.mrf.mxu2 }
 0x275   :  { %v1629_v27 = vadd.f32 %v1628_v51, %v1460_v58  ;;  %v3155_v51 = vor.u32 %v3441_v59, %v3152_v30 }
 0x276   :  { %v2224_v60 = vmax.f32 %v2160_v54, 0.0  ;;  %v1461_v32 = vpop.f32.mrf.mxu1 }
 0x277   :  { %v1797_v13 = vpop.f32.mrf.mxu3  ;;  %v2412_v2 = vpop.f32.mrf.mxu0  ;;  %v1462_v44 = vadd.f32 %v1461_v32, %v4236_v63 }
 0x278   :  { %v2267_v7 = vpack.c.bf16 %v2224_v60, %v2223_v53  ;;  %v1798_v45 = vadd.f32 %v1797_v13, %v1629_v27 }
 0x27a   :  { %2451 = vmatmul.bf16.gmra.mxu0 %v2267_v7  ;;  %v2093_v5 = vmul.f32 %v4698_v56, %v1798_v45 }
 0x27c   :  { %v1630_v40 = vpop.f32.mrf.mxu2  ;;  %v2161_v55 = vadd.f32 %v4704_v31, %v2093_v5 }
 0x27d   :  { %v1631_v42 = vadd.f32 %v1630_v40, %v1462_v44 }
 0x27e   :  { %v1464_v20 = vpop.f32.mrf.mxu1  ;;  %v2225_v3 = vmax.f32 %v2161_v55, 0.0 }
 0x27f   :  { %v1799_v24 = vpop.f32.mrf.mxu3  ;;  %v2414_v26 = vpop.f32.mrf.mxu0  ;;  %v1465_v52 = vadd.f32 %v1464_v20, %v4242_v6  ;;  %v3150_v6 = vld [vmem:[%s5010_s0 + $0x3e8] sm:$0xf] }
 0x280   :  { %v1800_v47 = vadd.f32 %v1799_v24, %v1631_v42  ;;  %v3547_v63 = vpack.c.bf16 %v2414_v26, %v2412_v2  ;;  %v3151_v19 = vor.u32 %v3443_v41, %v3150_v6 }
 0x281   :  { %1503 = vmatmul.bf16.gmra.mxu1 %v3131_v8  ;;  %1672 = vmatmul.bf16.gmra.mxu2 %v3135_v34 }
 0x282   :  { %v2094_v37 = vmul.f32 %v4698_v56, %v1800_v47  ;;  %3655 = vst [vmem:[%s5014_s5 + $0x60] sm:$0xff] %v3547_v63  }
 0x284   :  { %1841 = vmatmul.bf16.gmra.mxu3 %v3139_v11  ;;  %v2162_v62 = vadd.f32 %v4704_v31, %v2094_v37  ;;  %v1633_v36 = vpop.f32.mrf.mxu2 }
 0x285   :  { %v1634_v18 = vadd.f32 %v1633_v36, %v1465_v52 }
 0x286   :  { %v2226_v17 = vmax.f32 %v2162_v62, 0.0  ;;  %v1466_v0 = vpop.f32.mrf.mxu1 }
 0x287   :  { %v1802_v39 = vpop.f32.mrf.mxu3  ;;  %v2417_v50 = vpop.f32.mrf.mxu0  ;;  %v1467_v9 = vadd.f32 %v1466_v0, %v4266_v28 }
 0x288   :  { %v2268_v46 = vpack.c.bf16 %v2226_v17, %v2225_v3  ;;  %v1803_v4 = vadd.f32 %v1802_v39, %v1634_v18 }
 0x28a   :  { %2456 = vmatmul.bf16.gmra.mxu0 %v2268_v46  ;;  %v2095_v1 = vmul.f32 %v4698_v56, %v1803_v4 }
 0x28c   :  { %v1635_v23 = vpop.f32.mrf.mxu2  ;;  %v2163_v60 = vadd.f32 %v4704_v31, %v2095_v1 }
 0x28d   :  { %v1636_v12 = vadd.f32 %v1635_v23, %v1467_v9 }
 0x28e   :  { %v1469_v54 = vpop.f32.mrf.mxu1  ;;  %v2227_v7 = vmax.f32 %v2163_v60, 0.0 }
 0x28f   :  { %v1804_v33 = vpop.f32.mrf.mxu3  ;;  %v2419_v58 = vpop.f32.mrf.mxu0  ;;  %v1470_v32 = vadd.f32 %v1469_v54, %v4275_v49 }
 0x290   :  { %v1805_v53 = vadd.f32 %v1804_v33, %v1636_v12  ;;  %v3552_v28 = vpack.c.bf16 %v2419_v58, %v2417_v50 }
 0x291   :  { %1508 = vmatmul.bf16.gmra.mxu1 %v3147_v14  ;;  %1677 = vmatmul.bf16.gmra.mxu2 %v3151_v19 }
 0x292   :  { %v2096_v27 = vmul.f32 %v4698_v56, %v1805_v53  ;;  %3656 = vst [vmem:[%s5014_s5 + $0x68] sm:$0xff] %v3552_v28  }
 0x294   :  { %1846 = vmatmul.bf16.gmra.mxu3 %v3155_v51  ;;  %v2164_v13 = vadd.f32 %v4704_v31, %v2096_v27  ;;  %v1638_v2 = vpop.f32.mrf.mxu2 }
 0x295   :  { %v1639_v21 = vadd.f32 %v1638_v2, %v1470_v32 }
 0x296   :  { %v2228_v45 = vmax.f32 %v2164_v13, 0.0  ;;  %v1471_v43 = vpop.f32.mrf.mxu1 }
 0x297   :  { %v1807_v35 = vpop.f32.mrf.mxu3  ;;  %v2422_v38 = vpop.f32.mrf.mxu0  ;;  %v1472_v25 = vadd.f32 %v1471_v43, %v4299_v22 }
 0x298   :  { %v2269_v44 = vpack.c.bf16 %v2228_v45, %v2227_v7  ;;  %v1808_v48 = vadd.f32 %v1807_v35, %v1639_v21 }
 0x29a   :  { %2461 = vmatmul.bf16.gmra.mxu0 %v2269_v44  ;;  %v2097_v5 = vmul.f32 %v4698_v56, %v1808_v48 }
 0x29c   :  { %v1640_v40 = vpop.f32.mrf.mxu2  ;;  %v2165_v26 = vadd.f32 %v4704_v31, %v2097_v5 }
 0x29d   :  { %v1641_v42 = vadd.f32 %v1640_v40, %v1472_v25 }
 0x29e   :  { %v1474_v8 = vpop.f32.mrf.mxu1  ;;  %v2229_v55 = vmax.f32 %v2165_v26, 0.0 }
 0x29f   :  { %v1809_v24 = vpop.f32.mrf.mxu3  ;;  %v2424_v34 = vpop.f32.mrf.mxu0  ;;  %v1475_v22 = vadd.f32 %v1474_v8, %v4016_v61  ;;  %v5028_v8 = vld [vmem:[#allocation4_spill] sm:$0xff] }
 0x2a0   :  { %v1810_v49 = vadd.f32 %v1809_v24, %v1641_v42  ;;  %v3557_v20 = vpack.c.bf16 %v2424_v34, %v2422_v38 }
 0x2a2   :  { %v2098_v11 = vmul.f32 %v4698_v56, %v1810_v49  ;;  %3657 = vst [vmem:[%s5014_s5 + $0x70] sm:$0xff] %v3557_v20  }
 0x2a4   :  { %v2166_v47 = vadd.f32 %v4704_v31, %v2098_v11  ;;  %v1643_v63 = vpop.f32.mrf.mxu2 }
 0x2a5   :  { %v1644_v62 = vadd.f32 %v1643_v63, %v1475_v22 }
 0x2a6   :  { %v2230_v37 = vmax.f32 %v2166_v47, 0.0  ;;  %v1476_v36 = vpop.f32.mrf.mxu1 }
 0x2a7   :  { %v1812_v52 = vpop.f32.mrf.mxu3  ;;  %v2427_v3 = vpop.f32.mrf.mxu0  ;;  %v1477_v39 = vadd.f32 %v1476_v36, %v4049_v10  ;;  %v5029_v36 = vld [vmem:[#allocation5_spill] sm:$0xff] }
 0x2a8   :  { %v2270_v17 = vpack.c.bf16 %v2230_v37, %v2229_v55  ;;  %v1813_v18 = vadd.f32 %v1812_v52, %v1644_v62 }
 0x2aa   :  { %2466 = vmatmul.bf16.gmra.mxu0 %v2270_v17  ;;  %v2099_v50 = vmul.f32 %v4698_v56, %v1813_v18 }
 0x2ac   :  { %v1645_v0 = vpop.f32.mrf.mxu2  ;;  %v2167_v41 = vadd.f32 %v4704_v31, %v2099_v50 }
 0x2ad   :  { %v1646_v46 = vadd.f32 %v1645_v0, %v1477_v39 }
 0x2ae   :  { %v1479_v15 = vpop.f32.mrf.mxu1  ;;  %v2231_v23 = vmax.f32 %v2167_v41, 0.0 }
 0x2af   :  { %v1814_v4 = vpop.f32.mrf.mxu3  ;;  %v2429_v57 = vpop.f32.mrf.mxu0  ;;  %v1480_v10 = vadd.f32 %v1479_v15, %v4055_v16 }
 0x2b0   :  { %v1815_v61 = vadd.f32 %v1814_v4, %v1646_v46  ;;  %v3562_v6 = vpack.c.bf16 %v2429_v57, %v2427_v3 }
 0x2b2   :  { %v2100_v9 = vmul.f32 %v4698_v56, %v1815_v61  ;;  %3658 = vst [vmem:[%s5014_s5 + $0x78] sm:$0xff] %v3562_v6   ;;  %v5030_v61 = vld [vmem:[#allocation6_spill] sm:$0xff] }
 0x2b4   :  { %v2168_v59 = vadd.f32 %v4704_v31, %v2100_v9  ;;  %v1648_v30 = vpop.f32.mrf.mxu2 }
 0x2b5   :  { %v1649_v12 = vadd.f32 %v1648_v30, %v1480_v10 }
 0x2b6   :  { %v2232_v1 = vmax.f32 %v2168_v59, 0.0  ;;  %v1481_v14 = vpop.f32.mrf.mxu1 }
 0x2b7   :  { %v1817_v33 = vpop.f32.mrf.mxu3  ;;  %v2432_v19 = vpop.f32.mrf.mxu0  ;;  %v1482_v51 = vadd.f32 %v1481_v14, %v4088_v29  ;;  %v5027_v29 = vld [vmem:[#allocation3_spill] sm:$0xff] }
 0x2b8   :  { %v2271_v54 = vpack.c.bf16 %v2232_v1, %v2231_v23  ;;  %v1818_v58 = vadd.f32 %v1817_v33, %v1649_v12 }
 0x2ba   :  { %2471 = vmatmul.bf16.gmra.mxu0 %v2271_v54  ;;  %v2101_v28 = vmul.f32 %v4698_v56, %v1818_v58  ;;  %v5031_v54 = vld [vmem:[#allocation7_spill] sm:$0xff] }
 0x2bc   :  { %v1650_v53 = vpop.f32.mrf.mxu2  ;;  %v2169_v7 = vadd.f32 %v4704_v31, %v2101_v28 }
 0x2bd   :  { %v1651_v60 = vadd.f32 %v1650_v53, %v1482_v51 }
 0x2be   :  { %v1484_v13 = vpop.f32.mrf.mxu1  ;;  %v2233_v38 = vmax.f32 %v2169_v7, 0.0  ;;  %v5032_v7 = vld [vmem:[#allocation8_spill] sm:$0xff] }
 0x2bf   :  { %v1819_v27 = vpop.f32.mrf.mxu3  ;;  %v2434_v32 = vpop.f32.mrf.mxu0  ;;  %v1485_v35 = vadd.f32 %v1484_v13, %v5027_v29 }
 0x2c0   :  { %v1820_v16 = vadd.f32 %v1819_v27, %v1651_v60  ;;  %v3567_v2 = vpack.c.bf16 %v2434_v32, %v2432_v19 }
 0x2c2   :  { %v2102_v45 = vmul.f32 %v4698_v56, %v1820_v16  ;;  %3659 = vst [vmem:[%s5014_s5 + $0x80] sm:$0xff] %v3567_v2  }
 0x2c4   :  { %v2170_v21 = vadd.f32 %v4704_v31, %v2102_v45  ;;  %v1653_v43 = vpop.f32.mrf.mxu2 }
 0x2c5   :  { %v1654_v48 = vadd.f32 %v1653_v43, %v1485_v35 }
 0x2c6   :  { %v2234_v44 = vmax.f32 %v2170_v21, 0.0  ;;  %v1486_v40 = vpop.f32.mrf.mxu1 }
 0x2c7   :  { %v1822_v25 = vpop.f32.mrf.mxu3  ;;  %v2437_v5 = vpop.f32.mrf.mxu0  ;;  %v1487_v34 = vadd.f32 %v1486_v40, %v5028_v8 }
 0x2c8   :  { %v2272_v42 = vpack.c.bf16 %v2234_v44, %v2233_v38  ;;  %v1823_v24 = vadd.f32 %v1822_v25, %v1654_v48 }
 0x2ca   :  { %2476 = vmatmul.bf16.gmra.mxu0 %v2272_v42  ;;  %v2103_v20 = vmul.f32 %v4698_v56, %v1823_v24  ;;  %v5033_v24 = vld [vmem:[#allocation9_spill] sm:$0xff] }
 0x2cc   :  { %v1655_v49 = vpop.f32.mrf.mxu2  ;;  %v2171_v37 = vadd.f32 %v4704_v31, %v2103_v20 }
 0x2cd   :  { %v1656_v26 = vadd.f32 %v1655_v49, %v1487_v34 }
 0x2ce   :  { %v1489_v47 = vpop.f32.mrf.mxu1  ;;  %v2235_v18 = vmax.f32 %v2171_v37, 0.0  ;;  %v5034_v37 = vld [vmem:[#allocation10_spill] sm:$0xff] }
 0x2cf   :  { %v1824_v11 = vpop.f32.mrf.mxu3  ;;  %v2439_v22 = vpop.f32.mrf.mxu0  ;;  %v1490_v3 = vadd.f32 %v1489_v47, %v5029_v36 }
 0x2d0   :  { %v1825_v63 = vadd.f32 %v1824_v11, %v1656_v26  ;;  %v3572_v55 = vpack.c.bf16 %v2439_v22, %v2437_v5 }
 0x2d2   :  { %v2104_v62 = vmul.f32 %v4698_v56, %v1825_v63  ;;  %3660 = vst [vmem:[%s5014_s5 + $0x88] sm:$0xff] %v3572_v55  }
 0x2d4   :  { %v2172_v52 = vadd.f32 %v4704_v31, %v2104_v62  ;;  %v1658_v17 = vpop.f32.mrf.mxu2 }
 0x2d5   :  { %v1659_v0 = vadd.f32 %v1658_v17, %v1490_v3 }
 0x2d6   :  { %v2236_v39 = vmax.f32 %v2172_v52, 0.0  ;;  %v1491_v46 = vpop.f32.mrf.mxu1 }
 0x2d7   :  { %v1827_v50 = vpop.f32.mrf.mxu3  ;;  %v2442_v4 = vpop.f32.mrf.mxu0  ;;  %v1492_v6 = vadd.f32 %v1491_v46, %v5030_v61 }
 0x2d8   :  { %v2273_v15 = vpack.c.bf16 %v2236_v39, %v2235_v18  ;;  %v1828_v57 = vadd.f32 %v1827_v50, %v1659_v0 }
 0x2da   :  { %2481 = vmatmul.bf16.gmra.mxu0 %v2273_v15  ;;  %v2105_v9 = vmul.f32 %v4698_v56, %v1828_v57  ;;  %v5035_v57 = vld [vmem:[#allocation11_spill] sm:$0xff] }
 0x2dc   :  { %v1660_v41 = vpop.f32.mrf.mxu2  ;;  %v2173_v33 = vadd.f32 %v4704_v31, %v2105_v9 }
 0x2dd   :  { %v1661_v59 = vadd.f32 %v1660_v41, %v1492_v6 }
 0x2de   :  { %v1494_v30 = vpop.f32.mrf.mxu1  ;;  %v2237_v53 = vmax.f32 %v2173_v33, 0.0  ;;  %v5036_v33 = vld [vmem:[#allocation12_spill] sm:$0xff] }
 0x2df   :  { %v1829_v10 = vpop.f32.mrf.mxu3  ;;  %v2444_v23 = vpop.f32.mrf.mxu0  ;;  %v1495_v58 = vadd.f32 %v1494_v30, %v5031_v54 }
 0x2e0   :  { %v1830_v1 = vadd.f32 %v1829_v10, %v1661_v59  ;;  %v3577_v12 = vpack.c.bf16 %v2444_v23, %v2442_v4 }
 0x2e2   :  { %v2106_v14 = vmul.f32 %v4698_v56, %v1830_v1  ;;  %3661 = vst [vmem:[%s5014_s5 + $0x90] sm:$0xff] %v3577_v12  }
 0x2e4   :  { %v2174_v19 = vadd.f32 %v4704_v31, %v2106_v14  ;;  %v1663_v51 = vpop.f32.mrf.mxu2 }
 0x2e5   :  { %v1664_v60 = vadd.f32 %v1663_v51, %v1495_v58 }
 0x2e6   :  { %v2238_v28 = vmax.f32 %v2174_v19, 0.0  ;;  %v1496_v13 = vpop.f32.mrf.mxu1 }
 0x2e7   :  { %v1832_v27 = vpop.f32.mrf.mxu3  ;;  %v2447_v32 = vpop.f32.mrf.mxu0  ;;  %v1497_v45 = vadd.f32 %v1496_v13, %v5032_v7 }
 0x2e8   :  { %v2274_v16 = vpack.c.bf16 %v2238_v28, %v2237_v53  ;;  %v1833_v2 = vadd.f32 %v1832_v27, %v1664_v60 }
 0x2ea   :  { %2486 = vmatmul.bf16.gmra.mxu0 %v2274_v16  ;;  %v2107_v29 = vmul.f32 %v4698_v56, %v1833_v2  ;;  %v5037_v2 = vld [vmem:[#allocation13_spill] sm:$0xff] }
 0x2ec   :  { %v1665_v21 = vpop.f32.mrf.mxu2  ;;  %v2175_v40 = vadd.f32 %v4704_v31, %v2107_v29 }
 0x2ed   :  { %v1666_v35 = vadd.f32 %v1665_v21, %v1497_v45 }
 0x2ee   :  { %v1499_v38 = vpop.f32.mrf.mxu1  ;;  %v2239_v49 = vmax.f32 %v2175_v40, 0.0  ;;  %v5038_v40 = vld [vmem:[#allocation14_spill] sm:$0xff] }
 0x2ef   :  { %v1834_v43 = vpop.f32.mrf.mxu3  ;;  %v2449_v44 = vpop.f32.mrf.mxu0  ;;  %v1500_v8 = vadd.f32 %v1499_v38, %v5033_v24 }
 0x2f0   :  { %v1835_v48 = vadd.f32 %v1834_v43, %v1666_v35  ;;  %v3582_v25 = vpack.c.bf16 %v2449_v44, %v2447_v32 }
 0x2f2   :  { %v2108_v5 = vmul.f32 %v4698_v56, %v1835_v48  ;;  %3662 = vst [vmem:[%s5014_s5 + $0x98] sm:$0xff] %v3582_v25  }
 0x2f4   :  { %v2176_v42 = vadd.f32 %v4704_v31, %v2108_v5  ;;  %v1668_v34 = vpop.f32.mrf.mxu2 }
 0x2f5   :  { %v1669_v26 = vadd.f32 %v1668_v34, %v1500_v8 }
 0x2f6   :  { %v2240_v20 = vmax.f32 %v2176_v42, 0.0  ;;  %v1501_v47 = vpop.f32.mrf.mxu1 }
 0x2f7   :  { %v1837_v11 = vpop.f32.mrf.mxu3  ;;  %v2452_v22 = vpop.f32.mrf.mxu0  ;;  %v1502_v62 = vadd.f32 %v1501_v47, %v5034_v37 }
 0x2f8   :  { %v2275_v63 = vpack.c.bf16 %v2240_v20, %v2239_v49  ;;  %v1838_v55 = vadd.f32 %v1837_v11, %v1669_v26 }
 0x2fa   :  { %2491 = vmatmul.bf16.gmra.mxu0 %v2275_v63  ;;  %v2109_v36 = vmul.f32 %v4698_v56, %v1838_v55 }
 0x2fc   :  { %v1670_v52 = vpop.f32.mrf.mxu2  ;;  %v2177_v46 = vadd.f32 %v4704_v31, %v2109_v36 }
 0x2fd   :  { %v1671_v3 = vadd.f32 %v1670_v52, %v1502_v62 }
 0x2fe   :  { %v1504_v18 = vpop.f32.mrf.mxu1  ;;  %v2241_v41 = vmax.f32 %v2177_v46, 0.0 }
 0x2ff   :  { %v1839_v17 = vpop.f32.mrf.mxu3  ;;  %v2454_v39 = vpop.f32.mrf.mxu0  ;;  %v1505_v61 = vadd.f32 %v1504_v18, %v5035_v57 }
 0x300   :  { %v1840_v0 = vadd.f32 %v1839_v17, %v1671_v3  ;;  %v3587_v50 = vpack.c.bf16 %v2454_v39, %v2452_v22 }
 0x302   :  { %v2110_v4 = vmul.f32 %v4698_v56, %v1840_v0  ;;  %3663 = vst [vmem:[%s5014_s5 + $0xa0] sm:$0xff] %v3587_v50  }
 0x304   :  { %v2178_v15 = vadd.f32 %v4704_v31, %v2110_v4  ;;  %v1673_v6 = vpop.f32.mrf.mxu2 }
 0x305   :  { %v1674_v59 = vadd.f32 %v1673_v6, %v1505_v61 }
 0x306   :  { %v2242_v9 = vmax.f32 %v2178_v15, 0.0  ;;  %v1506_v30 = vpop.f32.mrf.mxu1 }
 0x307   :  { %v1842_v10 = vpop.f32.mrf.mxu3  ;;  %v2457_v23 = vpop.f32.mrf.mxu0  ;;  %v1507_v14 = vadd.f32 %v1506_v30, %v5036_v33 }
 0x308   :  { %v2276_v1 = vpack.c.bf16 %v2242_v9, %v2241_v41  ;;  %v1843_v12 = vadd.f32 %v1842_v10, %v1674_v59 }
 0x30a   :  { %2496 = vmatmul.bf16.gmra.mxu0 %v2276_v1  ;;  %v2111_v54 = vmul.f32 %v4698_v56, %v1843_v12 }
 0x30c   :  { %v1675_v19 = vpop.f32.mrf.mxu2  ;;  %v2179_v13 = vadd.f32 %v4704_v31, %v2111_v54 }
 0x30d   :  { %v1676_v58 = vadd.f32 %v1675_v19, %v1507_v14 }
 0x30e   :  { %v1509_v53 = vpop.f32.mrf.mxu1  ;;  %v2243_v21 = vmax.f32 %v2179_v13, 0.0 }
 0x30f   :  { %v1844_v51 = vpop.f32.mrf.mxu3  ;;  %v2459_v28 = vpop.f32.mrf.mxu0  ;;  %v1510_v7 = vadd.f32 %v1509_v53, %v5037_v2 }
 0x310   :  { %v1845_v60 = vadd.f32 %v1844_v51, %v1676_v58  ;;  %v3592_v27 = vpack.c.bf16 %v2459_v28, %v2457_v23 }
 0x312   :  { %v2112_v32 = vmul.f32 %v4698_v56, %v1845_v60  ;;  %3664 = vst [vmem:[%s5014_s5 + $0xa8] sm:$0xff] %v3592_v27  }
 0x314   :  { %v2180_v16 = vadd.f32 %v4704_v31, %v2112_v32  ;;  %v1678_v45 = vpop.f32.mrf.mxu2 }
 0x315   :  { %v1679_v35 = vadd.f32 %v1678_v45, %v1510_v7 }
 0x316   :  { %v2244_v29 = vmax.f32 %v2180_v16, 0.0  ;;  %v1511_v48 = vpop.f32.mrf.mxu1 }
 0x317   :  { %v1847_v43 = vpop.f32.mrf.mxu3  ;;  %v2462_v38 = vpop.f32.mrf.mxu0  ;;  %v1512_v5 = vadd.f32 %v1511_v48, %v5038_v40 }
 0x318   :  { %v2277_v44 = vpack.c.bf16 %v2244_v29, %v2243_v21  ;;  %v1848_v25 = vadd.f32 %v1847_v43, %v1679_v35 }
 0x31a   :  { %2501 = vmatmul.bf16.gmra.mxu0 %v2277_v44  ;;  %v2113_v24 = vmul.f32 %v4698_v56, %v1848_v25 }
 0x31c   :  { %v1680_v42 = vpop.f32.mrf.mxu2  ;;  %v2181_v11 = vadd.f32 %v4704_v31, %v2113_v24 }
 0x31d   :  { %v1681_v8 = vadd.f32 %v1680_v42, %v1512_v5 }
 0x31e   :  { %v2245_v63 = vmax.f32 %v2181_v11, 0.0 }
 0x31f   :  { %v1849_v34 = vpop.f32.mrf.mxu3  ;;  %v2464_v49 = vpop.f32.mrf.mxu0 }
 0x320   :  { %v1850_v20 = vadd.f32 %v1849_v34, %v1681_v8  ;;  %v3597_v26 = vpack.c.bf16 %v2464_v49, %v2462_v38 }
 0x322   :  { %v2114_v47 = vmul.f32 %v4698_v56, %v1850_v20  ;;  %3665 = vst [vmem:[%s5014_s5 + $0xb0] sm:$0xff] %v3597_v26  }
 0x324   :  { %v2182_v22 = vadd.f32 %v4704_v31, %v2114_v47 }
 0x326   :  { %v2246_v55 = vmax.f32 %v2182_v22, 0.0 }
 0x327   :  { %v2467_v37 = vpop.f32.mrf.mxu0 }
 0x328   :  { %v2278_v62 = vpack.c.bf16 %v2246_v55, %v2245_v63 }
 0x32a   :  { %2506 = vmatmul.bf16.gmra.mxu0 %v2278_v62 }
 0x32f   :  { %v2469_v52 = vpop.f32.mrf.mxu0 }
 0x330   :  { %v3602_v36 = vpack.c.bf16 %v2469_v52, %v2467_v37 }
 0x332   :  { %3666 = vst [vmem:[%s5014_s5 + $0xb8] sm:$0xff] %v3602_v36  }
 0x337   :  { %v2472_v3 = vpop.f32.mrf.mxu0 }
 0x33f   :  { %v2474_v17 = vpop.f32.mrf.mxu0 }
 0x340   :  { %v3607_v56 = vpack.c.bf16 %v2474_v17, %v2472_v3 }
 0x342   :  { %3667 = vst [vmem:[%s5014_s5 + $0xc0] sm:$0xff] %v3607_v56  }
 0x347   :  { %v2477_v18 = vpop.f32.mrf.mxu0 }
 0x34f   :  { %v2479_v31 = vpop.f32.mrf.mxu0 }
 0x350   :  { %v3612_v39 = vpack.c.bf16 %v2479_v31, %v2477_v18 }
 0x352   :  { %3668 = vst [vmem:[%s5014_s5 + $0xc8] sm:$0xff] %v3612_v39  }
 0x357   :  { %v2482_v0 = vpop.f32.mrf.mxu0 }
 0x35f   :  { %v2484_v50 = vpop.f32.mrf.mxu0 }
 0x360   :  { %v3617_v46 = vpack.c.bf16 %v2484_v50, %v2482_v0 }
 0x362   :  { %3669 = vst [vmem:[%s5014_s5 + $0xd0] sm:$0xff] %v3617_v46  }
 0x367   :  { %v2487_v4 = vpop.f32.mrf.mxu0 }
 0x36f   :  { %v2489_v15 = vpop.f32.mrf.mxu0 }
 0x370   :  { %v3622_v57 = vpack.c.bf16 %v2489_v15, %v2487_v4 }
 0x372   :  { %3670 = vst [vmem:[%s5014_s5 + $0xd8] sm:$0xff] %v3622_v57  }
 0x377   :  { %v2492_v61 = vpop.f32.mrf.mxu0 }
 0x37f   :  { %v2494_v6 = vpop.f32.mrf.mxu0 }
 0x380   :  { %v3627_v41 = vpack.c.bf16 %v2494_v6, %v2492_v61 }
 0x382   :  { %3671 = vst [vmem:[%s5014_s5 + $0xe0] sm:$0xff] %v3627_v41  }
 0x387   :  { %v2497_v9 = vpop.f32.mrf.mxu0 }
 0x38f   :  { %v2499_v59 = vpop.f32.mrf.mxu0 }
 0x390   :  { %v3632_v10 = vpack.c.bf16 %v2499_v59, %v2497_v9 }
 0x392   :  { %3672 = vst [vmem:[%s5014_s5 + $0xe8] sm:$0xff] %v3632_v10  }
 0x397   :  { %v2502_v30 = vpop.f32.mrf.mxu0 }
 0x39f   :  { %v2504_v23 = vpop.f32.mrf.mxu0 }
 0x3a0   :  { %v3637_v1 = vpack.c.bf16 %v2504_v23, %v2502_v30 }
 0x3a2   :  { %3673 = vst [vmem:[%s5014_s5 + $0xf0] sm:$0xff] %v3637_v1  }
 0x3a7   :  { %v2507_v12 = vpop.f32.mrf.mxu0 }
 0x3af   :  { %v2509_v33 = vpop.f32.mrf.mxu0 }
 0x3b0   :  { %v3642_v14 = vpack.c.bf16 %v2509_v33, %v2507_v12 }
 0x3b2   :  { %3674 = vst [vmem:[%s5014_s5 + $0xf8] sm:$0xff] %v3642_v14  }

// kernel: lagcn_forward.4
= control target key start
LH: loop header
LB: loop body
LE: loop exit
PB: predicated region body
PF: predicated region fallthrough
CT: control target
= control target key end

     0   :  { %s5009_s1 = inlined_call_operand.vmem [shape: bf16[512,128], index: 1, kind: input, shape index: {}]   ;;  %s5010_s0 = inlined_call_operand.vmem [shape: bf16[512,512], index: 0, kind: input, shape index: {}]   ;;  %s5011_s2 = inlined_call_operand.vmem [shape: bf16[128,128], index: 2, kind: input, shape index: {}]   ;;  %s5012_s3 = inlined_call_operand.vmem [shape: f32[1,128], index: 3, kind: input, shape index: {}]   ;;  %s5013_s4 = inlined_call_operand.vmem [shape: f32[1,128], index: 4, kind: input, shape index: {}]   ;;  %s5014_s5 = inlined_call_operand.vmem [shape: bf16[512,128], index: 5, kind: output, shape index: {}]  }
   0x1   :  { %v3451_v0 = vld [vmem:[%s5009_s1 + $0x38] sm:$0xff]  ;;  %v3450_v1 = vld [vmem:[%s5009_s1 + $0x30] sm:$0xff]  ;;  %v3449_v2 = vld [vmem:[%s5009_s1 + $0x28] sm:$0xff] }
   0x2   :  { %3675 = vmatpush.bf16.msra.mxu1 %v3451_v0  ;;  %3676 = vmatpush.bf16.msra.mxu2 %v3451_v0  ;;  %v3448_v3 = vld [vmem:[%s5009_s1 + $0x20] sm:$0xff]  ;;  %v3447_v4 = vld [vmem:[%s5009_s1 + $0x18] sm:$0xff]  ;;  %v3446_v5 = vld [vmem:[%s5009_s1 + $0x10] sm:$0xff] }
   0x3   :  { %3677 = vmatpush.bf16.msra.mxu3 %v3451_v0  ;;  %1176 = vmatpush.bf16.msra.mxu0 %v3451_v0  ;;  %v3445_v6 = vld [vmem:[%s5009_s1 + $0x8] sm:$0xff]  ;;  %v3444_v7 = vld [vmem:[%s5009_s1] sm:$0xff]  ;;  %v3350_v9 = vld [vmem:[%s5010_s0 + $0x10c] sm:$0xf0] }
   0x4   :  { %v2774_v8 = vld [vmem:[%s5010_s0 + $0x100] sm:$0xf]  ;;  %v3382_v11 = vld [vmem:[%s5010_s0 + $0x20c] sm:$0xf0]  ;;  %v3467_v14 = vld [vmem:[%s5009_s1 + $0xb8] sm:$0xff] }
   0x5   :  { %v2902_v10 = vld [vmem:[%s5010_s0 + $0x200] sm:$0xf]  ;;  %v3414_v13 = vld [vmem:[%s5010_s0 + $0x30c] sm:$0xf0]  ;;  %v3475_v15 = vld [vmem:[%s5009_s1 + $0xf8] sm:$0xff]  ;;  %v2775_v17 = vor.u32 %v3350_v9, %v2774_v8 }
   0x6   :  { %3678 = vmatpush.bf16.msra.mxu1 %v3450_v1  ;;  %3679 = vmatpush.bf16.msra.mxu2 %v3450_v1  ;;  %v3030_v12 = vld [vmem:[%s5010_s0 + $0x300] sm:$0xf]  ;;  %v3459_v16 = vld [vmem:[%s5009_s1 + $0x78] sm:$0xff]  ;;  %v2903_v18 = vor.u32 %v3382_v11, %v2902_v10  ;;  %v3466_v20 = vld [vmem:[%s5009_s1 + $0xb0] sm:$0xff] }
   0x7   :  { %3680 = vmatpush.bf16.msra.mxu3 %v3450_v1  ;;  %1177 = vmatpush.bf16.msra.mxu0 %v3450_v1  ;;  %v3031_v19 = vor.u32 %v3414_v13, %v3030_v12  ;;  %v3474_v21 = vld [vmem:[%s5009_s1 + $0xf0] sm:$0xff]  ;;  %v3465_v23 = vld [vmem:[%s5009_s1 + $0xa8] sm:$0xff]  ;;  %v2790_v26 = vld [vmem:[%s5010_s0 + $0x120] sm:$0xf] }
   0x8   :  { %v3458_v22 = vld [vmem:[%s5009_s1 + $0x70] sm:$0xff]  ;;  %v3473_v24 = vld [vmem:[%s5009_s1 + $0xe8] sm:$0xff]  ;;  %v2918_v28 = vld [vmem:[%s5010_s0 + $0x220] sm:$0xf] }
   0x9   :  { %v3457_v25 = vld [vmem:[%s5009_s1 + $0x68] sm:$0xff]  ;;  %v3354_v27 = vld [vmem:[%s5010_s0 + $0x12c] sm:$0xf0]  ;;  %v3046_v30 = vld [vmem:[%s5010_s0 + $0x320] sm:$0xf] }
   0xa   :  { %3681 = vmatpush.bf16.msra.mxu1 %v3449_v2  ;;  %3682 = vmatpush.bf16.msra.mxu2 %v3449_v2  ;;  %v3386_v29 = vld [vmem:[%s5010_s0 + $0x22c] sm:$0xf0]  ;;  %v2791_v32 = vor.u32 %v3354_v27, %v2790_v26  ;;  %v3464_v35 = vld [vmem:[%s5009_s1 + $0xa0] sm:$0xff]  ;;  %v3463_v47 = vld [vmem:[%s5009_s1 + $0x98] sm:$0xff] }
   0xb   :  { %3683 = vmatpush.bf16.msra.mxu3 %v3449_v2  ;;  %1178 = vmatpush.bf16.msra.mxu0 %v3449_v2  ;;  %v3418_v31 = vld [vmem:[%s5010_s0 + $0x32c] sm:$0xf0]  ;;  %v2919_v33 = vor.u32 %v3386_v29, %v2918_v28  ;;  %v3472_v36 = vld [vmem:[%s5009_s1 + $0xe0] sm:$0xff]  ;;  %v3471_v48 = vld [vmem:[%s5009_s1 + $0xd8] sm:$0xff] }
   0xc   :  { %v3047_v34 = vor.u32 %v3418_v31, %v3046_v30  ;;  %v3456_v37 = vld [vmem:[%s5009_s1 + $0x60] sm:$0xff]  ;;  %v3358_v39 = vld [vmem:[%s5010_s0 + $0x14c] sm:$0xf0]  ;;  %v3455_v49 = vld [vmem:[%s5009_s1 + $0x58] sm:$0xff] }
   0xd   :  { %v2806_v38 = vld [vmem:[%s5010_s0 + $0x140] sm:$0xf]  ;;  %v3390_v41 = vld [vmem:[%s5010_s0 + $0x24c] sm:$0xf0]  ;;  %v3469_v8 = vld [vmem:[%s5009_s1 + $0xc8] sm:$0xff] }
   0xe   :  { %3684 = vmatpush.bf16.msra.mxu1 %v3448_v3  ;;  %3685 = vmatpush.bf16.msra.mxu2 %v3448_v3  ;;  %v2934_v40 = vld [vmem:[%s5010_s0 + $0x240] sm:$0xf]  ;;  %v3422_v43 = vld [vmem:[%s5010_s0 + $0x34c] sm:$0xf0]  ;;  %v2807_v44 = vor.u32 %v3358_v39, %v2806_v38  ;;  %v3453_v9 = vld [vmem:[%s5009_s1 + $0x48] sm:$0xff] }
   0xf   :  { %3686 = vmatpush.bf16.msra.mxu3 %v3448_v3  ;;  %1179 = vmatpush.bf16.msra.mxu0 %v3448_v3  ;;  %v3062_v42 = vld [vmem:[%s5010_s0 + $0x340] sm:$0xf]  ;;  %v2935_v45 = vor.u32 %v3390_v41, %v2934_v40  ;;  %v3362_v51 = vld [vmem:[%s5010_s0 + $0x16c] sm:$0xf0] }
  0x10   :  { %v3063_v46 = vor.u32 %v3422_v43, %v3062_v42  ;;  %v2822_v50 = vld [vmem:[%s5010_s0 + $0x160] sm:$0xf]  ;;  %v3394_v53 = vld [vmem:[%s5010_s0 + $0x26c] sm:$0xf0] }
  0x11   :  { %v2950_v52 = vld [vmem:[%s5010_s0 + $0x260] sm:$0xf]  ;;  %v3426_v55 = vld [vmem:[%s5010_s0 + $0x36c] sm:$0xf0]  ;;  %v2823_v56 = vor.u32 %v3362_v51, %v2822_v50  ;;  %v3319_v50 = vld [vmem:[%s5010_s0 + $0x14] sm:$0xf0] }
  0x12   :  { %3687 = vmatpush.bf16.msra.mxu1 %v3447_v4  ;;  %3688 = vmatpush.bf16.msra.mxu2 %v3447_v4  ;;  %v3078_v54 = vld [vmem:[%s5010_s0 + $0x360] sm:$0xf]  ;;  %v2951_v57 = vor.u32 %v3394_v53, %v2950_v52  ;;  %v3462_v59 = vld [vmem:[%s5009_s1 + $0x90] sm:$0xff]  ;;  %v3317_v51 = vld [vmem:[%s5010_s0 + $0xc] sm:$0xf] }
  0x13   :  { %3689 = vmatpush.bf16.msra.mxu3 %v3447_v4  ;;  %1180 = vmatpush.bf16.msra.mxu0 %v3447_v4  ;;  %v3079_v58 = vor.u32 %v3426_v55, %v3078_v54  ;;  %v3470_v60 = vld [vmem:[%s5009_s1 + $0xd0] sm:$0xff]  ;;  %v2838_v62 = vld [vmem:[%s5010_s0 + $0x180] sm:$0xf]  ;;  %v2656_v52 = vld [vmem:[%s5010_s0 + $0x18] sm:$0xf0] }
  0x14   :  { %v3454_v61 = vld [vmem:[%s5009_s1 + $0x50] sm:$0xff]  ;;  %v2966_v0 = vld [vmem:[%s5010_s0 + $0x280] sm:$0xf] }
  0x15   :  { %v3366_v63 = vld [vmem:[%s5010_s0 + $0x18c] sm:$0xf0]  ;;  %v3094_v2 = vld [vmem:[%s5010_s0 + $0x380] sm:$0xf] }
  0x16   :  { %3690 = vmatpush.bf16.msra.mxu1 %v3446_v5  ;;  %3691 = vmatpush.bf16.msra.mxu2 %v3446_v5  ;;  %v3398_v1 = vld [vmem:[%s5010_s0 + $0x28c] sm:$0xf0]  ;;  %v2839_v4 = vor.u32 %v3366_v63, %v2838_v62  ;;  %v2854_v10 = vld [vmem:[%s5010_s0 + $0x1a0] sm:$0xf] }
  0x17   :  { %3692 = vmatpush.bf16.msra.mxu3 %v3446_v5  ;;  %1181 = vmatpush.bf16.msra.mxu0 %v3446_v5  ;;  %v3430_v3 = vld [vmem:[%s5010_s0 + $0x38c] sm:$0xf0]  ;;  %v2967_v5 = vor.u32 %v3398_v1, %v2966_v0  ;;  %v2982_v12 = vld [vmem:[%s5010_s0 + $0x2a0] sm:$0xf]  ;;  %v3320_v0 = vld [vmem:[%s5010_s0 + $0x24] sm:$0xf] }
  0x18   :  { %v3370_v11 = vld [vmem:[%s5010_s0 + $0x1ac] sm:$0xf0]  ;;  %v2998_v27 = vld [vmem:[%s5010_s0 + $0x2c0] sm:$0xf]  ;;  %v2664_v1 = vld [vmem:[%s5010_s0 + $0x30] sm:$0xf0] }
  0x19   :  { %v3402_v13 = vld [vmem:[%s5010_s0 + $0x2ac] sm:$0xf0]  ;;  %v3126_v29 = vld [vmem:[%s5010_s0 + $0x3c0] sm:$0xf] }
  0x1a   :  { %3693 = vmatpush.bf16.msra.mxu1 %v3445_v6  ;;  %3694 = vmatpush.bf16.msra.mxu2 %v3445_v6  ;;  %v3374_v26 = vld [vmem:[%s5010_s0 + $0x1cc] sm:$0xf0]  ;;  %v3142_v38 = vld [vmem:[%s5010_s0 + $0x3e0] sm:$0xf] }
  0x1b   :  { %3695 = vmatpush.bf16.msra.mxu3 %v3445_v6  ;;  %1182 = vmatpush.bf16.msra.mxu0 %v3445_v6  ;;  %v3095_v6 = vor.u32 %v3430_v3, %v3094_v2  ;;  %v3406_v28 = vld [vmem:[%s5010_s0 + $0x2cc] sm:$0xf0]  ;;  %v2662_v40 = vld [vmem:[%s5010_s0 + $0x20] sm:$0xf]  ;;  %v2670_v2 = vld [vmem:[%s5010_s0 + $0x28] sm:$0xf] }
  0x1c   :  { %v3438_v30 = vld [vmem:[%s5010_s0 + $0x3cc] sm:$0xf0]  ;;  %v2678_v53 = vld [vmem:[%s5010_s0 + $0x40] sm:$0xf]  ;;  %v3323_v3 = vld [vmem:[%s5010_s0 + $0x34] sm:$0xf0] }
  0x1d   :  { %v3442_v39 = vld [vmem:[%s5010_s0 + $0x3ec] sm:$0xf0] }
  0x1e   :  { %3696 = vmatpush.bf16.msra.mxu1 %v3444_v7  ;;  %3697 = vmatpush.bf16.msra.mxu2 %v3444_v7  ;;  %v3322_v41 = vld [vmem:[%s5010_s0 + $0x2c] sm:$0xf0] }
  0x1f   :  { %3698 = vmatpush.bf16.msra.mxu3 %v3444_v7  ;;  %1183 = vmatpush.bf16.msra.mxu0 %v3444_v7  ;;  %v3461_v7 = vld [vmem:[%s5009_s1 + $0x88] sm:$0xff]  ;;  %v2663_v42 = vor.u32 %v3322_v41, %v2662_v40  ;;  %v3326_v54 = vld [vmem:[%s5010_s0 + $0x4c] sm:$0xf0]  ;;  %v3331_v41 = vld [vmem:[%s5010_s0 + $0x74] sm:$0xf0] }
  0x20   :  { %v2679_v55 = vor.u32 %v3326_v54, %v2678_v53  ;;  %v2702_v40 = vld [vmem:[%s5010_s0 + $0x68] sm:$0xf]  ;;  %v3479_v53 = vld [vmem:[%s5011_s2 + $0x18] sm:$0xff] }
  0x21   :  { %1224 = vmatmul.bf16.vlgmr.msra.gmra.mxu1 %v2775_v17  ;;  %1264 = vmatmul.bf16.vlgmr.msra.gmra.mxu2 %v2903_v18  ;;  %v2983_v17 = vor.u32 %v3402_v13, %v2982_v12  ;;  %v2671_v12 = vor.u32 %v3323_v3, %v2670_v2  ;;  %v2720_v2 = vld [vmem:[%s5010_s0 + $0x98] sm:$0xf0]  ;;  %v2742_v3 = vld [vmem:[%s5010_s0 + $0xc0] sm:$0xf] }
  0x22   :  { %1514 = vmatpush.bf16.msrb.mxu2 %v3467_v14  ;;  %1345 = vmatpush.bf16.msrb.mxu1 %v3459_v16  ;;  %v3110_v14 = vld [vmem:[%s5010_s0 + $0x3a0] sm:$0xf]  ;;  %v2855_v16 = vor.u32 %v3370_v11, %v2854_v10  ;;  %v2667_v11 = vor.u32 %v3320_v0, %v2664_v1  ;;  %v3335_v0 = vld [vmem:[%s5010_s0 + $0x94] sm:$0xf0]  ;;  %v3333_v1 = vld [vmem:[%s5010_s0 + $0x8c] sm:$0xf] }
  0x23   :  { %1683 = vmatpush.bf16.msrb.mxu3 %v3475_v15  ;;  %v3434_v15 = vld [vmem:[%s5010_s0 + $0x3ac] sm:$0xf0] }
  0x24   :  { %1304 = vmatmul.bf16.vlgmr.msra.gmra.mxu3 %v3031_v19  ;;  %v3111_v18 = vor.u32 %v3434_v15, %v3110_v14  ;;  %v3460_v19 = vld [vmem:[%s5009_s1 + $0x80] sm:$0xff]  ;;  %v3481_v15 = vld [vmem:[%s5011_s2 + $0x28] sm:$0xff] }
  0x26   :  { %1515 = vmatpush.bf16.msrb.mxu2 %v3466_v20  ;;  %1346 = vmatpush.bf16.msrb.mxu1 %v3458_v22  ;;  %v3468_v20 = vld [vmem:[%s5009_s1 + $0xc0] sm:$0xff] }
  0x27   :  { %1684 = vmatpush.bf16.msrb.mxu3 %v3474_v21  ;;  %v3452_v21 = vld [vmem:[%s5009_s1 + $0x40] sm:$0xff] }
  0x28   :  { %v2646_v22 = vld [vmem:[%s5010_s0] sm:$0xf] }
  0x2a   :  { %1516 = vmatpush.bf16.msrb.mxu2 %v3465_v23  ;;  %1347 = vmatpush.bf16.msrb.mxu1 %v3457_v25  ;;  %v3318_v23 = vld [vmem:[%s5010_s0 + $0xc] sm:$0xf0]  ;;  %v2870_v25 = vld [vmem:[%s5010_s0 + $0x1c0] sm:$0xf] }
  0x2b   :  { %1685 = vmatpush.bf16.msrb.mxu3 %v3473_v24  ;;  %v2647_v24 = vor.u32 %v3318_v23, %v2646_v22  ;;  %v2871_v31 = vor.u32 %v3374_v26, %v2870_v25  ;;  %v3327_v22 = vld [vmem:[%s5010_s0 + $0x54] sm:$0xf0]  ;;  %v3325_v23 = vld [vmem:[%s5010_s0 + $0x4c] sm:$0xf]  ;;  %v2710_v25 = vld [vmem:[%s5010_s0 + $0x80] sm:$0xf] }
  0x2c   :  { %v3334_v26 = vld [vmem:[%s5010_s0 + $0x8c] sm:$0xf0] }
  0x2d   :  { %1184 = vmatmul.bf16.vlgmr.msra.gmra.mxu0 %v2647_v24  ;;  %v2688_v24 = vld [vmem:[%s5010_s0 + $0x58] sm:$0xf0] }
  0x2e   :  { %1517 = vmatpush.bf16.msrb.mxu2 %v3464_v35  ;;  %1348 = vmatpush.bf16.msrb.mxu1 %v3456_v37  ;;  %v3378_v35 = vld [vmem:[%s5010_s0 + $0x1ec] sm:$0xf0] }
  0x2f   :  { %1686 = vmatpush.bf16.msrb.mxu3 %v3472_v36  ;;  %v3014_v36 = vld [vmem:[%s5010_s0 + $0x2e0] sm:$0xf]  ;;  %v3410_v37 = vld [vmem:[%s5010_s0 + $0x2ec] sm:$0xf0] }
  0x31   :  { %1229 = vmatmul.bf16.gmra.mxu1 %v2791_v32  ;;  %1269 = vmatmul.bf16.gmra.mxu2 %v2919_v33  ;;  %v2999_v32 = vor.u32 %v3406_v28, %v2998_v27  ;;  %v3127_v33 = vor.u32 %v3438_v30, %v3126_v29  ;;  %v2711_v28 = vor.u32 %v3334_v26, %v2710_v25  ;;  %v3339_v25 = vld [vmem:[%s5010_s0 + $0xb4] sm:$0xf0]  ;;  %v3337_v26 = vld [vmem:[%s5010_s0 + $0xac] sm:$0xf] }
  0x32   :  { %1518 = vmatpush.bf16.msrb.mxu2 %v3463_v47  ;;  %1349 = vmatpush.bf16.msrb.mxu1 %v3455_v49  ;;  %v3316_v47 = vld [vmem:[%s5010_s0 + $0x4] sm:$0xf]  ;;  %v2654_v49 = vld [vmem:[%s5010_s0 + $0x8] sm:$0xf] }
  0x33   :  { %1687 = vmatpush.bf16.msrb.mxu3 %v3471_v48  ;;  %v2648_v48 = vld [vmem:[%s5010_s0 + $0x10] sm:$0xf0] }
  0x34   :  { %1309 = vmatmul.bf16.gmra.mxu3 %v3047_v34  ;;  %v2886_v34 = vld [vmem:[%s5010_s0 + $0x1e0] sm:$0xf] }
  0x35   :  { %v2887_v43 = vor.u32 %v3378_v35, %v2886_v34  ;;  %v3480_v34 = vld [vmem:[%s5011_s2 + $0x20] sm:$0xff] }
  0x36   :  { %1519 = vmatpush.bf16.msrb.mxu2 %v3462_v59  ;;  %1350 = vmatpush.bf16.msrb.mxu1 %v3454_v61  ;;  %v2659_v59 = vor.u32 %v3317_v51, %v2656_v52 }
  0x37   :  { %1688 = vmatpush.bf16.msrb.mxu3 %v3470_v60  ;;  %v3482_v60 = vld [vmem:[%s5011_s2 + $0x30] sm:$0xff] }
  0x3a   :  { %1520 = vmatpush.bf16.msrb.mxu2 %v3461_v7  ;;  %1351 = vmatpush.bf16.msrb.mxu1 %v3453_v9  ;;  %v3330_v7 = vld [vmem:[%s5010_s0 + $0x6c] sm:$0xf0] }
  0x3b   :  { %1689 = vmatpush.bf16.msrb.mxu3 %v3469_v8 }
  0x3d   :  { %1189 = vmatmul.bf16.gmra.mxu0 %v2663_v42  ;;  %v3329_v42 = vld [vmem:[%s5010_s0 + $0x6c] sm:$0xf] }
  0x3e   :  { %1521 = vmatpush.bf16.msrb.mxu2 %v3460_v19  ;;  %1352 = vmatpush.bf16.msrb.mxu1 %v3452_v21  ;;  %v3324_v19 = vld [vmem:[%s5010_s0 + $0x44] sm:$0xf]  ;;  %v2686_v21 = vld [vmem:[%s5010_s0 + $0x48] sm:$0xf] }
  0x3f   :  { %1690 = vmatpush.bf16.msrb.mxu3 %v3468_v20  ;;  %v2680_v20 = vld [vmem:[%s5010_s0 + $0x50] sm:$0xf0] }
  0x40   :  { %v2683_v30 = vor.u32 %v3324_v19, %v2680_v20 }
  0x41   :  { %1234 = vmatmul.bf16.gmra.mxu1 %v2807_v44  ;;  %1274 = vmatmul.bf16.gmra.mxu2 %v2935_v45  ;;  %v3015_v44 = vor.u32 %v3410_v37, %v3014_v36  ;;  %v3143_v45 = vor.u32 %v3442_v39, %v3142_v38  ;;  %v3328_v38 = vld [vmem:[%s5010_s0 + $0x64] sm:$0xf]  ;;  %v2696_v39 = vld [vmem:[%s5010_s0 + $0x70] sm:$0xf0] }
  0x44   :  { %1314 = vmatmul.bf16.gmra.mxu3 %v3063_v46  ;;  %v3483_v46 = vld [vmem:[%s5011_s2 + $0x38] sm:$0xff] }
  0x45   :  { %2143 = vmatpush.bf16.msrb.mxu0 %v3483_v46 }
  0x49   :  { %2144 = vmatpush.bf16.msrb.mxu0 %v3482_v60  ;;  %v2718_v60 = vld [vmem:[%s5010_s0 + $0x88] sm:$0xf] }
  0x4d   :  { %1194 = vmatmul.bf16.gmra.mxu0 %v2679_v55 }
  0x4e   :  { %2145 = vmatpush.bf16.msrb.mxu0 %v3481_v15  ;;  %v3478_v15 = vld [vmem:[%s5011_s2 + $0x10] sm:$0xff] }
  0x51   :  { %1239 = vmatmul.bf16.gmra.mxu1 %v2823_v56  ;;  %1279 = vmatmul.bf16.gmra.mxu2 %v2951_v57  ;;  %v2651_v56 = vor.u32 %v3316_v47, %v2648_v48  ;;  %v2655_v57 = vor.u32 %v3319_v50, %v2654_v49  ;;  %v2699_v49 = vor.u32 %v3328_v38, %v2696_v39 }
  0x52   :  { %2146 = vmatpush.bf16.msrb.mxu0 %v3480_v34  ;;  %v2703_v50 = vor.u32 %v3331_v41, %v2702_v40 }
  0x54   :  { %1319 = vmatmul.bf16.gmra.mxu3 %v3079_v58 }
  0x56   :  { %2147 = vmatpush.bf16.msrb.mxu0 %v3479_v53  ;;  %v3343_v53 = vld [vmem:[%s5010_s0 + $0xd4] sm:$0xf0] }
  0x5a   :  { %2148 = vmatpush.bf16.msrb.mxu0 %v3478_v15 }
  0x61   :  { %1244 = vmatmul.bf16.gmra.mxu1 %v2839_v4  ;;  %1284 = vmatmul.bf16.gmra.mxu2 %v2967_v5  ;;  %v3321_v4 = vld [vmem:[%s5010_s0 + $0x2c] sm:$0xf]  ;;  %v2672_v5 = vld [vmem:[%s5010_s0 + $0x38] sm:$0xf0] }
  0x62   :  { %v2675_v14 = vor.u32 %v3321_v4, %v2672_v5  ;;  %v3342_v4 = vld [vmem:[%s5010_s0 + $0xcc] sm:$0xf0] }
  0x64   :  { %1324 = vmatmul.bf16.gmra.mxu3 %v3095_v6  ;;  %v2694_v6 = vld [vmem:[%s5010_s0 + $0x60] sm:$0xf] }
  0x65   :  { %v2695_v9 = vor.u32 %v3330_v7, %v2694_v6  ;;  %v2743_v6 = vor.u32 %v3342_v4, %v2742_v3 }
  0x67   :  { %1199 = vmatmul.bf16.gmra.mxu0 %v2695_v9 }
  0x71   :  { %1249 = vmatmul.bf16.gmra.mxu1 %v2855_v16  ;;  %1289 = vmatmul.bf16.gmra.mxu2 %v2983_v17 }
  0x74   :  { %1329 = vmatmul.bf16.gmra.mxu3 %v3111_v18 }
  0x77   :  { %1204 = vmatmul.bf16.gmra.mxu0 %v2711_v28  ;;  %v2736_v28 = vld [vmem:[%s5010_s0 + $0xb8] sm:$0xf0] }
  0x81   :  { %1254 = vmatmul.bf16.gmra.mxu1 %v2871_v31  ;;  %1294 = vmatmul.bf16.gmra.mxu2 %v2999_v32  ;;  %v2687_v31 = vor.u32 %v3327_v22, %v2686_v21  ;;  %v3336_v22 = vld [vmem:[%s5010_s0 + $0xa4] sm:$0xf] }
  0x84   :  { %1334 = vmatmul.bf16.gmra.mxu3 %v3127_v33  ;;  %v2691_v33 = vor.u32 %v3325_v23, %v2688_v24  ;;  %v2728_v23 = vld [vmem:[%s5010_s0 + $0xb0] sm:$0xf0]  ;;  %v2734_v24 = vld [vmem:[%s5010_s0 + $0xa8] sm:$0xf] }
  0x85   :  { %v2731_v39 = vor.u32 %v3336_v22, %v2728_v23  ;;  %v2735_v40 = vor.u32 %v3339_v25, %v2734_v24  ;;  %v3344_v22 = vld [vmem:[%s5010_s0 + $0xe4] sm:$0xf]  ;;  %v2760_v23 = vld [vmem:[%s5010_s0 + $0xf0] sm:$0xf0]  ;;  %v2766_v24 = vld [vmem:[%s5010_s0 + $0xe8] sm:$0xf] }
  0x86   :  { %v3347_v25 = vld [vmem:[%s5010_s0 + $0xf4] sm:$0xf0] }
  0x91   :  { %1259 = vmatmul.bf16.gmra.mxu1 %v2887_v43  ;;  %1299 = vmatmul.bf16.gmra.mxu2 %v3015_v44  ;;  %v2704_v43 = vld [vmem:[%s5010_s0 + $0x78] sm:$0xf0]  ;;  %v2726_v44 = vld [vmem:[%s5010_s0 + $0xa0] sm:$0xf] }
  0x92   :  { %v2707_v52 = vor.u32 %v3329_v42, %v2704_v43  ;;  %v2739_v42 = vor.u32 %v3337_v26, %v2736_v28  ;;  %v3477_v43 = vld [vmem:[%s5011_s2 + $0x8] sm:$0xff]  ;;  %v2768_v28 = vld [vmem:[%s5010_s0 + $0xf8] sm:$0xf0] }
  0x93   :  { %2149 = vmatpush.bf16.msrb.mxu0 %v3477_v43  ;;  %v3345_v26 = vld [vmem:[%s5010_s0 + $0xec] sm:$0xf] }
  0x94   :  { %1339 = vmatmul.bf16.gmra.mxu3 %v3143_v45  ;;  %v3338_v45 = vld [vmem:[%s5010_s0 + $0xac] sm:$0xf0] }
  0x95   :  { %v2727_v47 = vor.u32 %v3338_v45, %v2726_v44 }
  0x97   :  { %1209 = vmatmul.bf16.gmra.mxu0 %v2727_v47 }
  0x9e   :  { %v4012_v58 = vpop.f32.mrf.mxu1 }
  0xa1   :  { %1353 = vmatmul.bf16.vlgmr.msrb.gmra.mxu1 %v2651_v56  ;;  %1522 = vmatmul.bf16.vlgmr.msrb.gmra.mxu2 %v2655_v57  ;;  %v3332_v57 = vld [vmem:[%s5010_s0 + $0x84] sm:$0xf] }
  0xa4   :  { %1691 = vmatmul.bf16.vlgmr.msrb.gmra.mxu3 %v2659_v59  ;;  %v4017_v61 = vpop.f32.mrf.mxu2  ;;  %v2712_v59 = vld [vmem:[%s5010_s0 + $0x90] sm:$0xf0] }
  0xa5   :  { %v2715_v9 = vor.u32 %v3332_v57, %v2712_v59  ;;  %v3341_v57 = vld [vmem:[%s5010_s0 + $0xcc] sm:$0xf]  ;;  %v2752_v59 = vld [vmem:[%s5010_s0 + $0xd8] sm:$0xf0] }
  0xa6   :  { %v4021_v63 = vpop.f32.mrf.mxu1  ;;  %v2755_v4 = vor.u32 %v3341_v57, %v2752_v59  ;;  %v3348_v57 = vld [vmem:[%s5010_s0 + $0x104] sm:$0xf]  ;;  %v2776_v59 = vld [vmem:[%s5010_s0 + $0x110] sm:$0xf0] }
  0xa7   :  { %v4019_v62 = vpop.f32.mrf.mxu3  ;;  %1214 = vmatmul.bf16.gmra.mxu0 %v2743_v6  ;;  %v3476_v6 = vld [vmem:[%s5011_s2] sm:$0xff] }
  0xa8   :  { %2150 = vmatpush.bf16.msrb.mxu0 %v3476_v6  ;;  %v2784_v6 = vld [vmem:[%s5010_s0 + $0x118] sm:$0xf0] }
  0xac   :  { %v4047_v8 = vpop.f32.mrf.mxu2 }
  0xae   :  { %v4051_v13 = vpop.f32.mrf.mxu1 }
  0xaf   :  { %v4049_v10 = vpop.f32.mrf.mxu3 }
  0xb1   :  { %1358 = vmatmul.bf16.gmra.mxu1 %v2667_v11  ;;  %1527 = vmatmul.bf16.gmra.mxu2 %v2671_v12  ;;  %v2719_v11 = vor.u32 %v3335_v0, %v2718_v60 }
  0xb4   :  { %1696 = vmatmul.bf16.gmra.mxu3 %v2675_v14  ;;  %v4056_v16 = vpop.f32.mrf.mxu2  ;;  %v2723_v14 = vor.u32 %v3333_v1, %v2720_v2 }
  0xb6   :  { %v4060_v18 = vpop.f32.mrf.mxu1 }
  0xb7   :  { %v4058_v17 = vpop.f32.mrf.mxu3 }
  0xbc   :  { %v4086_v27 = vpop.f32.mrf.mxu2 }
  0xbe   :  { %v4090_v32 = vpop.f32.mrf.mxu1 }
  0xbf   :  { %v4088_v29 = vpop.f32.mrf.mxu3 }
  0xc1   :  { %1363 = vmatmul.bf16.gmra.mxu1 %v2683_v30  ;;  %1532 = vmatmul.bf16.gmra.mxu2 %v2687_v31  ;;  %v2758_v30 = vld [vmem:[%s5010_s0 + $0xe0] sm:$0xf]  ;;  %v3346_v31 = vld [vmem:[%s5010_s0 + $0xec] sm:$0xf0] }
  0xc2   :  { %v2759_v34 = vor.u32 %v3346_v31, %v2758_v30 }
  0xc4   :  { %1701 = vmatmul.bf16.gmra.mxu3 %v2691_v33  ;;  %v4095_v35 = vpop.f32.mrf.mxu2  ;;  %1219 = vmatmul.bf16.gmra.mxu0 %v2759_v34  ;;  %v2763_v34 = vor.u32 %v3344_v22, %v2760_v23 }
  0xc6   :  { %v4099_v37 = vpop.f32.mrf.mxu1 }
  0xc7   :  { %v4097_v36 = vpop.f32.mrf.mxu3 }
  0xcc   :  { %v4125_v46 = vpop.f32.mrf.mxu2 }
  0xce   :  { %v4129_v51 = vpop.f32.mrf.mxu1 }
  0xcf   :  { %v4127_v48 = vpop.f32.mrf.mxu3 }
  0xd0   :  { %5015 = vst [vmem:[#allocation3_spill] sm:$0xff] %v4127_v48 }
  0xd1   :  { %1368 = vmatmul.bf16.gmra.mxu1 %v2699_v49  ;;  %1537 = vmatmul.bf16.gmra.mxu2 %v2703_v50  ;;  %v3340_v49 = vld [vmem:[%s5010_s0 + $0xc4] sm:$0xf]  ;;  %v2744_v50 = vld [vmem:[%s5010_s0 + $0xd0] sm:$0xf0] }
  0xd2   :  { %v2747_v1 = vor.u32 %v3340_v49, %v2744_v50 }
  0xd4   :  { %1706 = vmatmul.bf16.gmra.mxu3 %v2707_v52  ;;  %v4134_v54 = vpop.f32.mrf.mxu2  ;;  %v2750_v52 = vld [vmem:[%s5010_s0 + $0xc8] sm:$0xf] }
  0xd5   :  { %v2751_v2 = vor.u32 %v3343_v53, %v2750_v52 }
  0xd6   :  { %v4138_v56 = vpop.f32.mrf.mxu1 }
  0xd7   :  { %v4136_v55 = vpop.f32.mrf.mxu3 }
  0xd8   :  { %5016 = vst [vmem:[#allocation4_spill] sm:$0xff] %v4136_v55 }
  0xdc   :  { %v4164_v5 = vpop.f32.mrf.mxu2 }
  0xde   :  { %v4168_v12 = vpop.f32.mrf.mxu1 }
  0xdf   :  { %v4166_v7 = vpop.f32.mrf.mxu3 }
  0xe0   :  { %5017 = vst [vmem:[#allocation5_spill] sm:$0xff] %v4166_v7 }
  0xe1   :  { %1373 = vmatmul.bf16.gmra.mxu1 %v2715_v9  ;;  %1542 = vmatmul.bf16.gmra.mxu2 %v2719_v11  ;;  %v1185_v11 = vpop.f32.mrf.mxu0 }
  0xe4   :  { %1711 = vmatmul.bf16.gmra.mxu3 %v2723_v14  ;;  %v4173_v19 = vpop.f32.mrf.mxu2 }
  0xe6   :  { %v4177_v21 = vpop.f32.mrf.mxu1 }
  0xe7   :  { %v4175_v20 = vpop.f32.mrf.mxu3 }
  0xe8   :  { %5018 = vst [vmem:[#allocation6_spill] sm:$0xff] %v4175_v20 }
  0xe9   :  { %v1187_v43 = vpop.f32.mrf.mxu0 }
  0xec   :  { %v4203_v33 = vpop.f32.mrf.mxu2 }
  0xee   :  { %v4207_v41 = vpop.f32.mrf.mxu1 }
  0xef   :  { %v4205_v38 = vpop.f32.mrf.mxu3 }
  0xf0   :  { %5019 = vst [vmem:[#allocation7_spill] sm:$0xff] %v4205_v38 }
  0xf1   :  { %1378 = vmatmul.bf16.gmra.mxu1 %v2731_v39  ;;  %1547 = vmatmul.bf16.gmra.mxu2 %v2735_v40  ;;  %v2767_v39 = vor.u32 %v3347_v25, %v2766_v24  ;;  %v1190_v53 = vpop.f32.mrf.mxu0  ;;  %v2779_v24 = vor.u32 %v3348_v57, %v2776_v59  ;;  %v2798_v57 = vld [vmem:[%s5010_s0 + $0x128] sm:$0xf]  ;;  %v3355_v59 = vld [vmem:[%s5010_s0 + $0x134] sm:$0xf0] }
  0xf4   :  { %1716 = vmatmul.bf16.gmra.mxu3 %v2739_v42  ;;  %v4212_v44 = vpop.f32.mrf.mxu2  ;;  %v2771_v42 = vor.u32 %v3345_v26, %v2768_v28 }
  0xf6   :  { %v4216_v47 = vpop.f32.mrf.mxu1 }
  0xf7   :  { %v4214_v45 = vpop.f32.mrf.mxu3 }
  0xf8   :  { %5020 = vst [vmem:[#allocation8_spill] sm:$0xff] %v4214_v45 }
  0xfc   :  { %v4236_v60 = vpop.f32.mrf.mxu2 }
  0xfe   :  { %v4240_v3 = vpop.f32.mrf.mxu1 }
  0xff   :  { %v4238_v0 = vpop.f32.mrf.mxu3 }
 0x100   :  { %5021 = vst [vmem:[#allocation9_spill] sm:$0xff] %v4238_v0  ;;  %v2799_v0 = vor.u32 %v3355_v59, %v2798_v57 }
 0x101   :  { %1383 = vmatmul.bf16.gmra.mxu1 %v2747_v1  ;;  %1552 = vmatmul.bf16.gmra.mxu2 %v2751_v2  ;;  %v2782_v1 = vld [vmem:[%s5010_s0 + $0x108] sm:$0xf]  ;;  %v3351_v2 = vld [vmem:[%s5010_s0 + $0x114] sm:$0xf0] }
 0x102   :  { %v2783_v25 = vor.u32 %v3351_v2, %v2782_v1 }
 0x104   :  { %1721 = vmatmul.bf16.gmra.mxu3 %v2755_v4  ;;  %v4245_v9 = vpop.f32.mrf.mxu2  ;;  %v3349_v4 = vld [vmem:[%s5010_s0 + $0x10c] sm:$0xf] }
 0x105   :  { %v2787_v28 = vor.u32 %v3349_v4, %v2784_v6  ;;  %v2800_v4 = vld [vmem:[%s5010_s0 + $0x138] sm:$0xf0] }
 0x106   :  { %v4249_v15 = vpop.f32.mrf.mxu1 }
 0x107   :  { %v4247_v14 = vpop.f32.mrf.mxu3 }
 0x108   :  { %5022 = vst [vmem:[#allocation10_spill] sm:$0xff] %v4247_v14  ;;  %v3352_v14 = vld [vmem:[%s5010_s0 + $0x124] sm:$0xf] }
 0x10c   :  { %v4269_v30 = vpop.f32.mrf.mxu2 }
 0x10e   :  { %v4273_v40 = vpop.f32.mrf.mxu1 }
 0x10f   :  { %v4271_v31 = vpop.f32.mrf.mxu3 }
 0x110   :  { %5023 = vst [vmem:[#allocation11_spill] sm:$0xff] %v4271_v31 }
 0x111   :  { %1388 = vmatmul.bf16.gmra.mxu1 %v2763_v34  ;;  %1557 = vmatmul.bf16.gmra.mxu2 %v2767_v39  ;;  %v1192_v34 = vpop.f32.mrf.mxu0 }
 0x114   :  { %1726 = vmatmul.bf16.gmra.mxu3 %v2771_v42  ;;  %v4275_v49 = vpop.f32.mrf.mxu2 }
 0x116   :  { %v4279_v52 = vpop.f32.mrf.mxu1 }
 0x117   :  { %v4277_v50 = vpop.f32.mrf.mxu3 }
 0x118   :  { %5024 = vst [vmem:[#allocation12_spill] sm:$0xff] %v4277_v50 }
 0x11c   :  { %v4299_v22 = vpop.f32.mrf.mxu2 }
 0x11e   :  { %v1354_v26 = vpop.f32.mrf.mxu1 }
 0x11f   :  { %v4301_v23 = vpop.f32.mrf.mxu3  ;;  %v1355_v31 = vadd.f32 %v1354_v26, %v1185_v11  ;;  %v3353_v11 = vld [vmem:[%s5010_s0 + $0x12c] sm:$0xf] }
 0x120   :  { %5025 = vst [vmem:[#allocation13_spill] sm:$0xff] %v4301_v23  ;;  %v2792_v23 = vld [vmem:[%s5010_s0 + $0x130] sm:$0xf0]  ;;  %v2803_v38 = vor.u32 %v3353_v11, %v2800_v4 }
 0x121   :  { %1393 = vmatmul.bf16.gmra.mxu1 %v2779_v24  ;;  %1562 = vmatmul.bf16.gmra.mxu2 %v2783_v25  ;;  %v1195_v24 = vpop.f32.mrf.mxu0 }
 0x124   :  { %1731 = vmatmul.bf16.gmra.mxu3 %v2787_v28  ;;  %v1523_v39 = vpop.f32.mrf.mxu2  ;;  %v2795_v28 = vor.u32 %v3352_v14, %v2792_v23  ;;  %v2808_v14 = vld [vmem:[%s5010_s0 + $0x150] sm:$0xf0] }
 0x125   :  { %v1524_v1 = vadd.f32 %v1523_v39, %v1355_v31 }
 0x126   :  { %v1356_v50 = vpop.f32.mrf.mxu1 }
 0x127   :  { %v1692_v42 = vpop.f32.mrf.mxu3  ;;  %v1357_v2 = vadd.f32 %v1356_v50, %v1187_v43 }
 0x128   :  { %v1693_v20 = vadd.f32 %v1692_v42, %v1524_v1 }
 0x129   :  { %v1197_v55 = vpop.f32.mrf.mxu0 }
 0x12c   :  { %v1525_v6 = vpop.f32.mrf.mxu2 }
 0x12d   :  { %v1526_v25 = vadd.f32 %v1525_v6, %v1357_v2  ;;  %v3356_v2 = vld [vmem:[%s5010_s0 + $0x144] sm:$0xf] }
 0x12e   :  { %v1359_v45 = vpop.f32.mrf.mxu1  ;;  %v2811_v59 = vor.u32 %v3356_v2, %v2808_v14  ;;  %v2824_v2 = vld [vmem:[%s5010_s0 + $0x170] sm:$0xf0]  ;;  %v3363_v14 = vld [vmem:[%s5010_s0 + $0x174] sm:$0xf0] }
 0x12f   :  { %v1694_v26 = vpop.f32.mrf.mxu3  ;;  %v1360_v48 = vadd.f32 %v1359_v45, %v1190_v53  ;;  %v3357_v45 = vld [vmem:[%s5010_s0 + $0x14c] sm:$0xf]  ;;  %v2816_v53 = vld [vmem:[%s5010_s0 + $0x158] sm:$0xf0] }
 0x130   :  { %v1695_v7 = vadd.f32 %v1694_v26, %v1526_v25  ;;  %v2819_v4 = vor.u32 %v3357_v45, %v2816_v53 }
 0x131   :  { %1398 = vmatmul.bf16.gmra.mxu1 %v2795_v28  ;;  %1567 = vmatmul.bf16.gmra.mxu2 %v2799_v0  ;;  %v1200_v26 = vpop.f32.mrf.mxu0 }
 0x132   :  { %v2047_v31 = vpack.c.bf16 %v1695_v7, %v1693_v20  ;;  %v2814_v7 = vld [vmem:[%s5010_s0 + $0x148] sm:$0xf]  ;;  %v3359_v20 = vld [vmem:[%s5010_s0 + $0x154] sm:$0xf0] }
 0x133   :  { %v2815_v1 = vor.u32 %v3359_v20, %v2814_v7 }
 0x134   :  { %1736 = vmatmul.bf16.gmra.mxu3 %v2803_v38  ;;  %2151 = vmatmul.bf16.vlgmr.msrb.gmra.mxu0 %v2047_v31  ;;  %v1528_v43 = vpop.f32.mrf.mxu2 }
 0x135   :  { %v1529_v38 = vadd.f32 %v1528_v43, %v1360_v48 }
 0x136   :  { %v1361_v39 = vpop.f32.mrf.mxu1 }
 0x137   :  { %v1697_v50 = vpop.f32.mrf.mxu3  ;;  %v1362_v0 = vadd.f32 %v1361_v39, %v1192_v34  ;;  %v3360_v39 = vld [vmem:[%s5010_s0 + $0x164] sm:$0xf] }
 0x138   :  { %v1698_v6 = vadd.f32 %v1697_v50, %v1529_v38  ;;  %v2830_v50 = vld [vmem:[%s5010_s0 + $0x168] sm:$0xf] }
 0x139   :  { %v1202_v7 = vpop.f32.mrf.mxu0 }
 0x13c   :  { %v1530_v23 = vpop.f32.mrf.mxu2 }
 0x13d   :  { %v1531_v42 = vadd.f32 %v1530_v23, %v1362_v0  ;;  %v2832_v0 = vld [vmem:[%s5010_s0 + $0x178] sm:$0xf0] }
 0x13e   :  { %v1364_v11 = vpop.f32.mrf.mxu1 }
 0x13f   :  { %v1699_v57 = vpop.f32.mrf.mxu3  ;;  %v1365_v43 = vadd.f32 %v1364_v11, %v1195_v24  ;;  %v3361_v24 = vld [vmem:[%s5010_s0 + $0x16c] sm:$0xf] }
 0x140   :  { %v1700_v25 = vadd.f32 %v1699_v57, %v1531_v42  ;;  %v2827_v42 = vor.u32 %v3360_v39, %v2824_v2  ;;  %v2831_v57 = vor.u32 %v3363_v14, %v2830_v50  ;;  %v2840_v39 = vld [vmem:[%s5010_s0 + $0x190] sm:$0xf0]  ;;  %v3367_v2 = vld [vmem:[%s5010_s0 + $0x194] sm:$0xf0] }
 0x141   :  { %1403 = vmatmul.bf16.gmra.mxu1 %v2811_v59  ;;  %1572 = vmatmul.bf16.gmra.mxu2 %v2815_v1  ;;  %v2835_v1 = vor.u32 %v3361_v24, %v2832_v0 }
 0x142   :  { %v2048_v48 = vpack.c.bf16 %v1700_v25, %v1698_v6  ;;  %v1205_v25 = vpop.f32.mrf.mxu0 }
 0x144   :  { %1741 = vmatmul.bf16.gmra.mxu3 %v2819_v4  ;;  %2156 = vmatmul.bf16.gmra.mxu0 %v2048_v48  ;;  %v1533_v34 = vpop.f32.mrf.mxu2 }
 0x145   :  { %v1534_v20 = vadd.f32 %v1533_v34, %v1365_v43  ;;  %v3364_v43 = vld [vmem:[%s5010_s0 + $0x184] sm:$0xf] }
 0x146   :  { %v1366_v31 = vpop.f32.mrf.mxu1 }
 0x147   :  { %v1702_v28 = vpop.f32.mrf.mxu3  ;;  %v1367_v38 = vadd.f32 %v1366_v31, %v1197_v55 }
 0x148   :  { %v1703_v11 = vadd.f32 %v1702_v28, %v1534_v20  ;;  %v2846_v28 = vld [vmem:[%s5010_s0 + $0x188] sm:$0xf]  ;;  %v2848_v20 = vld [vmem:[%s5010_s0 + $0x198] sm:$0xf0] }
 0x14c   :  { %v1535_v45 = vpop.f32.mrf.mxu2 }
 0x14d   :  { %v1536_v53 = vadd.f32 %v1535_v45, %v1367_v38  ;;  %v2843_v45 = vor.u32 %v3364_v43, %v2840_v39  ;;  %v2856_v43 = vld [vmem:[%s5010_s0 + $0x1b0] sm:$0xf0]  ;;  %v3371_v39 = vld [vmem:[%s5010_s0 + $0x1b4] sm:$0xf0] }
 0x14e   :  { %v1369_v59 = vpop.f32.mrf.mxu1 }
 0x14f   :  { %v1704_v23 = vpop.f32.mrf.mxu3  ;;  %v1370_v31 = vadd.f32 %v1369_v59, %v1200_v26  ;;  %v3365_v26 = vld [vmem:[%s5010_s0 + $0x18c] sm:$0xf] }
 0x150   :  { %v1705_v4 = vadd.f32 %v1704_v23, %v1536_v53  ;;  %v2847_v53 = vor.u32 %v3367_v2, %v2846_v28 }
 0x151   :  { %1408 = vmatmul.bf16.gmra.mxu1 %v2827_v42  ;;  %1577 = vmatmul.bf16.gmra.mxu2 %v2831_v57  ;;  %v2851_v42 = vor.u32 %v3365_v26, %v2848_v20  ;;  %v1207_v57 = vpop.f32.mrf.mxu0 }
 0x152   :  { %v2049_v55 = vpack.c.bf16 %v1705_v4, %v1703_v11 }
 0x154   :  { %1746 = vmatmul.bf16.gmra.mxu3 %v2835_v1  ;;  %2161 = vmatmul.bf16.gmra.mxu0 %v2049_v55  ;;  %v1538_v6 = vpop.f32.mrf.mxu2 }
 0x155   :  { %v1539_v50 = vadd.f32 %v1538_v6, %v1370_v31  ;;  %v3368_v31 = vld [vmem:[%s5010_s0 + $0x1a4] sm:$0xf] }
 0x156   :  { %v1371_v34 = vpop.f32.mrf.mxu1 }
 0x157   :  { %v1707_v48 = vpop.f32.mrf.mxu3  ;;  %v1372_v14 = vadd.f32 %v1371_v34, %v1202_v7 }
 0x158   :  { %v1708_v59 = vadd.f32 %v1707_v48, %v1539_v50  ;;  %v2862_v48 = vld [vmem:[%s5010_s0 + $0x1a8] sm:$0xf]  ;;  %v2864_v50 = vld [vmem:[%s5010_s0 + $0x1b8] sm:$0xf0] }
 0x159   :  { %v1210_v34 = vpop.f32.mrf.mxu0 }
 0x15c   :  { %v1540_v38 = vpop.f32.mrf.mxu2 }
 0x15d   :  { %v1541_v24 = vadd.f32 %v1540_v38, %v1372_v14  ;;  %v2859_v38 = vor.u32 %v3368_v31, %v2856_v43  ;;  %v3375_v31 = vld [vmem:[%s5010_s0 + $0x1d4] sm:$0xf0] }
 0x15e   :  { %v1374_v23 = vpop.f32.mrf.mxu1 }
 0x15f   :  { %v1709_v0 = vpop.f32.mrf.mxu3  ;;  %v1375_v6 = vadd.f32 %v1374_v23, %v1205_v25  ;;  %v3369_v25 = vld [vmem:[%s5010_s0 + $0x1ac] sm:$0xf] }
 0x160   :  { %v1710_v1 = vadd.f32 %v1709_v0, %v1541_v24  ;;  %v2863_v24 = vor.u32 %v3371_v39, %v2862_v48  ;;  %v2880_v39 = vld [vmem:[%s5010_s0 + $0x1d8] sm:$0xf0] }
 0x161   :  { %1413 = vmatmul.bf16.gmra.mxu1 %v2843_v45  ;;  %1582 = vmatmul.bf16.gmra.mxu2 %v2847_v53  ;;  %v2867_v45 = vor.u32 %v3369_v25, %v2864_v50 }
 0x162   :  { %v2050_v7 = vpack.c.bf16 %v1710_v1, %v1708_v59 }
 0x164   :  { %1751 = vmatmul.bf16.gmra.mxu3 %v2851_v42  ;;  %2166 = vmatmul.bf16.gmra.mxu0 %v2050_v7  ;;  %v1543_v11 = vpop.f32.mrf.mxu2 }
 0x165   :  { %v1544_v28 = vadd.f32 %v1543_v11, %v1375_v6  ;;  %v2872_v6 = vld [vmem:[%s5010_s0 + $0x1d0] sm:$0xf0] }
 0x166   :  { %v1376_v55 = vpop.f32.mrf.mxu1 }
 0x167   :  { %v1712_v4 = vpop.f32.mrf.mxu3  ;;  %v1377_v2 = vadd.f32 %v1376_v55, %v1207_v57  ;;  %v1212_v57 = vpop.f32.mrf.mxu0  ;;  %v3372_v55 = vld [vmem:[%s5010_s0 + $0x1c4] sm:$0xf] }
 0x168   :  { %v1713_v53 = vadd.f32 %v1712_v4, %v1544_v28  ;;  %v2878_v4 = vld [vmem:[%s5010_s0 + $0x1c8] sm:$0xf] }
 0x16c   :  { %v1545_v14 = vpop.f32.mrf.mxu2 }
 0x16d   :  { %v1546_v26 = vadd.f32 %v1545_v14, %v1377_v2  ;;  %v2875_v14 = vor.u32 %v3372_v55, %v2872_v6  ;;  %v3379_v55 = vld [vmem:[%s5010_s0 + $0x1f4] sm:$0xf0] }
 0x16e   :  { %v1379_v0 = vpop.f32.mrf.mxu1 }
 0x16f   :  { %v1714_v20 = vpop.f32.mrf.mxu3  ;;  %v1380_v11 = vadd.f32 %v1379_v0, %v1210_v34  ;;  %v3373_v34 = vld [vmem:[%s5010_s0 + $0x1cc] sm:$0xf]  ;;  %v1215_v28 = vpop.f32.mrf.mxu0 }
 0x170   :  { %v1715_v23 = vadd.f32 %v1714_v20, %v1546_v26  ;;  %v2879_v26 = vor.u32 %v3375_v31, %v2878_v4  ;;  %v3377_v31 = vld [vmem:[%s5010_s0 + $0x1ec] sm:$0xf] }
 0x171   :  { %1418 = vmatmul.bf16.gmra.mxu1 %v2859_v38  ;;  %1587 = vmatmul.bf16.gmra.mxu2 %v2863_v24  ;;  %v2883_v38 = vor.u32 %v3373_v34, %v2880_v39 }
 0x172   :  { %v2051_v42 = vpack.c.bf16 %v1715_v23, %v1713_v53 }
 0x174   :  { %1756 = vmatmul.bf16.gmra.mxu3 %v2867_v45  ;;  %2171 = vmatmul.bf16.gmra.mxu0 %v2051_v42  ;;  %v1548_v59 = vpop.f32.mrf.mxu2 }
 0x175   :  { %v1549_v43 = vadd.f32 %v1548_v59, %v1380_v11  ;;  %v2888_v11 = vld [vmem:[%s5010_s0 + $0x1f0] sm:$0xf0] }
 0x176   :  { %v1381_v7 = vpop.f32.mrf.mxu1 }
 0x177   :  { %v1717_v1 = vpop.f32.mrf.mxu3  ;;  %v1382_v48 = vadd.f32 %v1381_v7, %v1212_v57  ;;  %v1217_v42 = vpop.f32.mrf.mxu0  ;;  %v3376_v7 = vld [vmem:[%s5010_s0 + $0x1e4] sm:$0xf] }
 0x178   :  { %v1718_v24 = vadd.f32 %v1717_v1, %v1549_v43  ;;  %v2894_v1 = vld [vmem:[%s5010_s0 + $0x1e8] sm:$0xf]  ;;  %v2896_v43 = vld [vmem:[%s5010_s0 + $0x1f8] sm:$0xf0] }
 0x17c   :  { %v1550_v2 = vpop.f32.mrf.mxu2 }
 0x17d   :  { %v1551_v25 = vadd.f32 %v1550_v2, %v1382_v48  ;;  %v2895_v2 = vor.u32 %v3379_v55, %v2894_v1  ;;  %v3381_v55 = vld [vmem:[%s5010_s0 + $0x20c] sm:$0xf] }
 0x17e   :  { %v1384_v20 = vpop.f32.mrf.mxu1 }
 0x17f   :  { %v1719_v50 = vpop.f32.mrf.mxu3  ;;  %v1385_v59 = vadd.f32 %v1384_v20, %v1215_v28  ;;  %v2891_v28 = vor.u32 %v3376_v7, %v2888_v11  ;;  %v1220_v20 = vpop.f32.mrf.mxu0  ;;  %v3383_v7 = vld [vmem:[%s5010_s0 + $0x214] sm:$0xf0] }
 0x180   :  { %v1720_v0 = vadd.f32 %v1719_v50, %v1551_v25  ;;  %v2899_v50 = vor.u32 %v3377_v31, %v2896_v43 }
 0x181   :  { %1423 = vmatmul.bf16.gmra.mxu1 %v2875_v14  ;;  %1592 = vmatmul.bf16.gmra.mxu2 %v2879_v26 }
 0x182   :  { %v2052_v45 = vpack.c.bf16 %v1720_v0, %v1718_v24 }
 0x184   :  { %1761 = vmatmul.bf16.gmra.mxu3 %v2883_v38  ;;  %2176 = vmatmul.bf16.gmra.mxu0 %v2052_v45  ;;  %v1553_v53 = vpop.f32.mrf.mxu2 }
 0x185   :  { %v1554_v6 = vadd.f32 %v1553_v53, %v1385_v59  ;;  %v2910_v59 = vld [vmem:[%s5010_s0 + $0x208] sm:$0xf] }
 0x186   :  { %v1386_v57 = vpop.f32.mrf.mxu1 }
 0x187   :  { %v1722_v23 = vpop.f32.mrf.mxu3  ;;  %v1387_v4 = vadd.f32 %v1386_v57, %v1217_v42  ;;  %v3380_v42 = vld [vmem:[%s5010_s0 + $0x204] sm:$0xf]  ;;  %v1222_v57 = vpop.f32.mrf.mxu0 }
 0x188   :  { %v1723_v14 = vadd.f32 %v1722_v23, %v1554_v6  ;;  %v2904_v23 = vld [vmem:[%s5010_s0 + $0x210] sm:$0xf0]  ;;  %v2912_v6 = vld [vmem:[%s5010_s0 + $0x218] sm:$0xf0] }
 0x18c   :  { %v1555_v48 = vpop.f32.mrf.mxu2 }
 0x18d   :  { %v1556_v34 = vadd.f32 %v1555_v48, %v1387_v4  ;;  %v2907_v48 = vor.u32 %v3380_v42, %v2904_v23  ;;  %v2928_v23 = vld [vmem:[%s5010_s0 + $0x238] sm:$0xf0] }
 0x18e   :  { %v1389_v25 = vpop.f32.mrf.mxu1 }
 0x18f   :  { %v1724_v39 = vpop.f32.mrf.mxu3  ;;  %v1390_v53 = vadd.f32 %v1389_v25, %v1220_v20 }
 0x190   :  { %v1725_v26 = vadd.f32 %v1724_v39, %v1556_v34  ;;  %v2911_v34 = vor.u32 %v3383_v7, %v2910_v59 }
 0x191   :  { %1428 = vmatmul.bf16.gmra.mxu1 %v2891_v28  ;;  %1597 = vmatmul.bf16.gmra.mxu2 %v2895_v2  ;;  %v2915_v28 = vor.u32 %v3381_v55, %v2912_v6 }
 0x192   :  { %v2053_v38 = vpack.c.bf16 %v1725_v26, %v1723_v14 }
 0x194   :  { %1766 = vmatmul.bf16.gmra.mxu3 %v2899_v50  ;;  %2181 = vmatmul.bf16.gmra.mxu0 %v2053_v38  ;;  %v1558_v24 = vpop.f32.mrf.mxu2 }
 0x195   :  { %v1559_v11 = vadd.f32 %v1558_v24, %v1390_v53  ;;  %v3384_v24 = vld [vmem:[%s5010_s0 + $0x224] sm:$0xf]  ;;  %v3387_v53 = vld [vmem:[%s5010_s0 + $0x234] sm:$0xf0] }
 0x196   :  { %v1391_v45 = vpop.f32.mrf.mxu1 }
 0x197   :  { %v1727_v0 = vpop.f32.mrf.mxu3  ;;  %v1392_v1 = vadd.f32 %v1391_v45, %v1222_v57  ;;  %v2920_v45 = vld [vmem:[%s5010_s0 + $0x230] sm:$0xf0] }
 0x198   :  { %v1728_v2 = vadd.f32 %v1727_v0, %v1559_v11  ;;  %v2926_v0 = vld [vmem:[%s5010_s0 + $0x228] sm:$0xf] }
 0x199   :  { %v2927_v55 = vor.u32 %v3387_v53, %v2926_v0  ;;  %v2942_v0 = vld [vmem:[%s5010_s0 + $0x248] sm:$0xf] }
 0x19c   :  { %v1560_v4 = vpop.f32.mrf.mxu2 }
 0x19d   :  { %v1561_v31 = vadd.f32 %v1560_v4, %v1392_v1  ;;  %v2923_v1 = vor.u32 %v3384_v24, %v2920_v45  ;;  %v3388_v24 = vld [vmem:[%s5010_s0 + $0x244] sm:$0xf]  ;;  %v2936_v45 = vld [vmem:[%s5010_s0 + $0x250] sm:$0xf0] }
 0x19e   :  { %v1394_v39 = vpop.f32.mrf.mxu1 }
 0x19f   :  { %v1729_v43 = vpop.f32.mrf.mxu3  ;;  %v1395_v38 = vadd.f32 %v1394_v39, %v4012_v58  ;;  %v3385_v58 = vld [vmem:[%s5010_s0 + $0x22c] sm:$0xf] }
 0x1a0   :  { %v1730_v25 = vadd.f32 %v1729_v43, %v1561_v31  ;;  %v2931_v4 = vor.u32 %v3385_v58, %v2928_v23  ;;  %v3389_v58 = vld [vmem:[%s5010_s0 + $0x24c] sm:$0xf]  ;;  %v2944_v23 = vld [vmem:[%s5010_s0 + $0x258] sm:$0xf0] }
 0x1a1   :  { %1433 = vmatmul.bf16.gmra.mxu1 %v2907_v48  ;;  %1602 = vmatmul.bf16.gmra.mxu2 %v2911_v34 }
 0x1a2   :  { %v2054_v50 = vpack.c.bf16 %v1730_v25, %v1728_v2  ;;  %v4476_v2 = vld [vmem:[%s5013_s4] ss:$0 sm:$0xff] }
 0x1a4   :  { %1771 = vmatmul.bf16.gmra.mxu3 %v2915_v28  ;;  %2186 = vmatmul.bf16.gmra.mxu0 %v2054_v50  ;;  %v1563_v14 = vpop.f32.mrf.mxu2 }
 0x1a5   :  { %v1564_v42 = vadd.f32 %v1563_v14, %v1395_v38 }
 0x1a6   :  { %v1396_v20 = vpop.f32.mrf.mxu1 }
 0x1a7   :  { %v1732_v26 = vpop.f32.mrf.mxu3  ;;  %v1397_v57 = vadd.f32 %v1396_v20, %v4021_v63  ;;  %v4470_v63 = vld [vmem:[%s5012_s3] ss:$0 sm:$0xff] }
 0x1a8   :  { %v1733_v31 = vadd.f32 %v1732_v26, %v1564_v42 }
 0x1ac   :  { %v1565_v59 = vpop.f32.mrf.mxu2 }
 0x1ad   :  { %v1566_v7 = vadd.f32 %v1565_v59, %v1397_v57 }
 0x1ae   :  { %v1399_v6 = vpop.f32.mrf.mxu1 }
 0x1af   :  { %v1734_v11 = vpop.f32.mrf.mxu3  ;;  %v1400_v26 = vadd.f32 %v1399_v6, %v4051_v13  ;;  %v3391_v13 = vld [vmem:[%s5010_s0 + $0x254] sm:$0xf0] }
 0x1b0   :  { %v1735_v43 = vadd.f32 %v1734_v11, %v1566_v7  ;;  %v2939_v7 = vor.u32 %v3388_v24, %v2936_v45 }
 0x1b1   :  { %v2152_v48 = vpop.f32.mrf.mxu0  ;;  %1438 = vmatmul.bf16.gmra.mxu1 %v2923_v1  ;;  %1607 = vmatmul.bf16.gmra.mxu2 %v2927_v55 }
 0x1b2   :  { %v2055_v34 = vpack.c.bf16 %v1735_v43, %v1733_v31  ;;  %v2316_v28 = vmul.f32 %v4470_v63, %v2152_v48  ;;  %v2947_v43 = vor.u32 %v3389_v58, %v2944_v23  ;;  %v3393_v23 = vld [vmem:[%s5010_s0 + $0x26c] sm:$0xf] }
 0x1b4   :  { %1776 = vmatmul.bf16.gmra.mxu3 %v2931_v4  ;;  %2191 = vmatmul.bf16.gmra.mxu0 %v2055_v34  ;;  %v1568_v39 = vpop.f32.mrf.mxu2  ;;  %v2384_v20 = vadd.f32 %v4476_v2, %v2316_v28  ;;  %v2943_v4 = vor.u32 %v3391_v13, %v2942_v0  ;;  %v3392_v0 = vld [vmem:[%s5010_s0 + $0x264] sm:$0xf]  ;;  %v2952_v13 = vld [vmem:[%s5010_s0 + $0x270] sm:$0xf0] }
 0x1b5   :  { %v1569_v53 = vadd.f32 %v1568_v39, %v1400_v26 }
 0x1b6   :  { %v1401_v50 = vpop.f32.mrf.mxu1  ;;  %v2448_v11 = vmax.f32 %v2384_v20, 0.0 }
 0x1b7   :  { %v1737_v25 = vpop.f32.mrf.mxu3  ;;  %v1402_v42 = vadd.f32 %v1401_v50, %v4060_v18 }
 0x1b8   :  { %v1738_v18 = vadd.f32 %v1737_v25, %v1569_v53  ;;  %v2958_v53 = vld [vmem:[%s5010_s0 + $0x268] sm:$0xf] }
 0x1b9   :  { %v2154_v14 = vpop.f32.mrf.mxu0 }
 0x1ba   :  { %v2317_v38 = vmul.f32 %v4470_v63, %v2154_v14 }
 0x1bc   :  { %v2385_v57 = vadd.f32 %v4476_v2, %v2317_v38  ;;  %v1570_v59 = vpop.f32.mrf.mxu2 }
 0x1bd   :  { %v1571_v55 = vadd.f32 %v1570_v59, %v1402_v42  ;;  %v2960_v59 = vld [vmem:[%s5010_s0 + $0x278] sm:$0xf0] }
 0x1be   :  { %v2449_v1 = vmax.f32 %v2385_v57, 0.0  ;;  %v1404_v31 = vpop.f32.mrf.mxu1 }
 0x1bf   :  { %v1739_v6 = vpop.f32.mrf.mxu3  ;;  %v1405_v25 = vadd.f32 %v1404_v31, %v4090_v32  ;;  %v3395_v32 = vld [vmem:[%s5010_s0 + $0x274] sm:$0xf0] }
 0x1c0   :  { %v3487_v48 = vpack.c.bf16 %v2449_v1, %v2448_v11  ;;  %v1740_v34 = vadd.f32 %v1739_v6, %v1571_v55  ;;  %v2955_v11 = vor.u32 %v3392_v0, %v2952_v13  ;;  %v2959_v31 = vor.u32 %v3395_v32, %v2958_v53  ;;  %v3396_v0 = vld [vmem:[%s5010_s0 + $0x284] sm:$0xf]  ;;  %v2968_v13 = vld [vmem:[%s5010_s0 + $0x290] sm:$0xf0]  ;;  %v2974_v53 = vld [vmem:[%s5010_s0 + $0x288] sm:$0xf] }
 0x1c1   :  { %v2157_v39 = vpop.f32.mrf.mxu0  ;;  %1443 = vmatmul.bf16.gmra.mxu1 %v2939_v7  ;;  %1612 = vmatmul.bf16.gmra.mxu2 %v2943_v4 }
 0x1c2   :  { %3488 = vst [vmem:[%s5014_s5] sm:$0xff] %v3487_v48   ;;  %v2056_v28 = vpack.c.bf16 %v1740_v34, %v1738_v18  ;;  %v2318_v14 = vmul.f32 %v4470_v63, %v2157_v39  ;;  %v2963_v18 = vor.u32 %v3393_v23, %v2960_v59  ;;  %v2976_v23 = vld [vmem:[%s5010_s0 + $0x298] sm:$0xf0] }
 0x1c4   :  { %1781 = vmatmul.bf16.gmra.mxu3 %v2947_v43  ;;  %2196 = vmatmul.bf16.gmra.mxu0 %v2056_v28  ;;  %v1573_v50 = vpop.f32.mrf.mxu2  ;;  %v2386_v24 = vadd.f32 %v4476_v2, %v2318_v14 }
 0x1c5   :  { %v1574_v42 = vadd.f32 %v1573_v50, %v1405_v25 }
 0x1c6   :  { %v1406_v20 = vpop.f32.mrf.mxu1  ;;  %v2450_v1 = vmax.f32 %v2386_v24, 0.0 }
 0x1c7   :  { %v1742_v26 = vpop.f32.mrf.mxu3  ;;  %v1407_v57 = vadd.f32 %v1406_v20, %v4099_v37 }
 0x1c8   :  { %v1743_v37 = vadd.f32 %v1742_v26, %v1574_v42 }
 0x1c9   :  { %v2159_v38 = vpop.f32.mrf.mxu0 }
 0x1ca   :  { %v2319_v45 = vmul.f32 %v4470_v63, %v2159_v38 }
 0x1cc   :  { %v2387_v58 = vadd.f32 %v4476_v2, %v2319_v45  ;;  %v1575_v7 = vpop.f32.mrf.mxu2 }
 0x1cd   :  { %v1576_v6 = vadd.f32 %v1575_v7, %v1407_v57  ;;  %v2971_v7 = vor.u32 %v3396_v0, %v2968_v13  ;;  %v2990_v0 = vld [vmem:[%s5010_s0 + $0x2a8] sm:$0xf] }
 0x1ce   :  { %v2451_v55 = vmax.f32 %v2387_v58, 0.0  ;;  %v1409_v43 = vpop.f32.mrf.mxu1  ;;  %v3397_v58 = vld [vmem:[%s5010_s0 + $0x28c] sm:$0xf] }
 0x1cf   :  { %v1744_v4 = vpop.f32.mrf.mxu3  ;;  %v1410_v26 = vadd.f32 %v1409_v43, %v4129_v51  ;;  %v3399_v51 = vld [vmem:[%s5010_s0 + $0x294] sm:$0xf0]  ;;  %v2979_v43 = vor.u32 %v3397_v58, %v2976_v23 }
 0x1d0   :  { %v3492_v48 = vpack.c.bf16 %v2451_v55, %v2450_v1  ;;  %v1745_v34 = vadd.f32 %v1744_v4, %v1576_v6  ;;  %v2975_v4 = vor.u32 %v3399_v51, %v2974_v53 }
 0x1d1   :  { %v2162_v39 = vpop.f32.mrf.mxu0  ;;  %1448 = vmatmul.bf16.gmra.mxu1 %v2955_v11  ;;  %1617 = vmatmul.bf16.gmra.mxu2 %v2959_v31 }
 0x1d2   :  { %3644 = vst [vmem:[%s5014_s5 + $0x8] sm:$0xff] %v3492_v48   ;;  %v2057_v28 = vpack.c.bf16 %v1745_v34, %v1743_v37  ;;  %v2320_v14 = vmul.f32 %v4470_v63, %v2162_v39 }
 0x1d4   :  { %1786 = vmatmul.bf16.gmra.mxu3 %v2963_v18  ;;  %2201 = vmatmul.bf16.gmra.mxu0 %v2057_v28  ;;  %v1578_v50 = vpop.f32.mrf.mxu2  ;;  %v2388_v24 = vadd.f32 %v4476_v2, %v2320_v14 }
 0x1d5   :  { %v1579_v32 = vadd.f32 %v1578_v50, %v1410_v26 }
 0x1d6   :  { %v1411_v38 = vpop.f32.mrf.mxu1  ;;  %v2452_v11 = vmax.f32 %v2388_v24, 0.0  ;;  %v3400_v24 = vld [vmem:[%s5010_s0 + $0x2a4] sm:$0xf] }
 0x1d7   :  { %v1747_v20 = vpop.f32.mrf.mxu3  ;;  %v1412_v42 = vadd.f32 %v1411_v38, %v4138_v56 }
 0x1d8   :  { %v1748_v56 = vadd.f32 %v1747_v20, %v1579_v32  ;;  %v3401_v32 = vld [vmem:[%s5010_s0 + $0x2ac] sm:$0xf] }
 0x1d9   :  { %v2164_v25 = vpop.f32.mrf.mxu0 }
 0x1da   :  { %v2321_v45 = vmul.f32 %v4470_v63, %v2164_v25 }
 0x1dc   :  { %v2389_v57 = vadd.f32 %v4476_v2, %v2321_v45  ;;  %v1580_v59 = vpop.f32.mrf.mxu2  ;;  %v2984_v45 = vld [vmem:[%s5010_s0 + $0x2b0] sm:$0xf0] }
 0x1dd   :  { %v1581_v55 = vadd.f32 %v1580_v59, %v1412_v42  ;;  %v2992_v42 = vld [vmem:[%s5010_s0 + $0x2b8] sm:$0xf0]  ;;  %v2987_v58 = vor.u32 %v3400_v24, %v2984_v45 }
 0x1de   :  { %v2453_v1 = vmax.f32 %v2389_v57, 0.0  ;;  %v1414_v31 = vpop.f32.mrf.mxu1 }
 0x1df   :  { %v1749_v6 = vpop.f32.mrf.mxu3  ;;  %v1415_v20 = vadd.f32 %v1414_v31, %v4168_v12  ;;  %v3403_v12 = vld [vmem:[%s5010_s0 + $0x2b4] sm:$0xf0] }
 0x1e0   :  { %v3497_v18 = vpack.c.bf16 %v2453_v1, %v2452_v11  ;;  %v1750_v37 = vadd.f32 %v1749_v6, %v1581_v55  ;;  %v2991_v1 = vor.u32 %v3403_v12, %v2990_v0  ;;  %v2995_v6 = vor.u32 %v3401_v32, %v2992_v42  ;;  %v3405_v0 = vld [vmem:[%s5010_s0 + $0x2cc] sm:$0xf]  ;;  %v3008_v12 = vld [vmem:[%s5010_s0 + $0x2d8] sm:$0xf0] }
 0x1e1   :  { %v2167_v48 = vpop.f32.mrf.mxu0  ;;  %1453 = vmatmul.bf16.gmra.mxu1 %v2971_v7  ;;  %1622 = vmatmul.bf16.gmra.mxu2 %v2975_v4 }
 0x1e2   :  { %3645 = vst [vmem:[%s5014_s5 + $0x10] sm:$0xff] %v3497_v18   ;;  %v2058_v34 = vpack.c.bf16 %v1750_v37, %v1748_v56  ;;  %v2322_v28 = vmul.f32 %v4470_v63, %v2167_v48 }
 0x1e4   :  { %1791 = vmatmul.bf16.gmra.mxu3 %v2979_v43  ;;  %2206 = vmatmul.bf16.gmra.mxu0 %v2058_v34  ;;  %v1583_v39 = vpop.f32.mrf.mxu2  ;;  %v2390_v25 = vadd.f32 %v4476_v2, %v2322_v28 }
 0x1e5   :  { %v1584_v13 = vadd.f32 %v1583_v39, %v1415_v20  ;;  %v3000_v20 = vld [vmem:[%s5010_s0 + $0x2d0] sm:$0xf0] }
 0x1e6   :  { %v1416_v14 = vpop.f32.mrf.mxu1  ;;  %v2454_v23 = vmax.f32 %v2390_v25, 0.0  ;;  %v3006_v25 = vld [vmem:[%s5010_s0 + $0x2c8] sm:$0xf] }
 0x1e7   :  { %v1752_v50 = vpop.f32.mrf.mxu3  ;;  %v1417_v53 = vadd.f32 %v1416_v14, %v4177_v21 }
 0x1e8   :  { %v1753_v21 = vadd.f32 %v1752_v50, %v1584_v13 }
 0x1e9   :  { %v2169_v38 = vpop.f32.mrf.mxu0 }
 0x1ea   :  { %v2323_v26 = vmul.f32 %v4470_v63, %v2169_v38  ;;  %v3404_v38 = vld [vmem:[%s5010_s0 + $0x2c4] sm:$0xf] }
 0x1ec   :  { %v2391_v51 = vadd.f32 %v4476_v2, %v2323_v26  ;;  %v1585_v57 = vpop.f32.mrf.mxu2 }
 0x1ed   :  { %v1586_v7 = vadd.f32 %v1585_v57, %v1417_v53  ;;  %v3003_v53 = vor.u32 %v3404_v38, %v3000_v20  ;;  %v3409_v38 = vld [vmem:[%s5010_s0 + $0x2ec] sm:$0xf]  ;;  %v3024_v20 = vld [vmem:[%s5010_s0 + $0x2f8] sm:$0xf0] }
 0x1ee   :  { %v2455_v59 = vmax.f32 %v2391_v51, 0.0  ;;  %v1419_v55 = vpop.f32.mrf.mxu1 }
 0x1ef   :  { %v1754_v11 = vpop.f32.mrf.mxu3  ;;  %v1420_v28 = vadd.f32 %v1419_v55, %v4207_v41  ;;  %v3407_v41 = vld [vmem:[%s5010_s0 + $0x2d4] sm:$0xf0] }
 0x1f0   :  { %v3502_v4 = vpack.c.bf16 %v2455_v59, %v2454_v23  ;;  %v1755_v31 = vadd.f32 %v1754_v11, %v1586_v7  ;;  %v3011_v59 = vor.u32 %v3405_v0, %v3008_v12 }
 0x1f1   :  { %v2172_v43 = vpop.f32.mrf.mxu0  ;;  %1458 = vmatmul.bf16.gmra.mxu1 %v2987_v58  ;;  %1627 = vmatmul.bf16.gmra.mxu2 %v2991_v1  ;;  %v3007_v58 = vor.u32 %v3407_v41, %v3006_v25 }
 0x1f2   :  { %3646 = vst [vmem:[%s5014_s5 + $0x18] sm:$0xff] %v3502_v4   ;;  %v2059_v56 = vpack.c.bf16 %v1755_v31, %v1753_v21  ;;  %v2324_v37 = vmul.f32 %v4470_v63, %v2172_v43 }
 0x1f4   :  { %1796 = vmatmul.bf16.gmra.mxu3 %v2995_v6  ;;  %2211 = vmatmul.bf16.gmra.mxu0 %v2059_v56  ;;  %v1588_v18 = vpop.f32.mrf.mxu2  ;;  %v2392_v50 = vadd.f32 %v4476_v2, %v2324_v37 }
 0x1f5   :  { %v1589_v26 = vadd.f32 %v1588_v18, %v1420_v28 }
 0x1f6   :  { %v1421_v34 = vpop.f32.mrf.mxu1  ;;  %v2456_v51 = vmax.f32 %v2392_v50, 0.0 }
 0x1f7   :  { %v1757_v48 = vpop.f32.mrf.mxu3  ;;  %v1422_v24 = vadd.f32 %v1421_v34, %v4216_v47  ;;  %v3016_v34 = vld [vmem:[%s5010_s0 + $0x2f0] sm:$0xf0] }
 0x1f8   :  { %v1758_v47 = vadd.f32 %v1757_v48, %v1589_v26  ;;  %v3408_v48 = vld [vmem:[%s5010_s0 + $0x2e4] sm:$0xf] }
 0x1f9   :  { %v2174_v39 = vpop.f32.mrf.mxu0  ;;  %v3019_v41 = vor.u32 %v3408_v48, %v3016_v34 }
 0x1fa   :  { %v2325_v14 = vmul.f32 %v4470_v63, %v2174_v39  ;;  %v3022_v39 = vld [vmem:[%s5010_s0 + $0x2e8] sm:$0xf] }
 0x1fc   :  { %v2393_v45 = vadd.f32 %v4476_v2, %v2325_v14  ;;  %v1590_v13 = vpop.f32.mrf.mxu2 }
 0x1fd   :  { %v1591_v42 = vadd.f32 %v1590_v13, %v1422_v24 }
 0x1fe   :  { %v2457_v32 = vmax.f32 %v2393_v45, 0.0  ;;  %v1424_v23 = vpop.f32.mrf.mxu1 }
 0x1ff   :  { %v1759_v57 = vpop.f32.mrf.mxu3  ;;  %v1425_v56 = vadd.f32 %v1424_v23, %v4240_v3  ;;  %v3411_v3 = vld [vmem:[%s5010_s0 + $0x2f4] sm:$0xf0] }
 0x200   :  { %v3507_v7 = vpack.c.bf16 %v2457_v32, %v2456_v51  ;;  %v1760_v11 = vadd.f32 %v1759_v57, %v1591_v42  ;;  %v3023_v12 = vor.u32 %v3411_v3, %v3022_v39 }
 0x201   :  { %v2177_v1 = vpop.f32.mrf.mxu0  ;;  %1463 = vmatmul.bf16.gmra.mxu1 %v3003_v53  ;;  %1632 = vmatmul.bf16.gmra.mxu2 %v3007_v58  ;;  %v3027_v53 = vor.u32 %v3409_v38, %v3024_v20 }
 0x202   :  { %3647 = vst [vmem:[%s5014_s5 + $0x20] sm:$0xff] %v3507_v7   ;;  %v2060_v55 = vpack.c.bf16 %v1760_v11, %v1758_v47  ;;  %v2326_v21 = vmul.f32 %v4470_v63, %v2177_v1 }
 0x204   :  { %1801 = vmatmul.bf16.gmra.mxu3 %v3011_v59  ;;  %2216 = vmatmul.bf16.gmra.mxu0 %v2060_v55  ;;  %v1593_v6 = vpop.f32.mrf.mxu2  ;;  %v2394_v18 = vadd.f32 %v4476_v2, %v2326_v21  ;;  %v3032_v21 = vld [vmem:[%s5010_s0 + $0x310] sm:$0xf0] }
 0x205   :  { %v1594_v28 = vadd.f32 %v1593_v6, %v1425_v56  ;;  %v3412_v6 = vld [vmem:[%s5010_s0 + $0x304] sm:$0xf] }
 0x206   :  { %v1426_v31 = vpop.f32.mrf.mxu1  ;;  %v2458_v26 = vmax.f32 %v2394_v18, 0.0  ;;  %v3413_v18 = vld [vmem:[%s5010_s0 + $0x30c] sm:$0xf]  ;;  %v3035_v34 = vor.u32 %v3412_v6, %v3032_v21 }
 0x207   :  { %v1762_v4 = vpop.f32.mrf.mxu3  ;;  %v1427_v50 = vadd.f32 %v1426_v31, %v4249_v15 }
 0x208   :  { %v1763_v15 = vadd.f32 %v1762_v4, %v1594_v28  ;;  %v3038_v4 = vld [vmem:[%s5010_s0 + $0x308] sm:$0xf] }
 0x209   :  { %v2179_v43 = vpop.f32.mrf.mxu0 }
 0x20a   :  { %v2327_v37 = vmul.f32 %v4470_v63, %v2179_v43 }
 0x20c   :  { %v2395_v14 = vadd.f32 %v4476_v2, %v2327_v37  ;;  %v1595_v25 = vpop.f32.mrf.mxu2  ;;  %v3040_v37 = vld [vmem:[%s5010_s0 + $0x318] sm:$0xf0] }
 0x20d   :  { %v1596_v45 = vadd.f32 %v1595_v25, %v1427_v50  ;;  %v3043_v20 = vor.u32 %v3413_v18, %v3040_v37 }
 0x20e   :  { %v2459_v24 = vmax.f32 %v2395_v14, 0.0  ;;  %v1429_v13 = vpop.f32.mrf.mxu1 }
 0x20f   :  { %v1764_v0 = vpop.f32.mrf.mxu3  ;;  %v1430_v11 = vadd.f32 %v1429_v13, %v4273_v40  ;;  %v3415_v40 = vld [vmem:[%s5010_s0 + $0x314] sm:$0xf0] }
 0x210   :  { %v3512_v51 = vpack.c.bf16 %v2459_v24, %v2458_v26  ;;  %v1765_v32 = vadd.f32 %v1764_v0, %v1596_v45  ;;  %v3039_v14 = vor.u32 %v3415_v40, %v3038_v4 }
 0x211   :  { %v2182_v42 = vpop.f32.mrf.mxu0  ;;  %1468 = vmatmul.bf16.gmra.mxu1 %v3019_v41  ;;  %1637 = vmatmul.bf16.gmra.mxu2 %v3023_v12 }
 0x212   :  { %3648 = vst [vmem:[%s5014_s5 + $0x28] sm:$0xff] %v3512_v51   ;;  %v2061_v57 = vpack.c.bf16 %v1765_v32, %v1763_v15  ;;  %v2328_v23 = vmul.f32 %v4470_v63, %v2182_v42  ;;  %v3416_v42 = vld [vmem:[%s5010_s0 + $0x324] sm:$0xf] }
 0x214   :  { %1806 = vmatmul.bf16.gmra.mxu3 %v3027_v53  ;;  %2221 = vmatmul.bf16.gmra.mxu0 %v2061_v57  ;;  %v1598_v58 = vpop.f32.mrf.mxu2  ;;  %v2396_v1 = vadd.f32 %v4476_v2, %v2328_v23  ;;  %v3048_v57 = vld [vmem:[%s5010_s0 + $0x330] sm:$0xf0] }
 0x215   :  { %v1599_v31 = vadd.f32 %v1598_v58, %v1430_v11  ;;  %v3054_v58 = vld [vmem:[%s5010_s0 + $0x328] sm:$0xf]  ;;  %v3056_v11 = vld [vmem:[%s5010_s0 + $0x338] sm:$0xf0] }
 0x216   :  { %v1431_v47 = vpop.f32.mrf.mxu1  ;;  %v2460_v39 = vmax.f32 %v2396_v1, 0.0 }
 0x217   :  { %v1767_v59 = vpop.f32.mrf.mxu3  ;;  %v1432_v43 = vadd.f32 %v1431_v47, %v4279_v52 }
 0x218   :  { %v1768_v52 = vadd.f32 %v1767_v59, %v1599_v31 }
 0x219   :  { %v2184_v7 = vpop.f32.mrf.mxu0 }
 0x21a   :  { %v2329_v55 = vmul.f32 %v4470_v63, %v2184_v7  ;;  %v3417_v7 = vld [vmem:[%s5010_s0 + $0x32c] sm:$0xf] }
 0x21c   :  { %v2397_v56 = vadd.f32 %v4476_v2, %v2329_v55  ;;  %v1600_v48 = vpop.f32.mrf.mxu2  ;;  %v3051_v55 = vor.u32 %v3416_v42, %v3048_v57 }
 0x21d   :  { %v1601_v28 = vadd.f32 %v1600_v48, %v1432_v43 }
 0x21e   :  { %v2461_v3 = vmax.f32 %v2397_v56, 0.0  ;;  %v1434_v38 = vpop.f32.mrf.mxu1  ;;  %v3059_v56 = vor.u32 %v3417_v7, %v3056_v11 }
 0x21f   :  { %v1769_v50 = vpop.f32.mrf.mxu3  ;;  %v1435_v15 = vadd.f32 %v1434_v38, %v4017_v61  ;;  %v3419_v61 = vld [vmem:[%s5010_s0 + $0x334] sm:$0xf0] }
 0x220   :  { %v3517_v25 = vpack.c.bf16 %v2461_v3, %v2460_v39  ;;  %v1770_v41 = vadd.f32 %v1769_v50, %v1601_v28  ;;  %v3055_v31 = vor.u32 %v3419_v61, %v3054_v58 }
 0x221   :  { %v2187_v26 = vpop.f32.mrf.mxu0  ;;  %1473 = vmatmul.bf16.gmra.mxu1 %v3035_v34  ;;  %1642 = vmatmul.bf16.gmra.mxu2 %v3039_v14 }
 0x222   :  { %3649 = vst [vmem:[%s5014_s5 + $0x30] sm:$0xff] %v3517_v25   ;;  %v2062_v24 = vpack.c.bf16 %v1770_v41, %v1768_v52  ;;  %v2330_v0 = vmul.f32 %v4470_v63, %v2187_v26  ;;  %v3420_v25 = vld [vmem:[%s5010_s0 + $0x344] sm:$0xf]  ;;  %v3064_v41 = vld [vmem:[%s5010_s0 + $0x350] sm:$0xf0] }
 0x223   :  { %v3070_v26 = vld [vmem:[%s5010_s0 + $0x348] sm:$0xf] }
 0x224   :  { %1811 = vmatmul.bf16.gmra.mxu3 %v3043_v20  ;;  %2226 = vmatmul.bf16.gmra.mxu0 %v2062_v24  ;;  %v1603_v45 = vpop.f32.mrf.mxu2  ;;  %v2398_v51 = vadd.f32 %v4476_v2, %v2330_v0 }
 0x225   :  { %v1604_v23 = vadd.f32 %v1603_v45, %v1435_v15  ;;  %v3067_v15 = vor.u32 %v3420_v25, %v3064_v41 }
 0x226   :  { %v1436_v13 = vpop.f32.mrf.mxu1  ;;  %v2462_v6 = vmax.f32 %v2398_v51, 0.0 }
 0x227   :  { %v1772_v12 = vpop.f32.mrf.mxu3  ;;  %v1437_v59 = vadd.f32 %v1436_v13, %v4047_v8  ;;  %v3072_v13 = vld [vmem:[%s5010_s0 + $0x358] sm:$0xf0] }
 0x228   :  { %v1773_v8 = vadd.f32 %v1772_v12, %v1604_v23  ;;  %v3421_v12 = vld [vmem:[%s5010_s0 + $0x34c] sm:$0xf] }
 0x229   :  { %v2189_v53 = vpop.f32.mrf.mxu0  ;;  %v3075_v23 = vor.u32 %v3421_v12, %v3072_v13 }
 0x22a   :  { %v2331_v32 = vmul.f32 %v4470_v63, %v2189_v53 }
 0x22c   :  { %v2399_v47 = vadd.f32 %v4476_v2, %v2331_v32  ;;  %v1605_v1 = vpop.f32.mrf.mxu2 }
 0x22d   :  { %v1606_v4 = vadd.f32 %v1605_v1, %v1437_v59 }
 0x22e   :  { %v2463_v21 = vmax.f32 %v2399_v47, 0.0  ;;  %v1439_v43 = vpop.f32.mrf.mxu1 }
 0x22f   :  { %v1774_v40 = vpop.f32.mrf.mxu3  ;;  %v1440_v38 = vadd.f32 %v1439_v43, %v4056_v16  ;;  %v3423_v16 = vld [vmem:[%s5010_s0 + $0x354] sm:$0xf0] }
 0x230   :  { %v3522_v18 = vpack.c.bf16 %v2463_v21, %v2462_v6  ;;  %v1775_v37 = vadd.f32 %v1774_v40, %v1606_v4  ;;  %v3071_v58 = vor.u32 %v3423_v16, %v3070_v26 }
 0x231   :  { %v2192_v48 = vpop.f32.mrf.mxu0  ;;  %1478 = vmatmul.bf16.gmra.mxu1 %v3051_v55  ;;  %1647 = vmatmul.bf16.gmra.mxu2 %v3055_v31 }
 0x232   :  { %3650 = vst [vmem:[%s5014_s5 + $0x38] sm:$0xff] %v3522_v18   ;;  %v2063_v34 = vpack.c.bf16 %v1775_v37, %v1773_v8  ;;  %v2332_v3 = vmul.f32 %v4470_v63, %v2192_v48  ;;  %v3080_v8 = vld [vmem:[%s5010_s0 + $0x370] sm:$0xf0]  ;;  %v3086_v18 = vld [vmem:[%s5010_s0 + $0x368] sm:$0xf] }
 0x234   :  { %1816 = vmatmul.bf16.gmra.mxu3 %v3059_v56  ;;  %2231 = vmatmul.bf16.gmra.mxu0 %v2063_v34  ;;  %v1608_v39 = vpop.f32.mrf.mxu2  ;;  %v2400_v20 = vadd.f32 %v4476_v2, %v2332_v3  ;;  %v3424_v56 = vld [vmem:[%s5010_s0 + $0x364] sm:$0xf]  ;;  %v3088_v3 = vld [vmem:[%s5010_s0 + $0x378] sm:$0xf0] }
 0x235   :  { %v1609_v24 = vadd.f32 %v1608_v39, %v1440_v38  ;;  %v3425_v39 = vld [vmem:[%s5010_s0 + $0x36c] sm:$0xf] }
 0x236   :  { %v1441_v50 = vpop.f32.mrf.mxu1  ;;  %v2464_v51 = vmax.f32 %v2400_v20, 0.0  ;;  %v3091_v26 = vor.u32 %v3425_v39, %v3088_v3 }
 0x237   :  { %v1777_v28 = vpop.f32.mrf.mxu3  ;;  %v1442_v45 = vadd.f32 %v1441_v50, %v4086_v27  ;;  %v3083_v50 = vor.u32 %v3424_v56, %v3080_v8 }
 0x238   :  { %v1778_v27 = vadd.f32 %v1777_v28, %v1609_v24 }
 0x239   :  { %v2194_v14 = vpop.f32.mrf.mxu0 }
 0x23a   :  { %v2333_v52 = vmul.f32 %v4470_v63, %v2194_v14 }
 0x23c   :  { %v2401_v0 = vadd.f32 %v4476_v2, %v2333_v52  ;;  %v1610_v53 = vpop.f32.mrf.mxu2 }
 0x23d   :  { %v1611_v42 = vadd.f32 %v1610_v53, %v1442_v45 }
 0x23e   :  { %v2465_v32 = vmax.f32 %v2401_v0, 0.0  ;;  %v1444_v61 = vpop.f32.mrf.mxu1 }
 0x23f   :  { %v1779_v57 = vpop.f32.mrf.mxu3  ;;  %v1445_v40 = vadd.f32 %v1444_v61, %v4095_v35  ;;  %v3427_v35 = vld [vmem:[%s5010_s0 + $0x374] sm:$0xf0]  ;;  %v3096_v61 = vld [vmem:[%s5010_s0 + $0x390] sm:$0xf0] }
 0x240   :  { %v3527_v59 = vpack.c.bf16 %v2465_v32, %v2464_v51  ;;  %v1780_v47 = vadd.f32 %v1779_v57, %v1611_v42  ;;  %v3087_v25 = vor.u32 %v3427_v35, %v3086_v18 }
 0x241   :  { %v2197_v7 = vpop.f32.mrf.mxu0  ;;  %1483 = vmatmul.bf16.gmra.mxu1 %v3067_v15  ;;  %1652 = vmatmul.bf16.gmra.mxu2 %v3071_v58  ;;  %v3428_v58 = vld [vmem:[%s5010_s0 + $0x384] sm:$0xf] }
 0x242   :  { %3651 = vst [vmem:[%s5014_s5 + $0x40] sm:$0xff] %v3527_v59   ;;  %v2064_v11 = vpack.c.bf16 %v1780_v47, %v1778_v27  ;;  %v2334_v55 = vmul.f32 %v4470_v63, %v2197_v7  ;;  %v3429_v7 = vld [vmem:[%s5010_s0 + $0x38c] sm:$0xf] }
 0x244   :  { %1821 = vmatmul.bf16.gmra.mxu3 %v3075_v23  ;;  %2236 = vmatmul.bf16.gmra.mxu0 %v2064_v11  ;;  %v1613_v1 = vpop.f32.mrf.mxu2  ;;  %v2402_v31 = vadd.f32 %v4476_v2, %v2334_v55  ;;  %v3102_v23 = vld [vmem:[%s5010_s0 + $0x388] sm:$0xf]  ;;  %v3104_v11 = vld [vmem:[%s5010_s0 + $0x398] sm:$0xf0]  ;;  %v3099_v55 = vor.u32 %v3428_v58, %v3096_v61 }
 0x245   :  { %v1614_v37 = vadd.f32 %v1613_v1, %v1445_v40  ;;  %v3107_v56 = vor.u32 %v3429_v7, %v3104_v11 }
 0x246   :  { %v1446_v21 = vpop.f32.mrf.mxu1  ;;  %v2466_v14 = vmax.f32 %v2402_v31, 0.0 }
 0x247   :  { %v1782_v6 = vpop.f32.mrf.mxu3  ;;  %v1447_v48 = vadd.f32 %v1446_v21, %v4125_v46 }
 0x248   :  { %v1783_v46 = vadd.f32 %v1782_v6, %v1614_v37 }
 0x249   :  { %v2199_v4 = vpop.f32.mrf.mxu0 }
 0x24a   :  { %v2335_v43 = vmul.f32 %v4470_v63, %v2199_v4 }
 0x24c   :  { %v2403_v34 = vadd.f32 %v4476_v2, %v2335_v43  ;;  %v1615_v28 = vpop.f32.mrf.mxu2 }
 0x24d   :  { %v1616_v20 = vadd.f32 %v1615_v28, %v1447_v48 }
 0x24e   :  { %v2467_v38 = vmax.f32 %v2403_v34, 0.0  ;;  %v1449_v41 = vpop.f32.mrf.mxu1 }
 0x24f   :  { %v1784_v52 = vpop.f32.mrf.mxu3  ;;  %v1450_v32 = vadd.f32 %v1449_v41, %v4134_v54  ;;  %v3431_v54 = vld [vmem:[%s5010_s0 + $0x394] sm:$0xf0] }
 0x250   :  { %v3532_v16 = vpack.c.bf16 %v2467_v38, %v2466_v14  ;;  %v1785_v24 = vadd.f32 %v1784_v52, %v1616_v20  ;;  %v3103_v31 = vor.u32 %v3431_v54, %v3102_v23  ;;  %v3432_v20 = vld [vmem:[%s5010_s0 + $0x3a4] sm:$0xf]  ;;  %v3112_v52 = vld [vmem:[%s5010_s0 + $0x3b0] sm:$0xf0] }
 0x251   :  { %v2202_v45 = vpop.f32.mrf.mxu0  ;;  %1488 = vmatmul.bf16.gmra.mxu1 %v3083_v50  ;;  %1657 = vmatmul.bf16.gmra.mxu2 %v3087_v25  ;;  %v3118_v25 = vld [vmem:[%s5010_s0 + $0x3a8] sm:$0xf] }
 0x252   :  { %3652 = vst [vmem:[%s5014_s5 + $0x48] sm:$0xff] %v3532_v16   ;;  %v2065_v0 = vpack.c.bf16 %v1785_v24, %v1783_v46  ;;  %v2336_v13 = vmul.f32 %v4470_v63, %v2202_v45  ;;  %v3433_v16 = vld [vmem:[%s5010_s0 + $0x3ac] sm:$0xf]  ;;  %v3120_v24 = vld [vmem:[%s5010_s0 + $0x3b8] sm:$0xf0] }
 0x254   :  { %1826 = vmatmul.bf16.gmra.mxu3 %v3091_v26  ;;  %2241 = vmatmul.bf16.gmra.mxu0 %v2065_v0  ;;  %v1618_v12 = vpop.f32.mrf.mxu2  ;;  %v2404_v42 = vadd.f32 %v4476_v2, %v2336_v13  ;;  %v3115_v0 = vor.u32 %v3432_v20, %v3112_v52 }
 0x255   :  { %v1619_v27 = vadd.f32 %v1618_v12, %v1450_v32 }
 0x256   :  { %v1451_v15 = vpop.f32.mrf.mxu1  ;;  %v2468_v6 = vmax.f32 %v2404_v42, 0.0  ;;  %v3123_v42 = vor.u32 %v3433_v16, %v3120_v24 }
 0x257   :  { %v1787_v53 = vpop.f32.mrf.mxu3  ;;  %v1452_v59 = vadd.f32 %v1451_v15, %v4164_v5 }
 0x258   :  { %v1788_v5 = vadd.f32 %v1787_v53, %v1619_v27 }
 0x259   :  { %v2204_v51 = vpop.f32.mrf.mxu0 }
 0x25a   :  { %v2337_v57 = vmul.f32 %v4470_v63, %v2204_v51 }
 0x25c   :  { %v2405_v47 = vadd.f32 %v4476_v2, %v2337_v57  ;;  %v1620_v1 = vpop.f32.mrf.mxu2 }
 0x25d   :  { %v1621_v4 = vadd.f32 %v1620_v1, %v1452_v59 }
 0x25e   :  { %v2469_v21 = vmax.f32 %v2405_v47, 0.0  ;;  %v1454_v43 = vpop.f32.mrf.mxu1 }
 0x25f   :  { %v1789_v40 = vpop.f32.mrf.mxu3  ;;  %v1455_v50 = vadd.f32 %v1454_v43, %v4173_v19  ;;  %v3435_v19 = vld [vmem:[%s5010_s0 + $0x3b4] sm:$0xf0] }
 0x260   :  { %v3537_v8 = vpack.c.bf16 %v2469_v21, %v2468_v6  ;;  %v1790_v18 = vadd.f32 %v1789_v40, %v1621_v4  ;;  %v3119_v51 = vor.u32 %v3435_v19, %v3118_v25  ;;  %v3436_v6 = vld [vmem:[%s5010_s0 + $0x3c4] sm:$0xf]  ;;  %v3128_v21 = vld [vmem:[%s5010_s0 + $0x3d0] sm:$0xf0]  ;;  %v3134_v4 = vld [vmem:[%s5010_s0 + $0x3c8] sm:$0xf] }
 0x261   :  { %v2207_v35 = vpop.f32.mrf.mxu0  ;;  %1493 = vmatmul.bf16.gmra.mxu1 %v3099_v55  ;;  %1662 = vmatmul.bf16.gmra.mxu2 %v3103_v31 }
 0x262   :  { %3653 = vst [vmem:[%s5014_s5 + $0x50] sm:$0xff] %v3537_v8   ;;  %v2066_v37 = vpack.c.bf16 %v1790_v18, %v1788_v5  ;;  %v2338_v34 = vmul.f32 %v4470_v63, %v2207_v35  ;;  %v3136_v5 = vld [vmem:[%s5010_s0 + $0x3d8] sm:$0xf0]  ;;  %v3131_v18 = vor.u32 %v3436_v6, %v3128_v21 }
 0x264   :  { %1831 = vmatmul.bf16.gmra.mxu3 %v3107_v56  ;;  %2246 = vmatmul.bf16.gmra.mxu0 %v2066_v37  ;;  %v1623_v48 = vpop.f32.mrf.mxu2  ;;  %v2406_v14 = vadd.f32 %v4476_v2, %v2338_v34  ;;  %v3437_v56 = vld [vmem:[%s5010_s0 + $0x3cc] sm:$0xf] }
 0x265   :  { %v1624_v41 = vadd.f32 %v1623_v48, %v1455_v50 }
 0x266   :  { %v1456_v3 = vpop.f32.mrf.mxu1  ;;  %v2470_v12 = vmax.f32 %v2406_v14, 0.0 }
 0x267   :  { %v1792_v39 = vpop.f32.mrf.mxu3  ;;  %v1457_v26 = vadd.f32 %v1456_v3, %v4203_v33 }
 0x268   :  { %v1793_v33 = vadd.f32 %v1792_v39, %v1624_v41 }
 0x269   :  { %v2209_v28 = vpop.f32.mrf.mxu0 }
 0x26a   :  { %v2339_v38 = vmul.f32 %v4470_v63, %v2209_v28  ;;  %v3139_v28 = vor.u32 %v3437_v56, %v3136_v5 }
 0x26c   :  { %v2407_v46 = vadd.f32 %v4476_v2, %v2339_v38  ;;  %v1625_v45 = vpop.f32.mrf.mxu2 }
 0x26d   :  { %v1626_v53 = vadd.f32 %v1625_v45, %v1457_v26  ;;  %v3440_v45 = vld [vmem:[%s5010_s0 + $0x3e4] sm:$0xf] }
 0x26e   :  { %v2471_v13 = vmax.f32 %v2407_v46, 0.0  ;;  %v1459_v32 = vpop.f32.mrf.mxu1 }
 0x26f   :  { %v1794_v15 = vpop.f32.mrf.mxu3  ;;  %v1460_v11 = vadd.f32 %v1459_v32, %v4212_v44  ;;  %v3439_v44 = vld [vmem:[%s5010_s0 + $0x3d4] sm:$0xf0] }
 0x270   :  { %v3542_v57 = vpack.c.bf16 %v2471_v13, %v2470_v12  ;;  %v1795_v58 = vadd.f32 %v1794_v15, %v1626_v53  ;;  %v3135_v39 = vor.u32 %v3439_v44, %v3134_v4  ;;  %v3150_v12 = vld [vmem:[%s5010_s0 + $0x3e8] sm:$0xf]  ;;  %v3441_v15 = vld [vmem:[%s5010_s0 + $0x3ec] sm:$0xf] }
 0x271   :  { %v2212_v61 = vpop.f32.mrf.mxu0  ;;  %1498 = vmatmul.bf16.gmra.mxu1 %v3115_v0  ;;  %1667 = vmatmul.bf16.gmra.mxu2 %v3119_v51  ;;  %v3144_v0 = vld [vmem:[%s5010_s0 + $0x3f0] sm:$0xf0]  ;;  %v3152_v51 = vld [vmem:[%s5010_s0 + $0x3f8] sm:$0xf0] }
 0x272   :  { %3654 = vst [vmem:[%s5014_s5 + $0x58] sm:$0xff] %v3542_v57   ;;  %v2067_v23 = vpack.c.bf16 %v1795_v58, %v1793_v33  ;;  %v2340_v27 = vmul.f32 %v4470_v63, %v2212_v61 }
 0x274   :  { %1836 = vmatmul.bf16.gmra.mxu3 %v3123_v42  ;;  %2251 = vmatmul.bf16.gmra.mxu0 %v2067_v23  ;;  %v1628_v54 = vpop.f32.mrf.mxu2  ;;  %v2408_v1 = vadd.f32 %v4476_v2, %v2340_v27  ;;  %v3147_v42 = vor.u32 %v3440_v45, %v3144_v0  ;;  %v3155_v27 = vor.u32 %v3441_v15, %v3152_v51 }
 0x275   :  { %v1629_v40 = vadd.f32 %v1628_v54, %v1460_v11 }
 0x276   :  { %v1461_v47 = vpop.f32.mrf.mxu1  ;;  %v2472_v35 = vmax.f32 %v2408_v1, 0.0 }
 0x277   :  { %v1797_v59 = vpop.f32.mrf.mxu3  ;;  %v1462_v31 = vadd.f32 %v1461_v47, %v4236_v60 }
 0x278   :  { %v1798_v60 = vadd.f32 %v1797_v59, %v1629_v40 }
 0x279   :  { %v2214_v7 = vpop.f32.mrf.mxu0 }
 0x27a   :  { %v2341_v55 = vmul.f32 %v4470_v63, %v2214_v7 }
 0x27c   :  { %v2409_v43 = vadd.f32 %v4476_v2, %v2341_v55  ;;  %v1630_v8 = vpop.f32.mrf.mxu2  ;;  %v4858_v55 = vld [vmem:[%s5012_s3] ss:$0 sm:$0xff] }
 0x27d   :  { %v1631_v48 = vadd.f32 %v1630_v8, %v1462_v31  ;;  %v4868_v8 = vld [vmem:[%s5013_s4] ss:$0 sm:$0xff] }
 0x27e   :  { %v2473_v37 = vmax.f32 %v2409_v43, 0.0  ;;  %v1464_v3 = vpop.f32.mrf.mxu1 }
 0x27f   :  { %v1799_v34 = vpop.f32.mrf.mxu3  ;;  %v1465_v46 = vadd.f32 %v1464_v3, %v4245_v9  ;;  %v3443_v9 = vld [vmem:[%s5010_s0 + $0x3f4] sm:$0xf0] }
 0x280   :  { %v3547_v50 = vpack.c.bf16 %v2473_v37, %v2472_v35  ;;  %v1800_v14 = vadd.f32 %v1799_v34, %v1631_v48  ;;  %v3151_v23 = vor.u32 %v3443_v9, %v3150_v12 }
 0x281   :  { %v2217_v38 = vpop.f32.mrf.mxu0  ;;  %1503 = vmatmul.bf16.gmra.mxu1 %v3131_v18  ;;  %1672 = vmatmul.bf16.gmra.mxu2 %v3135_v39 }
 0x282   :  { %3655 = vst [vmem:[%s5014_s5 + $0x60] sm:$0xff] %v3547_v50   ;;  %v2068_v20 = vpack.c.bf16 %v1800_v14, %v1798_v60  ;;  %v2342_v25 = vmul.f32 %v4470_v63, %v2217_v38 }
 0x284   :  { %1841 = vmatmul.bf16.gmra.mxu3 %v3139_v28  ;;  %2256 = vmatmul.bf16.gmra.mxu0 %v2068_v20  ;;  %v1633_v52 = vpop.f32.mrf.mxu2  ;;  %v2410_v16 = vadd.f32 %v4476_v2, %v2342_v25 }
 0x285   :  { %v1634_v13 = vadd.f32 %v1633_v52, %v1465_v46 }
 0x286   :  { %v1466_v41 = vpop.f32.mrf.mxu1  ;;  %v2474_v33 = vmax.f32 %v2410_v16, 0.0 }
 0x287   :  { %v1802_v19 = vpop.f32.mrf.mxu3  ;;  %v1467_v53 = vadd.f32 %v1466_v41, %v4269_v30 }
 0x288   :  { %v1803_v30 = vadd.f32 %v1802_v19, %v1634_v13 }
 0x289   :  { %v2219_v26 = vpop.f32.mrf.mxu0 }
 0x28a   :  { %v2343_v24 = vmul.f32 %v4470_v63, %v2219_v26 }
 0x28c   :  { %v2411_v63 = vadd.f32 %v4476_v2, %v2343_v24  ;;  %v1635_v32 = vpop.f32.mrf.mxu2 }
 0x28d   :  { %v1636_v58 = vadd.f32 %v1635_v32, %v1467_v53 }
 0x28e   :  { %v2475_v57 = vmax.f32 %v2411_v63, 0.0  ;;  %v1469_v54 = vpop.f32.mrf.mxu1 }
 0x28f   :  { %v1804_v61 = vpop.f32.mrf.mxu3  ;;  %v1470_v40 = vadd.f32 %v1469_v54, %v4275_v49 }
 0x290   :  { %v3552_v59 = vpack.c.bf16 %v2475_v57, %v2474_v33  ;;  %v1805_v47 = vadd.f32 %v1804_v61, %v1636_v58 }
 0x291   :  { %v2222_v7 = vpop.f32.mrf.mxu0  ;;  %1508 = vmatmul.bf16.gmra.mxu1 %v3147_v42  ;;  %1677 = vmatmul.bf16.gmra.mxu2 %v3151_v23 }
 0x292   :  { %3656 = vst [vmem:[%s5014_s5 + $0x68] sm:$0xff] %v3552_v59   ;;  %v2069_v11 = vpack.c.bf16 %v1805_v47, %v1803_v30  ;;  %v2344_v6 = vmul.f32 %v4858_v55, %v2222_v7 }
 0x294   :  { %1846 = vmatmul.bf16.gmra.mxu3 %v3155_v27  ;;  %2261 = vmatmul.bf16.gmra.mxu0 %v2069_v11  ;;  %v1638_v1 = vpop.f32.mrf.mxu2  ;;  %v2412_v31 = vadd.f32 %v4476_v2, %v2344_v6 }
 0x295   :  { %v1639_v56 = vadd.f32 %v1638_v1, %v1470_v40 }
 0x296   :  { %v1471_v4 = vpop.f32.mrf.mxu1  ;;  %v2476_v37 = vmax.f32 %v2412_v31, 0.0 }
 0x297   :  { %v1807_v21 = vpop.f32.mrf.mxu3  ;;  %v1472_v5 = vadd.f32 %v1471_v4, %v4299_v22 }
 0x298   :  { %v1808_v3 = vadd.f32 %v1807_v21, %v1639_v56 }
 0x299   :  { %v2224_v44 = vpop.f32.mrf.mxu0 }
 0x29a   :  { %v2345_v43 = vmul.f32 %v4858_v55, %v2224_v44 }
 0x29c   :  { %v2413_v18 = vadd.f32 %v4868_v8, %v2345_v43  ;;  %v1640_v35 = vpop.f32.mrf.mxu2 }
 0x29d   :  { %v1641_v34 = vadd.f32 %v1640_v35, %v1472_v5 }
 0x29e   :  { %v2477_v48 = vmax.f32 %v2413_v18, 0.0  ;;  %v1474_v49 = vpop.f32.mrf.mxu1 }
 0x29f   :  { %v1809_v39 = vpop.f32.mrf.mxu3  ;;  %v1475_v25 = vadd.f32 %v1474_v49, %v4019_v62 }
 0x2a0   :  { %v3557_v2 = vpack.c.bf16 %v2477_v48, %v2476_v37  ;;  %v1810_v28 = vadd.f32 %v1809_v39, %v1641_v34  ;;  %v5026_v34 = vld [vmem:[#allocation3_spill] sm:$0xff] }
 0x2a1   :  { %v2227_v60 = vpop.f32.mrf.mxu0 }
 0x2a2   :  { %3657 = vst [vmem:[%s5014_s5 + $0x70] sm:$0xff] %v3557_v2   ;;  %v2070_v22 = vpack.c.bf16 %v1810_v28, %v1808_v3  ;;  %v2346_v14 = vmul.f32 %v4858_v55, %v2227_v60 }
 0x2a4   :  { %2266 = vmatmul.bf16.gmra.mxu0 %v2070_v22  ;;  %v1643_v50 = vpop.f32.mrf.mxu2  ;;  %v2414_v19 = vadd.f32 %v4868_v8, %v2346_v14 }
 0x2a5   :  { %v1644_v26 = vadd.f32 %v1643_v50, %v1475_v25 }
 0x2a6   :  { %v1476_v20 = vpop.f32.mrf.mxu1  ;;  %v2478_v45 = vmax.f32 %v2414_v19, 0.0 }
 0x2a7   :  { %v1812_v38 = vpop.f32.mrf.mxu3  ;;  %v1477_v46 = vadd.f32 %v1476_v20, %v4049_v10 }
 0x2a8   :  { %v1813_v53 = vadd.f32 %v1812_v38, %v1644_v26 }
 0x2a9   :  { %v2229_v52 = vpop.f32.mrf.mxu0 }
 0x2aa   :  { %v2347_v41 = vmul.f32 %v4858_v55, %v2229_v52 }
 0x2ac   :  { %v2415_v16 = vadd.f32 %v4868_v8, %v2347_v41  ;;  %v1645_v24 = vpop.f32.mrf.mxu2 }
 0x2ad   :  { %v1646_v12 = vadd.f32 %v1645_v24, %v1477_v46 }
 0x2ae   :  { %v2479_v0 = vmax.f32 %v2415_v16, 0.0  ;;  %v1479_v13 = vpop.f32.mrf.mxu1  ;;  %v5027_v16 = vld [vmem:[#allocation4_spill] sm:$0xff] }
 0x2af   :  { %v1814_v9 = vpop.f32.mrf.mxu3  ;;  %v1480_v58 = vadd.f32 %v1479_v13, %v4058_v17 }
 0x2b0   :  { %v3562_v63 = vpack.c.bf16 %v2479_v0, %v2478_v45  ;;  %v1815_v15 = vadd.f32 %v1814_v9, %v1646_v12  ;;  %v5028_v9 = vld [vmem:[#allocation5_spill] sm:$0xff] }
 0x2b1   :  { %v2232_v51 = vpop.f32.mrf.mxu0 }
 0x2b2   :  { %3658 = vst [vmem:[%s5014_s5 + $0x78] sm:$0xff] %v3562_v63   ;;  %v2071_v62 = vpack.c.bf16 %v1815_v15, %v1813_v53  ;;  %v2348_v10 = vmul.f32 %v4858_v55, %v2232_v51 }
 0x2b4   :  { %2271 = vmatmul.bf16.gmra.mxu0 %v2071_v62  ;;  %v1648_v32 = vpop.f32.mrf.mxu2  ;;  %v2416_v61 = vadd.f32 %v4868_v8, %v2348_v10 }
 0x2b5   :  { %v1649_v54 = vadd.f32 %v1648_v32, %v1480_v58 }
 0x2b6   :  { %v1481_v33 = vpop.f32.mrf.mxu1  ;;  %v2480_v47 = vmax.f32 %v2416_v61, 0.0 }
 0x2b7   :  { %v1817_v42 = vpop.f32.mrf.mxu3  ;;  %v1482_v27 = vadd.f32 %v1481_v33, %v4088_v29 }
 0x2b8   :  { %v1818_v21 = vadd.f32 %v1817_v42, %v1649_v54 }
 0x2b9   :  { %v2234_v57 = vpop.f32.mrf.mxu0 }
 0x2ba   :  { %v2349_v23 = vmul.f32 %v4858_v55, %v2234_v57 }
 0x2bc   :  { %v2417_v30 = vadd.f32 %v4868_v8, %v2349_v23  ;;  %v1650_v59 = vpop.f32.mrf.mxu2 }
 0x2bd   :  { %v1651_v11 = vadd.f32 %v1650_v59, %v1482_v27 }
 0x2be   :  { %v2481_v7 = vmax.f32 %v2417_v30, 0.0  ;;  %v1484_v6 = vpop.f32.mrf.mxu1 }
 0x2bf   :  { %v1819_v1 = vpop.f32.mrf.mxu3  ;;  %v1485_v18 = vadd.f32 %v1484_v6, %v4097_v36 }
 0x2c0   :  { %v3567_v4 = vpack.c.bf16 %v2481_v7, %v2480_v47  ;;  %v1820_v44 = vadd.f32 %v1819_v1, %v1651_v11  ;;  %v5029_v47 = vld [vmem:[#allocation6_spill] sm:$0xff] }
 0x2c1   :  { %v2237_v40 = vpop.f32.mrf.mxu0 }
 0x2c2   :  { %3659 = vst [vmem:[%s5014_s5 + $0x80] sm:$0xff] %v3567_v4   ;;  %v2072_v17 = vpack.c.bf16 %v1820_v44, %v1818_v21  ;;  %v2350_v29 = vmul.f32 %v4858_v55, %v2237_v40  ;;  %v5030_v21 = vld [vmem:[#allocation7_spill] sm:$0xff] }
 0x2c4   :  { %2276 = vmatmul.bf16.gmra.mxu0 %v2072_v17  ;;  %v1653_v31 = vpop.f32.mrf.mxu2  ;;  %v2418_v35 = vadd.f32 %v4868_v8, %v2350_v29 }
 0x2c5   :  { %v1654_v48 = vadd.f32 %v1653_v31, %v1485_v18 }
 0x2c6   :  { %v1486_v56 = vpop.f32.mrf.mxu1  ;;  %v2482_v2 = vmax.f32 %v2418_v35, 0.0 }
 0x2c7   :  { %v1822_v43 = vpop.f32.mrf.mxu3  ;;  %v1487_v39 = vadd.f32 %v1486_v56, %v5026_v34 }
 0x2c8   :  { %v1823_v14 = vadd.f32 %v1822_v43, %v1654_v48 }
 0x2c9   :  { %v2239_v5 = vpop.f32.mrf.mxu0 }
 0x2ca   :  { %v2351_v37 = vmul.f32 %v4858_v55, %v2239_v5 }
 0x2cc   :  { %v2419_v49 = vadd.f32 %v4868_v8, %v2351_v37  ;;  %v1655_v3 = vpop.f32.mrf.mxu2 }
 0x2cd   :  { %v1656_v60 = vadd.f32 %v1655_v3, %v1487_v39 }
 0x2ce   :  { %v2483_v28 = vmax.f32 %v2419_v49, 0.0  ;;  %v1489_v50 = vpop.f32.mrf.mxu1 }
 0x2cf   :  { %v1824_v22 = vpop.f32.mrf.mxu3  ;;  %v1490_v24 = vadd.f32 %v1489_v50, %v5027_v16 }
 0x2d0   :  { %v3572_v38 = vpack.c.bf16 %v2483_v28, %v2482_v2  ;;  %v1825_v20 = vadd.f32 %v1824_v22, %v1656_v60  ;;  %v5031_v28 = vld [vmem:[#allocation8_spill] sm:$0xff] }
 0x2d1   :  { %v2242_v52 = vpop.f32.mrf.mxu0 }
 0x2d2   :  { %3660 = vst [vmem:[%s5014_s5 + $0x88] sm:$0xff] %v3572_v38   ;;  %v2073_v36 = vpack.c.bf16 %v1825_v20, %v1823_v14  ;;  %v2352_v19 = vmul.f32 %v4858_v55, %v2242_v52  ;;  %v5032_v38 = vld [vmem:[#allocation9_spill] sm:$0xff] }
 0x2d4   :  { %2281 = vmatmul.bf16.gmra.mxu0 %v2073_v36  ;;  %v1658_v25 = vpop.f32.mrf.mxu2  ;;  %v2420_v45 = vadd.f32 %v4868_v8, %v2352_v19 }
 0x2d5   :  { %v1659_v12 = vadd.f32 %v1658_v25, %v1490_v24 }
 0x2d6   :  { %v1491_v26 = vpop.f32.mrf.mxu1  ;;  %v2484_v15 = vmax.f32 %v2420_v45, 0.0 }
 0x2d7   :  { %v1827_v41 = vpop.f32.mrf.mxu3  ;;  %v1492_v13 = vadd.f32 %v1491_v26, %v5028_v9 }
 0x2d8   :  { %v1828_v42 = vadd.f32 %v1827_v41, %v1659_v12 }
 0x2d9   :  { %v2244_v46 = vpop.f32.mrf.mxu0 }
 0x2da   :  { %v2353_v0 = vmul.f32 %v4858_v55, %v2244_v46 }
 0x2dc   :  { %v2421_v53 = vadd.f32 %v4868_v8, %v2353_v0  ;;  %v1660_v63 = vpop.f32.mrf.mxu2 }
 0x2dd   :  { %v1661_v62 = vadd.f32 %v1660_v63, %v1492_v13 }
 0x2de   :  { %v2485_v51 = vmax.f32 %v2421_v53, 0.0  ;;  %v1494_v10 = vpop.f32.mrf.mxu1 }
 0x2df   :  { %v1829_v32 = vpop.f32.mrf.mxu3  ;;  %v1495_v7 = vadd.f32 %v1494_v10, %v5029_v47 }
 0x2e0   :  { %v3577_v33 = vpack.c.bf16 %v2485_v51, %v2484_v15  ;;  %v1830_v57 = vadd.f32 %v1829_v32, %v1661_v62  ;;  %v5033_v51 = vld [vmem:[#allocation10_spill] sm:$0xff] }
 0x2e1   :  { %v2247_v58 = vpop.f32.mrf.mxu0 }
 0x2e2   :  { %3661 = vst [vmem:[%s5014_s5 + $0x90] sm:$0xff] %v3577_v33   ;;  %v2074_v61 = vpack.c.bf16 %v1830_v57, %v1828_v42  ;;  %v2354_v54 = vmul.f32 %v4858_v55, %v2247_v58  ;;  %v5034_v33 = vld [vmem:[#allocation11_spill] sm:$0xff] }
 0x2e4   :  { %2286 = vmatmul.bf16.gmra.mxu0 %v2074_v61  ;;  %v1663_v23 = vpop.f32.mrf.mxu2  ;;  %v2422_v11 = vadd.f32 %v4868_v8, %v2354_v54 }
 0x2e5   :  { %v1664_v6 = vadd.f32 %v1663_v23, %v1495_v7 }
 0x2e6   :  { %v1496_v30 = vpop.f32.mrf.mxu1  ;;  %v2486_v17 = vmax.f32 %v2422_v11, 0.0 }
 0x2e7   :  { %v1832_v27 = vpop.f32.mrf.mxu3  ;;  %v1497_v4 = vadd.f32 %v1496_v30, %v5030_v21 }
 0x2e8   :  { %v1833_v5 = vadd.f32 %v1832_v27, %v1664_v6 }
 0x2e9   :  { %v2249_v59 = vpop.f32.mrf.mxu0 }
 0x2ea   :  { %v2355_v1 = vmul.f32 %v4858_v55, %v2249_v59 }
 0x2ec   :  { %v2423_v44 = vadd.f32 %v4868_v8, %v2355_v1  ;;  %v1665_v40 = vpop.f32.mrf.mxu2 }
 0x2ed   :  { %v1666_v29 = vadd.f32 %v1665_v40, %v1497_v4 }
 0x2ee   :  { %v2487_v31 = vmax.f32 %v2423_v44, 0.0  ;;  %v1499_v56 = vpop.f32.mrf.mxu1 }
 0x2ef   :  { %v1834_v43 = vpop.f32.mrf.mxu3  ;;  %v1500_v60 = vadd.f32 %v1499_v56, %v5031_v28 }
 0x2f0   :  { %v3582_v18 = vpack.c.bf16 %v2487_v31, %v2486_v17  ;;  %v1835_v35 = vadd.f32 %v1834_v43, %v1666_v29  ;;  %v5035_v31 = vld [vmem:[#allocation12_spill] sm:$0xff] }
 0x2f1   :  { %v2252_v37 = vpop.f32.mrf.mxu0 }
 0x2f2   :  { %3662 = vst [vmem:[%s5014_s5 + $0x98] sm:$0xff] %v3582_v18   ;;  %v2075_v48 = vpack.c.bf16 %v1835_v35, %v1833_v5  ;;  %v2356_v39 = vmul.f32 %v4858_v55, %v2252_v37  ;;  %v5036_v18 = vld [vmem:[#allocation13_spill] sm:$0xff] }
 0x2f4   :  { %2291 = vmatmul.bf16.gmra.mxu0 %v2075_v48  ;;  %v1668_v34 = vpop.f32.mrf.mxu2  ;;  %v2424_v22 = vadd.f32 %v4868_v8, %v2356_v39 }
 0x2f5   :  { %v1669_v14 = vadd.f32 %v1668_v34, %v1500_v60 }
 0x2f6   :  { %v1501_v3 = vpop.f32.mrf.mxu1  ;;  %v2488_v25 = vmax.f32 %v2424_v22, 0.0 }
 0x2f7   :  { %v1837_v49 = vpop.f32.mrf.mxu3  ;;  %v1502_v20 = vadd.f32 %v1501_v3, %v5032_v38 }
 0x2f8   :  { %v1838_v16 = vadd.f32 %v1837_v49, %v1669_v14 }
 0x2f9   :  { %v2254_v2 = vpop.f32.mrf.mxu0 }
 0x2fa   :  { %v2357_v50 = vmul.f32 %v4858_v55, %v2254_v2 }
 0x2fc   :  { %v2425_v52 = vadd.f32 %v4868_v8, %v2357_v50  ;;  %v1670_v36 = vpop.f32.mrf.mxu2 }
 0x2fd   :  { %v1671_v41 = vadd.f32 %v1670_v36, %v1502_v20 }
 0x2fe   :  { %v2489_v19 = vmax.f32 %v2425_v52, 0.0  ;;  %v1504_v46 = vpop.f32.mrf.mxu1 }
 0x2ff   :  { %v1839_v26 = vpop.f32.mrf.mxu3  ;;  %v1505_v62 = vadd.f32 %v1504_v46, %v5033_v51 }
 0x300   :  { %v3587_v24 = vpack.c.bf16 %v2489_v19, %v2488_v25  ;;  %v1840_v45 = vadd.f32 %v1839_v26, %v1671_v41 }
 0x301   :  { %v2257_v0 = vpop.f32.mrf.mxu0 }
 0x302   :  { %3663 = vst [vmem:[%s5014_s5 + $0xa0] sm:$0xff] %v3587_v24   ;;  %v2076_v12 = vpack.c.bf16 %v1840_v45, %v1838_v16  ;;  %v2358_v13 = vmul.f32 %v4858_v55, %v2257_v0 }
 0x304   :  { %2296 = vmatmul.bf16.gmra.mxu0 %v2076_v12  ;;  %v1673_v9 = vpop.f32.mrf.mxu2  ;;  %v2426_v32 = vadd.f32 %v4868_v8, %v2358_v13 }
 0x305   :  { %v1674_v42 = vadd.f32 %v1673_v9, %v1505_v62 }
 0x306   :  { %v1506_v63 = vpop.f32.mrf.mxu1  ;;  %v2490_v23 = vmax.f32 %v2426_v32, 0.0 }
 0x307   :  { %v1842_v53 = vpop.f32.mrf.mxu3  ;;  %v1507_v57 = vadd.f32 %v1506_v63, %v5034_v33 }
 0x308   :  { %v1843_v47 = vadd.f32 %v1842_v53, %v1674_v42 }
 0x309   :  { %v2259_v15 = vpop.f32.mrf.mxu0 }
 0x30a   :  { %v2359_v10 = vmul.f32 %v4858_v55, %v2259_v15 }
 0x30c   :  { %v2427_v58 = vadd.f32 %v4868_v8, %v2359_v10  ;;  %v1675_v61 = vpop.f32.mrf.mxu2 }
 0x30d   :  { %v1676_v27 = vadd.f32 %v1675_v61, %v1507_v57 }
 0x30e   :  { %v2491_v54 = vmax.f32 %v2427_v58, 0.0  ;;  %v1509_v59 = vpop.f32.mrf.mxu1 }
 0x30f   :  { %v1844_v30 = vpop.f32.mrf.mxu3  ;;  %v1510_v29 = vadd.f32 %v1509_v59, %v5035_v31 }
 0x310   :  { %v3592_v7 = vpack.c.bf16 %v2491_v54, %v2490_v23  ;;  %v1845_v11 = vadd.f32 %v1844_v30, %v1676_v27 }
 0x311   :  { %v2262_v1 = vpop.f32.mrf.mxu0 }
 0x312   :  { %3664 = vst [vmem:[%s5014_s5 + $0xa8] sm:$0xff] %v3592_v7   ;;  %v2077_v6 = vpack.c.bf16 %v1845_v11, %v1843_v47  ;;  %v2360_v4 = vmul.f32 %v4858_v55, %v2262_v1 }
 0x314   :  { %2301 = vmatmul.bf16.gmra.mxu0 %v2077_v6  ;;  %v1678_v21 = vpop.f32.mrf.mxu2  ;;  %v2428_v43 = vadd.f32 %v4868_v8, %v2360_v4 }
 0x315   :  { %v1679_v5 = vadd.f32 %v1678_v21, %v1510_v29 }
 0x316   :  { %v1511_v40 = vpop.f32.mrf.mxu1  ;;  %v2492_v34 = vmax.f32 %v2428_v43, 0.0 }
 0x317   :  { %v1847_v44 = vpop.f32.mrf.mxu3  ;;  %v1512_v35 = vadd.f32 %v1511_v40, %v5036_v18 }
 0x318   :  { %v1848_v2 = vadd.f32 %v1847_v44, %v1679_v5 }
 0x319   :  { %v2264_v17 = vpop.f32.mrf.mxu0 }
 0x31a   :  { %v2361_v56 = vmul.f32 %v4858_v55, %v2264_v17 }
 0x31c   :  { %v2429_v37 = vadd.f32 %v4868_v8, %v2361_v56  ;;  %v1680_v48 = vpop.f32.mrf.mxu2 }
 0x31d   :  { %v1681_v49 = vadd.f32 %v1680_v48, %v1512_v35 }
 0x31e   :  { %v2493_v39 = vmax.f32 %v2429_v37, 0.0 }
 0x31f   :  { %v1849_v3 = vpop.f32.mrf.mxu3 }
 0x320   :  { %v3597_v28 = vpack.c.bf16 %v2493_v39, %v2492_v34  ;;  %v1850_v60 = vadd.f32 %v1849_v3, %v1681_v49 }
 0x321   :  { %v2267_v22 = vpop.f32.mrf.mxu0 }
 0x322   :  { %3665 = vst [vmem:[%s5014_s5 + $0xb0] sm:$0xff] %v3597_v28   ;;  %v2078_v50 = vpack.c.bf16 %v1850_v60, %v1848_v2  ;;  %v2362_v14 = vmul.f32 %v4858_v55, %v2267_v22 }
 0x324   :  { %2306 = vmatmul.bf16.gmra.mxu0 %v2078_v50  ;;  %v2430_v20 = vadd.f32 %v4868_v8, %v2362_v14 }
 0x326   :  { %v2494_v25 = vmax.f32 %v2430_v20, 0.0 }
 0x329   :  { %v2269_v38 = vpop.f32.mrf.mxu0 }
 0x32a   :  { %v2363_v52 = vmul.f32 %v4858_v55, %v2269_v38 }
 0x32c   :  { %v2431_v36 = vadd.f32 %v4868_v8, %v2363_v52 }
 0x32e   :  { %v2495_v19 = vmax.f32 %v2431_v36, 0.0 }
 0x330   :  { %v3602_v41 = vpack.c.bf16 %v2495_v19, %v2494_v25 }
 0x331   :  { %v2272_v26 = vpop.f32.mrf.mxu0 }
 0x332   :  { %3666 = vst [vmem:[%s5014_s5 + $0xb8] sm:$0xff] %v3602_v41   ;;  %v2364_v46 = vmul.f32 %v4858_v55, %v2272_v26 }
 0x334   :  { %v2432_v24 = vadd.f32 %v4868_v8, %v2364_v46 }
 0x336   :  { %v2496_v12 = vmax.f32 %v2432_v24, 0.0 }
 0x339   :  { %v2274_v16 = vpop.f32.mrf.mxu0 }
 0x33a   :  { %v2365_v45 = vmul.f32 %v4858_v55, %v2274_v16 }
 0x33c   :  { %v2433_v0 = vadd.f32 %v4868_v8, %v2365_v45 }
 0x33e   :  { %v2497_v9 = vmax.f32 %v2433_v0, 0.0 }
 0x340   :  { %v3607_v13 = vpack.c.bf16 %v2497_v9, %v2496_v12 }
 0x341   :  { %v2277_v53 = vpop.f32.mrf.mxu0 }
 0x342   :  { %3667 = vst [vmem:[%s5014_s5 + $0xc0] sm:$0xff] %v3607_v13   ;;  %v2366_v63 = vmul.f32 %v4858_v55, %v2277_v53 }
 0x344   :  { %v2434_v51 = vadd.f32 %v4868_v8, %v2366_v63 }
 0x346   :  { %v2498_v10 = vmax.f32 %v2434_v51, 0.0 }
 0x349   :  { %v2279_v15 = vpop.f32.mrf.mxu0 }
 0x34a   :  { %v2367_v62 = vmul.f32 %v4858_v55, %v2279_v15 }
 0x34c   :  { %v2435_v32 = vadd.f32 %v4868_v8, %v2367_v62 }
 0x34e   :  { %v2499_v42 = vmax.f32 %v2435_v32, 0.0 }
 0x350   :  { %v3612_v33 = vpack.c.bf16 %v2499_v42, %v2498_v10 }
 0x351   :  { %v2282_v57 = vpop.f32.mrf.mxu0 }
 0x352   :  { %3668 = vst [vmem:[%s5014_s5 + $0xc8] sm:$0xff] %v3612_v33   ;;  %v2368_v58 = vmul.f32 %v4858_v55, %v2282_v57 }
 0x354   :  { %v2436_v23 = vadd.f32 %v4868_v8, %v2368_v58 }
 0x356   :  { %v2500_v30 = vmax.f32 %v2436_v23, 0.0 }
 0x359   :  { %v2284_v61 = vpop.f32.mrf.mxu0 }
 0x35a   :  { %v2369_v54 = vmul.f32 %v4858_v55, %v2284_v61 }
 0x35c   :  { %v2437_v27 = vadd.f32 %v4868_v8, %v2369_v54 }
 0x35e   :  { %v2501_v59 = vmax.f32 %v2437_v27, 0.0 }
 0x360   :  { %v3617_v47 = vpack.c.bf16 %v2501_v59, %v2500_v30 }
 0x361   :  { %v2287_v7 = vpop.f32.mrf.mxu0 }
 0x362   :  { %3669 = vst [vmem:[%s5014_s5 + $0xd0] sm:$0xff] %v3617_v47   ;;  %v2370_v11 = vmul.f32 %v4858_v55, %v2287_v7 }
 0x364   :  { %v2438_v6 = vadd.f32 %v4868_v8, %v2370_v11 }
 0x366   :  { %v2502_v44 = vmax.f32 %v2438_v6, 0.0 }
 0x369   :  { %v2289_v1 = vpop.f32.mrf.mxu0 }
 0x36a   :  { %v2371_v21 = vmul.f32 %v4858_v55, %v2289_v1 }
 0x36c   :  { %v2439_v4 = vadd.f32 %v4868_v8, %v2371_v21 }
 0x36e   :  { %v2503_v40 = vmax.f32 %v2439_v4, 0.0 }
 0x370   :  { %v3622_v17 = vpack.c.bf16 %v2503_v40, %v2502_v44 }
 0x371   :  { %v2292_v31 = vpop.f32.mrf.mxu0 }
 0x372   :  { %3670 = vst [vmem:[%s5014_s5 + $0xd8] sm:$0xff] %v3622_v17   ;;  %v2372_v29 = vmul.f32 %v4858_v55, %v2292_v31 }
 0x374   :  { %v2440_v56 = vadd.f32 %v4868_v8, %v2372_v29 }
 0x376   :  { %v2504_v35 = vmax.f32 %v2440_v56, 0.0 }
 0x379   :  { %v2294_v43 = vpop.f32.mrf.mxu0 }
 0x37a   :  { %v2373_v5 = vmul.f32 %v4858_v55, %v2294_v43 }
 0x37c   :  { %v2441_v18 = vadd.f32 %v4868_v8, %v2373_v5 }
 0x37e   :  { %v2505_v37 = vmax.f32 %v2441_v18, 0.0 }
 0x380   :  { %v3627_v48 = vpack.c.bf16 %v2505_v37, %v2504_v35 }
 0x381   :  { %v2297_v34 = vpop.f32.mrf.mxu0 }
 0x382   :  { %3671 = vst [vmem:[%s5014_s5 + $0xe0] sm:$0xff] %v3627_v48   ;;  %v2374_v39 = vmul.f32 %v4858_v55, %v2297_v34 }
 0x384   :  { %v2442_v3 = vadd.f32 %v4868_v8, %v2374_v39 }
 0x386   :  { %v2506_v60 = vmax.f32 %v2442_v3, 0.0 }
 0x389   :  { %v2299_v49 = vpop.f32.mrf.mxu0 }
 0x38a   :  { %v2375_v2 = vmul.f32 %v4858_v55, %v2299_v49 }
 0x38c   :  { %v2443_v28 = vadd.f32 %v4868_v8, %v2375_v2 }
 0x38e   :  { %v2507_v22 = vmax.f32 %v2443_v28, 0.0 }
 0x390   :  { %v3632_v50 = vpack.c.bf16 %v2507_v22, %v2506_v60 }
 0x391   :  { %v2302_v14 = vpop.f32.mrf.mxu0 }
 0x392   :  { %3672 = vst [vmem:[%s5014_s5 + $0xe8] sm:$0xff] %v3632_v50   ;;  %v2376_v38 = vmul.f32 %v4858_v55, %v2302_v14 }
 0x394   :  { %v2444_v52 = vadd.f32 %v4868_v8, %v2376_v38 }
 0x396   :  { %v2508_v19 = vmax.f32 %v2444_v52, 0.0 }
 0x399   :  { %v2304_v20 = vpop.f32.mrf.mxu0 }
 0x39a   :  { %v2377_v36 = vmul.f32 %v4858_v55, %v2304_v20 }
 0x39c   :  { %v2445_v25 = vadd.f32 %v4868_v8, %v2377_v36 }
 0x39e   :  { %v2509_v41 = vmax.f32 %v2445_v25, 0.0 }
 0x3a0   :  { %v3637_v26 = vpack.c.bf16 %v2509_v41, %v2508_v19 }
 0x3a1   :  { %v2307_v46 = vpop.f32.mrf.mxu0 }
 0x3a2   :  { %3673 = vst [vmem:[%s5014_s5 + $0xf0] sm:$0xff] %v3637_v26   ;;  %v2378_v16 = vmul.f32 %v4858_v55, %v2307_v46 }
 0x3a4   :  { %v2446_v45 = vadd.f32 %v4868_v8, %v2378_v16 }
 0x3a6   :  { %v2510_v9 = vmax.f32 %v2446_v45, 0.0 }
 0x3a9   :  { %v2309_v24 = vpop.f32.mrf.mxu0 }
 0x3aa   :  { %v2379_v0 = vmul.f32 %v4858_v55, %v2309_v24 }
 0x3ac   :  { %v2447_v12 = vadd.f32 %v4868_v8, %v2379_v0 }
 0x3ae   :  { %v2511_v13 = vmax.f32 %v2447_v12, 0.0 }
 0x3b0   :  { %v3642_v53 = vpack.c.bf16 %v2511_v13, %v2510_v9 }
 0x3b2   :  { %3674 = vst [vmem:[%s5014_s5 + $0xf8] sm:$0xff] %v3642_v53  }

</bundles_post_ra>
